<compile_context>
chip_gen: v6e
topology: v6e:2x2x1
jax: 0.10.0
libtpu: 0.0.40
codegen_flags: <defaults>
</compile_context>

<pallas_src>
import math

import jax
import jax.numpy as jnp
from jax import lax
from jax.experimental import pallas as pl
from jax.experimental.pallas import tpu as pltpu

BS = 2             # batch size
N_POINTS = 1024    # points per object (obj_batch is [BS, 3, 1024])
P_CHUNK = 128      # points per chunk (lane-dense, one MXU M-block per dot)
F_CHUNK = 256      # PointNet feature lanes per chunk -> [128,256] f32 chunk = 32 vregs
HIDDEN = 32        # hidden_dim
EMBED = 32         # embed_dim
HAND_DIM = 25      # hand_state_dim (relative=False, space='euler')
OBJ_FEAT = 1024    # PointNet global feature dim
SIGMA = 25.0       # VE-SDE sigma for the (substituted) marginal_prob_func
LOG_SIGMA = math.log(SIGMA)
TWO_PI = 2.0 * math.pi


# ----------------------------------------------------------------------------- #
# Fused kernel: one grid step per batch element (fully independent -> megacore-safe)
# ----------------------------------------------------------------------------- #
def fused_kernel(pts_ref, t_ref, hand_ref,
                 w_pe_ref, b_pe_ref,
                 w_gfp_ref,
                 w_sig_sin_ref, w_sig_cos_ref, b_sig_ref,
                 w_h1_ref, b_h1_ref, w_h2_ref, b_h2_ref,
                 w_o1_ref, b_o1_ref, w_o2_ref, b_o2_ref,
                 w_m1a_h_ref, w_m1a_s_ref, w_m1a_o_ref, b_m1a_ref,
                 w_m1b_ref, b_m1b_ref,
                 w_m2a_x_ref, w_m2a_s_ref, w_m2a_o_ref, b_m2a_ref,
                 w_m2b_ref, b_m2b_ref,
                 out_ref):
    f32 = jnp.float32
    n_pchunks = pts_ref.shape[1]
    n_fchunks = w_pe_ref.shape[1] // F_CHUNK

    # --- Point encoder (streamed max-pool, bf16 MXU, f32 accumulation) ----------
    # TODO(synk): Pointnet2Backbone ('pt2') source was not provided; substituted with
    # a per-point Linear(3->1024) + ReLU + max-pool (same [BS, 1024] global feature).
    # Bias + ReLU are hoisted post-pool: max_p(relu(xW+b)) == relu(max_p(xW)+b).
    w_pe = w_pe_ref[...]                                   # [3, OBJ_FEAT] bf16
    dnums = (((0,), (0,)), ((), ()))                       # contract the K=3 axis

    pooled = [jnp.full((1, F_CHUNK), -jnp.inf, f32) for _ in range(n_fchunks)]
    for p in range(n_pchunks):
        lhs = pts_ref[0, p]                                # [3, P_CHUNK] bf16 (lane-dense)
        for f in range(n_fchunks):
            cf = lax.dot_general(lhs, w_pe[:, f * F_CHUNK:(f + 1) * F_CHUNK],
                                 dnums, preferred_element_type=f32)   # [P_CHUNK, F_CHUNK]
            pooled[f] = jnp.maximum(pooled[f], jnp.max(cf, axis=0, keepdims=True))

    # obj_global_enc layer 1 as per-chunk split matmuls (no [1,1024] concat).
    o_pre = b_o1_ref[...]                                  # [1, HIDDEN]
    for f in range(n_fchunks):
        sl = slice(f * F_CHUNK, (f + 1) * F_CHUNK)
        obj_g = jnp.maximum(pooled[f] + b_pe_ref[:, sl], 0.0)          # [1, F_CHUNK]
        o_pre = o_pre + jnp.dot(obj_g, w_o1_ref[sl, :], preferred_element_type=f32)
    o = jnp.maximum(o_pre, 0.0)
    o = jnp.maximum(jnp.dot(o, w_o2_ref[...], preferred_element_type=f32)
                    + b_o2_ref[...], 0.0)                  # [1, EMBED]

    # --- sigma embedding: relu(Linear(GaussianFourierProjection(t))) ------------
    # cat([sin, cos]) removed via split weight: W_sig = [W_sin; W_cos].
    t = t_ref[0]                                           # [1, 1]
    xp = t * w_gfp_ref[...] * TWO_PI                       # [1, EMBED//2]
    sigma_feat = jnp.maximum(
        jnp.dot(jnp.sin(xp), w_sig_sin_ref[...], preferred_element_type=f32)
        + jnp.dot(jnp.cos(xp), w_sig_cos_ref[...], preferred_element_type=f32)
        + b_sig_ref[...], 0.0)                             # [1, EMBED]

    # --- hand_global_enc: Linear/ReLU/Linear/ReLU --------------------------------
    h = hand_ref[0]                                        # [1, HAND_DIM]
    h = jnp.maximum(jnp.dot(h, w_h1_ref[...], preferred_element_type=f32)
                    + b_h1_ref[...], 0.0)
    h = jnp.maximum(jnp.dot(h, w_h2_ref[...], preferred_element_type=f32)
                    + b_h2_ref[...], 0.0)                  # [1, HIDDEN]

    # --- mlp1_main on cat([h, sigma_feat, o]) (split weights, no concat) ---------
    x = jnp.maximum(
        jnp.dot(h, w_m1a_h_ref[...], preferred_element_type=f32)
        + jnp.dot(sigma_feat, w_m1a_s_ref[...], preferred_element_type=f32)
        + jnp.dot(o, w_m1a_o_ref[...], preferred_element_type=f32)
        + b_m1a_ref[...], 0.0)
    x = jnp.dot(x, w_m1b_ref[...], preferred_element_type=f32) + b_m1b_ref[...]

    # --- mlp2_main on cat([x, sigma_feat, o]) (split weights, no concat) ---------
    x = jnp.maximum(
        jnp.dot(x, w_m2a_x_ref[...], preferred_element_type=f32)
        + jnp.dot(sigma_feat, w_m2a_s_ref[...], preferred_element_type=f32)
        + jnp.dot(o, w_m2a_o_ref[...], preferred_element_type=f32)
        + b_m2a_ref[...], 0.0)
    x = jnp.dot(x, w_m2b_ref[...], preferred_element_type=f32) + b_m2b_ref[...]

    # --- x / (std + 1e-7) ---------------------------------------------------------
    # TODO(synk): marginal_prob_func is an injected callable in torch; substituted
    # with the standard VE-SDE marginal std.
    std = jnp.sqrt((jnp.exp((2.0 * LOG_SIGMA) * t) - 1.0) / (2.0 * LOG_SIGMA))
    out_ref[0] = x / (std + 1e-7)


# ----------------------------------------------------------------------------- #
# Glue (plain JAX): params and wrapper
# ----------------------------------------------------------------------------- #
def init_params(key):
    ks = jax.random.split(key, 11)

    def lin(k, fin, fout):
        k1, k2 = jax.random.split(k)
        w = jax.random.normal(k1, (fin, fout), jnp.float32) * (1.0 / jnp.sqrt(fin))
        b = jax.random.normal(k2, (1, fout), jnp.float32) * 0.01
        return w, b

    p = {}
    p["w_gfp"] = jax.random.normal(ks[0], (1, EMBED // 2), jnp.float32) * 30.0
    p["sig"] = lin(ks[1], EMBED, EMBED)                  # embed_sigma Linear
    p["h1"] = lin(ks[2], HAND_DIM, HIDDEN)               # hand_global_enc
    p["h2"] = lin(ks[3], HIDDEN, HIDDEN)
    p["o1"] = lin(ks[4], OBJ_FEAT, HIDDEN)               # obj_global_enc
    p["o2"] = lin(ks[5], HIDDEN, EMBED)
    p["m1a"] = lin(ks[6], HIDDEN + 2 * EMBED, HIDDEN)    # mlp1_main
    p["m1b"] = lin(ks[7], HIDDEN, HIDDEN)
    p["m2a"] = lin(ks[8], HIDDEN + 2 * EMBED, HIDDEN)    # mlp2_main
    p["m2b"] = lin(ks[9], HIDDEN, HAND_DIM)
    p["obj_enc"] = lin(ks[10], 3, OBJ_FEAT)              # PointNet substitute
    return p


def _full_spec(shape):
    nd = len(shape)
    return pl.BlockSpec(shape, lambda b, _nd=nd: (0,) * _nd)


def cond_score_forward(params, hand_batch, obj_batch, t):
    bs = hand_batch.shape[0]

    # Matches the torch semantics: obj_batch.reshape(bs, -1, 3) (raw row-major
    # reinterpretation of [bs, 3, 1024]) feeds the point encoder as [bs, N, 3].
    pts = obj_batch.reshape(bs, -1, 3).astype(jnp.float32)        # [bs, N, 3]
    n_points = pts.shape[1]
    n_pchunks = n_points // P_CHUNK
    # Lane-dense kernel layout: [bs, n_pchunks, 3, P_CHUNK] (points on the lane dim),
    # cast to bf16 for the MXU (accumulation stays f32 in-kernel).
    pts = jnp.transpose(pts, (0, 2, 1))                           # [bs, 3, N]
    pts = pts.reshape(bs, 3, n_pchunks, P_CHUNK)
    pts = jnp.transpose(pts, (0, 2, 1, 3)).astype(jnp.bfloat16)   # [bs, nc, 3, 128]

    hand3 = hand_batch.reshape(bs, 1, -1).astype(jnp.float32)     # [bs, 1, 25]
    t3 = t.astype(jnp.float32).reshape(bs, 1, 1)                  # [bs, 1, 1]

    w_pe, b_pe = params["obj_enc"]
    w_pe = w_pe.astype(jnp.bfloat16)                              # [3, 1024] bf16
    w_sig, b_sig = params["sig"]
    w_h1, b_h1 = params["h1"]
    w_h2, b_h2 = params["h2"]
    w_o1, b_o1 = params["o1"]
    w_o2, b_o2 = params["o2"]
    w_m1a, b_m1a = params["m1a"]
    w_m1b, b_m1b = params["m1b"]
    w_m2a, b_m2a = params["m2a"]
    w_m2b, b_m2b = params["m2b"]

    # Trace-time weight splits (replace in-kernel lane concatenates with split matmuls).
    w_sig_sin = w_sig[: EMBED // 2]
    w_sig_cos = w_sig[EMBED // 2:]
    w_m1a_h = w_m1a[:HIDDEN]
    w_m1a_s = w_m1a[HIDDEN:HIDDEN + EMBED]
    w_m1a_o = w_m1a[HIDDEN + EMBED:]
    w_m2a_x = w_m2a[:HIDDEN]
    w_m2a_s = w_m2a[HIDDEN:HIDDEN + EMBED]
    w_m2a_o = w_m2a[HIDDEN + EMBED:]

    args = (pts, t3, hand3,
            w_pe, b_pe,
            params["w_gfp"],
            w_sig_sin, w_sig_cos, b_sig,
            w_h1, b_h1, w_h2, b_h2,
            w_o1, b_o1, w_o2, b_o2,
            w_m1a_h, w_m1a_s, w_m1a_o, b_m1a,
            w_m1b, b_m1b,
            w_m2a_x, w_m2a_s, w_m2a_o, b_m2a,
            w_m2b, b_m2b)

    in_specs = [
        pl.BlockSpec((1, n_pchunks, 3, P_CHUNK), lambda b: (b, 0, 0, 0)),
        pl.BlockSpec((1, 1, 1), lambda b: (b, 0, 0)),
        pl.BlockSpec((1, 1, HAND_DIM), lambda b: (b, 0, 0)),
    ]
    in_specs += [_full_spec(a.shape) for a in args[3:]]

    out = pl.pallas_call(
        fused_kernel,
        out_shape=jax.ShapeDtypeStruct((bs, 1, HAND_DIM), jnp.float32),
        grid=(bs,),
        in_specs=in_specs,
        out_specs=pl.BlockSpec((1, 1, HAND_DIM), lambda b: (b, 0, 0)),
        compiler_params=pltpu.CompilerParams(dimension_semantics=("parallel",)),
    )(*args)
    return out.reshape(bs, HAND_DIM)


if __name__ == "__main__":
    key = jax.random.PRNGKey(0)
    kp, kh, ko, kt = jax.random.split(key, 4)
    params = init_params(kp)

    hand_batch = jax.random.normal(kh, (BS, HAND_DIM, 1), jnp.float32)   # [bs, 25, 1]
    obj_batch = jax.random.normal(ko, (BS, 3, N_POINTS), jnp.float32)    # [bs, 3, 1024]
    t = jax.random.uniform(kt, (BS,), jnp.float32, 1e-3, 1.0)            # [bs]

    out = cond_score_forward(params, hand_batch, obj_batch, t)
    out = jax.block_until_ready(out)
    assert out.shape == (BS, HAND_DIM) and out.dtype == jnp.float32
    assert bool(jnp.all(jnp.isfinite(out)))
    print("KERNEL_OK")
</pallas_src>

<mosaic_0001>
module attributes {stable_mosaic.version = 11 : i64} {
  func.func @fused_kernel(%arg0: i32, %arg1: memref<1x8x3x128xbf16, #tpu.memory_space<vmem>>, %arg2: memref<1x1x1xf32, #tpu.memory_space<vmem>>, %arg3: memref<1x1x25xf32, #tpu.memory_space<vmem>>, %arg4: memref<3x1024xbf16, #tpu.memory_space<vmem>>, %arg5: memref<1x1024xf32, #tpu.memory_space<vmem>>, %arg6: memref<1x16xf32, #tpu.memory_space<vmem>>, %arg7: memref<16x32xf32, #tpu.memory_space<vmem>>, %arg8: memref<16x32xf32, #tpu.memory_space<vmem>>, %arg9: memref<1x32xf32, #tpu.memory_space<vmem>>, %arg10: memref<25x32xf32, #tpu.memory_space<vmem>>, %arg11: memref<1x32xf32, #tpu.memory_space<vmem>>, %arg12: memref<32x32xf32, #tpu.memory_space<vmem>>, %arg13: memref<1x32xf32, #tpu.memory_space<vmem>>, %arg14: memref<1024x32xf32, #tpu.memory_space<vmem>>, %arg15: memref<1x32xf32, #tpu.memory_space<vmem>>, %arg16: memref<32x32xf32, #tpu.memory_space<vmem>>, %arg17: memref<1x32xf32, #tpu.memory_space<vmem>>, %arg18: memref<32x32xf32, #tpu.memory_space<vmem>>, %arg19: memref<32x32xf32, #tpu.memory_space<vmem>>, %arg20: memref<32x32xf32, #tpu.memory_space<vmem>>, %arg21: memref<1x32xf32, #tpu.memory_space<vmem>>, %arg22: memref<32x32xf32, #tpu.memory_space<vmem>>, %arg23: memref<1x32xf32, #tpu.memory_space<vmem>>, %arg24: memref<32x32xf32, #tpu.memory_space<vmem>>, %arg25: memref<32x32xf32, #tpu.memory_space<vmem>>, %arg26: memref<32x32xf32, #tpu.memory_space<vmem>>, %arg27: memref<1x32xf32, #tpu.memory_space<vmem>>, %arg28: memref<32x25xf32, #tpu.memory_space<vmem>>, %arg29: memref<1x25xf32, #tpu.memory_space<vmem>>, %arg30: memref<1x1x25xf32, #tpu.memory_space<vmem>>) attributes {dimension_semantics = [#tpu.dimension_semantics<parallel>], iteration_bounds = array<i64: 2>, scalar_prefetch = 0 : i64, scratch_operands = 0 : i64, tpu.core_type = #tpu.core_type<tc>, window_params = [{transform_indices = @transform_0, window_bounds = array<i64: 1, 8, 3, 128>}, {transform_indices = @transform_1, window_bounds = array<i64: 1, 1, 1>}, {transform_indices = @transform_2, window_bounds = array<i64: 1, 1, 25>}, {pipeline_mode = #tpu.pipeline_mode<synchronous>, transform_indices = @transform_3, window_bounds = array<i64: 3, 1024>}, {pipeline_mode = #tpu.pipeline_mode<synchronous>, transform_indices = @transform_4, window_bounds = array<i64: 1, 1024>}, {pipeline_mode = #tpu.pipeline_mode<synchronous>, transform_indices = @transform_5, window_bounds = array<i64: 1, 16>}, {pipeline_mode = #tpu.pipeline_mode<synchronous>, transform_indices = @transform_6, window_bounds = array<i64: 16, 32>}, {pipeline_mode = #tpu.pipeline_mode<synchronous>, transform_indices = @transform_7, window_bounds = array<i64: 16, 32>}, {pipeline_mode = #tpu.pipeline_mode<synchronous>, transform_indices = @transform_8, window_bounds = array<i64: 1, 32>}, {pipeline_mode = #tpu.pipeline_mode<synchronous>, transform_indices = @transform_9, window_bounds = array<i64: 25, 32>}, {pipeline_mode = #tpu.pipeline_mode<synchronous>, transform_indices = @transform_10, window_bounds = array<i64: 1, 32>}, {pipeline_mode = #tpu.pipeline_mode<synchronous>, transform_indices = @transform_11, window_bounds = array<i64: 32, 32>}, {pipeline_mode = #tpu.pipeline_mode<synchronous>, transform_indices = @transform_12, window_bounds = array<i64: 1, 32>}, {pipeline_mode = #tpu.pipeline_mode<synchronous>, transform_indices = @transform_13, window_bounds = array<i64: 1024, 32>}, {pipeline_mode = #tpu.pipeline_mode<synchronous>, transform_indices = @transform_14, window_bounds = array<i64: 1, 32>}, {pipeline_mode = #tpu.pipeline_mode<synchronous>, transform_indices = @transform_15, window_bounds = array<i64: 32, 32>}, {pipeline_mode = #tpu.pipeline_mode<synchronous>, transform_indices = @transform_16, window_bounds = array<i64: 1, 32>}, {pipeline_mode = #tpu.pipeline_mode<synchronous>, transform_indices = @transform_17, window_bounds = array<i64: 32, 32>}, {pipeline_mode = #tpu.pipeline_mode<synchronous>, transform_indices = @transform_18, window_bounds = array<i64: 32, 32>}, {pipeline_mode = #tpu.pipeline_mode<synchronous>, transform_indices = @transform_19, window_bounds = array<i64: 32, 32>}, {pipeline_mode = #tpu.pipeline_mode<synchronous>, transform_indices = @transform_20, window_bounds = array<i64: 1, 32>}, {pipeline_mode = #tpu.pipeline_mode<synchronous>, transform_indices = @transform_21, window_bounds = array<i64: 32, 32>}, {pipeline_mode = #tpu.pipeline_mode<synchronous>, transform_indices = @transform_22, window_bounds = array<i64: 1, 32>}, {pipeline_mode = #tpu.pipeline_mode<synchronous>, transform_indices = @transform_23, window_bounds = array<i64: 32, 32>}, {pipeline_mode = #tpu.pipeline_mode<synchronous>, transform_indices = @transform_24, window_bounds = array<i64: 32, 32>}, {pipeline_mode = #tpu.pipeline_mode<synchronous>, transform_indices = @transform_25, window_bounds = array<i64: 32, 32>}, {pipeline_mode = #tpu.pipeline_mode<synchronous>, transform_indices = @transform_26, window_bounds = array<i64: 1, 32>}, {pipeline_mode = #tpu.pipeline_mode<synchronous>, transform_indices = @transform_27, window_bounds = array<i64: 32, 25>}, {pipeline_mode = #tpu.pipeline_mode<synchronous>, transform_indices = @transform_28, window_bounds = array<i64: 1, 25>}, {transform_indices = @transform_29, window_bounds = array<i64: 1, 1, 25>}]} {
    %c0 = arith.constant 0 : index
    %c0_0 = arith.constant 0 : index
    %0 = vector.load %arg4[%c0, %c0_0] : memref<3x1024xbf16, #tpu.memory_space<vmem>>, vector<3x1024xbf16>
    %cst = arith.constant 0xFF800000 : f32
    %1 = vector.broadcast %cst : f32 to vector<1x256xf32>
    %cst_1 = arith.constant 0xFF800000 : f32
    %2 = vector.broadcast %cst_1 : f32 to vector<1x256xf32>
    %cst_2 = arith.constant 0xFF800000 : f32
    %3 = vector.broadcast %cst_2 : f32 to vector<1x256xf32>
    %cst_3 = arith.constant 0xFF800000 : f32
    %4 = vector.broadcast %cst_3 : f32 to vector<1x256xf32>
    %c0_4 = arith.constant 0 : index
    %c0_5 = arith.constant 0 : index
    %c0_6 = arith.constant 0 : index
    %c0_7 = arith.constant 0 : index
    %5 = vector.load %arg1[%c0_4, %c0_5, %c0_6, %c0_7] : memref<1x8x3x128xbf16, #tpu.memory_space<vmem>>, vector<1x1x3x128xbf16>
    %6 = vector.shape_cast %5 : vector<1x1x3x128xbf16> to vector<3x128xbf16>
    %7 = vector.extract_strided_slice %0 {offsets = [0, 0], sizes = [3, 256], strides = [1, 1]} : vector<3x1024xbf16> to vector<3x256xbf16>
    %cst_8 = arith.constant dense<0.000000e+00> : vector<128x256xf32>
    %8 = tpu.matmul %6, %7, %cst_8 {dimension_numbers = #tpu.dot_dimension_numbers<[0], [0], [1], [1], [0, 1, 1, 1], [], []>} : vector<3x128xbf16>, vector<3x256xbf16>, vector<128x256xf32> -> vector<128x256xf32>
    %cst_9 = arith.constant dense<0xFF800000> : vector<256xf32>
    %9 = vector.multi_reduction <maximumf>, %8, %cst_9 [0] : vector<128x256xf32> to vector<256xf32>
    %10 = vector.shape_cast %9 : vector<256xf32> to vector<1x256xf32>
    %11 = arith.maximumf %1, %10 : vector<1x256xf32>
    %12 = vector.extract_strided_slice %0 {offsets = [0, 256], sizes = [3, 256], strides = [1, 1]} : vector<3x1024xbf16> to vector<3x256xbf16>
    %cst_10 = arith.constant dense<0.000000e+00> : vector<128x256xf32>
    %13 = tpu.matmul %6, %12, %cst_10 {dimension_numbers = #tpu.dot_dimension_numbers<[0], [0], [1], [1], [0, 1, 1, 1], [], []>} : vector<3x128xbf16>, vector<3x256xbf16>, vector<128x256xf32> -> vector<128x256xf32>
    %cst_11 = arith.constant dense<0xFF800000> : vector<256xf32>
    %14 = vector.multi_reduction <maximumf>, %13, %cst_11 [0] : vector<128x256xf32> to vector<256xf32>
    %15 = vector.shape_cast %14 : vector<256xf32> to vector<1x256xf32>
    %16 = arith.maximumf %2, %15 : vector<1x256xf32>
    %17 = vector.extract_strided_slice %0 {offsets = [0, 512], sizes = [3, 256], strides = [1, 1]} : vector<3x1024xbf16> to vector<3x256xbf16>
    %cst_12 = arith.constant dense<0.000000e+00> : vector<128x256xf32>
    %18 = tpu.matmul %6, %17, %cst_12 {dimension_numbers = #tpu.dot_dimension_numbers<[0], [0], [1], [1], [0, 1, 1, 1], [], []>} : vector<3x128xbf16>, vector<3x256xbf16>, vector<128x256xf32> -> vector<128x256xf32>
    %cst_13 = arith.constant dense<0xFF800000> : vector<256xf32>
    %19 = vector.multi_reduction <maximumf>, %18, %cst_13 [0] : vector<128x256xf32> to vector<256xf32>
    %20 = vector.shape_cast %19 : vector<256xf32> to vector<1x256xf32>
    %21 = arith.maximumf %3, %20 : vector<1x256xf32>
    %22 = vector.extract_strided_slice %0 {offsets = [0, 768], sizes = [3, 256], strides = [1, 1]} : vector<3x1024xbf16> to vector<3x256xbf16>
    %cst_14 = arith.constant dense<0.000000e+00> : vector<128x256xf32>
    %23 = tpu.matmul %6, %22, %cst_14 {dimension_numbers = #tpu.dot_dimension_numbers<[0], [0], [1], [1], [0, 1, 1, 1], [], []>} : vector<3x128xbf16>, vector<3x256xbf16>, vector<128x256xf32> -> vector<128x256xf32>
    %cst_15 = arith.constant dense<0xFF800000> : vector<256xf32>
    %24 = vector.multi_reduction <maximumf>, %23, %cst_15 [0] : vector<128x256xf32> to vector<256xf32>
    %25 = vector.shape_cast %24 : vector<256xf32> to vector<1x256xf32>
    %26 = arith.maximumf %4, %25 : vector<1x256xf32>
    %c0_16 = arith.constant 0 : index
    %c1 = arith.constant 1 : index
    %c0_17 = arith.constant 0 : index
    %c0_18 = arith.constant 0 : index
    %27 = vector.load %arg1[%c0_16, %c1, %c0_17, %c0_18] : memref<1x8x3x128xbf16, #tpu.memory_space<vmem>>, vector<1x1x3x128xbf16>
    %28 = vector.shape_cast %27 : vector<1x1x3x128xbf16> to vector<3x128xbf16>
    %29 = vector.extract_strided_slice %0 {offsets = [0, 0], sizes = [3, 256], strides = [1, 1]} : vector<3x1024xbf16> to vector<3x256xbf16>
    %cst_19 = arith.constant dense<0.000000e+00> : vector<128x256xf32>
    %30 = tpu.matmul %28, %29, %cst_19 {dimension_numbers = #tpu.dot_dimension_numbers<[0], [0], [1], [1], [0, 1, 1, 1], [], []>} : vector<3x128xbf16>, vector<3x256xbf16>, vector<128x256xf32> -> vector<128x256xf32>
    %cst_20 = arith.constant dense<0xFF800000> : vector<256xf32>
    %31 = vector.multi_reduction <maximumf>, %30, %cst_20 [0] : vector<128x256xf32> to vector<256xf32>
    %32 = vector.shape_cast %31 : vector<256xf32> to vector<1x256xf32>
    %33 = arith.maximumf %11, %32 : vector<1x256xf32>
    %34 = vector.extract_strided_slice %0 {offsets = [0, 256], sizes = [3, 256], strides = [1, 1]} : vector<3x1024xbf16> to vector<3x256xbf16>
    %cst_21 = arith.constant dense<0.000000e+00> : vector<128x256xf32>
    %35 = tpu.matmul %28, %34, %cst_21 {dimension_numbers = #tpu.dot_dimension_numbers<[0], [0], [1], [1], [0, 1, 1, 1], [], []>} : vector<3x128xbf16>, vector<3x256xbf16>, vector<128x256xf32> -> vector<128x256xf32>
    %cst_22 = arith.constant dense<0xFF800000> : vector<256xf32>
    %36 = vector.multi_reduction <maximumf>, %35, %cst_22 [0] : vector<128x256xf32> to vector<256xf32>
    %37 = vector.shape_cast %36 : vector<256xf32> to vector<1x256xf32>
    %38 = arith.maximumf %16, %37 : vector<1x256xf32>
    %39 = vector.extract_strided_slice %0 {offsets = [0, 512], sizes = [3, 256], strides = [1, 1]} : vector<3x1024xbf16> to vector<3x256xbf16>
    %cst_23 = arith.constant dense<0.000000e+00> : vector<128x256xf32>
    %40 = tpu.matmul %28, %39, %cst_23 {dimension_numbers = #tpu.dot_dimension_numbers<[0], [0], [1], [1], [0, 1, 1, 1], [], []>} : vector<3x128xbf16>, vector<3x256xbf16>, vector<128x256xf32> -> vector<128x256xf32>
    %cst_24 = arith.constant dense<0xFF800000> : vector<256xf32>
    %41 = vector.multi_reduction <maximumf>, %40, %cst_24 [0] : vector<128x256xf32> to vector<256xf32>
    %42 = vector.shape_cast %41 : vector<256xf32> to vector<1x256xf32>
    %43 = arith.maximumf %21, %42 : vector<1x256xf32>
    %44 = vector.extract_strided_slice %0 {offsets = [0, 768], sizes = [3, 256], strides = [1, 1]} : vector<3x1024xbf16> to vector<3x256xbf16>
    %cst_25 = arith.constant dense<0.000000e+00> : vector<128x256xf32>
    %45 = tpu.matmul %28, %44, %cst_25 {dimension_numbers = #tpu.dot_dimension_numbers<[0], [0], [1], [1], [0, 1, 1, 1], [], []>} : vector<3x128xbf16>, vector<3x256xbf16>, vector<128x256xf32> -> vector<128x256xf32>
    %cst_26 = arith.constant dense<0xFF800000> : vector<256xf32>
    %46 = vector.multi_reduction <maximumf>, %45, %cst_26 [0] : vector<128x256xf32> to vector<256xf32>
    %47 = vector.shape_cast %46 : vector<256xf32> to vector<1x256xf32>
    %48 = arith.maximumf %26, %47 : vector<1x256xf32>
    %c0_27 = arith.constant 0 : index
    %c2 = arith.constant 2 : index
    %c0_28 = arith.constant 0 : index
    %c0_29 = arith.constant 0 : index
    %49 = vector.load %arg1[%c0_27, %c2, %c0_28, %c0_29] : memref<1x8x3x128xbf16, #tpu.memory_space<vmem>>, vector<1x1x3x128xbf16>
    %50 = vector.shape_cast %49 : vector<1x1x3x128xbf16> to vector<3x128xbf16>
    %51 = vector.extract_strided_slice %0 {offsets = [0, 0], sizes = [3, 256], strides = [1, 1]} : vector<3x1024xbf16> to vector<3x256xbf16>
    %cst_30 = arith.constant dense<0.000000e+00> : vector<128x256xf32>
    %52 = tpu.matmul %50, %51, %cst_30 {dimension_numbers = #tpu.dot_dimension_numbers<[0], [0], [1], [1], [0, 1, 1, 1], [], []>} : vector<3x128xbf16>, vector<3x256xbf16>, vector<128x256xf32> -> vector<128x256xf32>
    %cst_31 = arith.constant dense<0xFF800000> : vector<256xf32>
    %53 = vector.multi_reduction <maximumf>, %52, %cst_31 [0] : vector<128x256xf32> to vector<256xf32>
    %54 = vector.shape_cast %53 : vector<256xf32> to vector<1x256xf32>
    %55 = arith.maximumf %33, %54 : vector<1x256xf32>
    %56 = vector.extract_strided_slice %0 {offsets = [0, 256], sizes = [3, 256], strides = [1, 1]} : vector<3x1024xbf16> to vector<3x256xbf16>
    %cst_32 = arith.constant dense<0.000000e+00> : vector<128x256xf32>
    %57 = tpu.matmul %50, %56, %cst_32 {dimension_numbers = #tpu.dot_dimension_numbers<[0], [0], [1], [1], [0, 1, 1, 1], [], []>} : vector<3x128xbf16>, vector<3x256xbf16>, vector<128x256xf32> -> vector<128x256xf32>
    %cst_33 = arith.constant dense<0xFF800000> : vector<256xf32>
    %58 = vector.multi_reduction <maximumf>, %57, %cst_33 [0] : vector<128x256xf32> to vector<256xf32>
    %59 = vector.shape_cast %58 : vector<256xf32> to vector<1x256xf32>
    %60 = arith.maximumf %38, %59 : vector<1x256xf32>
    %61 = vector.extract_strided_slice %0 {offsets = [0, 512], sizes = [3, 256], strides = [1, 1]} : vector<3x1024xbf16> to vector<3x256xbf16>
    %cst_34 = arith.constant dense<0.000000e+00> : vector<128x256xf32>
    %62 = tpu.matmul %50, %61, %cst_34 {dimension_numbers = #tpu.dot_dimension_numbers<[0], [0], [1], [1], [0, 1, 1, 1], [], []>} : vector<3x128xbf16>, vector<3x256xbf16>, vector<128x256xf32> -> vector<128x256xf32>
    %cst_35 = arith.constant dense<0xFF800000> : vector<256xf32>
    %63 = vector.multi_reduction <maximumf>, %62, %cst_35 [0] : vector<128x256xf32> to vector<256xf32>
    %64 = vector.shape_cast %63 : vector<256xf32> to vector<1x256xf32>
    %65 = arith.maximumf %43, %64 : vector<1x256xf32>
    %66 = vector.extract_strided_slice %0 {offsets = [0, 768], sizes = [3, 256], strides = [1, 1]} : vector<3x1024xbf16> to vector<3x256xbf16>
    %cst_36 = arith.constant dense<0.000000e+00> : vector<128x256xf32>
    %67 = tpu.matmul %50, %66, %cst_36 {dimension_numbers = #tpu.dot_dimension_numbers<[0], [0], [1], [1], [0, 1, 1, 1], [], []>} : vector<3x128xbf16>, vector<3x256xbf16>, vector<128x256xf32> -> vector<128x256xf32>
    %cst_37 = arith.constant dense<0xFF800000> : vector<256xf32>
    %68 = vector.multi_reduction <maximumf>, %67, %cst_37 [0] : vector<128x256xf32> to vector<256xf32>
    %69 = vector.shape_cast %68 : vector<256xf32> to vector<1x256xf32>
    %70 = arith.maximumf %48, %69 : vector<1x256xf32>
    %c0_38 = arith.constant 0 : index
    %c3 = arith.constant 3 : index
    %c0_39 = arith.constant 0 : index
    %c0_40 = arith.constant 0 : index
    %71 = vector.load %arg1[%c0_38, %c3, %c0_39, %c0_40] : memref<1x8x3x128xbf16, #tpu.memory_space<vmem>>, vector<1x1x3x128xbf16>
    %72 = vector.shape_cast %71 : vector<1x1x3x128xbf16> to vector<3x128xbf16>
    %73 = vector.extract_strided_slice %0 {offsets = [0, 0], sizes = [3, 256], strides = [1, 1]} : vector<3x1024xbf16> to vector<3x256xbf16>
    %cst_41 = arith.constant dense<0.000000e+00> : vector<128x256xf32>
    %74 = tpu.matmul %72, %73, %cst_41 {dimension_numbers = #tpu.dot_dimension_numbers<[0], [0], [1], [1], [0, 1, 1, 1], [], []>} : vector<3x128xbf16>, vector<3x256xbf16>, vector<128x256xf32> -> vector<128x256xf32>
    %cst_42 = arith.constant dense<0xFF800000> : vector<256xf32>
    %75 = vector.multi_reduction <maximumf>, %74, %cst_42 [0] : vector<128x256xf32> to vector<256xf32>
    %76 = vector.shape_cast %75 : vector<256xf32> to vector<1x256xf32>
    %77 = arith.maximumf %55, %76 : vector<1x256xf32>
    %78 = vector.extract_strided_slice %0 {offsets = [0, 256], sizes = [3, 256], strides = [1, 1]} : vector<3x1024xbf16> to vector<3x256xbf16>
    %cst_43 = arith.constant dense<0.000000e+00> : vector<128x256xf32>
    %79 = tpu.matmul %72, %78, %cst_43 {dimension_numbers = #tpu.dot_dimension_numbers<[0], [0], [1], [1], [0, 1, 1, 1], [], []>} : vector<3x128xbf16>, vector<3x256xbf16>, vector<128x256xf32> -> vector<128x256xf32>
    %cst_44 = arith.constant dense<0xFF800000> : vector<256xf32>
    %80 = vector.multi_reduction <maximumf>, %79, %cst_44 [0] : vector<128x256xf32> to vector<256xf32>
    %81 = vector.shape_cast %80 : vector<256xf32> to vector<1x256xf32>
    %82 = arith.maximumf %60, %81 : vector<1x256xf32>
    %83 = vector.extract_strided_slice %0 {offsets = [0, 512], sizes = [3, 256], strides = [1, 1]} : vector<3x1024xbf16> to vector<3x256xbf16>
    %cst_45 = arith.constant dense<0.000000e+00> : vector<128x256xf32>
    %84 = tpu.matmul %72, %83, %cst_45 {dimension_numbers = #tpu.dot_dimension_numbers<[0], [0], [1], [1], [0, 1, 1, 1], [], []>} : vector<3x128xbf16>, vector<3x256xbf16>, vector<128x256xf32> -> vector<128x256xf32>
    %cst_46 = arith.constant dense<0xFF800000> : vector<256xf32>
    %85 = vector.multi_reduction <maximumf>, %84, %cst_46 [0] : vector<128x256xf32> to vector<256xf32>
    %86 = vector.shape_cast %85 : vector<256xf32> to vector<1x256xf32>
    %87 = arith.maximumf %65, %86 : vector<1x256xf32>
    %88 = vector.extract_strided_slice %0 {offsets = [0, 768], sizes = [3, 256], strides = [1, 1]} : vector<3x1024xbf16> to vector<3x256xbf16>
    %cst_47 = arith.constant dense<0.000000e+00> : vector<128x256xf32>
    %89 = tpu.matmul %72, %88, %cst_47 {dimension_numbers = #tpu.dot_dimension_numbers<[0], [0], [1], [1], [0, 1, 1, 1], [], []>} : vector<3x128xbf16>, vector<3x256xbf16>, vector<128x256xf32> -> vector<128x256xf32>
    %cst_48 = arith.constant dense<0xFF800000> : vector<256xf32>
    %90 = vector.multi_reduction <maximumf>, %89, %cst_48 [0] : vector<128x256xf32> to vector<256xf32>
    %91 = vector.shape_cast %90 : vector<256xf32> to vector<1x256xf32>
    %92 = arith.maximumf %70, %91 : vector<1x256xf32>
    %c0_49 = arith.constant 0 : index
    %c4 = arith.constant 4 : index
    %c0_50 = arith.constant 0 : index
    %c0_51 = arith.constant 0 : index
    %93 = vector.load %arg1[%c0_49, %c4, %c0_50, %c0_51] : memref<1x8x3x128xbf16, #tpu.memory_space<vmem>>, vector<1x1x3x128xbf16>
    %94 = vector.shape_cast %93 : vector<1x1x3x128xbf16> to vector<3x128xbf16>
    %95 = vector.extract_strided_slice %0 {offsets = [0, 0], sizes = [3, 256], strides = [1, 1]} : vector<3x1024xbf16> to vector<3x256xbf16>
    %cst_52 = arith.constant dense<0.000000e+00> : vector<128x256xf32>
    %96 = tpu.matmul %94, %95, %cst_52 {dimension_numbers = #tpu.dot_dimension_numbers<[0], [0], [1], [1], [0, 1, 1, 1], [], []>} : vector<3x128xbf16>, vector<3x256xbf16>, vector<128x256xf32> -> vector<128x256xf32>
    %cst_53 = arith.constant dense<0xFF800000> : vector<256xf32>
    %97 = vector.multi_reduction <maximumf>, %96, %cst_53 [0] : vector<128x256xf32> to vector<256xf32>
    %98 = vector.shape_cast %97 : vector<256xf32> to vector<1x256xf32>
    %99 = arith.maximumf %77, %98 : vector<1x256xf32>
    %100 = vector.extract_strided_slice %0 {offsets = [0, 256], sizes = [3, 256], strides = [1, 1]} : vector<3x1024xbf16> to vector<3x256xbf16>
    %cst_54 = arith.constant dense<0.000000e+00> : vector<128x256xf32>
    %101 = tpu.matmul %94, %100, %cst_54 {dimension_numbers = #tpu.dot_dimension_numbers<[0], [0], [1], [1], [0, 1, 1, 1], [], []>} : vector<3x128xbf16>, vector<3x256xbf16>, vector<128x256xf32> -> vector<128x256xf32>
    %cst_55 = arith.constant dense<0xFF800000> : vector<256xf32>
    %102 = vector.multi_reduction <maximumf>, %101, %cst_55 [0] : vector<128x256xf32> to vector<256xf32>
    %103 = vector.shape_cast %102 : vector<256xf32> to vector<1x256xf32>
    %104 = arith.maximumf %82, %103 : vector<1x256xf32>
    %105 = vector.extract_strided_slice %0 {offsets = [0, 512], sizes = [3, 256], strides = [1, 1]} : vector<3x1024xbf16> to vector<3x256xbf16>
    %cst_56 = arith.constant dense<0.000000e+00> : vector<128x256xf32>
    %106 = tpu.matmul %94, %105, %cst_56 {dimension_numbers = #tpu.dot_dimension_numbers<[0], [0], [1], [1], [0, 1, 1, 1], [], []>} : vector<3x128xbf16>, vector<3x256xbf16>, vector<128x256xf32> -> vector<128x256xf32>
    %cst_57 = arith.constant dense<0xFF800000> : vector<256xf32>
    %107 = vector.multi_reduction <maximumf>, %106, %cst_57 [0] : vector<128x256xf32> to vector<256xf32>
    %108 = vector.shape_cast %107 : vector<256xf32> to vector<1x256xf32>
    %109 = arith.maximumf %87, %108 : vector<1x256xf32>
    %110 = vector.extract_strided_slice %0 {offsets = [0, 768], sizes = [3, 256], strides = [1, 1]} : vector<3x1024xbf16> to vector<3x256xbf16>
    %cst_58 = arith.constant dense<0.000000e+00> : vector<128x256xf32>
    %111 = tpu.matmul %94, %110, %cst_58 {dimension_numbers = #tpu.dot_dimension_numbers<[0], [0], [1], [1], [0, 1, 1, 1], [], []>} : vector<3x128xbf16>, vector<3x256xbf16>, vector<128x256xf32> -> vector<128x256xf32>
    %cst_59 = arith.constant dense<0xFF800000> : vector<256xf32>
    %112 = vector.multi_reduction <maximumf>, %111, %cst_59 [0] : vector<128x256xf32> to vector<256xf32>
    %113 = vector.shape_cast %112 : vector<256xf32> to vector<1x256xf32>
    %114 = arith.maximumf %92, %113 : vector<1x256xf32>
    %c0_60 = arith.constant 0 : index
    %c5 = arith.constant 5 : index
    %c0_61 = arith.constant 0 : index
    %c0_62 = arith.constant 0 : index
    %115 = vector.load %arg1[%c0_60, %c5, %c0_61, %c0_62] : memref<1x8x3x128xbf16, #tpu.memory_space<vmem>>, vector<1x1x3x128xbf16>
    %116 = vector.shape_cast %115 : vector<1x1x3x128xbf16> to vector<3x128xbf16>
    %117 = vector.extract_strided_slice %0 {offsets = [0, 0], sizes = [3, 256], strides = [1, 1]} : vector<3x1024xbf16> to vector<3x256xbf16>
    %cst_63 = arith.constant dense<0.000000e+00> : vector<128x256xf32>
    %118 = tpu.matmul %116, %117, %cst_63 {dimension_numbers = #tpu.dot_dimension_numbers<[0], [0], [1], [1], [0, 1, 1, 1], [], []>} : vector<3x128xbf16>, vector<3x256xbf16>, vector<128x256xf32> -> vector<128x256xf32>
    %cst_64 = arith.constant dense<0xFF800000> : vector<256xf32>
    %119 = vector.multi_reduction <maximumf>, %118, %cst_64 [0] : vector<128x256xf32> to vector<256xf32>
    %120 = vector.shape_cast %119 : vector<256xf32> to vector<1x256xf32>
    %121 = arith.maximumf %99, %120 : vector<1x256xf32>
    %122 = vector.extract_strided_slice %0 {offsets = [0, 256], sizes = [3, 256], strides = [1, 1]} : vector<3x1024xbf16> to vector<3x256xbf16>
    %cst_65 = arith.constant dense<0.000000e+00> : vector<128x256xf32>
    %123 = tpu.matmul %116, %122, %cst_65 {dimension_numbers = #tpu.dot_dimension_numbers<[0], [0], [1], [1], [0, 1, 1, 1], [], []>} : vector<3x128xbf16>, vector<3x256xbf16>, vector<128x256xf32> -> vector<128x256xf32>
    %cst_66 = arith.constant dense<0xFF800000> : vector<256xf32>
    %124 = vector.multi_reduction <maximumf>, %123, %cst_66 [0] : vector<128x256xf32> to vector<256xf32>
    %125 = vector.shape_cast %124 : vector<256xf32> to vector<1x256xf32>
    %126 = arith.maximumf %104, %125 : vector<1x256xf32>
    %127 = vector.extract_strided_slice %0 {offsets = [0, 512], sizes = [3, 256], strides = [1, 1]} : vector<3x1024xbf16> to vector<3x256xbf16>
    %cst_67 = arith.constant dense<0.000000e+00> : vector<128x256xf32>
    %128 = tpu.matmul %116, %127, %cst_67 {dimension_numbers = #tpu.dot_dimension_numbers<[0], [0], [1], [1], [0, 1, 1, 1], [], []>} : vector<3x128xbf16>, vector<3x256xbf16>, vector<128x256xf32> -> vector<128x256xf32>
    %cst_68 = arith.constant dense<0xFF800000> : vector<256xf32>
    %129 = vector.multi_reduction <maximumf>, %128, %cst_68 [0] : vector<128x256xf32> to vector<256xf32>
    %130 = vector.shape_cast %129 : vector<256xf32> to vector<1x256xf32>
    %131 = arith.maximumf %109, %130 : vector<1x256xf32>
    %132 = vector.extract_strided_slice %0 {offsets = [0, 768], sizes = [3, 256], strides = [1, 1]} : vector<3x1024xbf16> to vector<3x256xbf16>
    %cst_69 = arith.constant dense<0.000000e+00> : vector<128x256xf32>
    %133 = tpu.matmul %116, %132, %cst_69 {dimension_numbers = #tpu.dot_dimension_numbers<[0], [0], [1], [1], [0, 1, 1, 1], [], []>} : vector<3x128xbf16>, vector<3x256xbf16>, vector<128x256xf32> -> vector<128x256xf32>
    %cst_70 = arith.constant dense<0xFF800000> : vector<256xf32>
    %134 = vector.multi_reduction <maximumf>, %133, %cst_70 [0] : vector<128x256xf32> to vector<256xf32>
    %135 = vector.shape_cast %134 : vector<256xf32> to vector<1x256xf32>
    %136 = arith.maximumf %114, %135 : vector<1x256xf32>
    %c0_71 = arith.constant 0 : index
    %c6 = arith.constant 6 : index
    %c0_72 = arith.constant 0 : index
    %c0_73 = arith.constant 0 : index
    %137 = vector.load %arg1[%c0_71, %c6, %c0_72, %c0_73] : memref<1x8x3x128xbf16, #tpu.memory_space<vmem>>, vector<1x1x3x128xbf16>
    %138 = vector.shape_cast %137 : vector<1x1x3x128xbf16> to vector<3x128xbf16>
    %139 = vector.extract_strided_slice %0 {offsets = [0, 0], sizes = [3, 256], strides = [1, 1]} : vector<3x1024xbf16> to vector<3x256xbf16>
    %cst_74 = arith.constant dense<0.000000e+00> : vector<128x256xf32>
    %140 = tpu.matmul %138, %139, %cst_74 {dimension_numbers = #tpu.dot_dimension_numbers<[0], [0], [1], [1], [0, 1, 1, 1], [], []>} : vector<3x128xbf16>, vector<3x256xbf16>, vector<128x256xf32> -> vector<128x256xf32>
    %cst_75 = arith.constant dense<0xFF800000> : vector<256xf32>
    %141 = vector.multi_reduction <maximumf>, %140, %cst_75 [0] : vector<128x256xf32> to vector<256xf32>
    %142 = vector.shape_cast %141 : vector<256xf32> to vector<1x256xf32>
    %143 = arith.maximumf %121, %142 : vector<1x256xf32>
    %144 = vector.extract_strided_slice %0 {offsets = [0, 256], sizes = [3, 256], strides = [1, 1]} : vector<3x1024xbf16> to vector<3x256xbf16>
    %cst_76 = arith.constant dense<0.000000e+00> : vector<128x256xf32>
    %145 = tpu.matmul %138, %144, %cst_76 {dimension_numbers = #tpu.dot_dimension_numbers<[0], [0], [1], [1], [0, 1, 1, 1], [], []>} : vector<3x128xbf16>, vector<3x256xbf16>, vector<128x256xf32> -> vector<128x256xf32>
    %cst_77 = arith.constant dense<0xFF800000> : vector<256xf32>
    %146 = vector.multi_reduction <maximumf>, %145, %cst_77 [0] : vector<128x256xf32> to vector<256xf32>
    %147 = vector.shape_cast %146 : vector<256xf32> to vector<1x256xf32>
    %148 = arith.maximumf %126, %147 : vector<1x256xf32>
    %149 = vector.extract_strided_slice %0 {offsets = [0, 512], sizes = [3, 256], strides = [1, 1]} : vector<3x1024xbf16> to vector<3x256xbf16>
    %cst_78 = arith.constant dense<0.000000e+00> : vector<128x256xf32>
    %150 = tpu.matmul %138, %149, %cst_78 {dimension_numbers = #tpu.dot_dimension_numbers<[0], [0], [1], [1], [0, 1, 1, 1], [], []>} : vector<3x128xbf16>, vector<3x256xbf16>, vector<128x256xf32> -> vector<128x256xf32>
    %cst_79 = arith.constant dense<0xFF800000> : vector<256xf32>
    %151 = vector.multi_reduction <maximumf>, %150, %cst_79 [0] : vector<128x256xf32> to vector<256xf32>
    %152 = vector.shape_cast %151 : vector<256xf32> to vector<1x256xf32>
    %153 = arith.maximumf %131, %152 : vector<1x256xf32>
    %154 = vector.extract_strided_slice %0 {offsets = [0, 768], sizes = [3, 256], strides = [1, 1]} : vector<3x1024xbf16> to vector<3x256xbf16>
    %cst_80 = arith.constant dense<0.000000e+00> : vector<128x256xf32>
    %155 = tpu.matmul %138, %154, %cst_80 {dimension_numbers = #tpu.dot_dimension_numbers<[0], [0], [1], [1], [0, 1, 1, 1], [], []>} : vector<3x128xbf16>, vector<3x256xbf16>, vector<128x256xf32> -> vector<128x256xf32>
    %cst_81 = arith.constant dense<0xFF800000> : vector<256xf32>
    %156 = vector.multi_reduction <maximumf>, %155, %cst_81 [0] : vector<128x256xf32> to vector<256xf32>
    %157 = vector.shape_cast %156 : vector<256xf32> to vector<1x256xf32>
    %158 = arith.maximumf %136, %157 : vector<1x256xf32>
    %c0_82 = arith.constant 0 : index
    %c7 = arith.constant 7 : index
    %c0_83 = arith.constant 0 : index
    %c0_84 = arith.constant 0 : index
    %159 = vector.load %arg1[%c0_82, %c7, %c0_83, %c0_84] : memref<1x8x3x128xbf16, #tpu.memory_space<vmem>>, vector<1x1x3x128xbf16>
    %160 = vector.shape_cast %159 : vector<1x1x3x128xbf16> to vector<3x128xbf16>
    %161 = vector.extract_strided_slice %0 {offsets = [0, 0], sizes = [3, 256], strides = [1, 1]} : vector<3x1024xbf16> to vector<3x256xbf16>
    %cst_85 = arith.constant dense<0.000000e+00> : vector<128x256xf32>
    %162 = tpu.matmul %160, %161, %cst_85 {dimension_numbers = #tpu.dot_dimension_numbers<[0], [0], [1], [1], [0, 1, 1, 1], [], []>} : vector<3x128xbf16>, vector<3x256xbf16>, vector<128x256xf32> -> vector<128x256xf32>
    %cst_86 = arith.constant dense<0xFF800000> : vector<256xf32>
    %163 = vector.multi_reduction <maximumf>, %162, %cst_86 [0] : vector<128x256xf32> to vector<256xf32>
    %164 = vector.shape_cast %163 : vector<256xf32> to vector<1x256xf32>
    %165 = arith.maximumf %143, %164 : vector<1x256xf32>
    %166 = vector.extract_strided_slice %0 {offsets = [0, 256], sizes = [3, 256], strides = [1, 1]} : vector<3x1024xbf16> to vector<3x256xbf16>
    %cst_87 = arith.constant dense<0.000000e+00> : vector<128x256xf32>
    %167 = tpu.matmul %160, %166, %cst_87 {dimension_numbers = #tpu.dot_dimension_numbers<[0], [0], [1], [1], [0, 1, 1, 1], [], []>} : vector<3x128xbf16>, vector<3x256xbf16>, vector<128x256xf32> -> vector<128x256xf32>
    %cst_88 = arith.constant dense<0xFF800000> : vector<256xf32>
    %168 = vector.multi_reduction <maximumf>, %167, %cst_88 [0] : vector<128x256xf32> to vector<256xf32>
    %169 = vector.shape_cast %168 : vector<256xf32> to vector<1x256xf32>
    %170 = arith.maximumf %148, %169 : vector<1x256xf32>
    %171 = vector.extract_strided_slice %0 {offsets = [0, 512], sizes = [3, 256], strides = [1, 1]} : vector<3x1024xbf16> to vector<3x256xbf16>
    %cst_89 = arith.constant dense<0.000000e+00> : vector<128x256xf32>
    %172 = tpu.matmul %160, %171, %cst_89 {dimension_numbers = #tpu.dot_dimension_numbers<[0], [0], [1], [1], [0, 1, 1, 1], [], []>} : vector<3x128xbf16>, vector<3x256xbf16>, vector<128x256xf32> -> vector<128x256xf32>
    %cst_90 = arith.constant dense<0xFF800000> : vector<256xf32>
    %173 = vector.multi_reduction <maximumf>, %172, %cst_90 [0] : vector<128x256xf32> to vector<256xf32>
    %174 = vector.shape_cast %173 : vector<256xf32> to vector<1x256xf32>
    %175 = arith.maximumf %153, %174 : vector<1x256xf32>
    %176 = vector.extract_strided_slice %0 {offsets = [0, 768], sizes = [3, 256], strides = [1, 1]} : vector<3x1024xbf16> to vector<3x256xbf16>
    %cst_91 = arith.constant dense<0.000000e+00> : vector<128x256xf32>
    %177 = tpu.matmul %160, %176, %cst_91 {dimension_numbers = #tpu.dot_dimension_numbers<[0], [0], [1], [1], [0, 1, 1, 1], [], []>} : vector<3x128xbf16>, vector<3x256xbf16>, vector<128x256xf32> -> vector<128x256xf32>
    %cst_92 = arith.constant dense<0xFF800000> : vector<256xf32>
    %178 = vector.multi_reduction <maximumf>, %177, %cst_92 [0] : vector<128x256xf32> to vector<256xf32>
    %179 = vector.shape_cast %178 : vector<256xf32> to vector<1x256xf32>
    %180 = arith.maximumf %158, %179 : vector<1x256xf32>
    %c0_93 = arith.constant 0 : index
    %c0_94 = arith.constant 0 : index
    %181 = vector.load %arg15[%c0_93, %c0_94] : memref<1x32xf32, #tpu.memory_space<vmem>>, vector<1x32xf32>
    %c0_95 = arith.constant 0 : index
    %c0_96 = arith.constant 0 : index
    %182 = vector.load %arg5[%c0_95, %c0_96] : memref<1x1024xf32, #tpu.memory_space<vmem>>, vector<1x256xf32>
    %183 = arith.addf %165, %182 : vector<1x256xf32>
    %cst_97 = arith.constant 0.000000e+00 : f32
    %184 = vector.broadcast %cst_97 : f32 to vector<1x256xf32>
    %185 = arith.maximumf %183, %184 : vector<1x256xf32>
    %c0_98 = arith.constant 0 : index
    %c0_99 = arith.constant 0 : index
    %186 = vector.load %arg14[%c0_98, %c0_99] : memref<1024x32xf32, #tpu.memory_space<vmem>>, vector<256x32xf32>
    %cst_100 = arith.constant dense<0.000000e+00> : vector<1x32xf32>
    %187 = tpu.matmul %185, %186, %cst_100 {dimension_numbers = #tpu.dot_dimension_numbers<[1], [0], [0], [1], [0, 0, 1, 1], [], []>} : vector<1x256xf32>, vector<256x32xf32>, vector<1x32xf32> -> vector<1x32xf32>
    %188 = arith.addf %181, %187 : vector<1x32xf32>
    %c0_101 = arith.constant 0 : index
    %c256 = arith.constant 256 : index
    %189 = vector.load %arg5[%c0_101, %c256] : memref<1x1024xf32, #tpu.memory_space<vmem>>, vector<1x256xf32>
    %190 = arith.addf %170, %189 : vector<1x256xf32>
    %cst_102 = arith.constant 0.000000e+00 : f32
    %191 = vector.broadcast %cst_102 : f32 to vector<1x256xf32>
    %192 = arith.maximumf %190, %191 : vector<1x256xf32>
    %c256_103 = arith.constant 256 : index
    %c0_104 = arith.constant 0 : index
    %193 = vector.load %arg14[%c256_103, %c0_104] : memref<1024x32xf32, #tpu.memory_space<vmem>>, vector<256x32xf32>
    %cst_105 = arith.constant dense<0.000000e+00> : vector<1x32xf32>
    %194 = tpu.matmul %192, %193, %cst_105 {dimension_numbers = #tpu.dot_dimension_numbers<[1], [0], [0], [1], [0, 0, 1, 1], [], []>} : vector<1x256xf32>, vector<256x32xf32>, vector<1x32xf32> -> vector<1x32xf32>
    %195 = arith.addf %188, %194 : vector<1x32xf32>
    %c0_106 = arith.constant 0 : index
    %c512 = arith.constant 512 : index
    %196 = vector.load %arg5[%c0_106, %c512] : memref<1x1024xf32, #tpu.memory_space<vmem>>, vector<1x256xf32>
    %197 = arith.addf %175, %196 : vector<1x256xf32>
    %cst_107 = arith.constant 0.000000e+00 : f32
    %198 = vector.broadcast %cst_107 : f32 to vector<1x256xf32>
    %199 = arith.maximumf %197, %198 : vector<1x256xf32>
    %c512_108 = arith.constant 512 : index
    %c0_109 = arith.constant 0 : index
    %200 = vector.load %arg14[%c512_108, %c0_109] : memref<1024x32xf32, #tpu.memory_space<vmem>>, vector<256x32xf32>
    %cst_110 = arith.constant dense<0.000000e+00> : vector<1x32xf32>
    %201 = tpu.matmul %199, %200, %cst_110 {dimension_numbers = #tpu.dot_dimension_numbers<[1], [0], [0], [1], [0, 0, 1, 1], [], []>} : vector<1x256xf32>, vector<256x32xf32>, vector<1x32xf32> -> vector<1x32xf32>
    %202 = arith.addf %195, %201 : vector<1x32xf32>
    %c0_111 = arith.constant 0 : index
    %c768 = arith.constant 768 : index
    %203 = vector.load %arg5[%c0_111, %c768] : memref<1x1024xf32, #tpu.memory_space<vmem>>, vector<1x256xf32>
    %204 = arith.addf %180, %203 : vector<1x256xf32>
    %cst_112 = arith.constant 0.000000e+00 : f32
    %205 = vector.broadcast %cst_112 : f32 to vector<1x256xf32>
    %206 = arith.maximumf %204, %205 : vector<1x256xf32>
    %c768_113 = arith.constant 768 : index
    %c0_114 = arith.constant 0 : index
    %207 = vector.load %arg14[%c768_113, %c0_114] : memref<1024x32xf32, #tpu.memory_space<vmem>>, vector<256x32xf32>
    %cst_115 = arith.constant dense<0.000000e+00> : vector<1x32xf32>
    %208 = tpu.matmul %206, %207, %cst_115 {dimension_numbers = #tpu.dot_dimension_numbers<[1], [0], [0], [1], [0, 0, 1, 1], [], []>} : vector<1x256xf32>, vector<256x32xf32>, vector<1x32xf32> -> vector<1x32xf32>
    %209 = arith.addf %202, %208 : vector<1x32xf32>
    %cst_116 = arith.constant 0.000000e+00 : f32
    %210 = vector.broadcast %cst_116 : f32 to vector<1x32xf32>
    %211 = arith.maximumf %209, %210 : vector<1x32xf32>
    %c0_117 = arith.constant 0 : index
    %c0_118 = arith.constant 0 : index
    %212 = vector.load %arg16[%c0_117, %c0_118] : memref<32x32xf32, #tpu.memory_space<vmem>>, vector<32x32xf32>
    %cst_119 = arith.constant dense<0.000000e+00> : vector<1x32xf32>
    %213 = tpu.matmul %211, %212, %cst_119 {dimension_numbers = #tpu.dot_dimension_numbers<[1], [0], [0], [1], [0, 0, 1, 1], [], []>} : vector<1x32xf32>, vector<32x32xf32>, vector<1x32xf32> -> vector<1x32xf32>
    %c0_120 = arith.constant 0 : index
    %c0_121 = arith.constant 0 : index
    %214 = vector.load %arg17[%c0_120, %c0_121] : memref<1x32xf32, #tpu.memory_space<vmem>>, vector<1x32xf32>
    %215 = arith.addf %213, %214 : vector<1x32xf32>
    %cst_122 = arith.constant 0.000000e+00 : f32
    %216 = vector.broadcast %cst_122 : f32 to vector<1x32xf32>
    %217 = arith.maximumf %215, %216 : vector<1x32xf32>
    %c0_123 = arith.constant 0 : index
    %c0_124 = arith.constant 0 : index
    %c0_125 = arith.constant 0 : index
    %218 = vector.load %arg2[%c0_123, %c0_124, %c0_125] : memref<1x1x1xf32, #tpu.memory_space<vmem>>, vector<1x1x1xf32>
    %219 = vector.shape_cast %218 : vector<1x1x1xf32> to vector<1x1xf32>
    %c0_126 = arith.constant 0 : index
    %c0_127 = arith.constant 0 : index
    %220 = vector.load %arg6[%c0_126, %c0_127] : memref<1x16xf32, #tpu.memory_space<vmem>>, vector<1x16xf32>
    %221 = vector.broadcast %219 : vector<1x1xf32> to vector<1x16xf32>
    %222 = arith.mulf %221, %220 : vector<1x16xf32>
    %cst_128 = arith.constant 6.28318548 : f32
    %223 = vector.broadcast %cst_128 : f32 to vector<1x16xf32>
    %224 = arith.mulf %222, %223 : vector<1x16xf32>
    %225 = math.sin %224 : vector<1x16xf32>
    %c0_129 = arith.constant 0 : index
    %c0_130 = arith.constant 0 : index
    %226 = vector.load %arg7[%c0_129, %c0_130] : memref<16x32xf32, #tpu.memory_space<vmem>>, vector<16x32xf32>
    %cst_131 = arith.constant dense<0.000000e+00> : vector<1x32xf32>
    %227 = tpu.matmul %225, %226, %cst_131 {dimension_numbers = #tpu.dot_dimension_numbers<[1], [0], [0], [1], [0, 0, 1, 1], [], []>} : vector<1x16xf32>, vector<16x32xf32>, vector<1x32xf32> -> vector<1x32xf32>
    %228 = math.cos %224 : vector<1x16xf32>
    %c0_132 = arith.constant 0 : index
    %c0_133 = arith.constant 0 : index
    %229 = vector.load %arg8[%c0_132, %c0_133] : memref<16x32xf32, #tpu.memory_space<vmem>>, vector<16x32xf32>
    %cst_134 = arith.constant dense<0.000000e+00> : vector<1x32xf32>
    %230 = tpu.matmul %228, %229, %cst_134 {dimension_numbers = #tpu.dot_dimension_numbers<[1], [0], [0], [1], [0, 0, 1, 1], [], []>} : vector<1x16xf32>, vector<16x32xf32>, vector<1x32xf32> -> vector<1x32xf32>
    %231 = arith.addf %227, %230 : vector<1x32xf32>
    %c0_135 = arith.constant 0 : index
    %c0_136 = arith.constant 0 : index
    %232 = vector.load %arg9[%c0_135, %c0_136] : memref<1x32xf32, #tpu.memory_space<vmem>>, vector<1x32xf32>
    %233 = arith.addf %231, %232 : vector<1x32xf32>
    %cst_137 = arith.constant 0.000000e+00 : f32
    %234 = vector.broadcast %cst_137 : f32 to vector<1x32xf32>
    %235 = arith.maximumf %233, %234 : vector<1x32xf32>
    %c0_138 = arith.constant 0 : index
    %c0_139 = arith.constant 0 : index
    %c0_140 = arith.constant 0 : index
    %236 = vector.load %arg3[%c0_138, %c0_139, %c0_140] : memref<1x1x25xf32, #tpu.memory_space<vmem>>, vector<1x1x25xf32>
    %237 = vector.shape_cast %236 : vector<1x1x25xf32> to vector<1x25xf32>
    %c0_141 = arith.constant 0 : index
    %c0_142 = arith.constant 0 : index
    %238 = vector.load %arg10[%c0_141, %c0_142] : memref<25x32xf32, #tpu.memory_space<vmem>>, vector<25x32xf32>
    %cst_143 = arith.constant dense<0.000000e+00> : vector<1x32xf32>
    %239 = tpu.matmul %237, %238, %cst_143 {dimension_numbers = #tpu.dot_dimension_numbers<[1], [0], [0], [1], [0, 0, 1, 1], [], []>} : vector<1x25xf32>, vector<25x32xf32>, vector<1x32xf32> -> vector<1x32xf32>
    %c0_144 = arith.constant 0 : index
    %c0_145 = arith.constant 0 : index
    %240 = vector.load %arg11[%c0_144, %c0_145] : memref<1x32xf32, #tpu.memory_space<vmem>>, vector<1x32xf32>
    %241 = arith.addf %239, %240 : vector<1x32xf32>
    %cst_146 = arith.constant 0.000000e+00 : f32
    %242 = vector.broadcast %cst_146 : f32 to vector<1x32xf32>
    %243 = arith.maximumf %241, %242 : vector<1x32xf32>
    %c0_147 = arith.constant 0 : index
    %c0_148 = arith.constant 0 : index
    %244 = vector.load %arg12[%c0_147, %c0_148] : memref<32x32xf32, #tpu.memory_space<vmem>>, vector<32x32xf32>
    %cst_149 = arith.constant dense<0.000000e+00> : vector<1x32xf32>
    %245 = tpu.matmul %243, %244, %cst_149 {dimension_numbers = #tpu.dot_dimension_numbers<[1], [0], [0], [1], [0, 0, 1, 1], [], []>} : vector<1x32xf32>, vector<32x32xf32>, vector<1x32xf32> -> vector<1x32xf32>
    %c0_150 = arith.constant 0 : index
    %c0_151 = arith.constant 0 : index
    %246 = vector.load %arg13[%c0_150, %c0_151] : memref<1x32xf32, #tpu.memory_space<vmem>>, vector<1x32xf32>
    %247 = arith.addf %245, %246 : vector<1x32xf32>
    %cst_152 = arith.constant 0.000000e+00 : f32
    %248 = vector.broadcast %cst_152 : f32 to vector<1x32xf32>
    %249 = arith.maximumf %247, %248 : vector<1x32xf32>
    %c0_153 = arith.constant 0 : index
    %c0_154 = arith.constant 0 : index
    %250 = vector.load %arg18[%c0_153, %c0_154] : memref<32x32xf32, #tpu.memory_space<vmem>>, vector<32x32xf32>
    %cst_155 = arith.constant dense<0.000000e+00> : vector<1x32xf32>
    %251 = tpu.matmul %249, %250, %cst_155 {dimension_numbers = #tpu.dot_dimension_numbers<[1], [0], [0], [1], [0, 0, 1, 1], [], []>} : vector<1x32xf32>, vector<32x32xf32>, vector<1x32xf32> -> vector<1x32xf32>
    %c0_156 = arith.constant 0 : index
    %c0_157 = arith.constant 0 : index
    %252 = vector.load %arg19[%c0_156, %c0_157] : memref<32x32xf32, #tpu.memory_space<vmem>>, vector<32x32xf32>
    %cst_158 = arith.constant dense<0.000000e+00> : vector<1x32xf32>
    %253 = tpu.matmul %235, %252, %cst_158 {dimension_numbers = #tpu.dot_dimension_numbers<[1], [0], [0], [1], [0, 0, 1, 1], [], []>} : vector<1x32xf32>, vector<32x32xf32>, vector<1x32xf32> -> vector<1x32xf32>
    %254 = arith.addf %251, %253 : vector<1x32xf32>
    %c0_159 = arith.constant 0 : index
    %c0_160 = arith.constant 0 : index
    %255 = vector.load %arg20[%c0_159, %c0_160] : memref<32x32xf32, #tpu.memory_space<vmem>>, vector<32x32xf32>
    %cst_161 = arith.constant dense<0.000000e+00> : vector<1x32xf32>
    %256 = tpu.matmul %217, %255, %cst_161 {dimension_numbers = #tpu.dot_dimension_numbers<[1], [0], [0], [1], [0, 0, 1, 1], [], []>} : vector<1x32xf32>, vector<32x32xf32>, vector<1x32xf32> -> vector<1x32xf32>
    %257 = arith.addf %254, %256 : vector<1x32xf32>
    %c0_162 = arith.constant 0 : index
    %c0_163 = arith.constant 0 : index
    %258 = vector.load %arg21[%c0_162, %c0_163] : memref<1x32xf32, #tpu.memory_space<vmem>>, vector<1x32xf32>
    %259 = arith.addf %257, %258 : vector<1x32xf32>
    %cst_164 = arith.constant 0.000000e+00 : f32
    %260 = vector.broadcast %cst_164 : f32 to vector<1x32xf32>
    %261 = arith.maximumf %259, %260 : vector<1x32xf32>
    %c0_165 = arith.constant 0 : index
    %c0_166 = arith.constant 0 : index
    %262 = vector.load %arg22[%c0_165, %c0_166] : memref<32x32xf32, #tpu.memory_space<vmem>>, vector<32x32xf32>
    %cst_167 = arith.constant dense<0.000000e+00> : vector<1x32xf32>
    %263 = tpu.matmul %261, %262, %cst_167 {dimension_numbers = #tpu.dot_dimension_numbers<[1], [0], [0], [1], [0, 0, 1, 1], [], []>} : vector<1x32xf32>, vector<32x32xf32>, vector<1x32xf32> -> vector<1x32xf32>
    %c0_168 = arith.constant 0 : index
    %c0_169 = arith.constant 0 : index
    %264 = vector.load %arg23[%c0_168, %c0_169] : memref<1x32xf32, #tpu.memory_space<vmem>>, vector<1x32xf32>
    %265 = arith.addf %263, %264 : vector<1x32xf32>
    %c0_170 = arith.constant 0 : index
    %c0_171 = arith.constant 0 : index
    %266 = vector.load %arg24[%c0_170, %c0_171] : memref<32x32xf32, #tpu.memory_space<vmem>>, vector<32x32xf32>
    %cst_172 = arith.constant dense<0.000000e+00> : vector<1x32xf32>
    %267 = tpu.matmul %265, %266, %cst_172 {dimension_numbers = #tpu.dot_dimension_numbers<[1], [0], [0], [1], [0, 0, 1, 1], [], []>} : vector<1x32xf32>, vector<32x32xf32>, vector<1x32xf32> -> vector<1x32xf32>
    %c0_173 = arith.constant 0 : index
    %c0_174 = arith.constant 0 : index
    %268 = vector.load %arg25[%c0_173, %c0_174] : memref<32x32xf32, #tpu.memory_space<vmem>>, vector<32x32xf32>
    %cst_175 = arith.constant dense<0.000000e+00> : vector<1x32xf32>
    %269 = tpu.matmul %235, %268, %cst_175 {dimension_numbers = #tpu.dot_dimension_numbers<[1], [0], [0], [1], [0, 0, 1, 1], [], []>} : vector<1x32xf32>, vector<32x32xf32>, vector<1x32xf32> -> vector<1x32xf32>
    %270 = arith.addf %267, %269 : vector<1x32xf32>
    %c0_176 = arith.constant 0 : index
    %c0_177 = arith.constant 0 : index
    %271 = vector.load %arg26[%c0_176, %c0_177] : memref<32x32xf32, #tpu.memory_space<vmem>>, vector<32x32xf32>
    %cst_178 = arith.constant dense<0.000000e+00> : vector<1x32xf32>
    %272 = tpu.matmul %217, %271, %cst_178 {dimension_numbers = #tpu.dot_dimension_numbers<[1], [0], [0], [1], [0, 0, 1, 1], [], []>} : vector<1x32xf32>, vector<32x32xf32>, vector<1x32xf32> -> vector<1x32xf32>
    %273 = arith.addf %270, %272 : vector<1x32xf32>
    %c0_179 = arith.constant 0 : index
    %c0_180 = arith.constant 0 : index
    %274 = vector.load %arg27[%c0_179, %c0_180] : memref<1x32xf32, #tpu.memory_space<vmem>>, vector<1x32xf32>
    %275 = arith.addf %273, %274 : vector<1x32xf32>
    %cst_181 = arith.constant 0.000000e+00 : f32
    %276 = vector.broadcast %cst_181 : f32 to vector<1x32xf32>
    %277 = arith.maximumf %275, %276 : vector<1x32xf32>
    %c0_182 = arith.constant 0 : index
    %c0_183 = arith.constant 0 : index
    %278 = vector.load %arg28[%c0_182, %c0_183] : memref<32x25xf32, #tpu.memory_space<vmem>>, vector<32x25xf32>
    %cst_184 = arith.constant dense<0.000000e+00> : vector<1x25xf32>
    %279 = tpu.matmul %277, %278, %cst_184 {dimension_numbers = #tpu.dot_dimension_numbers<[1], [0], [0], [1], [0, 0, 1, 1], [], []>} : vector<1x32xf32>, vector<32x25xf32>, vector<1x25xf32> -> vector<1x25xf32>
    %c0_185 = arith.constant 0 : index
    %c0_186 = arith.constant 0 : index
    %280 = vector.load %arg29[%c0_185, %c0_186] : memref<1x25xf32, #tpu.memory_space<vmem>>, vector<1x25xf32>
    %281 = arith.addf %279, %280 : vector<1x25xf32>
    %cst_187 = arith.constant 6.43775177 : f32
    %282 = vector.broadcast %cst_187 : f32 to vector<1x1xf32>
    %283 = arith.mulf %282, %219 : vector<1x1xf32>
    %284 = math.exp %283 : vector<1x1xf32>
    %cst_188 = arith.constant 1.000000e+00 : f32
    %285 = vector.broadcast %cst_188 : f32 to vector<1x1xf32>
    %286 = arith.subf %284, %285 : vector<1x1xf32>
    %cst_189 = arith.constant 6.43775177 : f32
    %287 = vector.broadcast %cst_189 : f32 to vector<1x1xf32>
    %288 = arith.divf %286, %287 : vector<1x1xf32>
    %289 = math.sqrt %288 : vector<1x1xf32>
    %cst_190 = arith.constant 1.000000e-07 : f32
    %290 = vector.broadcast %cst_190 : f32 to vector<1x1xf32>
    %291 = arith.addf %289, %290 : vector<1x1xf32>
    %292 = vector.broadcast %291 : vector<1x1xf32> to vector<1x25xf32>
    %293 = arith.divf %281, %292 : vector<1x25xf32>
    %c0_191 = arith.constant 0 : index
    %c0_192 = arith.constant 0 : index
    %c0_193 = arith.constant 0 : index
    %294 = vector.load %arg30[%c0_191, %c0_192, %c0_193] : memref<1x1x25xf32, #tpu.memory_space<vmem>>, vector<1x1x25xf32>
    %295 = vector.shape_cast %294 : vector<1x1x25xf32> to vector<1x25xf32>
    %296 = vector.shape_cast %293 : vector<1x25xf32> to vector<1x1x25xf32>
    tpu.vector_store %arg30[%c0_191, %c0_192, %c0_193], %296 {strides = array<i32>} : memref<1x1x25xf32, #tpu.memory_space<vmem>>, vector<1x1x25xf32>,
    return
  }
  func.func @transform_0(%arg0: i32) -> (i32, i32, i32, i32) {
    %c0_i32 = arith.constant 0 : i32
    %c0_i32_0 = arith.constant 0 : i32
    %c0_i32_1 = arith.constant 0 : i32
    %c0_i32_2 = arith.constant 0 : i32
    return %arg0, %c0_i32, %c0_i32_0, %c0_i32_1 : i32, i32, i32, i32
  }
  func.func @transform_1(%arg0: i32) -> (i32, i32, i32) {
    %c0_i32 = arith.constant 0 : i32
    %c0_i32_0 = arith.constant 0 : i32
    %c0_i32_1 = arith.constant 0 : i32
    return %arg0, %c0_i32, %c0_i32_0 : i32, i32, i32
  }
  func.func @transform_2(%arg0: i32) -> (i32, i32, i32) {
    %c0_i32 = arith.constant 0 : i32
    %c0_i32_0 = arith.constant 0 : i32
    %c0_i32_1 = arith.constant 0 : i32
    return %arg0, %c0_i32, %c0_i32_0 : i32, i32, i32
  }
  func.func @transform_3(%arg0: i32) -> (i32, i32) {
    %c0_i32 = arith.constant 0 : i32
    %c0_i32_0 = arith.constant 0 : i32
    %c0_i32_1 = arith.constant 0 : i32
    return %c0_i32, %c0_i32_0 : i32, i32
  }
  func.func @transform_4(%arg0: i32) -> (i32, i32) {
    %c0_i32 = arith.constant 0 : i32
    %c0_i32_0 = arith.constant 0 : i32
    %c0_i32_1 = arith.constant 0 : i32
    return %c0_i32, %c0_i32_0 : i32, i32
  }
  func.func @transform_5(%arg0: i32) -> (i32, i32) {
    %c0_i32 = arith.constant 0 : i32
    %c0_i32_0 = arith.constant 0 : i32
    %c0_i32_1 = arith.constant 0 : i32
    return %c0_i32, %c0_i32_0 : i32, i32
  }
  func.func @transform_6(%arg0: i32) -> (i32, i32) {
    %c0_i32 = arith.constant 0 : i32
    %c0_i32_0 = arith.constant 0 : i32
    %c0_i32_1 = arith.constant 0 : i32
    return %c0_i32, %c0_i32_0 : i32, i32
  }
  func.func @transform_7(%arg0: i32) -> (i32, i32) {
    %c0_i32 = arith.constant 0 : i32
    %c0_i32_0 = arith.constant 0 : i32
    %c0_i32_1 = arith.constant 0 : i32
    return %c0_i32, %c0_i32_0 : i32, i32
  }
  func.func @transform_8(%arg0: i32) -> (i32, i32) {
    %c0_i32 = arith.constant 0 : i32
    %c0_i32_0 = arith.constant 0 : i32
    %c0_i32_1 = arith.constant 0 : i32
    return %c0_i32, %c0_i32_0 : i32, i32
  }
  func.func @transform_9(%arg0: i32) -> (i32, i32) {
    %c0_i32 = arith.constant 0 : i32
    %c0_i32_0 = arith.constant 0 : i32
    %c0_i32_1 = arith.constant 0 : i32
    return %c0_i32, %c0_i32_0 : i32, i32
  }
  func.func @transform_10(%arg0: i32) -> (i32, i32) {
    %c0_i32 = arith.constant 0 : i32
    %c0_i32_0 = arith.constant 0 : i32
    %c0_i32_1 = arith.constant 0 : i32
    return %c0_i32, %c0_i32_0 : i32, i32
  }
  func.func @transform_11(%arg0: i32) -> (i32, i32) {
    %c0_i32 = arith.constant 0 : i32
    %c0_i32_0 = arith.constant 0 : i32
    %c0_i32_1 = arith.constant 0 : i32
    return %c0_i32, %c0_i32_0 : i32, i32
  }
  func.func @transform_12(%arg0: i32) -> (i32, i32) {
    %c0_i32 = arith.constant 0 : i32
    %c0_i32_0 = arith.constant 0 : i32
    %c0_i32_1 = arith.constant 0 : i32
    return %c0_i32, %c0_i32_0 : i32, i32
  }
  func.func @transform_13(%arg0: i32) -> (i32, i32) {
    %c0_i32 = arith.constant 0 : i32
    %c0_i32_0 = arith.constant 0 : i32
    %c0_i32_1 = arith.constant 0 : i32
    return %c0_i32, %c0_i32_0 : i32, i32
  }
  func.func @transform_14(%arg0: i32) -> (i32, i32) {
    %c0_i32 = arith.constant 0 : i32
    %c0_i32_0 = arith.constant 0 : i32
    %c0_i32_1 = arith.constant 0 : i32
    return %c0_i32, %c0_i32_0 : i32, i32
  }
  func.func @transform_15(%arg0: i32) -> (i32, i32) {
    %c0_i32 = arith.constant 0 : i32
    %c0_i32_0 = arith.constant 0 : i32
    %c0_i32_1 = arith.constant 0 : i32
    return %c0_i32, %c0_i32_0 : i32, i32
  }
  func.func @transform_16(%arg0: i32) -> (i32, i32) {
    %c0_i32 = arith.constant 0 : i32
    %c0_i32_0 = arith.constant 0 : i32
    %c0_i32_1 = arith.constant 0 : i32
    return %c0_i32, %c0_i32_0 : i32, i32
  }
  func.func @transform_17(%arg0: i32) -> (i32, i32) {
    %c0_i32 = arith.constant 0 : i32
    %c0_i32_0 = arith.constant 0 : i32
    %c0_i32_1 = arith.constant 0 : i32
    return %c0_i32, %c0_i32_0 : i32, i32
  }
  func.func @transform_18(%arg0: i32) -> (i32, i32) {
    %c0_i32 = arith.constant 0 : i32
    %c0_i32_0 = arith.constant 0 : i32
    %c0_i32_1 = arith.constant 0 : i32
    return %c0_i32, %c0_i32_0 : i32, i32
  }
  func.func @transform_19(%arg0: i32) -> (i32, i32) {
    %c0_i32 = arith.constant 0 : i32
    %c0_i32_0 = arith.constant 0 : i32
    %c0_i32_1 = arith.constant 0 : i32
    return %c0_i32, %c0_i32_0 : i32, i32
  }
  func.func @transform_20(%arg0: i32) -> (i32, i32) {
    %c0_i32 = arith.constant 0 : i32
    %c0_i32_0 = arith.constant 0 : i32
    %c0_i32_1 = arith.constant 0 : i32
    return %c0_i32, %c0_i32_0 : i32, i32
  }
  func.func @transform_21(%arg0: i32) -> (i32, i32) {
    %c0_i32 = arith.constant 0 : i32
    %c0_i32_0 = arith.constant 0 : i32
    %c0_i32_1 = arith.constant 0 : i32
    return %c0_i32, %c0_i32_0 : i32, i32
  }
  func.func @transform_22(%arg0: i32) -> (i32, i32) {
    %c0_i32 = arith.constant 0 : i32
    %c0_i32_0 = arith.constant 0 : i32
    %c0_i32_1 = arith.constant 0 : i32
    return %c0_i32, %c0_i32_0 : i32, i32
  }
  func.func @transform_23(%arg0: i32) -> (i32, i32) {
    %c0_i32 = arith.constant 0 : i32
    %c0_i32_0 = arith.constant 0 : i32
    %c0_i32_1 = arith.constant 0 : i32
    return %c0_i32, %c0_i32_0 : i32, i32
  }
  func.func @transform_24(%arg0: i32) -> (i32, i32) {
    %c0_i32 = arith.constant 0 : i32
    %c0_i32_0 = arith.constant 0 : i32
    %c0_i32_1 = arith.constant 0 : i32
    return %c0_i32, %c0_i32_0 : i32, i32
  }
  func.func @transform_25(%arg0: i32) -> (i32, i32) {
    %c0_i32 = arith.constant 0 : i32
    %c0_i32_0 = arith.constant 0 : i32
    %c0_i32_1 = arith.constant 0 : i32
    return %c0_i32, %c0_i32_0 : i32, i32
  }
  func.func @transform_26(%arg0: i32) -> (i32, i32) {
    %c0_i32 = arith.constant 0 : i32
    %c0_i32_0 = arith.constant 0 : i32
    %c0_i32_1 = arith.constant 0 : i32
    return %c0_i32, %c0_i32_0 : i32, i32
  }
  func.func @transform_27(%arg0: i32) -> (i32, i32) {
    %c0_i32 = arith.constant 0 : i32
    %c0_i32_0 = arith.constant 0 : i32
    %c0_i32_1 = arith.constant 0 : i32
    return %c0_i32, %c0_i32_0 : i32, i32
  }
  func.func @transform_28(%arg0: i32) -> (i32, i32) {
    %c0_i32 = arith.constant 0 : i32
    %c0_i32_0 = arith.constant 0 : i32
    %c0_i32_1 = arith.constant 0 : i32
    return %c0_i32, %c0_i32_0 : i32, i32
  }
  func.func @transform_29(%arg0: i32) -> (i32, i32, i32) {
    %c0_i32 = arith.constant 0 : i32
    %c0_i32_0 = arith.constant 0 : i32
    %c0_i32_1 = arith.constant 0 : i32
    return %arg0, %c0_i32, %c0_i32_0 : i32, i32, i32
  }
}

</mosaic_0001>

<bundles_post_ra>
// kernel: tpu_custom_call.1
= control target key start
LH: loop header
LB: loop body
LE: loop exit
PB: predicated region body
PF: predicated region fallthrough
CT: control target
= control target key end

     0   :  { %s8996_s6 = smov 1   ;;  %s8997_s10 = smov 2   ;;  %s11256_s0 = inlined_call_operand.smem [shape: u32[30], index: -1, kind: input, shape index: {}] }
   0x1   :  { %s9045_s5 = sld [smem:[%s11256_s0]]   ;;  %s8998_s14 = smov 3  }
   0x2   :  { %s9050_s9 = sld [smem:[%s11256_s0 + %s8996_s6]]   ;;  %s8999_s18 = smov 4  }
   0x3   :  { %s9055_s13 = sld [smem:[%s11256_s0 + %s8997_s10]]   ;;  %s9000_s22 = smov 5  }
   0x4   :  { %s9060_s17 = sld [smem:[%s11256_s0 + %s8998_s14]]   ;;  %s9001_s26 = smov 6  }
   0x5   :  { %s9065_s21 = sld [smem:[%s11256_s0 + %s8999_s18]]   ;;  %s9002_s30 = smov 7  }
   0x6   :  { %s9070_s25 = sld [smem:[%s11256_s0 + %s9000_s22]]   ;;  %s9003_s4 = smov 8  }
   0x7   :  { %11274 = sst [smem:[#allocation5_spill]] %s9045_s5  ;;  %s9004_s10 = smov 9  }
   0x8   :  { %11275 = sst [smem:[#allocation6_spill]] %s9050_s9  ;;  %s9005_s15 = smov 10  }
   0x9   :  { %11276 = sst [smem:[#allocation7_spill]] %s9055_s13  ;;  %s9006_s20 = smov 11  }
   0xa   :  { %s9075_s29 = sld [smem:[%s11256_s0 + %s9001_s26]]   ;;  %s9007_s26 = smov 12  }
   0xb   :  { %s9080_s3 = sld [smem:[%s11256_s0 + %s9002_s30]]   ;;  %s9008_s1 = smov 13  }
   0xc   :  { %s9085_s8 = sld [smem:[%s11256_s0 + %s9003_s4]]   ;;  %s9009_s7 = smov 14  }
   0xd   :  { %s9090_s14 = sld [smem:[%s11256_s0 + %s9004_s10]]   ;;  %s9011_s22 = smov 16  }
   0xe   :  { %s9095_s19 = sld [smem:[%s11256_s0 + %s9005_s15]]   ;;  %s9010_s15 = smov 15  }
   0xf   :  { %s9100_s24 = sld [smem:[%s11256_s0 + %s9006_s20]]   ;;  %s9012_s28 = smov 17  }
  0x10   :  { %s9105_s30 = sld [smem:[%s11256_s0 + %s9007_s26]]  }
  0x11   :  { %11277 = sst [smem:[#allocation8_spill]] %s9080_s3 }
  0x12   :  { %11278 = sst [smem:[#allocation9_spill]] %s9085_s8 }
  0x13   :  { %11279 = sst [smem:[#allocation10_spill]] %s9090_s14 }
  0x14   :  { %11280 = sst [smem:[#allocation11_spill]] %s9095_s19 }
  0x15   :  { %11281 = sst [smem:[#allocation12_spill]] %s9100_s24 }
  0x16   :  { %11282 = sst [smem:[#allocation13_spill]] %s9105_s30 }
  0x17   :  { %s9110_s6 = sld [smem:[%s11256_s0 + %s9008_s1]]  }
  0x18   :  { %s9115_s12 = sld [smem:[%s11256_s0 + %s9009_s7]]   ;;  %s9013_s7 = smov 18  }
  0x19   :  { %s9120_s20 = sld [smem:[%s11256_s0 + %s9010_s15]]   ;;  %s9014_s15 = smov 19  }
  0x1a   :  { %s9125_s27 = sld [smem:[%s11256_s0 + %s9011_s22]]   ;;  %s9015_s22 = smov 20  }
  0x1b   :  { %s9130_s4 = sld [smem:[%s11256_s0 + %s9012_s28]]   ;;  %s9016_s28 = smov 21  }
  0x1c   :  { %s9135_s30 = sld [smem:[%s11256_s0 + %s9013_s7]]   ;;  %s9017_s7 = smov 22  }
  0x1d   :  { %11283 = sst [smem:[#allocation14_spill]] %s9110_s6 }
  0x1e   :  { %11284 = sst [smem:[#allocation15_spill]] %s9115_s12 }
  0x1f   :  { %s9140_s19 = sld [smem:[%s11256_s0 + %s9014_s15]]   ;;  %s9018_s15 = smov 23  }
  0x20   :  { %11285 = sst [smem:[#allocation16_spill]] %s9125_s27 }
  0x21   :  { %11286 = sst [smem:[#allocation17_spill]] %s9130_s4 }
  0x22   :  { %s9145_s27 = sld [smem:[%s11256_s0 + %s9015_s22]]   ;;  %s9019_s22 = smov 24  }
  0x23   :  { %s9150_s4 = sld [smem:[%s11256_s0 + %s9016_s28]]   ;;  %s9020_s28 = smov 25  }
  0x24   :  { %s9155_s24 = sld [smem:[%s11256_s0 + %s9017_s7]]   ;;  %s9021_s7 = smov 26  }
  0x25   :  { %11287 = sst [smem:[#allocation18_spill]] %s9140_s19 }
  0x26   :  { %s9160_s19 = sld [smem:[%s11256_s0 + %s9018_s15]]   ;;  %s9022_s15 = smov 27  }
  0x28   :  { %11288 = sst [smem:[#allocation19_spill]] %s9145_s27 }
  0x29   :  { %11289 = sst [smem:[#allocation20_spill]] %s9150_s4 }
  0x2a   :  { %11290 = sst [smem:[#allocation21_spill]] %s9155_s24 }
  0x2b   :  { %s9165_s27 = sld [smem:[%s11256_s0 + %s9019_s22]]   ;;  %s9023_s22 = smov 28  }
  0x2c   :  { %11291 = sst [smem:[#allocation22_spill]] %s9160_s19 }
  0x2d   :  { %s9170_s4 = sld [smem:[%s11256_s0 + %s9020_s28]]   ;;  %s9024_s28 = smov 29  }
  0x2e   :  { %s9175_s24 = sld [smem:[%s11256_s0 + %s9021_s7]]  }
  0x2f   :  { %s9180_s19 = sld [smem:[%s11256_s0 + %s9022_s15]]  }
  0x31   :  { %11292 = sst [smem:[#allocation23_spill]] %s9165_s27 }
  0x32   :  { %s9185_s27 = sld [smem:[%s11256_s0 + %s9023_s22]]  }
  0x33   :  { %11293 = sst [smem:[#allocation24_spill]] %s9170_s4 }
  0x34   :  { %s9190_s4 = sld [smem:[%s11256_s0 + %s9024_s28]]  }
  0x35   :  { %64 = vsyncpa [#allocation3], 0 }
  0x36   :  { %66 = vsyncpa [#allocation3 + $0x1], 0  ;;  %s9192_s7 = smov 0   ;;  %s9194_s10 = smov 0  }
  0x37   :  { %s9196_s11 = smov 0   ;;  %s9198_s15 = smov 0  }
  0x38 LB: > { %s11294_s14 = sld [smem:[#allocation10_spill]]  ;;  %s9213_s0 = sadd.s32 4294967295, %s8994_s15   ;;  %s8990_s11 = sphi %s9196_s11, %s11339_s11   ;;  %s8986_s10 = sphi %s9194_s10, %s11338_s10   ;;  %s8982_s7 = sphi %s9192_s7, %s11337_s7   ;;  %s8994_s15 = sphi %s9198_s15, %s11340_s15  }
  0x39   : > { %s11295_s6 = sld [smem:[#allocation14_spill]]  ;;  %s8204_s16 = sadd.s32 4294967294, %s8994_s15  }
  0x3a   : > { %s11296_s3 = sld [smem:[#allocation8_spill]]  ;;  %s9217_s18 = sadd.s32 1, %s8994_s15  }
  0x3b   : > { %s703_s22 = sadd.s32 1, %s8990_s11  ;;  %s700_s23 = ssub.s32 %s8994_s15, %s9217_s18 }
  0x3c   : > { %p713_p0 = scmp.ne.s32.totalorder %s8990_s11, %s8986_s10  ;;  %p701_p1 = scmp.eq.s32.totalorder %s700_s23, 0 }
  0x3d   : > { %p714_p2 = scmp.eq.s32.totalorder %s9213_s0, 1  ;;  %p719_p3 = scmp.ne.s32.totalorder %s8986_s10, %s8982_s7 }
  0x3e   : > { %p720_p4 = scmp.eq.s32.totalorder %s8204_s16, 1  ;;  %p8207_p7 = scmp.ge.s32.totalorder %s8994_s15, 1 }
  0x3f   : > { %s9228_s26 = scalar_select %p701_p1, %s8990_s11, %s703_s22  }
  0x40   : > { %p9230_p5 = por %p714_p2, %p713_p0  ;;  %p9234_p6 = por %p720_p4, %p719_p3 }
  0x41   : > { %p836_p8 = scmp.lt.s32.totalorder %s8994_s15, 3 }
  0x43   : > { %p837_p9 = pnand %p8207_p7, %p836_p8 }
  0x45   : > { %840 = sbr.rel (%p837_p9) target bundleno = 2831 (0xb0f), region = 136 }
  0x4a   : > { %p917_p10 = scmp.lt.s32.totalorder %s9213_s0, 1  ;;  %v929_v0 = vld [vmem:[%s9060_s17] sm:$0xff]  ;;  %v952_v1 = vlaneseq  ;;  %vm982_vm0 = vcmask 1040384   ;;  %s11299_s5 = sld [smem:[#allocation5_spill]]  ;;  %v9025_v2 = vmov 1983009808  }
  0x4b   : > { %v950_v3 = vunpack.c.l.s4 %v9025_v2  ;;  %v930_v4 = vld [vmem:[%s9060_s17 + $0x8] sm:$0xff]  ;;  %vm983_vm1 = vcmask 1041408   ;;  %v9026_v6 = vmov 0   ;;  %v9027_v8 = vmov 65535   ;;  %s11308_s9 = sld [smem:[#allocation6_spill]] }
  0x4c   : > { %s9244_s2 = scalar_select %p917_p10, %s9213_s0, 1  ;;  %v9246_v5 = vshrl.u32 %v952_v1, 7  ;;  %1024 = vmatprep.mubr.bf16.mxu0 %v9026_v6  ;;  %1194 = vmatprep.mubr.bf16.mxu1 %v9026_v6  ;;  %v984_v9 = vsel %vm982_vm0, 4294967295, %v9027_v8  ;;  %v1147_v10 = vcombine.high %v929_v0, %v929_v0  ;;  %v1487_v11 = vcombine.high %v930_v4, %v930_v4 }
  0x4d   : > { %v951_v7 = vunpack.c.0.s8 %v950_v3  ;;  %v985_v14 = vsel %vm983_vm1, %v984_v9, 0  ;;  %vm957_vm2 = vcmask 23552   ;;  %vm9035_vm8 = vmmov 0   ;;  %s11322_s12 = sld [smem:[#allocation15_spill]] }
  0x4e   : > { %11300 = vst [vmem:[#allocation25_spill] sm:$0xff] %v9246_v5  ;;  %s8499_s16 = sshll.u32 %s9244_s2, 4  ;;  %s11323_s13 = sld [smem:[#allocation7_spill]] }
  0x4f   : > { %v954_v12 = vsub.s32 %v951_v7, %v9246_v5  ;;  %s11324_s8 = sld [smem:[#allocation9_spill]] }
  0x50   : > { %s9253_s22 = scalar_lea.vmem %s11299_s5, %s8499_s16  ;;  %s11329_s5 = sld [smem:[#allocation11_spill]] }
  0x51   : > { %v931_v13 = vld [vmem:[%s9253_s22] sm:$0x3]  ;;  %v955_v15 = vrot.slane %v929_v0, %v954_v12  ;;  %v1154_v16 = vrot.slane %v1147_v10, %v954_v12  ;;  %v1324_v17 = vrot.slane %v930_v4, %v954_v12  ;;  %v1494_v18 = vrot.slane %v1487_v11, %v954_v12  ;;  %v8242_v31 = vld [vmem:[%s9253_s22 + $0x2] sm:$0x3]  ;;  %v8275_v36 = vld [vmem:[%s9253_s22 + $0x4] sm:$0x3]  ;;  %s10741_s23 = scalar_lea.vmem %s11308_s9, %s9244_s2 }
  0x52   : > { %932 = vxpose.xlu0.c.b16.start.end [1/1] (short) %v931_v13, 128  ;;  %2329 = vxpose.xlu1.c.b16.start.end [1/1] (short) %v8275_v36, 128  ;;  %v8308_v46 = vld [vmem:[%s9253_s22 + $0x6] sm:$0x3] }
  0x53   : > { %v956_v19 = vcombine.high %v955_v15, %v955_v15  ;;  %v9257_v20 = vand.u32 %v985_v14, %v955_v15  ;;  %v1155_v21 = vcombine.high %v1154_v16, %v1154_v16  ;;  %v9259_v22 = vand.u32 %v1154_v16, %v985_v14 }
  0x54   : > { %v1325_v23 = vcombine.high %v1324_v17, %v1324_v17  ;;  %v9261_v24 = vand.u32 %v1324_v17, %v985_v14  ;;  %v1495_v25 = vcombine.high %v1494_v18, %v1494_v18  ;;  %v9263_v26 = vand.u32 %v1494_v18, %v985_v14  ;;  %s927_s16 = scalar_lea.vmem %s11323_s13, %s9244_s2  ;;  %s11325_s2 = sld [smem:[#allocation18_spill]] }
  0x55   : > { %v9265_v27 = vand.u32 %v985_v14, %v956_v19  ;;  %v9267_v28 = vand.u32 %v1155_v21, %v985_v14 }
  0x56   : > { %v9269_v29 = vand.u32 %v1325_v23, %v985_v14  ;;  %v9271_v30 = vand.u32 %v1495_v25, %v985_v14 }
  0x57   : > { %1006 = vmatprep.subr.bf16.mxu0 %v9265_v27  ;;  %1176 = vmatprep.subr.bf16.mxu1 %v9267_v28 }
  0x58   : > { %1007 = vmatpush1.bf16.msra.mxu0 %v9257_v20  ;;  %1177 = vmatpush1.bf16.msra.mxu1 %v9259_v22 }
  0x59   : > { %1346 = vmatprep.subr.bf16.mxu0 %v9269_v29  ;;  %1516 = vmatprep.subr.bf16.mxu1 %v9271_v30 }
  0x6f   : > { %1659 = vxpose.xlu0.c.b16.start.end [1/1] (short) %v8242_v31, 128  ;;  %2999 = vxpose.xlu1.c.b16.start.end [1/1] (short) %v8308_v46, 128 }
  0xb4   : > { %v940_v32 = vpop.trf.xlu0 }
  0xb5   : > { %8210 = vmatmul.mubr.msk.bf16.vlgmr.msra.gmra.mxu0 %vm957_vm2, %v940_v32  ;;  %8218 = vmatmul.mubr.msk.bf16.vlgmr.msra.gmra.mxu1 %vm957_vm2, %v940_v32 }
  0xb6   : > { %1347 = vmatpush1.bf16.msra.mxu0 %v9261_v24  ;;  %1517 = vmatpush1.bf16.msra.mxu1 %v9263_v26 }
  0xb7   : > { %1034 = vmatprep.mubr.bf16.mxu0 %v9026_v6  ;;  %1204 = vmatprep.mubr.bf16.mxu1 %v9026_v6 }
  0xb8   : > { %1713 = vmatprep.subr.bf16.mxu0 %v9265_v27  ;;  %1870 = vmatprep.subr.bf16.mxu1 %v9267_v28  ;;  %v941_v33 = vpop.trf.xlu0 }
  0xbc   : > { %v942_v34 = vpop.trf.xlu0 }
  0xbd   : > { %8211 = vmatmul.mubr.msk.bf16.gmra.mxu0 %vm957_vm2, %v941_v33  ;;  %8219 = vmatmul.mubr.msk.bf16.gmra.mxu1 %vm957_vm2, %v941_v33 }
  0xbe   : > { %1044 = vmatprep.mubr.bf16.mxu0 %v9026_v6  ;;  %1214 = vmatprep.mubr.bf16.mxu1 %v9026_v6 }
  0xc0   : > { %v943_v35 = vpop.trf.xlu0 }
  0xc4   : > { %v944_v37 = vpop.trf.xlu0 }
  0xc5   : > { %8212 = vmatmul.mubr.msk.bf16.gmra.mxu0 %vm957_vm2, %v942_v34  ;;  %8220 = vmatmul.mubr.msk.bf16.gmra.mxu1 %vm957_vm2, %v942_v34 }
  0xc6   : > { %1054 = vmatprep.mubr.bf16.mxu0 %v9026_v6  ;;  %1224 = vmatprep.mubr.bf16.mxu1 %v9026_v6 }
  0xc8   : > { %v945_v38 = vpop.trf.xlu0 }
  0xcc   : > { %v946_v39 = vpop.trf.xlu0 }
  0xcd   : > { %8213 = vmatmul.mubr.msk.bf16.gmra.mxu0 %vm957_vm2, %v943_v35  ;;  %8221 = vmatmul.mubr.msk.bf16.gmra.mxu1 %vm957_vm2, %v943_v35 }
  0xce   : > { %1064 = vmatprep.mubr.bf16.mxu0 %v9026_v6  ;;  %1234 = vmatprep.mubr.bf16.mxu1 %v9026_v6 }
  0xd0   : > { %v947_v40 = vpop.trf.xlu0 }
  0xd4   : > { %v1667_v41 = vpop.trf.xlu0 }
  0xd5   : > { %8214 = vmatmul.mubr.msk.bf16.gmra.mxu0 %vm957_vm2, %v944_v37  ;;  %8222 = vmatmul.mubr.msk.bf16.gmra.mxu1 %vm957_vm2, %v944_v37 }
  0xd6   : > { %1074 = vmatprep.mubr.bf16.mxu0 %v9026_v6  ;;  %1244 = vmatprep.mubr.bf16.mxu1 %v9026_v6 }
  0xd8   : > { %v1668_v42 = vpop.trf.xlu0 }
  0xdc   : > { %v9365_v43 = vpop.trf.xlu0 }
  0xdd   : > { %8215 = vmatmul.mubr.msk.bf16.gmra.mxu0 %vm957_vm2, %v945_v38  ;;  %8223 = vmatmul.mubr.msk.bf16.gmra.mxu1 %vm957_vm2, %v945_v38 }
  0xde   : > { %1084 = vmatprep.mubr.bf16.mxu0 %v9026_v6  ;;  %1254 = vmatprep.mubr.bf16.mxu1 %v9026_v6 }
  0xe0   : > { %v9373_v44 = vpop.trf.xlu0 }
  0xe4   : > { %v9381_v45 = vpop.trf.xlu0 }
  0xe5   : > { %8216 = vmatmul.mubr.msk.bf16.gmra.mxu0 %vm957_vm2, %v946_v39  ;;  %8224 = vmatmul.mubr.msk.bf16.gmra.mxu1 %vm957_vm2, %v946_v39 }
  0xe6   : > { %1094 = vmatprep.mubr.bf16.mxu0 %v9026_v6  ;;  %1264 = vmatprep.mubr.bf16.mxu1 %v9026_v6 }
  0xe8   : > { %v9390_v47 = vpop.trf.xlu0 }
  0xec   : > { %v9398_v48 = vpop.trf.xlu0 }
  0xed   : > { %8217 = vmatmul.mubr.msk.bf16.gmra.mxu0 %vm957_vm2, %v947_v40  ;;  %8225 = vmatmul.mubr.msk.bf16.gmra.mxu1 %vm957_vm2, %v947_v40 }
  0xee   : > { %1364 = vmatprep.mubr.bf16.mxu0 %v9026_v6  ;;  %1534 = vmatprep.mubr.bf16.mxu1 %v9026_v6 }
  0xf0   : > { %v9406_v49 = vpop.trf.xlu0 }
  0xf5   : > { %8226 = vmatmul.mubr.msk.bf16.vlgmr.msra.gmra.mxu0 %vm957_vm2, %v940_v32  ;;  %8234 = vmatmul.mubr.msk.bf16.vlgmr.msra.gmra.mxu1 %vm957_vm2, %v940_v32 }
  0xf6   : > { %1714 = vmatpush1.bf16.msra.mxu0 %v9257_v20  ;;  %1871 = vmatpush1.bf16.msra.mxu1 %v9259_v22 }
  0xf7   : > { %1374 = vmatprep.mubr.bf16.mxu0 %v9026_v6  ;;  %1544 = vmatprep.mubr.bf16.mxu1 %v9026_v6 }
  0xf8   : > { %2027 = vmatprep.subr.bf16.mxu0 %v9269_v29  ;;  %2184 = vmatprep.subr.bf16.mxu1 %v9271_v30 }
  0xfd   : > { %8227 = vmatmul.mubr.msk.bf16.gmra.mxu0 %vm957_vm2, %v941_v33  ;;  %8235 = vmatmul.mubr.msk.bf16.gmra.mxu1 %vm957_vm2, %v941_v33 }
  0xfe   : > { %1384 = vmatprep.mubr.bf16.mxu0 %v9026_v6  ;;  %1554 = vmatprep.mubr.bf16.mxu1 %v9026_v6 }
 0x105   : > { %8228 = vmatmul.mubr.msk.bf16.gmra.mxu0 %vm957_vm2, %v942_v34  ;;  %8236 = vmatmul.mubr.msk.bf16.gmra.mxu1 %vm957_vm2, %v942_v34 }
 0x106   : > { %1394 = vmatprep.mubr.bf16.mxu0 %v9026_v6  ;;  %1564 = vmatprep.mubr.bf16.mxu1 %v9026_v6 }
 0x10d   : > { %8229 = vmatmul.mubr.msk.bf16.gmra.mxu0 %vm957_vm2, %v943_v35  ;;  %8237 = vmatmul.mubr.msk.bf16.gmra.mxu1 %vm957_vm2, %v943_v35 }
 0x10e   : > { %1404 = vmatprep.mubr.bf16.mxu0 %v9026_v6  ;;  %1574 = vmatprep.mubr.bf16.mxu1 %v9026_v6 }
 0x115   : > { %8230 = vmatmul.mubr.msk.bf16.gmra.mxu0 %vm957_vm2, %v944_v37  ;;  %8238 = vmatmul.mubr.msk.bf16.gmra.mxu1 %vm957_vm2, %v944_v37 }
 0x116   : > { %1414 = vmatprep.mubr.bf16.mxu0 %v9026_v6  ;;  %1584 = vmatprep.mubr.bf16.mxu1 %v9026_v6 }
 0x11d   : > { %8231 = vmatmul.mubr.msk.bf16.gmra.mxu0 %vm957_vm2, %v945_v38  ;;  %8239 = vmatmul.mubr.msk.bf16.gmra.mxu1 %vm957_vm2, %v945_v38 }
 0x11e   : > { %1424 = vmatprep.mubr.bf16.mxu0 %v9026_v6  ;;  %1594 = vmatprep.mubr.bf16.mxu1 %v9026_v6 }
 0x125   : > { %8232 = vmatmul.mubr.msk.bf16.gmra.mxu0 %vm957_vm2, %v946_v39  ;;  %8240 = vmatmul.mubr.msk.bf16.gmra.mxu1 %vm957_vm2, %v946_v39 }
 0x126   : > { %1434 = vmatprep.mubr.bf16.mxu0 %v9026_v6  ;;  %1604 = vmatprep.mubr.bf16.mxu1 %v9026_v6 }
 0x12d   : > { %8233 = vmatmul.mubr.msk.bf16.gmra.mxu0 %vm957_vm2, %v947_v40  ;;  %8241 = vmatmul.mubr.msk.bf16.gmra.mxu1 %vm957_vm2, %v947_v40 }
 0x12e   : > { %1731 = vmatprep.mubr.bf16.mxu0 %v9026_v6  ;;  %1888 = vmatprep.mubr.bf16.mxu1 %v9026_v6 }
 0x135   : > { %8243 = vmatmul.mubr.msk.bf16.vlgmr.msra.gmra.mxu0 %vm957_vm2, %v1667_v41  ;;  %8251 = vmatmul.mubr.msk.bf16.vlgmr.msra.gmra.mxu1 %vm957_vm2, %v1667_v41 }
 0x136   : > { %2028 = vmatpush1.bf16.msra.mxu0 %v9261_v24  ;;  %2185 = vmatpush1.bf16.msra.mxu1 %v9263_v26 }
 0x137   : > { %1741 = vmatprep.mubr.bf16.mxu0 %v9026_v6  ;;  %1898 = vmatprep.mubr.bf16.mxu1 %v9026_v6 }
 0x138   : > { %2383 = vmatprep.subr.bf16.mxu0 %v9265_v27  ;;  %2540 = vmatprep.subr.bf16.mxu1 %v9267_v28 }
 0x13d   : > { %8244 = vmatmul.mubr.msk.bf16.gmra.mxu0 %vm957_vm2, %v1668_v42  ;;  %8252 = vmatmul.mubr.msk.bf16.gmra.mxu1 %vm957_vm2, %v1668_v42 }
 0x13e   : > { %1751 = vmatprep.mubr.bf16.mxu0 %v9026_v6  ;;  %1908 = vmatprep.mubr.bf16.mxu1 %v9026_v6 }
 0x145   : > { %8245 = vmatmul.mubr.msk.bf16.gmra.mxu0 %vm957_vm2, %v9365_v43  ;;  %8253 = vmatmul.mubr.msk.bf16.gmra.mxu1 %vm957_vm2, %v9365_v43 }
 0x146   : > { %1761 = vmatprep.mubr.bf16.mxu0 %v9026_v6  ;;  %1918 = vmatprep.mubr.bf16.mxu1 %v9026_v6 }
 0x14d   : > { %8246 = vmatmul.mubr.msk.bf16.gmra.mxu0 %vm957_vm2, %v9373_v44  ;;  %8254 = vmatmul.mubr.msk.bf16.gmra.mxu1 %vm957_vm2, %v9373_v44 }
 0x14e   : > { %1771 = vmatprep.mubr.bf16.mxu0 %v9026_v6  ;;  %1928 = vmatprep.mubr.bf16.mxu1 %v9026_v6 }
 0x155   : > { %8247 = vmatmul.mubr.msk.bf16.gmra.mxu0 %vm957_vm2, %v9381_v45  ;;  %8255 = vmatmul.mubr.msk.bf16.gmra.mxu1 %vm957_vm2, %v9381_v45 }
 0x156   : > { %1781 = vmatprep.mubr.bf16.mxu0 %v9026_v6  ;;  %1938 = vmatprep.mubr.bf16.mxu1 %v9026_v6 }
 0x15d   : > { %8248 = vmatmul.mubr.msk.bf16.gmra.mxu0 %vm957_vm2, %v9390_v47  ;;  %8256 = vmatmul.mubr.msk.bf16.gmra.mxu1 %vm957_vm2, %v9390_v47 }
 0x15e   : > { %1791 = vmatprep.mubr.bf16.mxu0 %v9026_v6  ;;  %1948 = vmatprep.mubr.bf16.mxu1 %v9026_v6 }
 0x165   : > { %8249 = vmatmul.mubr.msk.bf16.gmra.mxu0 %vm957_vm2, %v9398_v48  ;;  %8257 = vmatmul.mubr.msk.bf16.gmra.mxu1 %vm957_vm2, %v9398_v48 }
 0x166   : > { %1801 = vmatprep.mubr.bf16.mxu0 %v9026_v6  ;;  %1958 = vmatprep.mubr.bf16.mxu1 %v9026_v6 }
 0x16d   : > { %8250 = vmatmul.mubr.msk.bf16.gmra.mxu0 %vm957_vm2, %v9406_v49  ;;  %8258 = vmatmul.mubr.msk.bf16.gmra.mxu1 %vm957_vm2, %v9406_v49 }
 0x16e   : > { %2045 = vmatprep.mubr.bf16.mxu0 %v9026_v6  ;;  %2202 = vmatprep.mubr.bf16.mxu1 %v9026_v6 }
 0x175   : > { %v1026_v50 = vpop.f32.mrf.mxu0  ;;  %v1196_v51 = vpop.f32.mrf.mxu1  ;;  %8259 = vmatmul.mubr.msk.bf16.vlgmr.msra.gmra.mxu0 %vm957_vm2, %v1667_v41  ;;  %8267 = vmatmul.mubr.msk.bf16.vlgmr.msra.gmra.mxu1 %vm957_vm2, %v1667_v41 }
 0x176   : > { %2384 = vmatpush1.bf16.msra.mxu0 %v9257_v20  ;;  %2541 = vmatpush1.bf16.msra.mxu1 %v9259_v22 }
 0x177   : > { %v1028_v52 = vpop.f32.mrf.mxu0  ;;  %v1198_v53 = vpop.f32.mrf.mxu1  ;;  %2055 = vmatprep.mubr.bf16.mxu0 %v9026_v6  ;;  %2212 = vmatprep.mubr.bf16.mxu1 %v9026_v6 }
 0x178   : > { %2697 = vmatprep.subr.bf16.mxu0 %v9269_v29  ;;  %2854 = vmatprep.subr.bf16.mxu1 %v9271_v30 }
 0x179   : > { %v1030_v54 = vpop.f32.mrf.mxu0  ;;  %v1200_v55 = vpop.f32.mrf.mxu1 }
 0x17b   : > { %v1032_v56 = vpop.f32.mrf.mxu0  ;;  %v1202_v57 = vpop.f32.mrf.mxu1 }
 0x17d   : > { %v1036_v58 = vpop.f32.mrf.mxu0  ;;  %v1206_v59 = vpop.f32.mrf.mxu1  ;;  %8260 = vmatmul.mubr.msk.bf16.gmra.mxu0 %vm957_vm2, %v1668_v42  ;;  %8268 = vmatmul.mubr.msk.bf16.gmra.mxu1 %vm957_vm2, %v1668_v42 }
 0x17e   : > { %v1105_v60 = vmax.f32 %v1026_v50, %v1036_v58  ;;  %v1275_v61 = vmax.f32 %v1196_v51, %v1206_v59  ;;  %2065 = vmatprep.mubr.bf16.mxu0 %v9026_v6  ;;  %2222 = vmatprep.mubr.bf16.mxu1 %v9026_v6 }
 0x17f   : > { %v1038_v62 = vpop.f32.mrf.mxu0  ;;  %v1208_v63 = vpop.f32.mrf.mxu1 }
 0x180   : > { %v1126_v0 = vmax.f32 %v1028_v52, %v1038_v62  ;;  %v1296_v1 = vmax.f32 %v1198_v53, %v1208_v63 }
 0x181   : > { %v1040_v2 = vpop.f32.mrf.mxu0  ;;  %v1210_v3 = vpop.f32.mrf.mxu1 }
 0x182   : > { %v1106_v4 = vmax.f32 %v1030_v54, %v1040_v2  ;;  %v1276_v7 = vmax.f32 %v1200_v55, %v1210_v3 }
 0x183   : > { %v1042_v8 = vpop.f32.mrf.mxu0  ;;  %v1212_v9 = vpop.f32.mrf.mxu1 }
 0x184   : > { %v1127_v10 = vmax.f32 %v1032_v56, %v1042_v8  ;;  %v1297_v11 = vmax.f32 %v1202_v57, %v1212_v9 }
 0x185   : > { %v1046_v12 = vpop.f32.mrf.mxu0  ;;  %v1216_v13 = vpop.f32.mrf.mxu1  ;;  %8261 = vmatmul.mubr.msk.bf16.gmra.mxu0 %vm957_vm2, %v9365_v43  ;;  %8269 = vmatmul.mubr.msk.bf16.gmra.mxu1 %vm957_vm2, %v9365_v43 }
 0x186   : > { %v1107_v14 = vmax.f32 %v1105_v60, %v1046_v12  ;;  %v1277_v15 = vmax.f32 %v1275_v61, %v1216_v13  ;;  %2075 = vmatprep.mubr.bf16.mxu0 %v9026_v6  ;;  %2232 = vmatprep.mubr.bf16.mxu1 %v9026_v6 }
 0x187   : > { %v1048_v16 = vpop.f32.mrf.mxu0  ;;  %v1218_v17 = vpop.f32.mrf.mxu1 }
 0x188   : > { %v1128_v18 = vmax.f32 %v1126_v0, %v1048_v16  ;;  %v1298_v19 = vmax.f32 %v1296_v1, %v1218_v17 }
 0x189   : > { %v1050_v21 = vpop.f32.mrf.mxu0  ;;  %v1220_v23 = vpop.f32.mrf.mxu1 }
 0x18a   : > { %v1108_v25 = vmax.f32 %v1106_v4, %v1050_v21  ;;  %v1278_v31 = vmax.f32 %v1276_v7, %v1220_v23 }
 0x18b   : > { %v1052_v32 = vpop.f32.mrf.mxu0  ;;  %v1222_v33 = vpop.f32.mrf.mxu1 }
 0x18c   : > { %v1129_v34 = vmax.f32 %v1127_v10, %v1052_v32  ;;  %v1299_v35 = vmax.f32 %v1297_v11, %v1222_v33 }
 0x18d   : > { %v1056_v36 = vpop.f32.mrf.mxu0  ;;  %v1226_v37 = vpop.f32.mrf.mxu1  ;;  %8262 = vmatmul.mubr.msk.bf16.gmra.mxu0 %vm957_vm2, %v9373_v44  ;;  %8270 = vmatmul.mubr.msk.bf16.gmra.mxu1 %vm957_vm2, %v9373_v44 }
 0x18e   : > { %v1109_v38 = vmax.f32 %v1107_v14, %v1056_v36  ;;  %v1279_v39 = vmax.f32 %v1277_v15, %v1226_v37  ;;  %2085 = vmatprep.mubr.bf16.mxu0 %v9026_v6  ;;  %2242 = vmatprep.mubr.bf16.mxu1 %v9026_v6 }
 0x18f   : > { %v1058_v40 = vpop.f32.mrf.mxu0  ;;  %v1228_v41 = vpop.f32.mrf.mxu1 }
 0x190   : > { %v1130_v42 = vmax.f32 %v1128_v18, %v1058_v40  ;;  %v1300_v43 = vmax.f32 %v1298_v19, %v1228_v41 }
 0x191   : > { %v1060_v46 = vpop.f32.mrf.mxu0  ;;  %v1230_v50 = vpop.f32.mrf.mxu1 }
 0x192   : > { %v1110_v51 = vmax.f32 %v1108_v25, %v1060_v46  ;;  %v1280_v52 = vmax.f32 %v1278_v31, %v1230_v50 }
 0x193   : > { %v1062_v53 = vpop.f32.mrf.mxu0  ;;  %v1232_v54 = vpop.f32.mrf.mxu1 }
 0x194   : > { %v1131_v55 = vmax.f32 %v1129_v34, %v1062_v53  ;;  %v1301_v56 = vmax.f32 %v1299_v35, %v1232_v54 }
 0x195   : > { %v1066_v57 = vpop.f32.mrf.mxu0  ;;  %v1236_v44 = vpop.f32.mrf.mxu1  ;;  %8263 = vmatmul.mubr.msk.bf16.gmra.mxu0 %vm957_vm2, %v9381_v45  ;;  %8271 = vmatmul.mubr.msk.bf16.gmra.mxu1 %vm957_vm2, %v9381_v45 }
 0x196   : > { %v1111_v58 = vmax.f32 %v1109_v38, %v1066_v57  ;;  %v1281_v59 = vmax.f32 %v1279_v39, %v1236_v44  ;;  %2095 = vmatprep.mubr.bf16.mxu0 %v9026_v6  ;;  %2252 = vmatprep.mubr.bf16.mxu1 %v9026_v6 }
 0x197   : > { %v1068_v60 = vpop.f32.mrf.mxu0  ;;  %v1238_v61 = vpop.f32.mrf.mxu1 }
 0x198   : > { %v1132_v62 = vmax.f32 %v1130_v42, %v1068_v60  ;;  %v1302_v63 = vmax.f32 %v1300_v43, %v1238_v61 }
 0x199   : > { %v1070_v0 = vpop.f32.mrf.mxu0  ;;  %v1240_v1 = vpop.f32.mrf.mxu1 }
 0x19a   : > { %v1112_v2 = vmax.f32 %v1110_v51, %v1070_v0  ;;  %v1282_v3 = vmax.f32 %v1280_v52, %v1240_v1 }
 0x19b   : > { %v1072_v4 = vpop.f32.mrf.mxu0  ;;  %v1242_v7 = vpop.f32.mrf.mxu1 }
 0x19c   : > { %v1133_v8 = vmax.f32 %v1131_v55, %v1072_v4  ;;  %v1303_v9 = vmax.f32 %v1301_v56, %v1242_v7 }
 0x19d   : > { %v1076_v10 = vpop.f32.mrf.mxu0  ;;  %v1246_v45 = vpop.f32.mrf.mxu1  ;;  %8264 = vmatmul.mubr.msk.bf16.gmra.mxu0 %vm957_vm2, %v9390_v47  ;;  %8272 = vmatmul.mubr.msk.bf16.gmra.mxu1 %vm957_vm2, %v9390_v47 }
 0x19e   : > { %v1113_v11 = vmax.f32 %v1111_v58, %v1076_v10  ;;  %v1283_v12 = vmax.f32 %v1281_v59, %v1246_v45  ;;  %2105 = vmatprep.mubr.bf16.mxu0 %v9026_v6  ;;  %2262 = vmatprep.mubr.bf16.mxu1 %v9026_v6 }
 0x19f   : > { %v1078_v13 = vpop.f32.mrf.mxu0  ;;  %v1248_v14 = vpop.f32.mrf.mxu1 }
 0x1a0   : > { %v1134_v15 = vmax.f32 %v1132_v62, %v1078_v13  ;;  %v1304_v16 = vmax.f32 %v1302_v63, %v1248_v14  ;;  %v9462_v63 = vpop.trf.xlu1 }
 0x1a1   : > { %v1080_v17 = vpop.f32.mrf.mxu0  ;;  %v1250_v18 = vpop.f32.mrf.mxu1 }
 0x1a2   : > { %v1114_v19 = vmax.f32 %v1112_v2, %v1080_v17  ;;  %v1284_v21 = vmax.f32 %v1282_v3, %v1250_v18 }
 0x1a3   : > { %v1082_v23 = vpop.f32.mrf.mxu0  ;;  %v1252_v25 = vpop.f32.mrf.mxu1 }
 0x1a4   : > { %v1135_v31 = vmax.f32 %v1133_v8, %v1082_v23  ;;  %v1305_v32 = vmax.f32 %v1303_v9, %v1252_v25  ;;  %v9482_v14 = vpop.trf.xlu1 }
 0x1a5   : > { %v1086_v33 = vpop.f32.mrf.mxu0  ;;  %v1256_v47 = vpop.f32.mrf.mxu1  ;;  %8265 = vmatmul.mubr.msk.bf16.gmra.mxu0 %vm957_vm2, %v9398_v48  ;;  %8273 = vmatmul.mubr.msk.bf16.gmra.mxu1 %vm957_vm2, %v9398_v48 }
 0x1a6   : > { %v1115_v34 = vmax.f32 %v1113_v11, %v1086_v33  ;;  %v1285_v35 = vmax.f32 %v1283_v12, %v1256_v47  ;;  %2115 = vmatprep.mubr.bf16.mxu0 %v9026_v6  ;;  %2272 = vmatprep.mubr.bf16.mxu1 %v9026_v6 }
 0x1a7   : > { %v1088_v36 = vpop.f32.mrf.mxu0  ;;  %v1258_v37 = vpop.f32.mrf.mxu1 }
 0x1a8   : > { %v1136_v38 = vmax.f32 %v1134_v15, %v1088_v36  ;;  %v1306_v39 = vmax.f32 %v1304_v16, %v1258_v37  ;;  %v9490_v36 = vpop.trf.xlu1 }
 0x1a9   : > { %v1090_v40 = vpop.f32.mrf.mxu0  ;;  %v1260_v41 = vpop.f32.mrf.mxu1 }
 0x1aa   : > { %v1116_v42 = vmax.f32 %v1114_v19, %v1090_v40  ;;  %v1286_v43 = vmax.f32 %v1284_v21, %v1260_v41 }
 0x1ab   : > { %v1092_v46 = vpop.f32.mrf.mxu0  ;;  %v1262_v50 = vpop.f32.mrf.mxu1 }
 0x1ac   : > { %v1137_v51 = vmax.f32 %v1135_v31, %v1092_v46  ;;  %v1307_v52 = vmax.f32 %v1305_v32, %v1262_v50 }
 0x1ad   : > { %v1096_v53 = vpop.f32.mrf.mxu0  ;;  %v1266_v48 = vpop.f32.mrf.mxu1  ;;  %8266 = vmatmul.mubr.msk.bf16.gmra.mxu0 %vm957_vm2, %v9406_v49  ;;  %8274 = vmatmul.mubr.msk.bf16.gmra.mxu1 %vm957_vm2, %v9406_v49 }
 0x1ae   : > { %v1117_v54 = vmax.f32 %v1115_v34, %v1096_v53  ;;  %v1287_v55 = vmax.f32 %v1285_v35, %v1266_v48  ;;  %2401 = vmatprep.mubr.bf16.mxu0 %v9026_v6  ;;  %2558 = vmatprep.mubr.bf16.mxu1 %v9026_v6 }
 0x1af   : > { %v1098_v56 = vpop.f32.mrf.mxu0  ;;  %v1268_v57 = vpop.f32.mrf.mxu1 }
 0x1b0   : > { %v1138_v44 = vmax.f32 %v1136_v38, %v1098_v56  ;;  %v1308_v58 = vmax.f32 %v1306_v39, %v1268_v57  ;;  %v9498_v57 = vpop.trf.xlu1 }
 0x1b1   : > { %v1100_v59 = vpop.f32.mrf.mxu0  ;;  %v1270_v60 = vpop.f32.mrf.mxu1 }
 0x1b2   : > { %v1118_v61 = vmax.f32 %v1116_v42, %v1100_v59  ;;  %v1288_v62 = vmax.f32 %v1286_v43, %v1270_v60 }
 0x1b3   : > { %v1102_v0 = vpop.f32.mrf.mxu0  ;;  %v1272_v1 = vpop.f32.mrf.mxu1 }
 0x1b4   : > { %v9464_v2 = vmax.f32 %v1117_v54, %v1118_v61  ;;  %v9466_v49 = vmax.f32 %v1287_v55, %v1288_v62  ;;  %v1139_v3 = vmax.f32 %v1137_v51, %v1102_v0  ;;  %v1309_v4 = vmax.f32 %v1307_v52, %v1272_v1 }
 0x1b5   : > { %v1366_v7 = vpop.f32.mrf.mxu0  ;;  %v1536_v8 = vpop.f32.mrf.mxu1  ;;  %8276 = vmatmul.mubr.msk.bf16.vlgmr.msra.gmra.mxu0 %vm957_vm2, %v9462_v63  ;;  %8284 = vmatmul.mubr.msk.bf16.vlgmr.msra.gmra.mxu1 %vm957_vm2, %v9462_v63 }
 0x1b6   : > { %v9472_v9 = vmax.f32 %v1138_v44, %v1139_v3  ;;  %v9474_v10 = vmax.f32 %v1308_v58, %v1309_v4  ;;  %2698 = vmatpush1.bf16.msra.mxu0 %v9261_v24  ;;  %2855 = vmatpush1.bf16.msra.mxu1 %v9263_v26 }
 0x1b7   : > { %v1368_v45 = vpop.f32.mrf.mxu0  ;;  %v1538_v11 = vpop.f32.mrf.mxu1  ;;  %2411 = vmatprep.mubr.bf16.mxu0 %v9026_v6  ;;  %2568 = vmatprep.mubr.bf16.mxu1 %v9026_v6 }
 0x1b8   : > { %3053 = vmatprep.subr.bf16.mxu0 %v9265_v27  ;;  %3210 = vmatprep.subr.bf16.mxu1 %v9267_v28 }
 0x1b9   : > { %v1370_v12 = vpop.f32.mrf.mxu0  ;;  %v1540_v13 = vpop.f32.mrf.mxu1 }
 0x1bb   : > { %v1372_v15 = vpop.f32.mrf.mxu0  ;;  %v1542_v16 = vpop.f32.mrf.mxu1 }
 0x1bd   : > { %v1376_v17 = vpop.f32.mrf.mxu0  ;;  %v1546_v18 = vpop.f32.mrf.mxu1  ;;  %8277 = vmatmul.mubr.msk.bf16.gmra.mxu0 %vm957_vm2, %v9482_v14  ;;  %8285 = vmatmul.mubr.msk.bf16.gmra.mxu1 %vm957_vm2, %v9482_v14 }
 0x1be   : > { %2421 = vmatprep.mubr.bf16.mxu0 %v9026_v6  ;;  %2578 = vmatprep.mubr.bf16.mxu1 %v9026_v6  ;;  %v1445_v19 = vmax.f32 %v1366_v7, %v1376_v17  ;;  %v1615_v21 = vmax.f32 %v1536_v8, %v1546_v18 }
 0x1bf   : > { %v1378_v23 = vpop.f32.mrf.mxu0  ;;  %v1548_v25 = vpop.f32.mrf.mxu1 }
 0x1c0   : > { %v1466_v31 = vmax.f32 %v1368_v45, %v1378_v23  ;;  %v1636_v32 = vmax.f32 %v1538_v11, %v1548_v25 }
 0x1c1   : > { %v1380_v33 = vpop.f32.mrf.mxu0  ;;  %v1550_v47 = vpop.f32.mrf.mxu1 }
 0x1c2   : > { %v1446_v34 = vmax.f32 %v1370_v12, %v1380_v33  ;;  %v1616_v35 = vmax.f32 %v1540_v13, %v1550_v47 }
 0x1c3   : > { %v1382_v37 = vpop.f32.mrf.mxu0  ;;  %v1552_v38 = vpop.f32.mrf.mxu1 }
 0x1c4   : > { %v1467_v39 = vmax.f32 %v1372_v15, %v1382_v37  ;;  %v1637_v40 = vmax.f32 %v1542_v16, %v1552_v38  ;;  %v9506_v15 = vpop.trf.xlu1  ;;  %v8341_v16 = vld [vmem:[%s9253_s22 + $0x8] sm:$0x3] }
 0x1c5   : > { %v1386_v41 = vpop.f32.mrf.mxu0  ;;  %v1556_v42 = vpop.f32.mrf.mxu1  ;;  %8278 = vmatmul.mubr.msk.bf16.gmra.mxu0 %vm957_vm2, %v9490_v36  ;;  %8286 = vmatmul.mubr.msk.bf16.gmra.mxu1 %vm957_vm2, %v9490_v36 }
 0x1c6   : > { %v1447_v43 = vmax.f32 %v1445_v19, %v1386_v41  ;;  %v1617_v46 = vmax.f32 %v1615_v21, %v1556_v42  ;;  %2431 = vmatprep.mubr.bf16.mxu0 %v9026_v6  ;;  %2588 = vmatprep.mubr.bf16.mxu1 %v9026_v6 }
 0x1c7   : > { %v1388_v50 = vpop.f32.mrf.mxu0  ;;  %v1558_v51 = vpop.f32.mrf.mxu1  ;;  %3669 = vxpose.xlu0.c.b16.start.end [1/1] (short) %v8341_v16, 128 }
 0x1c8   : > { %v1468_v52 = vmax.f32 %v1466_v31, %v1388_v50  ;;  %v1638_v53 = vmax.f32 %v1636_v32, %v1558_v51  ;;  %v9515_v41 = vpop.trf.xlu1 }
 0x1c9   : > { %v1390_v48 = vpop.f32.mrf.mxu0  ;;  %v1560_v54 = vpop.f32.mrf.mxu1 }
 0x1ca   : > { %v1448_v55 = vmax.f32 %v1446_v34, %v1390_v48  ;;  %v1618_v56 = vmax.f32 %v1616_v35, %v1560_v54 }
 0x1cb   : > { %v1392_v44 = vpop.f32.mrf.mxu0  ;;  %v1562_v58 = vpop.f32.mrf.mxu1 }
 0x1cc   : > { %v1469_v59 = vmax.f32 %v1467_v39, %v1392_v44  ;;  %v1639_v60 = vmax.f32 %v1637_v40, %v1562_v58 }
 0x1cd   : > { %v1396_v61 = vpop.f32.mrf.mxu0  ;;  %v1566_v62 = vpop.f32.mrf.mxu1  ;;  %8279 = vmatmul.mubr.msk.bf16.gmra.mxu0 %vm957_vm2, %v9498_v57  ;;  %8287 = vmatmul.mubr.msk.bf16.gmra.mxu1 %vm957_vm2, %v9498_v57 }
 0x1ce   : > { %v1449_v0 = vmax.f32 %v1447_v43, %v1396_v61  ;;  %v1619_v1 = vmax.f32 %v1617_v46, %v1566_v62  ;;  %2441 = vmatprep.mubr.bf16.mxu0 %v9026_v6  ;;  %2598 = vmatprep.mubr.bf16.mxu1 %v9026_v6  ;;  %v9523_v62 = vpop.trf.xlu1 }
 0x1cf   : > { %v1398_v3 = vpop.f32.mrf.mxu0  ;;  %v1568_v4 = vpop.f32.mrf.mxu1 }
 0x1d0   : > { %v1470_v7 = vmax.f32 %v1468_v52, %v1398_v3  ;;  %v1640_v8 = vmax.f32 %v1638_v53, %v1568_v4 }
 0x1d1   : > { %v1400_v45 = vpop.f32.mrf.mxu0  ;;  %v1570_v11 = vpop.f32.mrf.mxu1 }
 0x1d2   : > { %v1450_v12 = vmax.f32 %v1448_v55, %v1400_v45  ;;  %v1620_v13 = vmax.f32 %v1618_v56, %v1570_v11 }
 0x1d3   : > { %v1402_v17 = vpop.f32.mrf.mxu0  ;;  %v1572_v18 = vpop.f32.mrf.mxu1 }
 0x1d4   : > { %v1471_v19 = vmax.f32 %v1469_v59, %v1402_v17  ;;  %v1641_v21 = vmax.f32 %v1639_v60, %v1572_v18 }
 0x1d5   : > { %v1406_v23 = vpop.f32.mrf.mxu0  ;;  %v1576_v25 = vpop.f32.mrf.mxu1  ;;  %8280 = vmatmul.mubr.msk.bf16.gmra.mxu0 %vm957_vm2, %v9506_v15  ;;  %8288 = vmatmul.mubr.msk.bf16.gmra.mxu1 %vm957_vm2, %v9506_v15 }
 0x1d6   : > { %v1451_v31 = vmax.f32 %v1449_v0, %v1406_v23  ;;  %v1621_v32 = vmax.f32 %v1619_v1, %v1576_v25  ;;  %2451 = vmatprep.mubr.bf16.mxu0 %v9026_v6  ;;  %2608 = vmatprep.mubr.bf16.mxu1 %v9026_v6  ;;  %v9531_v25 = vpop.trf.xlu1 }
 0x1d7   : > { %v1408_v33 = vpop.f32.mrf.mxu0  ;;  %v1578_v47 = vpop.f32.mrf.mxu1 }
 0x1d8   : > { %v1472_v34 = vmax.f32 %v1470_v7, %v1408_v33  ;;  %v1642_v35 = vmax.f32 %v1640_v8, %v1578_v47 }
 0x1d9   : > { %v1410_v37 = vpop.f32.mrf.mxu0  ;;  %v1580_v38 = vpop.f32.mrf.mxu1 }
 0x1da   : > { %v1452_v39 = vmax.f32 %v1450_v12, %v1410_v37  ;;  %v1622_v40 = vmax.f32 %v1620_v13, %v1580_v38 }
 0x1db   : > { %v1412_v42 = vpop.f32.mrf.mxu0  ;;  %v1582_v43 = vpop.f32.mrf.mxu1 }
 0x1dc   : > { %v1473_v46 = vmax.f32 %v1471_v19, %v1412_v42  ;;  %v1643_v50 = vmax.f32 %v1641_v21, %v1582_v43 }
 0x1dd   : > { %v1416_v51 = vpop.f32.mrf.mxu0  ;;  %v1586_v52 = vpop.f32.mrf.mxu1  ;;  %8281 = vmatmul.mubr.msk.bf16.gmra.mxu0 %vm957_vm2, %v9515_v41  ;;  %8289 = vmatmul.mubr.msk.bf16.gmra.mxu1 %vm957_vm2, %v9515_v41 }
 0x1de   : > { %v1453_v53 = vmax.f32 %v1451_v31, %v1416_v51  ;;  %v1623_v48 = vmax.f32 %v1621_v32, %v1586_v52  ;;  %2461 = vmatprep.mubr.bf16.mxu0 %v9026_v6  ;;  %2618 = vmatprep.mubr.bf16.mxu1 %v9026_v6 }
 0x1df   : > { %v1418_v54 = vpop.f32.mrf.mxu0  ;;  %v1588_v55 = vpop.f32.mrf.mxu1 }
 0x1e0   : > { %v1474_v56 = vmax.f32 %v1472_v34, %v1418_v54  ;;  %v1644_v44 = vmax.f32 %v1642_v35, %v1588_v55 }
 0x1e1   : > { %v1420_v58 = vpop.f32.mrf.mxu0  ;;  %v1590_v59 = vpop.f32.mrf.mxu1 }
 0x1e2   : > { %v1454_v60 = vmax.f32 %v1452_v39, %v1420_v58  ;;  %v1624_v61 = vmax.f32 %v1622_v40, %v1590_v59 }
 0x1e3   : > { %v1422_v0 = vpop.f32.mrf.mxu0  ;;  %v1592_v1 = vpop.f32.mrf.mxu1 }
 0x1e4   : > { %v1475_v3 = vmax.f32 %v1473_v46, %v1422_v0  ;;  %v1645_v4 = vmax.f32 %v1643_v50, %v1592_v1 }
 0x1e5   : > { %v1426_v7 = vpop.f32.mrf.mxu0  ;;  %v1596_v8 = vpop.f32.mrf.mxu1  ;;  %8282 = vmatmul.mubr.msk.bf16.gmra.mxu0 %vm957_vm2, %v9523_v62  ;;  %8290 = vmatmul.mubr.msk.bf16.gmra.mxu1 %vm957_vm2, %v9523_v62 }
 0x1e6   : > { %v1455_v45 = vmax.f32 %v1453_v53, %v1426_v7  ;;  %v1625_v11 = vmax.f32 %v1623_v48, %v1596_v8  ;;  %2471 = vmatprep.mubr.bf16.mxu0 %v9026_v6  ;;  %2628 = vmatprep.mubr.bf16.mxu1 %v9026_v6 }
 0x1e7   : > { %v1428_v12 = vpop.f32.mrf.mxu0  ;;  %v1598_v13 = vpop.f32.mrf.mxu1 }
 0x1e8   : > { %v1476_v16 = vmax.f32 %v1474_v56, %v1428_v12  ;;  %v1646_v17 = vmax.f32 %v1644_v44, %v1598_v13 }
 0x1e9   : > { %v1430_v18 = vpop.f32.mrf.mxu0  ;;  %v1600_v19 = vpop.f32.mrf.mxu1 }
 0x1ea   : > { %v1456_v21 = vmax.f32 %v1454_v60, %v1430_v18  ;;  %v1626_v23 = vmax.f32 %v1624_v61, %v1600_v19 }
 0x1eb   : > { %v1432_v31 = vpop.f32.mrf.mxu0  ;;  %v1602_v32 = vpop.f32.mrf.mxu1 }
 0x1ec   : > { %v1477_v33 = vmax.f32 %v1475_v3, %v1432_v31  ;;  %v1647_v47 = vmax.f32 %v1645_v4, %v1602_v32 }
 0x1ed   : > { %v1436_v34 = vpop.f32.mrf.mxu0  ;;  %v1606_v35 = vpop.f32.mrf.mxu1  ;;  %8283 = vmatmul.mubr.msk.bf16.gmra.mxu0 %vm957_vm2, %v9531_v25  ;;  %8291 = vmatmul.mubr.msk.bf16.gmra.mxu1 %vm957_vm2, %v9531_v25 }
 0x1ee   : > { %v1457_v37 = vmax.f32 %v1455_v45, %v1436_v34  ;;  %v1627_v38 = vmax.f32 %v1625_v11, %v1606_v35  ;;  %2715 = vmatprep.mubr.bf16.mxu0 %v9026_v6  ;;  %2872 = vmatprep.mubr.bf16.mxu1 %v9026_v6 }
 0x1ef   : > { %v1438_v39 = vpop.f32.mrf.mxu0  ;;  %v1608_v40 = vpop.f32.mrf.mxu1 }
 0x1f0   : > { %v1478_v42 = vmax.f32 %v1476_v16, %v1438_v39  ;;  %v1648_v43 = vmax.f32 %v1646_v17, %v1608_v40 }
 0x1f1   : > { %v1440_v46 = vpop.f32.mrf.mxu0  ;;  %v1610_v50 = vpop.f32.mrf.mxu1 }
 0x1f2   : > { %v1458_v51 = vmax.f32 %v1456_v21, %v1440_v46  ;;  %v1628_v52 = vmax.f32 %v1626_v23, %v1610_v50 }
 0x1f3   : > { %v1442_v53 = vpop.f32.mrf.mxu0  ;;  %v1612_v48 = vpop.f32.mrf.mxu1 }
 0x1f4   : > { %v9539_v54 = vmax.f32 %v1457_v37, %v1458_v51  ;;  %v9541_v55 = vmax.f32 %v1627_v38, %v1628_v52  ;;  %v1479_v56 = vmax.f32 %v1477_v33, %v1442_v53  ;;  %v1649_v44 = vmax.f32 %v1647_v47, %v1612_v48 }
 0x1f5   : > { %v1733_v58 = vpop.f32.mrf.mxu0  ;;  %v1890_v59 = vpop.f32.mrf.mxu1  ;;  %8292 = vmatmul.mubr.msk.bf16.vlgmr.msra.gmra.mxu0 %vm957_vm2, %v9462_v63  ;;  %8300 = vmatmul.mubr.msk.bf16.vlgmr.msra.gmra.mxu1 %vm957_vm2, %v9462_v63 }
 0x1f6   : > { %v9547_v60 = vmax.f32 %v1478_v42, %v1479_v56  ;;  %v9549_v61 = vmax.f32 %v1648_v43, %v1649_v44  ;;  %3054 = vmatpush1.bf16.msra.mxu0 %v9257_v20  ;;  %3211 = vmatpush1.bf16.msra.mxu1 %v9259_v22 }
 0x1f7   : > { %v1735_v0 = vpop.f32.mrf.mxu0  ;;  %v1892_v1 = vpop.f32.mrf.mxu1  ;;  %2725 = vmatprep.mubr.bf16.mxu0 %v9026_v6  ;;  %2882 = vmatprep.mubr.bf16.mxu1 %v9026_v6 }
 0x1f8   : > { %3367 = vmatprep.subr.bf16.mxu0 %v9269_v29  ;;  %3524 = vmatprep.subr.bf16.mxu1 %v9271_v30 }
 0x1f9   : > { %v1737_v3 = vpop.f32.mrf.mxu0  ;;  %v1894_v63 = vpop.f32.mrf.mxu1 }
 0x1fb   : > { %v1739_v4 = vpop.f32.mrf.mxu0  ;;  %v1896_v7 = vpop.f32.mrf.mxu1 }
 0x1fd   : > { %v1743_v8 = vpop.f32.mrf.mxu0  ;;  %v1900_v45 = vpop.f32.mrf.mxu1  ;;  %8293 = vmatmul.mubr.msk.bf16.gmra.mxu0 %vm957_vm2, %v9482_v14  ;;  %8301 = vmatmul.mubr.msk.bf16.gmra.mxu1 %vm957_vm2, %v9482_v14 }
 0x1fe   : > { %2735 = vmatprep.mubr.bf16.mxu0 %v9026_v6  ;;  %2892 = vmatprep.mubr.bf16.mxu1 %v9026_v6  ;;  %v1812_v11 = vmax.f32 %v1733_v58, %v1743_v8  ;;  %v1969_v12 = vmax.f32 %v1890_v59, %v1900_v45 }
 0x1ff   : > { %v1745_v13 = vpop.f32.mrf.mxu0  ;;  %v1902_v16 = vpop.f32.mrf.mxu1 }
 0x200   : > { %v1833_v17 = vmax.f32 %v1735_v0, %v1745_v13  ;;  %v1990_v18 = vmax.f32 %v1892_v1, %v1902_v16 }
 0x201   : > { %v1747_v19 = vpop.f32.mrf.mxu0  ;;  %v1904_v21 = vpop.f32.mrf.mxu1 }
 0x202   : > { %v1813_v23 = vmax.f32 %v1737_v3, %v1747_v19  ;;  %v1970_v31 = vmax.f32 %v1894_v63, %v1904_v21 }
 0x203   : > { %v1749_v32 = vpop.f32.mrf.mxu0  ;;  %v1906_v33 = vpop.f32.mrf.mxu1 }
 0x204   : > { %v1834_v47 = vmax.f32 %v1739_v4, %v1749_v32  ;;  %v1991_v34 = vmax.f32 %v1896_v7, %v1906_v33 }
 0x205   : > { %v1753_v35 = vpop.f32.mrf.mxu0  ;;  %v1910_v14 = vpop.f32.mrf.mxu1  ;;  %8294 = vmatmul.mubr.msk.bf16.gmra.mxu0 %vm957_vm2, %v9490_v36  ;;  %8302 = vmatmul.mubr.msk.bf16.gmra.mxu1 %vm957_vm2, %v9490_v36 }
 0x206   : > { %v1814_v37 = vmax.f32 %v1812_v11, %v1753_v35  ;;  %v1971_v38 = vmax.f32 %v1969_v12, %v1910_v14  ;;  %2745 = vmatprep.mubr.bf16.mxu0 %v9026_v6  ;;  %2902 = vmatprep.mubr.bf16.mxu1 %v9026_v6 }
 0x207   : > { %v1755_v39 = vpop.f32.mrf.mxu0  ;;  %v1912_v40 = vpop.f32.mrf.mxu1 }
 0x208   : > { %v1835_v42 = vmax.f32 %v1833_v17, %v1755_v39  ;;  %v1992_v43 = vmax.f32 %v1990_v18, %v1912_v40 }
 0x209   : > { %v1757_v46 = vpop.f32.mrf.mxu0  ;;  %v1914_v50 = vpop.f32.mrf.mxu1 }
 0x20a   : > { %v1815_v51 = vmax.f32 %v1813_v23, %v1757_v46  ;;  %v1972_v52 = vmax.f32 %v1970_v31, %v1914_v50 }
 0x20b   : > { %v1759_v53 = vpop.f32.mrf.mxu0  ;;  %v1916_v48 = vpop.f32.mrf.mxu1 }
 0x20c   : > { %v1836_v56 = vmax.f32 %v1834_v47, %v1759_v53  ;;  %v1993_v44 = vmax.f32 %v1991_v34, %v1916_v48 }
 0x20d   : > { %v1763_v58 = vpop.f32.mrf.mxu0  ;;  %v1920_v36 = vpop.f32.mrf.mxu1  ;;  %8295 = vmatmul.mubr.msk.bf16.gmra.mxu0 %vm957_vm2, %v9498_v57  ;;  %8303 = vmatmul.mubr.msk.bf16.gmra.mxu1 %vm957_vm2, %v9498_v57 }
 0x20e   : > { %v1816_v59 = vmax.f32 %v1814_v37, %v1763_v58  ;;  %v1973_v0 = vmax.f32 %v1971_v38, %v1920_v36  ;;  %2755 = vmatprep.mubr.bf16.mxu0 %v9026_v6  ;;  %2912 = vmatprep.mubr.bf16.mxu1 %v9026_v6 }
 0x20f   : > { %v1765_v1 = vpop.f32.mrf.mxu0  ;;  %v1922_v3 = vpop.f32.mrf.mxu1 }
 0x210   : > { %v1837_v63 = vmax.f32 %v1835_v42, %v1765_v1  ;;  %v1994_v4 = vmax.f32 %v1992_v43, %v1922_v3 }
 0x211   : > { %v1767_v7 = vpop.f32.mrf.mxu0  ;;  %v1924_v8 = vpop.f32.mrf.mxu1 }
 0x212   : > { %v1817_v45 = vmax.f32 %v1815_v51, %v1767_v7  ;;  %v1974_v11 = vmax.f32 %v1972_v52, %v1924_v8 }
 0x213   : > { %v1769_v12 = vpop.f32.mrf.mxu0  ;;  %v1926_v13 = vpop.f32.mrf.mxu1 }
 0x214   : > { %v1838_v16 = vmax.f32 %v1836_v56, %v1769_v12  ;;  %v1995_v17 = vmax.f32 %v1993_v44, %v1926_v13 }
 0x215   : > { %v1773_v18 = vpop.f32.mrf.mxu0  ;;  %v1930_v57 = vpop.f32.mrf.mxu1  ;;  %8296 = vmatmul.mubr.msk.bf16.gmra.mxu0 %vm957_vm2, %v9506_v15  ;;  %8304 = vmatmul.mubr.msk.bf16.gmra.mxu1 %vm957_vm2, %v9506_v15 }
 0x216   : > { %v1818_v19 = vmax.f32 %v1816_v59, %v1773_v18  ;;  %v1975_v21 = vmax.f32 %v1973_v0, %v1930_v57  ;;  %2765 = vmatprep.mubr.bf16.mxu0 %v9026_v6  ;;  %2922 = vmatprep.mubr.bf16.mxu1 %v9026_v6  ;;  %v1120_v18 = vrot.slane %v9464_v2, 4  ;;  %v1290_v57 = vrot.slane %v9466_v49, 4 }
 0x217   : > { %v1775_v23 = vpop.f32.mrf.mxu0  ;;  %v1932_v31 = vpop.f32.mrf.mxu1 }
 0x218   : > { %v1839_v32 = vmax.f32 %v1837_v63, %v1775_v23  ;;  %v1996_v33 = vmax.f32 %v1994_v4, %v1932_v31  ;;  %v1141_v31 = vrot.slane %v9472_v9, 4 }
 0x219   : > { %v1777_v47 = vpop.f32.mrf.mxu0  ;;  %v1934_v34 = vpop.f32.mrf.mxu1 }
 0x21a   : > { %v1819_v35 = vmax.f32 %v1817_v45, %v1777_v47  ;;  %v1976_v14 = vmax.f32 %v1974_v11, %v1934_v34 }
 0x21b   : > { %v1779_v37 = vpop.f32.mrf.mxu0  ;;  %v1936_v38 = vpop.f32.mrf.mxu1 }
 0x21c   : > { %v1840_v39 = vmax.f32 %v1838_v16, %v1779_v37  ;;  %v1997_v40 = vmax.f32 %v1995_v17, %v1936_v38  ;;  %v1291_v37 = vmax.f32 %v9466_v49, %v1290_v57 }
 0x21d   : > { %v1783_v42 = vpop.f32.mrf.mxu0  ;;  %v1940_v15 = vpop.f32.mrf.mxu1  ;;  %8297 = vmatmul.mubr.msk.bf16.gmra.mxu0 %vm957_vm2, %v9515_v41  ;;  %8305 = vmatmul.mubr.msk.bf16.gmra.mxu1 %vm957_vm2, %v9515_v41 }
 0x21e   : > { %v1820_v43 = vmax.f32 %v1818_v19, %v1783_v42  ;;  %v1977_v46 = vmax.f32 %v1975_v21, %v1940_v15  ;;  %2775 = vmatprep.mubr.bf16.mxu0 %v9026_v6  ;;  %2932 = vmatprep.mubr.bf16.mxu1 %v9026_v6  ;;  %v1142_v15 = vmax.f32 %v9472_v9, %v1141_v31 }
 0x21f   : > { %v1785_v50 = vpop.f32.mrf.mxu0  ;;  %v1942_v51 = vpop.f32.mrf.mxu1 }
 0x220   : > { %v1841_v52 = vmax.f32 %v1839_v32, %v1785_v50  ;;  %v1998_v53 = vmax.f32 %v1996_v33, %v1942_v51  ;;  %v1311_v32 = vrot.slane %v9474_v10, 4 }
 0x221   : > { %v1787_v48 = vpop.f32.mrf.mxu0  ;;  %v1944_v56 = vpop.f32.mrf.mxu1 }
 0x222   : > { %v1821_v44 = vmax.f32 %v1819_v35, %v1787_v48  ;;  %v1978_v58 = vmax.f32 %v1976_v14, %v1944_v56  ;;  %v1121_v14 = vmax.f32 %v9464_v2, %v1120_v18  ;;  %v1292_v48 = vrot.slane %v1291_v37, 2 }
 0x223   : > { %v1789_v36 = vpop.f32.mrf.mxu0  ;;  %v1946_v59 = vpop.f32.mrf.mxu1 }
 0x224   : > { %v1842_v0 = vmax.f32 %v1840_v39, %v1789_v36  ;;  %v1999_v1 = vmax.f32 %v1997_v40, %v1946_v59  ;;  %v1143_v59 = vrot.slane %v1142_v15, 2 }
 0x225   : > { %v1793_v3 = vpop.f32.mrf.mxu0  ;;  %v1950_v41 = vpop.f32.mrf.mxu1  ;;  %8298 = vmatmul.mubr.msk.bf16.gmra.mxu0 %vm957_vm2, %v9523_v62  ;;  %8306 = vmatmul.mubr.msk.bf16.gmra.mxu1 %vm957_vm2, %v9523_v62 }
 0x226   : > { %v1822_v63 = vmax.f32 %v1820_v43, %v1793_v3  ;;  %v1979_v4 = vmax.f32 %v1977_v46, %v1950_v41  ;;  %2785 = vmatprep.mubr.bf16.mxu0 %v9026_v6  ;;  %2942 = vmatprep.mubr.bf16.mxu1 %v9026_v6  ;;  %v1312_v43 = vmax.f32 %v9474_v10, %v1311_v32 }
 0x227   : > { %v1795_v7 = vpop.f32.mrf.mxu0  ;;  %v1952_v8 = vpop.f32.mrf.mxu1 }
 0x228   : > { %v1843_v45 = vmax.f32 %v1841_v52, %v1795_v7  ;;  %v2000_v11 = vmax.f32 %v1998_v53, %v1952_v8  ;;  %v9607_v52 = vpop.trf.xlu1  ;;  %v1122_v53 = vrot.slane %v1121_v14, 2  ;;  %v1293_v7 = vmax.f32 %v1291_v37, %v1292_v48 }
 0x229   : > { %v1797_v12 = vpop.f32.mrf.mxu0  ;;  %v1954_v13 = vpop.f32.mrf.mxu1 }
 0x22a   : > { %v1823_v16 = vmax.f32 %v1821_v44, %v1797_v12  ;;  %v1980_v17 = vmax.f32 %v1978_v58, %v1954_v13 }
 0x22b   : > { %v1799_v19 = vpop.f32.mrf.mxu0  ;;  %v1956_v62 = vpop.f32.mrf.mxu1 }
 0x22c   : > { %v1844_v21 = vmax.f32 %v1842_v0, %v1799_v19  ;;  %v2001_v23 = vmax.f32 %v1999_v1, %v1956_v62  ;;  %v1313_v0 = vrot.slane %v1312_v43, 2  ;;  %v9631_v32 = vpop.trf.xlu1 }
 0x22d   : > { %v1803_v33 = vpop.f32.mrf.mxu0  ;;  %v1960_v47 = vpop.f32.mrf.mxu1  ;;  %8299 = vmatmul.mubr.msk.bf16.gmra.mxu0 %vm957_vm2, %v9531_v25  ;;  %8307 = vmatmul.mubr.msk.bf16.gmra.mxu1 %vm957_vm2, %v9531_v25 }
 0x22e   : > { %v1824_v34 = vmax.f32 %v1822_v63, %v1803_v33  ;;  %v1981_v35 = vmax.f32 %v1979_v4, %v1960_v47  ;;  %3071 = vmatprep.mubr.bf16.mxu0 %v9026_v6  ;;  %3228 = vmatprep.mubr.bf16.mxu1 %v9026_v6  ;;  %v1123_v4 = vmax.f32 %v1121_v14, %v1122_v53  ;;  %v1294_v47 = vrot.slane %v1293_v7, 1 }
 0x22f   : > { %v1805_v38 = vpop.f32.mrf.mxu0  ;;  %v1962_v39 = vpop.f32.mrf.mxu1  ;;  %v1314_v18 = vmax.f32 %v1312_v43, %v1313_v0 }
 0x230   : > { %v1845_v40 = vmax.f32 %v1843_v45, %v1805_v38  ;;  %v2002_v42 = vmax.f32 %v2000_v11, %v1962_v39  ;;  %v1124_v33 = vrot.slane %v1123_v4, 1  ;;  %v9645_v48 = vmax.f32 %v1293_v7, %v1294_v47 }
 0x231   : > { %v1807_v46 = vpop.f32.mrf.mxu0  ;;  %v1964_v25 = vpop.f32.mrf.mxu1 }
 0x232   : > { %v1825_v50 = vmax.f32 %v1823_v16, %v1807_v46  ;;  %v1982_v51 = vmax.f32 %v1980_v17, %v1964_v25  ;;  %v1144_v17 = vmax.f32 %v1142_v15, %v1143_v59  ;;  %v9643_v53 = vmax.f32 %v1123_v4, %v1124_v33 }
 0x233   : > { %v1809_v56 = vpop.f32.mrf.mxu0  ;;  %v1966_v2 = vpop.f32.mrf.mxu1 }
 0x234   : > { %v1826_v44 = vmax.f32 %v1824_v34, %v1825_v50  ;;  %v1983_v49 = vmax.f32 %v1981_v35, %v1982_v51  ;;  %v1846_v58 = vmax.f32 %v1844_v21, %v1809_v56  ;;  %v2003_v36 = vmax.f32 %v2001_v23, %v1966_v2 }
 0x235   : > { %v9609_v1 = vpop.f32.mrf.mxu0  ;;  %v9611_v9 = vpop.f32.mrf.mxu1  ;;  %8309 = vmatmul.mubr.msk.bf16.vlgmr.msra.gmra.mxu0 %vm957_vm2, %v9607_v52  ;;  %8317 = vmatmul.mubr.msk.bf16.vlgmr.msra.gmra.mxu1 %vm957_vm2, %v9607_v52 }
 0x236   : > { %v1827_v10 = vrot.slane %v1826_v44, 4  ;;  %v1984_v3 = vrot.slane %v1983_v49, 4  ;;  %v1847_v41 = vmax.f32 %v1845_v40, %v1846_v58  ;;  %v2004_v63 = vmax.f32 %v2002_v42, %v2003_v36  ;;  %3368 = vmatpush1.bf16.msra.mxu0 %v9261_v24  ;;  %3525 = vmatpush1.bf16.msra.mxu1 %v9263_v26 }
 0x237   : > { %v9619_v8 = vpop.f32.mrf.mxu0  ;;  %v9621_v45 = vpop.f32.mrf.mxu1  ;;  %3081 = vmatprep.mubr.bf16.mxu0 %v9026_v6  ;;  %3238 = vmatprep.mubr.bf16.mxu1 %v9026_v6  ;;  %v1145_v40 = vrot.slane %v1144_v17, 1  ;;  %v1315_v42 = vrot.slane %v1314_v18, 1 }
 0x238   : > { %v1828_v11 = vmax.f32 %v1826_v44, %v1827_v10  ;;  %v1985_v12 = vmax.f32 %v1983_v49, %v1984_v3  ;;  %v1848_v13 = vrot.slane %v1847_v41, 4  ;;  %v2005_v16 = vrot.slane %v2004_v63, 4  ;;  %3723 = vmatprep.subr.bf16.mxu0 %v9265_v27  ;;  %3880 = vmatprep.subr.bf16.mxu1 %v9267_v28 }
 0x239   : > { %v9627_v57 = vpop.f32.mrf.mxu0  ;;  %v9629_v19 = vpop.f32.mrf.mxu1  ;;  %v9653_v10 = vmax.f32 %v1144_v17, %v1145_v40  ;;  %v9655_v3 = vmax.f32 %v1314_v18, %v1315_v42 }
 0x23a   : > { %v1829_v62 = vrot.slane %v1828_v11, 2  ;;  %v1986_v21 = vrot.slane %v1985_v12, 2  ;;  %v1849_v23 = vmax.f32 %v1847_v41, %v1848_v13  ;;  %v2006_v31 = vmax.f32 %v2004_v63, %v2005_v16  ;;  %v9667_v13 = vpop.trf.xlu1 }
 0x23b   : > { %v9633_v34 = vpop.f32.mrf.mxu0  ;;  %v9635_v35 = vpop.f32.mrf.mxu1 }
 0x23c   : > { %v1830_v14 = vmax.f32 %v1828_v11, %v1829_v62  ;;  %v1987_v37 = vmax.f32 %v1985_v12, %v1986_v21  ;;  %v1850_v38 = vrot.slane %v1849_v23, 2  ;;  %v2007_v39 = vrot.slane %v2006_v31, 2 }
 0x23d   : > { %v2057_v15 = vpop.f32.mrf.mxu0  ;;  %v2214_v43 = vpop.f32.mrf.mxu1  ;;  %8310 = vmatmul.mubr.msk.bf16.gmra.mxu0 %vm957_vm2, %v9631_v32  ;;  %8318 = vmatmul.mubr.msk.bf16.gmra.mxu1 %vm957_vm2, %v9631_v32 }
 0x23e   : > { %v1831_v46 = vrot.slane %v1830_v14, 1  ;;  %v1988_v25 = vrot.slane %v1987_v37, 1  ;;  %v1851_v50 = vmax.f32 %v1849_v23, %v1850_v38  ;;  %v2008_v51 = vmax.f32 %v2006_v31, %v2007_v39  ;;  %3091 = vmatprep.mubr.bf16.mxu0 %v9026_v6  ;;  %3248 = vmatprep.mubr.bf16.mxu1 %v9026_v6  ;;  %v9683_v42 = vpop.trf.xlu1 }
 0x23f   : > { %v2126_v56 = vmax.f32 %v9609_v1, %v2057_v15  ;;  %v2283_v2 = vmax.f32 %v9611_v9, %v2214_v43  ;;  %v2059_v44 = vpop.f32.mrf.mxu0  ;;  %v2216_v49 = vpop.f32.mrf.mxu1 }
 0x240   : > { %v9649_v58 = vmax.f32 %v1830_v14, %v1831_v46  ;;  %v9651_v36 = vmax.f32 %v1987_v37, %v1988_v25  ;;  %v1852_v59 = vrot.slane %v1851_v50, 1  ;;  %v2009_v0 = vrot.slane %v2008_v51, 1 }
 0x241   : > { %v2147_v41 = vmax.f32 %v9619_v8, %v2059_v44  ;;  %v2304_v63 = vmax.f32 %v9621_v45, %v2216_v49  ;;  %v2061_v4 = vpop.f32.mrf.mxu0  ;;  %v2218_v1 = vpop.f32.mrf.mxu1 }
 0x242   : > { %v1854_v9 = vmax.f32 %v9643_v53, %v9649_v58  ;;  %v2011_v7 = vmax.f32 %v9645_v48, %v9651_v36  ;;  %v9663_v11 = vmax.f32 %v1851_v50, %v1852_v59  ;;  %v9665_v12 = vmax.f32 %v2008_v51, %v2009_v0 }
 0x243   : > { %v2127_v16 = vmax.f32 %v9627_v57, %v2061_v4  ;;  %v2284_v8 = vmax.f32 %v9629_v19, %v2218_v1  ;;  %v2063_v17 = vpop.f32.mrf.mxu0  ;;  %v2220_v45 = vpop.f32.mrf.mxu1 }
 0x244   : > { %v1855_v18 = vmax.f32 %v9653_v10, %v9663_v11  ;;  %v2012_v62 = vmax.f32 %v9655_v3, %v9665_v12  ;;  %v2148_v21 = vmax.f32 %v9633_v34, %v2063_v17  ;;  %v2305_v23 = vmax.f32 %v9635_v35, %v2220_v45 }
 0x245   : > { %v2067_v31 = vpop.f32.mrf.mxu0  ;;  %v2224_v33 = vpop.f32.mrf.mxu1  ;;  %8311 = vmatmul.mubr.msk.bf16.gmra.mxu0 %vm957_vm2, %v9667_v13  ;;  %8319 = vmatmul.mubr.msk.bf16.gmra.mxu1 %vm957_vm2, %v9667_v13 }
 0x246   : > { %v2128_v57 = vmax.f32 %v2126_v56, %v2067_v31  ;;  %v2285_v19 = vmax.f32 %v2283_v2, %v2224_v33  ;;  %3101 = vmatprep.mubr.bf16.mxu0 %v9026_v6  ;;  %3258 = vmatprep.mubr.bf16.mxu1 %v9026_v6 }
 0x247   : > { %v2069_v47 = vpop.f32.mrf.mxu0  ;;  %v2226_v14 = vpop.f32.mrf.mxu1 }
 0x248   : > { %v2149_v37 = vmax.f32 %v2147_v41, %v2069_v47  ;;  %v2306_v34 = vmax.f32 %v2304_v63, %v2226_v14 }
 0x249   : > { %v2071_v38 = vpop.f32.mrf.mxu0  ;;  %v2228_v35 = vpop.f32.mrf.mxu1 }
 0x24a   : > { %v2129_v39 = vmax.f32 %v2127_v16, %v2071_v38  ;;  %v2286_v40 = vmax.f32 %v2284_v8, %v2228_v35  ;;  %v9691_v16 = vpop.trf.xlu1  ;;  %v8374_v8 = vld [vmem:[%s9253_s22 + $0xa] sm:$0x3] }
 0x24b   : > { %v2073_v15 = vpop.f32.mrf.mxu0  ;;  %v2230_v43 = vpop.f32.mrf.mxu1  ;;  %4339 = vxpose.xlu1.c.b16.start.end [1/1] (short) %v8374_v8, 128 }
 0x24c   : > { %v2150_v46 = vmax.f32 %v2148_v21, %v2073_v15  ;;  %v2307_v25 = vmax.f32 %v2305_v23, %v2230_v43 }
 0x24d   : > { %v2077_v50 = vpop.f32.mrf.mxu0  ;;  %v2234_v51 = vpop.f32.mrf.mxu1  ;;  %8312 = vmatmul.mubr.msk.bf16.gmra.mxu0 %vm957_vm2, %v9683_v42  ;;  %8320 = vmatmul.mubr.msk.bf16.gmra.mxu1 %vm957_vm2, %v9683_v42 }
 0x24e   : > { %v2130_v56 = vmax.f32 %v2128_v57, %v2077_v50  ;;  %v2287_v2 = vmax.f32 %v2285_v19, %v2234_v51  ;;  %3111 = vmatprep.mubr.bf16.mxu0 %v9026_v6  ;;  %3268 = vmatprep.mubr.bf16.mxu1 %v9026_v6  ;;  %v9700_v15 = vpop.trf.xlu1 }
 0x24f   : > { %v2079_v44 = vpop.f32.mrf.mxu0  ;;  %v2236_v49 = vpop.f32.mrf.mxu1 }
 0x250   : > { %v2151_v59 = vmax.f32 %v2149_v37, %v2079_v44  ;;  %v2308_v0 = vmax.f32 %v2306_v34, %v2236_v49 }
 0x251   : > { %v2081_v41 = vpop.f32.mrf.mxu0  ;;  %v2238_v63 = vpop.f32.mrf.mxu1 }
 0x252   : > { %v2131_v4 = vmax.f32 %v2129_v39, %v2081_v41  ;;  %v2288_v1 = vmax.f32 %v2286_v40, %v2238_v63 }
 0x253   : > { %v2083_v17 = vpop.f32.mrf.mxu0  ;;  %v2240_v45 = vpop.f32.mrf.mxu1 }
 0x254   : > { %v2152_v21 = vmax.f32 %v2150_v46, %v2083_v17  ;;  %v2309_v23 = vmax.f32 %v2307_v25, %v2240_v45  ;;  %v9708_v17 = vpop.trf.xlu1 }
 0x255   : > { %v2087_v31 = vpop.f32.mrf.mxu0  ;;  %v2244_v33 = vpop.f32.mrf.mxu1  ;;  %8313 = vmatmul.mubr.msk.bf16.gmra.mxu0 %vm957_vm2, %v9691_v16  ;;  %8321 = vmatmul.mubr.msk.bf16.gmra.mxu1 %vm957_vm2, %v9691_v16 }
 0x256   : > { %v2132_v57 = vmax.f32 %v2130_v56, %v2087_v31  ;;  %v2289_v19 = vmax.f32 %v2287_v2, %v2244_v33  ;;  %3121 = vmatprep.mubr.bf16.mxu0 %v9026_v6  ;;  %3278 = vmatprep.mubr.bf16.mxu1 %v9026_v6 }
 0x257   : > { %v2089_v47 = vpop.f32.mrf.mxu0  ;;  %v2246_v14 = vpop.f32.mrf.mxu1 }
 0x258   : > { %v2153_v37 = vmax.f32 %v2151_v59, %v2089_v47  ;;  %v2310_v34 = vmax.f32 %v2308_v0, %v2246_v14 }
 0x259   : > { %v2091_v38 = vpop.f32.mrf.mxu0  ;;  %v2248_v35 = vpop.f32.mrf.mxu1 }
 0x25a   : > { %v2133_v39 = vmax.f32 %v2131_v4, %v2091_v38  ;;  %v2290_v40 = vmax.f32 %v2288_v1, %v2248_v35 }
 0x25b   : > { %v2093_v43 = vpop.f32.mrf.mxu0  ;;  %v2250_v46 = vpop.f32.mrf.mxu1 }
 0x25c   : > { %v2154_v25 = vmax.f32 %v2152_v21, %v2093_v43  ;;  %v2311_v50 = vmax.f32 %v2309_v23, %v2250_v46  ;;  %v9716_v46 = vpop.trf.xlu1 }
 0x25d   : > { %v2097_v51 = vpop.f32.mrf.mxu0  ;;  %v2254_v56 = vpop.f32.mrf.mxu1  ;;  %8314 = vmatmul.mubr.msk.bf16.gmra.mxu0 %vm957_vm2, %v9700_v15  ;;  %8322 = vmatmul.mubr.msk.bf16.gmra.mxu1 %vm957_vm2, %v9700_v15 }
 0x25e   : > { %v2134_v2 = vmax.f32 %v2132_v57, %v2097_v51  ;;  %v2291_v44 = vmax.f32 %v2289_v19, %v2254_v56  ;;  %3131 = vmatprep.mubr.bf16.mxu0 %v9026_v6  ;;  %3288 = vmatprep.mubr.bf16.mxu1 %v9026_v6 }
 0x25f   : > { %v2099_v49 = vpop.f32.mrf.mxu0  ;;  %v2256_v59 = vpop.f32.mrf.mxu1 }
 0x260   : > { %v2155_v0 = vmax.f32 %v2153_v37, %v2099_v49  ;;  %v2312_v41 = vmax.f32 %v2310_v34, %v2256_v59  ;;  %v1481_v49 = vrot.slane %v9547_v60, 4  ;;  %v1651_v59 = vrot.slane %v9549_v61, 4 }
 0x261   : > { %v2101_v63 = vpop.f32.mrf.mxu0  ;;  %v2258_v4 = vpop.f32.mrf.mxu1 }
 0x262   : > { %v2135_v1 = vmax.f32 %v2133_v39, %v2101_v63  ;;  %v2292_v8 = vmax.f32 %v2290_v40, %v2258_v4 }
 0x263   : > { %v2103_v45 = vpop.f32.mrf.mxu0  ;;  %v2260_v21 = vpop.f32.mrf.mxu1 }
 0x264   : > { %v2156_v23 = vmax.f32 %v2154_v25, %v2103_v45  ;;  %v2313_v31 = vmax.f32 %v2311_v50, %v2260_v21  ;;  %v1460_v25 = vrot.slane %v9539_v54, 4  ;;  %v1630_v50 = vrot.slane %v9541_v55, 4 }
 0x265   : > { %v2107_v33 = vpop.f32.mrf.mxu0  ;;  %v2264_v57 = vpop.f32.mrf.mxu1  ;;  %8315 = vmatmul.mubr.msk.bf16.gmra.mxu0 %vm957_vm2, %v9708_v17  ;;  %8323 = vmatmul.mubr.msk.bf16.gmra.mxu1 %vm957_vm2, %v9708_v17 }
 0x266   : > { %v2136_v19 = vmax.f32 %v2134_v2, %v2107_v33  ;;  %v2293_v47 = vmax.f32 %v2291_v44, %v2264_v57  ;;  %3141 = vmatprep.mubr.bf16.mxu0 %v9026_v6  ;;  %3298 = vmatprep.mubr.bf16.mxu1 %v9026_v6  ;;  %v1482_v33 = vmax.f32 %v9547_v60, %v1481_v49 }
 0x267   : > { %v2109_v14 = vpop.f32.mrf.mxu0  ;;  %v2266_v37 = vpop.f32.mrf.mxu1  ;;  %v1652_v57 = vmax.f32 %v9549_v61, %v1651_v59 }
 0x268   : > { %v2157_v34 = vmax.f32 %v2155_v0, %v2109_v14  ;;  %v2314_v38 = vmax.f32 %v2312_v41, %v2266_v37 }
 0x269   : > { %v2111_v35 = vpop.f32.mrf.mxu0  ;;  %v2268_v39 = vpop.f32.mrf.mxu1 }
 0x26a   : > { %v2137_v40 = vmax.f32 %v2135_v1, %v2111_v35  ;;  %v2294_v43 = vmax.f32 %v2292_v8, %v2268_v39  ;;  %v1461_v1 = vmax.f32 %v9539_v54, %v1460_v25  ;;  %v1631_v8 = vmax.f32 %v9541_v55, %v1630_v50 }
 0x26b   : > { %v2113_v51 = vpop.f32.mrf.mxu0  ;;  %v2270_v56 = vpop.f32.mrf.mxu1  ;;  %v1483_v50 = vrot.slane %v1482_v33, 2 }
 0x26c   : > { %v2158_v2 = vmax.f32 %v2156_v23, %v2113_v51  ;;  %v2315_v44 = vmax.f32 %v2313_v31, %v2270_v56  ;;  %v1462_v35 = vrot.slane %v1461_v1, 2  ;;  %v1632_v39 = vrot.slane %v1631_v8, 2 }
 0x26d   : > { %v2117_v0 = vpop.f32.mrf.mxu0  ;;  %v2274_v41 = vpop.f32.mrf.mxu1  ;;  %8316 = vmatmul.mubr.msk.bf16.gmra.mxu0 %vm957_vm2, %v9716_v46  ;;  %8324 = vmatmul.mubr.msk.bf16.gmra.mxu1 %vm957_vm2, %v9716_v46 }
 0x26e   : > { %v2138_v63 = vmax.f32 %v2136_v19, %v2117_v0  ;;  %v2295_v4 = vmax.f32 %v2293_v47, %v2274_v41  ;;  %3385 = vmatprep.mubr.bf16.mxu0 %v9026_v6  ;;  %3542 = vmatprep.mubr.bf16.mxu1 %v9026_v6  ;;  %v1653_v41 = vrot.slane %v1652_v57, 2 }
 0x26f   : > { %v2119_v45 = vpop.f32.mrf.mxu0  ;;  %v2276_v21 = vpop.f32.mrf.mxu1 }
 0x270   : > { %v2159_v23 = vmax.f32 %v2157_v34, %v2119_v45  ;;  %v2316_v31 = vmax.f32 %v2314_v38, %v2276_v21  ;;  %v1484_v21 = vmax.f32 %v1482_v33, %v1483_v50 }
 0x271   : > { %v2121_v14 = vpop.f32.mrf.mxu0  ;;  %v2278_v37 = vpop.f32.mrf.mxu1 }
 0x272   : > { %v2139_v19 = vmax.f32 %v2137_v40, %v2121_v14  ;;  %v2296_v47 = vmax.f32 %v2294_v43, %v2278_v37  ;;  %v1485_v33 = vrot.slane %v1484_v21, 1 }
 0x273   : > { %v2123_v51 = vpop.f32.mrf.mxu0  ;;  %v2280_v56 = vpop.f32.mrf.mxu1 }
 0x274   : > { %v2140_v0 = vmax.f32 %v2138_v63, %v2139_v19  ;;  %v2297_v54 = vmax.f32 %v2295_v4, %v2296_v47  ;;  %v2160_v25 = vmax.f32 %v2158_v2, %v2123_v51  ;;  %v2317_v55 = vmax.f32 %v2315_v44, %v2280_v56 }
 0x275   : > { %v9732_v34 = vpop.f32.mrf.mxu0  ;;  %v9734_v38 = vpop.f32.mrf.mxu1  ;;  %8325 = vmatmul.mubr.msk.bf16.vlgmr.msra.gmra.mxu0 %vm957_vm2, %v9607_v52  ;;  %8333 = vmatmul.mubr.msk.bf16.vlgmr.msra.gmra.mxu1 %vm957_vm2, %v9607_v52  ;;  %v1463_v2 = vmax.f32 %v1461_v1, %v1462_v35  ;;  %v1633_v44 = vmax.f32 %v1631_v8, %v1632_v39 }
 0x276   : > { %v2141_v60 = vrot.slane %v2140_v0, 4  ;;  %v2298_v61 = vrot.slane %v2297_v54, 4  ;;  %v2161_v40 = vmax.f32 %v2159_v23, %v2160_v25  ;;  %v2318_v43 = vmax.f32 %v2316_v31, %v2317_v55  ;;  %3724 = vmatpush1.bf16.msra.mxu0 %v9257_v20  ;;  %3881 = vmatpush1.bf16.msra.mxu1 %v9259_v22 }
 0x277   : > { %v9742_v49 = vpop.f32.mrf.mxu0  ;;  %v9744_v59 = vpop.f32.mrf.mxu1  ;;  %3395 = vmatprep.mubr.bf16.mxu0 %v9026_v6  ;;  %3552 = vmatprep.mubr.bf16.mxu1 %v9026_v6  ;;  %v1654_v23 = vmax.f32 %v1652_v57, %v1653_v41  ;;  %v1464_v47 = vrot.slane %v1463_v2, 1  ;;  %v1634_v35 = vrot.slane %v1633_v44, 1 }
 0x278   : > { %v2142_v63 = vmax.f32 %v2140_v0, %v2141_v60  ;;  %v2299_v52 = vmax.f32 %v2297_v54, %v2298_v61  ;;  %v2162_v4 = vrot.slane %v2161_v40, 4  ;;  %v2319_v45 = vrot.slane %v2318_v43, 4  ;;  %4037 = vmatprep.subr.bf16.mxu0 %v9269_v29  ;;  %4194 = vmatprep.subr.bf16.mxu1 %v9271_v30 }
 0x279   : > { %v9750_v1 = vpop.f32.mrf.mxu0  ;;  %v9752_v8 = vpop.f32.mrf.mxu1  ;;  %v1655_v57 = vrot.slane %v1654_v23, 1 }
 0x27a   : > { %v2143_v31 = vrot.slane %v2142_v63, 2  ;;  %v2300_v14 = vrot.slane %v2299_v52, 2  ;;  %v2163_v37 = vmax.f32 %v2161_v40, %v2162_v4  ;;  %v2320_v19 = vmax.f32 %v2318_v43, %v2319_v45 }
 0x27b   : > { %v9754_v39 = vpop.f32.mrf.mxu0  ;;  %v9756_v51 = vpop.f32.mrf.mxu1  ;;  %v9764_v43 = vmax.f32 %v1463_v2, %v1464_v47 }
 0x27c   : > { %v2144_v56 = vmax.f32 %v2142_v63, %v2143_v31  ;;  %v2301_v0 = vmax.f32 %v2299_v52, %v2300_v14  ;;  %v2164_v54 = vrot.slane %v2163_v37, 2  ;;  %v2321_v25 = vrot.slane %v2320_v19, 2 }
 0x27d   : > { %v2413_v55 = vpop.f32.mrf.mxu0  ;;  %v2570_v50 = vpop.f32.mrf.mxu1  ;;  %8326 = vmatmul.mubr.msk.bf16.gmra.mxu0 %vm957_vm2, %v9631_v32  ;;  %8334 = vmatmul.mubr.msk.bf16.gmra.mxu1 %vm957_vm2, %v9631_v32  ;;  %v9766_v63 = vmax.f32 %v1633_v44, %v1634_v35 }
 0x27e   : > { %v2145_v41 = vrot.slane %v2144_v56, 1  ;;  %v2302_v60 = vrot.slane %v2301_v0, 1  ;;  %v2165_v61 = vmax.f32 %v2163_v37, %v2164_v54  ;;  %v2322_v40 = vmax.f32 %v2320_v19, %v2321_v25  ;;  %3405 = vmatprep.mubr.bf16.mxu0 %v9026_v6  ;;  %3562 = vmatprep.mubr.bf16.mxu1 %v9026_v6 }
 0x27f   : > { %v2482_v52 = vmax.f32 %v9732_v34, %v2413_v55  ;;  %v2639_v4 = vmax.f32 %v9734_v38, %v2570_v50  ;;  %v2415_v45 = vpop.f32.mrf.mxu0  ;;  %v2572_v31 = vpop.f32.mrf.mxu1  ;;  %v9774_v54 = vmax.f32 %v1484_v21, %v1485_v33  ;;  %v9776_v25 = vmax.f32 %v1654_v23, %v1655_v57 }
 0x280   : > { %v9770_v14 = vmax.f32 %v2144_v56, %v2145_v41  ;;  %v9772_v32 = vmax.f32 %v2301_v0, %v2302_v60  ;;  %v2166_v37 = vrot.slane %v2165_v61, 1  ;;  %v2323_v19 = vrot.slane %v2322_v40, 1 }
 0x281   : > { %v2503_v2 = vmax.f32 %v9742_v49, %v2415_v45  ;;  %v2660_v44 = vmax.f32 %v9744_v59, %v2572_v31  ;;  %v2417_v47 = vpop.f32.mrf.mxu0  ;;  %v2574_v34 = vpop.f32.mrf.mxu1 }
 0x282   : > { %v2168_v38 = vmax.f32 %v9764_v43, %v9770_v14  ;;  %v2325_v35 = vmax.f32 %v9766_v63, %v9772_v32  ;;  %v9784_v56 = vmax.f32 %v2165_v61, %v2166_v37  ;;  %v9786_v0 = vmax.f32 %v2322_v40, %v2323_v19 }
 0x283   : > { %v2483_v21 = vmax.f32 %v9750_v1, %v2417_v47  ;;  %v2640_v23 = vmax.f32 %v9752_v8, %v2574_v34  ;;  %v2419_v33 = vpop.f32.mrf.mxu0  ;;  %v2576_v49 = vpop.f32.mrf.mxu1 }
 0x284   : > { %v2504_v55 = vmax.f32 %v9754_v39, %v2419_v33  ;;  %v2661_v50 = vmax.f32 %v9756_v51, %v2576_v49  ;;  %v11302_v43 = vmax.f32 %v9776_v25, %v9786_v0 }
 0x285   : > { %v2423_v41 = vpop.f32.mrf.mxu0  ;;  %v2580_v60 = vpop.f32.mrf.mxu1  ;;  %8327 = vmatmul.mubr.msk.bf16.gmra.mxu0 %vm957_vm2, %v9667_v13  ;;  %8335 = vmatmul.mubr.msk.bf16.gmra.mxu1 %vm957_vm2, %v9667_v13 }
 0x286   : > { %v2484_v1 = vmax.f32 %v2482_v52, %v2423_v41  ;;  %v2641_v8 = vmax.f32 %v2639_v4, %v2580_v60  ;;  %3415 = vmatprep.mubr.bf16.mxu0 %v9026_v6  ;;  %3572 = vmatprep.mubr.bf16.mxu1 %v9026_v6 }
 0x287   : > { %v2425_v61 = vpop.f32.mrf.mxu0  ;;  %v2582_v40 = vpop.f32.mrf.mxu1 }
 0x288   : > { %v2505_v45 = vmax.f32 %v2503_v2, %v2425_v61  ;;  %v2662_v39 = vmax.f32 %v2660_v44, %v2582_v40 }
 0x289   : > { %v2427_v31 = vpop.f32.mrf.mxu0  ;;  %v2584_v51 = vpop.f32.mrf.mxu1 }
 0x28a   : > { %v2485_v37 = vmax.f32 %v2483_v21, %v2427_v31  ;;  %v2642_v19 = vmax.f32 %v2640_v23, %v2584_v51 }
 0x28b   : > { %v2429_v47 = vpop.f32.mrf.mxu0  ;;  %v2586_v34 = vpop.f32.mrf.mxu1 }
 0x28c   : > { %v2506_v33 = vmax.f32 %v2504_v55, %v2429_v47  ;;  %v2663_v49 = vmax.f32 %v2661_v50, %v2586_v34 }
 0x28d   : > { %v2433_v57 = vpop.f32.mrf.mxu0  ;;  %v2590_v13 = vpop.f32.mrf.mxu1  ;;  %8328 = vmatmul.mubr.msk.bf16.gmra.mxu0 %vm957_vm2, %v9683_v42  ;;  %8336 = vmatmul.mubr.msk.bf16.gmra.mxu1 %vm957_vm2, %v9683_v42 }
 0x28e   : > { %v2486_v52 = vmax.f32 %v2484_v1, %v2433_v57  ;;  %v2643_v4 = vmax.f32 %v2641_v8, %v2590_v13  ;;  %3425 = vmatprep.mubr.bf16.mxu0 %v9026_v6  ;;  %3582 = vmatprep.mubr.bf16.mxu1 %v9026_v6 }
 0x28f   : > { %v2435_v2 = vpop.f32.mrf.mxu0  ;;  %v2592_v44 = vpop.f32.mrf.mxu1 }
 0x290   : > { %v2507_v21 = vmax.f32 %v2505_v45, %v2435_v2  ;;  %v2664_v23 = vmax.f32 %v2662_v39, %v2592_v44 }
 0x291   : > { %v2437_v55 = vpop.f32.mrf.mxu0  ;;  %v2594_v50 = vpop.f32.mrf.mxu1 }
 0x292   : > { %v2487_v41 = vmax.f32 %v2485_v37, %v2437_v55  ;;  %v2644_v60 = vmax.f32 %v2642_v19, %v2594_v50 }
 0x293   : > { %v2439_v61 = vpop.f32.mrf.mxu0  ;;  %v2596_v40 = vpop.f32.mrf.mxu1 }
 0x294   : > { %v2508_v31 = vmax.f32 %v2506_v33, %v2439_v61  ;;  %v2665_v51 = vmax.f32 %v2663_v49, %v2596_v40 }
 0x295   : > { %v2443_v47 = vpop.f32.mrf.mxu0  ;;  %v2600_v42 = vpop.f32.mrf.mxu1  ;;  %8329 = vmatmul.mubr.msk.bf16.gmra.mxu0 %vm957_vm2, %v9691_v16  ;;  %8337 = vmatmul.mubr.msk.bf16.gmra.mxu1 %vm957_vm2, %v9691_v16 }
 0x296   : > { %v2488_v57 = vmax.f32 %v2486_v52, %v2443_v47  ;;  %v2645_v1 = vmax.f32 %v2643_v4, %v2600_v42  ;;  %3435 = vmatprep.mubr.bf16.mxu0 %v9026_v6  ;;  %3592 = vmatprep.mubr.bf16.mxu1 %v9026_v6 }
 0x297   : > { %v2445_v8 = vpop.f32.mrf.mxu0  ;;  %v2602_v45 = vpop.f32.mrf.mxu1 }
 0x298   : > { %v2509_v39 = vmax.f32 %v2507_v21, %v2445_v8  ;;  %v2666_v37 = vmax.f32 %v2664_v23, %v2602_v45 }
 0x299   : > { %v2447_v19 = vpop.f32.mrf.mxu0  ;;  %v2604_v34 = vpop.f32.mrf.mxu1 }
 0x29a   : > { %v2489_v33 = vmax.f32 %v2487_v41, %v2447_v19  ;;  %v2646_v49 = vmax.f32 %v2644_v60, %v2604_v34 }
 0x29b   : > { %v2449_v13 = vpop.f32.mrf.mxu0  ;;  %v2606_v2 = vpop.f32.mrf.mxu1 }
 0x29c   : > { %v2510_v44 = vmax.f32 %v2508_v31, %v2449_v13  ;;  %v2667_v55 = vmax.f32 %v2665_v51, %v2606_v2 }
 0x29d   : > { %v2453_v50 = vpop.f32.mrf.mxu0  ;;  %v2610_v16 = vpop.f32.mrf.mxu1  ;;  %8330 = vmatmul.mubr.msk.bf16.gmra.mxu0 %vm957_vm2, %v9700_v15  ;;  %8338 = vmatmul.mubr.msk.bf16.gmra.mxu1 %vm957_vm2, %v9700_v15 }
 0x29e   : > { %v2490_v52 = vmax.f32 %v2488_v57, %v2453_v50  ;;  %v2647_v4 = vmax.f32 %v2645_v1, %v2610_v16  ;;  %3445 = vmatprep.mubr.bf16.mxu0 %v9026_v6  ;;  %3602 = vmatprep.mubr.bf16.mxu1 %v9026_v6 }
 0x29f   : > { %v2455_v21 = vpop.f32.mrf.mxu0  ;;  %v2612_v23 = vpop.f32.mrf.mxu1 }
 0x2a0   : > { %v2511_v41 = vmax.f32 %v2509_v39, %v2455_v21  ;;  %v2668_v60 = vmax.f32 %v2666_v37, %v2612_v23 }
 0x2a1   : > { %v2457_v61 = vpop.f32.mrf.mxu0  ;;  %v2614_v40 = vpop.f32.mrf.mxu1 }
 0x2a2   : > { %v2491_v31 = vmax.f32 %v2489_v33, %v2457_v61  ;;  %v2648_v51 = vmax.f32 %v2646_v49, %v2614_v40 }
 0x2a3   : > { %v2459_v47 = vpop.f32.mrf.mxu0  ;;  %v2616_v42 = vpop.f32.mrf.mxu1 }
 0x2a4   : > { %v2512_v8 = vmax.f32 %v2510_v44, %v2459_v47  ;;  %v2669_v45 = vmax.f32 %v2667_v55, %v2616_v42 }
 0x2a5   : > { %v2463_v19 = vpop.f32.mrf.mxu0  ;;  %v2620_v15 = vpop.f32.mrf.mxu1  ;;  %8331 = vmatmul.mubr.msk.bf16.gmra.mxu0 %vm957_vm2, %v9708_v17  ;;  %8339 = vmatmul.mubr.msk.bf16.gmra.mxu1 %vm957_vm2, %v9708_v17 }
 0x2a6   : > { %v2492_v57 = vmax.f32 %v2490_v52, %v2463_v19  ;;  %v2649_v1 = vmax.f32 %v2647_v4, %v2620_v15  ;;  %3455 = vmatprep.mubr.bf16.mxu0 %v9026_v6  ;;  %3612 = vmatprep.mubr.bf16.mxu1 %v9026_v6 }
 0x2a7   : > { %v2465_v39 = vpop.f32.mrf.mxu0  ;;  %v2622_v37 = vpop.f32.mrf.mxu1 }
 0x2a8   : > { %v2513_v34 = vmax.f32 %v2511_v41, %v2465_v39  ;;  %v2670_v33 = vmax.f32 %v2668_v60, %v2622_v37 }
 0x2a9   : > { %v2467_v49 = vpop.f32.mrf.mxu0  ;;  %v2624_v13 = vpop.f32.mrf.mxu1 }
 0x2aa   : > { %v2493_v2 = vmax.f32 %v2491_v31, %v2467_v49  ;;  %v2650_v44 = vmax.f32 %v2648_v51, %v2624_v13 }
 0x2ab   : > { %v2469_v55 = vpop.f32.mrf.mxu0  ;;  %v2626_v50 = vpop.f32.mrf.mxu1 }
 0x2ac   : > { %v2514_v16 = vmax.f32 %v2512_v8, %v2469_v55  ;;  %v2671_v21 = vmax.f32 %v2669_v45, %v2626_v50  ;;  %v9832_v8 = vpop.trf.xlu0 }
 0x2ad   : > { %v2473_v23 = vpop.f32.mrf.mxu0  ;;  %v2630_v17 = vpop.f32.mrf.mxu1  ;;  %8332 = vmatmul.mubr.msk.bf16.gmra.mxu0 %vm957_vm2, %v9716_v46  ;;  %8340 = vmatmul.mubr.msk.bf16.gmra.mxu1 %vm957_vm2, %v9716_v46 }
 0x2ae   : > { %v2494_v52 = vmax.f32 %v2492_v57, %v2473_v23  ;;  %v2651_v4 = vmax.f32 %v2649_v1, %v2630_v17  ;;  %3741 = vmatprep.mubr.bf16.mxu0 %v9026_v6  ;;  %3898 = vmatprep.mubr.bf16.mxu1 %v9026_v6 }
 0x2af   : > { %v2475_v41 = vpop.f32.mrf.mxu0  ;;  %v2632_v60 = vpop.f32.mrf.mxu1 }
 0x2b0   : > { %v2515_v61 = vmax.f32 %v2513_v34, %v2475_v41  ;;  %v2672_v40 = vmax.f32 %v2670_v33, %v2632_v60 }
 0x2b1   : > { %v2477_v31 = vpop.f32.mrf.mxu0  ;;  %v2634_v51 = vpop.f32.mrf.mxu1 }
 0x2b2   : > { %v2495_v47 = vmax.f32 %v2493_v2, %v2477_v31  ;;  %v2652_v42 = vmax.f32 %v2650_v44, %v2634_v51 }
 0x2b3   : > { %v2479_v45 = vpop.f32.mrf.mxu0  ;;  %v2636_v19 = vpop.f32.mrf.mxu1 }
 0x2b4   : > { %v2496_v15 = vmax.f32 %v2494_v52, %v2495_v47  ;;  %v2653_v46 = vmax.f32 %v2651_v4, %v2652_v42  ;;  %v2516_v57 = vmax.f32 %v2514_v16, %v2479_v45  ;;  %v2673_v1 = vmax.f32 %v2671_v21, %v2636_v19 }
 0x2b5   : > { %v9834_v39 = vpop.f32.mrf.mxu0  ;;  %v9836_v37 = vpop.f32.mrf.mxu1  ;;  %8342 = vmatmul.mubr.msk.bf16.vlgmr.msra.gmra.mxu0 %vm957_vm2, %v9832_v8  ;;  %8350 = vmatmul.mubr.msk.bf16.vlgmr.msra.gmra.mxu1 %vm957_vm2, %v9832_v8 }
 0x2b6   : > { %v2497_v34 = vrot.slane %v2496_v15, 4  ;;  %v2654_v33 = vrot.slane %v2653_v46, 4  ;;  %v2517_v49 = vmax.f32 %v2515_v61, %v2516_v57  ;;  %v2674_v13 = vmax.f32 %v2672_v40, %v2673_v1  ;;  %4038 = vmatpush1.bf16.msra.mxu0 %v9261_v24  ;;  %4195 = vmatpush1.bf16.msra.mxu1 %v9263_v26  ;;  %v9856_v61 = vpop.trf.xlu0 }
 0x2b7   : > { %v9844_v2 = vpop.f32.mrf.mxu0  ;;  %v9846_v44 = vpop.f32.mrf.mxu1  ;;  %3751 = vmatprep.mubr.bf16.mxu0 %v9026_v6  ;;  %3908 = vmatprep.mubr.bf16.mxu1 %v9026_v6 }
 0x2b8   : > { %v2498_v55 = vmax.f32 %v2496_v15, %v2497_v34  ;;  %v2655_v50 = vmax.f32 %v2653_v46, %v2654_v33  ;;  %v2518_v16 = vrot.slane %v2517_v49, 4  ;;  %v2675_v21 = vrot.slane %v2674_v13, 4  ;;  %4393 = vmatprep.subr.bf16.mxu0 %v9265_v27  ;;  %4550 = vmatprep.subr.bf16.mxu1 %v9267_v28 }
 0x2b9   : > { %v9852_v23 = vpop.f32.mrf.mxu0  ;;  %v9854_v17 = vpop.f32.mrf.mxu1 }
 0x2ba   : > { %v2499_v52 = vrot.slane %v2498_v55, 2  ;;  %v2656_v4 = vrot.slane %v2655_v50, 2  ;;  %v2519_v41 = vmax.f32 %v2517_v49, %v2518_v16  ;;  %v2676_v60 = vmax.f32 %v2674_v13, %v2675_v21 }
 0x2bb   : > { %v2723_v40 = vpop.f32.mrf.mxu0  ;;  %v2880_v31 = vpop.f32.mrf.mxu1 }
 0x2bc   : > { %v2500_v51 = vmax.f32 %v2498_v55, %v2499_v52  ;;  %v2657_v47 = vmax.f32 %v2655_v50, %v2656_v4  ;;  %v2520_v42 = vrot.slane %v2519_v41, 2  ;;  %v2677_v45 = vrot.slane %v2676_v60, 2 }
 0x2bd   : > { %v2727_v19 = vpop.f32.mrf.mxu0  ;;  %v2884_v15 = vpop.f32.mrf.mxu1  ;;  %8343 = vmatmul.mubr.msk.bf16.gmra.mxu0 %vm957_vm2, %v9856_v61  ;;  %8351 = vmatmul.mubr.msk.bf16.gmra.mxu1 %vm957_vm2, %v9856_v61 }
 0x2be   : > { %v2501_v46 = vrot.slane %v2500_v51, 1  ;;  %v2658_v57 = vrot.slane %v2657_v47, 1  ;;  %v2521_v1 = vmax.f32 %v2519_v41, %v2520_v42  ;;  %v2678_v34 = vmax.f32 %v2676_v60, %v2677_v45  ;;  %3761 = vmatprep.mubr.bf16.mxu0 %v9026_v6  ;;  %3918 = vmatprep.mubr.bf16.mxu1 %v9026_v6 }
 0x2bf   : > { %v2796_v33 = vmax.f32 %v9834_v39, %v2727_v19  ;;  %v2953_v49 = vmax.f32 %v9836_v37, %v2884_v15  ;;  %v2729_v13 = vpop.f32.mrf.mxu0  ;;  %v2886_v55 = vpop.f32.mrf.mxu1 }
 0x2c0   : > { %v2502_v50 = vmax.f32 %v2500_v51, %v2501_v46  ;;  %v2659_v16 = vmax.f32 %v2657_v47, %v2658_v57  ;;  %v2522_v21 = vrot.slane %v2521_v1, 1  ;;  %v2679_v52 = vrot.slane %v2678_v34, 1  ;;  %v9878_v47 = vpop.trf.xlu0 }
 0x2c1   : > { %v2817_v4 = vmax.f32 %v9844_v2, %v2729_v13  ;;  %v2974_v59 = vmax.f32 %v9846_v44, %v2886_v55  ;;  %v2731_v41 = vpop.f32.mrf.mxu0  ;;  %v2888_v60 = vpop.f32.mrf.mxu1 }
 0x2c2   : > { %v9871_v42 = vmax.f32 %v1854_v9, %v2502_v50  ;;  %v9876_v39 = vmax.f32 %v2011_v7, %v2659_v16  ;;  %v2523_v37 = vmax.f32 %v2521_v1, %v2522_v21  ;;  %v2680_v51 = vmax.f32 %v2678_v34, %v2679_v52 }
 0x2c3   : > { %v2797_v2 = vmax.f32 %v9852_v23, %v2731_v41  ;;  %v2954_v44 = vmax.f32 %v9854_v17, %v2888_v60  ;;  %v2733_v45 = vpop.f32.mrf.mxu0  ;;  %v2890_v19 = vpop.f32.mrf.mxu1 }
 0x2c4   : > { %v9885_v53 = vmax.f32 %v1855_v18, %v2523_v37  ;;  %v9890_v48 = vmax.f32 %v2012_v62, %v2680_v51  ;;  %v2818_v58 = vmax.f32 %v2723_v40, %v2733_v45  ;;  %v2975_v36 = vmax.f32 %v2880_v31, %v2890_v19  ;;  %v9898_v15 = vpop.trf.xlu0  ;;  %v8407_v51 = vld [vmem:[%s9253_s22 + $0xc] sm:$0x3] }
 0x2c5   : > { %v2737_v9 = vpop.f32.mrf.mxu0  ;;  %v2894_v7 = vpop.f32.mrf.mxu1  ;;  %8344 = vmatmul.mubr.msk.bf16.gmra.mxu0 %vm957_vm2, %v9878_v47  ;;  %8352 = vmatmul.mubr.msk.bf16.gmra.mxu1 %vm957_vm2, %v9878_v47 }
 0x2c6   : > { %v2798_v23 = vmax.f32 %v2796_v33, %v2737_v9  ;;  %v2955_v17 = vmax.f32 %v2953_v49, %v2894_v7  ;;  %3771 = vmatprep.mubr.bf16.mxu0 %v9026_v6  ;;  %3928 = vmatprep.mubr.bf16.mxu1 %v9026_v6 }
 0x2c7   : > { %v2739_v10 = vpop.f32.mrf.mxu0  ;;  %v2896_v3 = vpop.f32.mrf.mxu1  ;;  %5009 = vxpose.xlu0.c.b16.start.end [1/1] (short) %v8407_v51, 128 }
 0x2c8   : > { %v2819_v11 = vmax.f32 %v2817_v4, %v2739_v10  ;;  %v2976_v12 = vmax.f32 %v2974_v59, %v2896_v3  ;;  %v9906_v37 = vpop.trf.xlu0 }
 0x2c9   : > { %v2741_v18 = vpop.f32.mrf.mxu0  ;;  %v2898_v62 = vpop.f32.mrf.mxu1 }
 0x2ca   : > { %v2799_v40 = vmax.f32 %v2797_v2, %v2741_v18  ;;  %v2956_v31 = vmax.f32 %v2954_v44, %v2898_v62 }
 0x2cb   : > { %v2743_v46 = vpop.f32.mrf.mxu0  ;;  %v2900_v57 = vpop.f32.mrf.mxu1 }
 0x2cc   : > { %v2820_v1 = vmax.f32 %v2818_v58, %v2743_v46  ;;  %v2977_v34 = vmax.f32 %v2975_v36, %v2900_v57 }
 0x2cd   : > { %v2747_v33 = vpop.f32.mrf.mxu0  ;;  %v2904_v49 = vpop.f32.mrf.mxu1  ;;  %8345 = vmatmul.mubr.msk.bf16.gmra.mxu0 %vm957_vm2, %v9898_v15  ;;  %8353 = vmatmul.mubr.msk.bf16.gmra.mxu1 %vm957_vm2, %v9898_v15 }
 0x2ce   : > { %v2800_v59 = vmax.f32 %v2798_v23, %v2747_v33  ;;  %v2957_v13 = vmax.f32 %v2955_v17, %v2904_v49  ;;  %3781 = vmatprep.mubr.bf16.mxu0 %v9026_v6  ;;  %3938 = vmatprep.mubr.bf16.mxu1 %v9026_v6 }
 0x2cf   : > { %v2749_v55 = vpop.f32.mrf.mxu0  ;;  %v2906_v50 = vpop.f32.mrf.mxu1 }
 0x2d0   : > { %v2821_v16 = vmax.f32 %v2819_v11, %v2749_v55  ;;  %v2978_v21 = vmax.f32 %v2976_v12, %v2906_v50  ;;  %8919 = vset.pattern.permute.xlu0 %v9026_v6 }
 0x2d1   : > { %v2751_v52 = vpop.f32.mrf.mxu0  ;;  %v2908_v4 = vpop.f32.mrf.mxu1 }
 0x2d2   : > { %v2801_v41 = vmax.f32 %v2799_v40, %v2751_v52  ;;  %v2958_v60 = vmax.f32 %v2956_v31, %v2908_v4  ;;  %v9915_v40 = vpop.trf.xlu0 }
 0x2d3   : > { %v2753_v2 = vpop.f32.mrf.mxu0  ;;  %v2910_v44 = vpop.f32.mrf.mxu1 }
 0x2d4   : > { %v2822_v45 = vmax.f32 %v2820_v1, %v2753_v2  ;;  %v2979_v19 = vmax.f32 %v2977_v34, %v2910_v44 }
 0x2d5   : > { %v2757_v58 = vpop.f32.mrf.mxu0  ;;  %v2914_v36 = vpop.f32.mrf.mxu1  ;;  %8346 = vmatmul.mubr.msk.bf16.gmra.mxu0 %vm957_vm2, %v9906_v37  ;;  %8354 = vmatmul.mubr.msk.bf16.gmra.mxu1 %vm957_vm2, %v9906_v37 }
 0x2d6   : > { %v2802_v9 = vmax.f32 %v2800_v59, %v2757_v58  ;;  %v2959_v7 = vmax.f32 %v2957_v13, %v2914_v36  ;;  %3791 = vmatprep.mubr.bf16.mxu0 %v9026_v6  ;;  %3948 = vmatprep.mubr.bf16.mxu1 %v9026_v6 }
 0x2d7   : > { %v2759_v23 = vpop.f32.mrf.mxu0  ;;  %v2916_v17 = vpop.f32.mrf.mxu1 }
 0x2d8   : > { %v2823_v10 = vmax.f32 %v2821_v16, %v2759_v23  ;;  %v2980_v3 = vmax.f32 %v2978_v21, %v2916_v17 }
 0x2d9   : > { %v2761_v11 = vpop.f32.mrf.mxu0  ;;  %v2918_v12 = vpop.f32.mrf.mxu1 }
 0x2da   : > { %v2803_v18 = vmax.f32 %v2801_v41, %v2761_v11  ;;  %v2960_v62 = vmax.f32 %v2958_v60, %v2918_v12  ;;  %v9924_v60 = vpop.trf.xlu0 }
 0x2db   : > { %v2763_v31 = vpop.f32.mrf.mxu0  ;;  %v2920_v46 = vpop.f32.mrf.mxu1 }
 0x2dc   : > { %v2824_v57 = vmax.f32 %v2822_v45, %v2763_v31  ;;  %v2981_v1 = vmax.f32 %v2979_v19, %v2920_v46 }
 0x2dd   : > { %v2767_v34 = vpop.f32.mrf.mxu0  ;;  %v2924_v33 = vpop.f32.mrf.mxu1  ;;  %8347 = vmatmul.mubr.msk.bf16.gmra.mxu0 %vm957_vm2, %v9915_v40  ;;  %8355 = vmatmul.mubr.msk.bf16.gmra.mxu1 %vm957_vm2, %v9915_v40 }
 0x2de   : > { %v2804_v49 = vmax.f32 %v2802_v9, %v2767_v34  ;;  %v2961_v59 = vmax.f32 %v2959_v7, %v2924_v33  ;;  %3801 = vmatprep.mubr.bf16.mxu0 %v9026_v6  ;;  %3958 = vmatprep.mubr.bf16.mxu1 %v9026_v6 }
 0x2df   : > { %v2769_v13 = vpop.f32.mrf.mxu0  ;;  %v2926_v55 = vpop.f32.mrf.mxu1 }
 0x2e0   : > { %v2825_v50 = vmax.f32 %v2823_v10, %v2769_v13  ;;  %v2982_v16 = vmax.f32 %v2980_v3, %v2926_v55 }
 0x2e1   : > { %v2771_v21 = vpop.f32.mrf.mxu0  ;;  %v2928_v52 = vpop.f32.mrf.mxu1 }
 0x2e2   : > { %v2805_v4 = vmax.f32 %v2803_v18, %v2771_v21  ;;  %v2962_v41 = vmax.f32 %v2960_v62, %v2928_v52  ;;  %v9932_v62 = vpop.trf.xlu0 }
 0x2e3   : > { %v2773_v51 = vpop.f32.mrf.mxu0  ;;  %v2930_v2 = vpop.f32.mrf.mxu1 }
 0x2e4   : > { %v2826_v44 = vmax.f32 %v2824_v57, %v2773_v51  ;;  %v2983_v45 = vmax.f32 %v2981_v1, %v2930_v2 }
 0x2e5   : > { %v2777_v19 = vpop.f32.mrf.mxu0  ;;  %v2934_v58 = vpop.f32.mrf.mxu1  ;;  %8348 = vmatmul.mubr.msk.bf16.gmra.mxu0 %vm957_vm2, %v9924_v60  ;;  %8356 = vmatmul.mubr.msk.bf16.gmra.mxu1 %vm957_vm2, %v9924_v60 }
 0x2e6   : > { %v2806_v36 = vmax.f32 %v2804_v49, %v2777_v19  ;;  %v2963_v9 = vmax.f32 %v2961_v59, %v2934_v58  ;;  %3811 = vmatprep.mubr.bf16.mxu0 %v9026_v6  ;;  %3968 = vmatprep.mubr.bf16.mxu1 %v9026_v6 }
 0x2e7   : > { %v2779_v7 = vpop.f32.mrf.mxu0  ;;  %v2936_v23 = vpop.f32.mrf.mxu1 }
 0x2e8   : > { %v2827_v17 = vmax.f32 %v2825_v50, %v2779_v7  ;;  %v2984_v10 = vmax.f32 %v2982_v16, %v2936_v23 }
 0x2e9   : > { %v2781_v3 = vpop.f32.mrf.mxu0  ;;  %v2938_v11 = vpop.f32.mrf.mxu1 }
 0x2ea   : > { %v2807_v12 = vmax.f32 %v2805_v4, %v2781_v3  ;;  %v2964_v18 = vmax.f32 %v2962_v41, %v2938_v11 }
 0x2eb   : > { %v2783_v31 = vpop.f32.mrf.mxu0  ;;  %v2940_v46 = vpop.f32.mrf.mxu1 }
 0x2ec   : > { %v2828_v57 = vmax.f32 %v2826_v44, %v2783_v31  ;;  %v2985_v1 = vmax.f32 %v2983_v45, %v2940_v46 }
 0x2ed   : > { %v2787_v34 = vpop.f32.mrf.mxu0  ;;  %v2944_v33 = vpop.f32.mrf.mxu1  ;;  %8349 = vmatmul.mubr.msk.bf16.gmra.mxu0 %vm957_vm2, %v9932_v62  ;;  %8357 = vmatmul.mubr.msk.bf16.gmra.mxu1 %vm957_vm2, %v9932_v62 }
 0x2ee   : > { %v2808_v49 = vmax.f32 %v2806_v36, %v2787_v34  ;;  %v2965_v59 = vmax.f32 %v2963_v9, %v2944_v33  ;;  %4055 = vmatprep.mubr.bf16.mxu0 %v9026_v6  ;;  %4212 = vmatprep.mubr.bf16.mxu1 %v9026_v6 }
 0x2ef   : > { %v2789_v13 = vpop.f32.mrf.mxu0  ;;  %v2946_v55 = vpop.f32.mrf.mxu1 }
 0x2f0   : > { %v2829_v50 = vmax.f32 %v2827_v17, %v2789_v13  ;;  %v2986_v16 = vmax.f32 %v2984_v10, %v2946_v55 }
 0x2f1   : > { %v2791_v21 = vpop.f32.mrf.mxu0  ;;  %v2948_v52 = vpop.f32.mrf.mxu1 }
 0x2f2   : > { %v2809_v4 = vmax.f32 %v2807_v12, %v2791_v21  ;;  %v2966_v41 = vmax.f32 %v2964_v18, %v2948_v52 }
 0x2f3   : > { %v2793_v51 = vpop.f32.mrf.mxu0  ;;  %v2950_v2 = vpop.f32.mrf.mxu1 }
 0x2f4   : > { %v2810_v44 = vmax.f32 %v2808_v49, %v2809_v4  ;;  %v2967_v45 = vmax.f32 %v2965_v59, %v2966_v41  ;;  %v2830_v19 = vmax.f32 %v2828_v57, %v2793_v51  ;;  %v2987_v58 = vmax.f32 %v2985_v1, %v2950_v2 }
 0x2f5   : > { %v9940_v36 = vpop.f32.mrf.mxu0  ;;  %v9942_v9 = vpop.f32.mrf.mxu1  ;;  %8358 = vmatmul.mubr.msk.bf16.vlgmr.msra.gmra.mxu0 %vm957_vm2, %v9832_v8  ;;  %8366 = vmatmul.mubr.msk.bf16.vlgmr.msra.gmra.mxu1 %vm957_vm2, %v9832_v8 }
 0x2f6   : > { %v2811_v7 = vrot.slane %v2810_v44, 4  ;;  %v2968_v23 = vrot.slane %v2967_v45, 4  ;;  %v2831_v17 = vmax.f32 %v2829_v50, %v2830_v19  ;;  %v2988_v10 = vmax.f32 %v2986_v16, %v2987_v58  ;;  %4394 = vmatpush1.bf16.msra.mxu0 %v9257_v20  ;;  %4551 = vmatpush1.bf16.msra.mxu1 %v9259_v22 }
 0x2f7   : > { %v9950_v3 = vpop.f32.mrf.mxu0  ;;  %v9952_v11 = vpop.f32.mrf.mxu1  ;;  %4065 = vmatprep.mubr.bf16.mxu0 %v9026_v6  ;;  %4222 = vmatprep.mubr.bf16.mxu1 %v9026_v6 }
 0x2f8   : > { %v2812_v12 = vmax.f32 %v2810_v44, %v2811_v7  ;;  %v2969_v18 = vmax.f32 %v2967_v45, %v2968_v23  ;;  %v2832_v31 = vrot.slane %v2831_v17, 4  ;;  %v2989_v8 = vrot.slane %v2988_v10, 4  ;;  %4707 = vmatprep.subr.bf16.mxu0 %v9269_v29  ;;  %4864 = vmatprep.subr.bf16.mxu1 %v9271_v30 }
 0x2f9   : > { %v3077_v46 = vpop.f32.mrf.mxu0  ;;  %v3234_v57 = vpop.f32.mrf.mxu1 }
 0x2fa   : > { %v2813_v1 = vrot.slane %v2812_v12, 2  ;;  %v2970_v34 = vrot.slane %v2969_v18, 2  ;;  %v2833_v33 = vmax.f32 %v2831_v17, %v2832_v31  ;;  %v2990_v49 = vmax.f32 %v2988_v10, %v2989_v8 }
 0x2fb   : > { %v3079_v59 = vpop.f32.mrf.mxu0  ;;  %v3236_v13 = vpop.f32.mrf.mxu1 }
 0x2fc   : > { %v2814_v55 = vmax.f32 %v2812_v12, %v2813_v1  ;;  %v2971_v50 = vmax.f32 %v2969_v18, %v2970_v34  ;;  %v2834_v16 = vrot.slane %v2833_v33, 2  ;;  %v2991_v21 = vrot.slane %v2990_v49, 2 }
 0x2fd   : > { %v3083_v52 = vpop.f32.mrf.mxu0  ;;  %v3240_v4 = vpop.f32.mrf.mxu1  ;;  %8359 = vmatmul.mubr.msk.bf16.gmra.mxu0 %vm957_vm2, %v9856_v61  ;;  %8367 = vmatmul.mubr.msk.bf16.gmra.mxu1 %vm957_vm2, %v9856_v61 }
 0x2fe   : > { %v2815_v41 = vrot.slane %v2814_v55, 1  ;;  %v2972_v51 = vrot.slane %v2971_v50, 1  ;;  %v2835_v2 = vmax.f32 %v2833_v33, %v2834_v16  ;;  %v2992_v44 = vmax.f32 %v2990_v49, %v2991_v21  ;;  %4075 = vmatprep.mubr.bf16.mxu0 %v9026_v6  ;;  %4232 = vmatprep.mubr.bf16.mxu1 %v9026_v6 }
 0x2ff   : > { %v3152_v45 = vmax.f32 %v9940_v36, %v3083_v52  ;;  %v3309_v19 = vmax.f32 %v9942_v9, %v3240_v4  ;;  %v3085_v58 = vpop.f32.mrf.mxu0  ;;  %v3242_v7 = vpop.f32.mrf.mxu1 }
 0x300   : > { %v2816_v23 = vmax.f32 %v2814_v55, %v2815_v41  ;;  %v2973_v17 = vmax.f32 %v2971_v50, %v2972_v51  ;;  %v2836_v10 = vrot.slane %v2835_v2, 1  ;;  %v2993_v12 = vrot.slane %v2992_v44, 1 }
 0x301   : > { %v3173_v61 = vmax.f32 %v9950_v3, %v3085_v58  ;;  %v3330_v18 = vmax.f32 %v9952_v11, %v3242_v7  ;;  %v3087_v31 = vpop.f32.mrf.mxu0  ;;  %v3244_v8 = vpop.f32.mrf.mxu1  ;;  %v11301_v11 = vmax.f32 %v9774_v54, %v9784_v56 }
 0x302   : > { %v9971_v1 = vmax.f32 %v2168_v38, %v2816_v23  ;;  %v9976_v36 = vmax.f32 %v2325_v35, %v2973_v17  ;;  %v2837_v9 = vmax.f32 %v2835_v2, %v2836_v10  ;;  %v2994_v34 = vmax.f32 %v2992_v44, %v2993_v12 }
 0x303   : > { %v3153_v33 = vmax.f32 %v3077_v46, %v3087_v31  ;;  %v3310_v49 = vmax.f32 %v3234_v57, %v3244_v8  ;;  %v3089_v55 = vpop.f32.mrf.mxu0  ;;  %v3246_v3 = vpop.f32.mrf.mxu1 }
 0x304   : > { %v9981_v50 = vmax.f32 %v11301_v11, %v2837_v9  ;;  %v9986_v14 = vmax.f32 %v11302_v43, %v2994_v34  ;;  %v3174_v38 = vmax.f32 %v3079_v59, %v3089_v55  ;;  %v3331_v63 = vmax.f32 %v3236_v13, %v3246_v3 }
 0x305   : > { %v3093_v32 = vpop.f32.mrf.mxu0  ;;  %v3250_v35 = vpop.f32.mrf.mxu1  ;;  %8360 = vmatmul.mubr.msk.bf16.gmra.mxu0 %vm957_vm2, %v9878_v47  ;;  %8368 = vmatmul.mubr.msk.bf16.gmra.mxu1 %vm957_vm2, %v9878_v47 }
 0x306   : > { %v3154_v46 = vmax.f32 %v3152_v45, %v3093_v32  ;;  %v3311_v57 = vmax.f32 %v3309_v19, %v3250_v35  ;;  %4085 = vmatprep.mubr.bf16.mxu0 %v9026_v6  ;;  %4242 = vmatprep.mubr.bf16.mxu1 %v9026_v6 }
 0x307   : > { %v3095_v54 = vpop.f32.mrf.mxu0  ;;  %v3252_v25 = vpop.f32.mrf.mxu1 }
 0x308   : > { %v3175_v56 = vmax.f32 %v3173_v61, %v3095_v54  ;;  %v3332_v0 = vmax.f32 %v3330_v18, %v3252_v25 }
 0x309   : > { %v3097_v59 = vpop.f32.mrf.mxu0  ;;  %v3254_v13 = vpop.f32.mrf.mxu1 }
 0x30a   : > { %v3155_v16 = vmax.f32 %v3153_v33, %v3097_v59  ;;  %v3312_v21 = vmax.f32 %v3310_v49, %v3254_v13 }
 0x30b   : > { %v3099_v52 = vpop.f32.mrf.mxu0  ;;  %v3256_v4 = vpop.f32.mrf.mxu1 }
 0x30c   : > { %v3176_v41 = vmax.f32 %v3174_v38, %v3099_v52  ;;  %v3333_v51 = vmax.f32 %v3331_v63, %v3256_v4 }
 0x30d   : > { %v3103_v2 = vpop.f32.mrf.mxu0  ;;  %v3260_v47 = vpop.f32.mrf.mxu1  ;;  %8361 = vmatmul.mubr.msk.bf16.gmra.mxu0 %vm957_vm2, %v9898_v15  ;;  %8369 = vmatmul.mubr.msk.bf16.gmra.mxu1 %vm957_vm2, %v9898_v15 }
 0x30e   : > { %v3156_v44 = vmax.f32 %v3154_v46, %v3103_v2  ;;  %v3313_v45 = vmax.f32 %v3311_v57, %v3260_v47  ;;  %4095 = vmatprep.mubr.bf16.mxu0 %v9026_v6  ;;  %4252 = vmatprep.mubr.bf16.mxu1 %v9026_v6 }
 0x30f   : > { %v3105_v19 = vpop.f32.mrf.mxu0  ;;  %v3262_v58 = vpop.f32.mrf.mxu1 }
 0x310   : > { %v3177_v7 = vmax.f32 %v3175_v56, %v3105_v19  ;;  %v3334_v23 = vmax.f32 %v3332_v0, %v3262_v58 }
 0x311   : > { %v3107_v17 = vpop.f32.mrf.mxu0  ;;  %v3264_v10 = vpop.f32.mrf.mxu1 }
 0x312   : > { %v3157_v12 = vmax.f32 %v3155_v16, %v3107_v17  ;;  %v3314_v61 = vmax.f32 %v3312_v21, %v3264_v10 }
 0x313   : > { %v3109_v18 = vpop.f32.mrf.mxu0  ;;  %v3266_v31 = vpop.f32.mrf.mxu1 }
 0x314   : > { %v3178_v8 = vmax.f32 %v3176_v41, %v3109_v18  ;;  %v3335_v9 = vmax.f32 %v3333_v51, %v3266_v31 }
 0x315   : > { %v3113_v34 = vpop.f32.mrf.mxu0  ;;  %v3270_v15 = vpop.f32.mrf.mxu1  ;;  %8362 = vmatmul.mubr.msk.bf16.gmra.mxu0 %vm957_vm2, %v9906_v37  ;;  %8370 = vmatmul.mubr.msk.bf16.gmra.mxu1 %vm957_vm2, %v9906_v37 }
 0x316   : > { %v3158_v33 = vmax.f32 %v3156_v44, %v3113_v34  ;;  %v3315_v49 = vmax.f32 %v3313_v45, %v3270_v15  ;;  %4105 = vmatprep.mubr.bf16.mxu0 %v9026_v6  ;;  %4262 = vmatprep.mubr.bf16.mxu1 %v9026_v6 }
 0x317   : > { %v3115_v55 = vpop.f32.mrf.mxu0  ;;  %v3272_v3 = vpop.f32.mrf.mxu1 }
 0x318   : > { %v3179_v11 = vmax.f32 %v3177_v7, %v3115_v55  ;;  %v3336_v43 = vmax.f32 %v3334_v23, %v3272_v3 }
 0x319   : > { %v3117_v38 = vpop.f32.mrf.mxu0  ;;  %v3274_v63 = vpop.f32.mrf.mxu1 }
 0x31a   : > { %v3159_v32 = vmax.f32 %v3157_v12, %v3117_v38  ;;  %v3316_v35 = vmax.f32 %v3314_v61, %v3274_v63 }
 0x31b   : > { %v3119_v46 = vpop.f32.mrf.mxu0  ;;  %v3276_v57 = vpop.f32.mrf.mxu1 }
 0x31c   : > { %v3180_v54 = vmax.f32 %v3178_v8, %v3119_v46  ;;  %v3337_v25 = vmax.f32 %v3335_v9, %v3276_v57 }
 0x31d   : > { %v3123_v56 = vpop.f32.mrf.mxu0  ;;  %v3280_v37 = vpop.f32.mrf.mxu1  ;;  %8363 = vmatmul.mubr.msk.bf16.gmra.mxu0 %vm957_vm2, %v9915_v40  ;;  %8371 = vmatmul.mubr.msk.bf16.gmra.mxu1 %vm957_vm2, %v9915_v40 }
 0x31e   : > { %v3160_v0 = vmax.f32 %v3158_v33, %v3123_v56  ;;  %v3317_v59 = vmax.f32 %v3315_v49, %v3280_v37  ;;  %4115 = vmatprep.mubr.bf16.mxu0 %v9026_v6  ;;  %4272 = vmatprep.mubr.bf16.mxu1 %v9026_v6 }
 0x31f   : > { %v3125_v13 = vpop.f32.mrf.mxu0  ;;  %v3282_v16 = vpop.f32.mrf.mxu1 }
 0x320   : > { %v3181_v21 = vmax.f32 %v3179_v11, %v3125_v13  ;;  %v3338_v52 = vmax.f32 %v3336_v43, %v3282_v16 }
 0x321   : > { %v3127_v4 = vpop.f32.mrf.mxu0  ;;  %v3284_v41 = vpop.f32.mrf.mxu1 }
 0x322   : > { %v3161_v51 = vmax.f32 %v3159_v32, %v3127_v4  ;;  %v3318_v2 = vmax.f32 %v3316_v35, %v3284_v41 }
 0x323   : > { %v3129_v47 = vpop.f32.mrf.mxu0  ;;  %v3286_v44 = vpop.f32.mrf.mxu1 }
 0x324   : > { %v3182_v45 = vmax.f32 %v3180_v54, %v3129_v47  ;;  %v3339_v19 = vmax.f32 %v3337_v25, %v3286_v44  ;;  %v10024_v25 = vpop.trf.xlu1 }
 0x325   : > { %v3133_v58 = vpop.f32.mrf.mxu0  ;;  %v3290_v40 = vpop.f32.mrf.mxu1  ;;  %8364 = vmatmul.mubr.msk.bf16.gmra.mxu0 %vm957_vm2, %v9924_v60  ;;  %8372 = vmatmul.mubr.msk.bf16.gmra.mxu1 %vm957_vm2, %v9924_v60 }
 0x326   : > { %v3162_v7 = vmax.f32 %v3160_v0, %v3133_v58  ;;  %v3319_v23 = vmax.f32 %v3317_v59, %v3290_v40  ;;  %4125 = vmatprep.mubr.bf16.mxu0 %v9026_v6  ;;  %4282 = vmatprep.mubr.bf16.mxu1 %v9026_v6 }
 0x327   : > { %v3135_v17 = vpop.f32.mrf.mxu0  ;;  %v3292_v10 = vpop.f32.mrf.mxu1 }
 0x328   : > { %v3183_v12 = vmax.f32 %v3181_v21, %v3135_v17  ;;  %v3340_v61 = vmax.f32 %v3338_v52, %v3292_v10 }
 0x329   : > { %v3137_v18 = vpop.f32.mrf.mxu0  ;;  %v3294_v31 = vpop.f32.mrf.mxu1 }
 0x32a   : > { %v3163_v8 = vmax.f32 %v3161_v51, %v3137_v18  ;;  %v3320_v9 = vmax.f32 %v3318_v2, %v3294_v31 }
 0x32b   : > { %v3139_v34 = vpop.f32.mrf.mxu0  ;;  %v3296_v15 = vpop.f32.mrf.mxu1 }
 0x32c   : > { %v3184_v33 = vmax.f32 %v3182_v45, %v3139_v34  ;;  %v3341_v49 = vmax.f32 %v3339_v19, %v3296_v15 }
 0x32d   : > { %v3143_v55 = vpop.f32.mrf.mxu0  ;;  %v3300_v60 = vpop.f32.mrf.mxu1  ;;  %8365 = vmatmul.mubr.msk.bf16.gmra.mxu0 %vm957_vm2, %v9932_v62  ;;  %8373 = vmatmul.mubr.msk.bf16.gmra.mxu1 %vm957_vm2, %v9932_v62 }
 0x32e   : > { %v3164_v3 = vmax.f32 %v3162_v7, %v3143_v55  ;;  %v3321_v11 = vmax.f32 %v3319_v23, %v3300_v60  ;;  %4411 = vmatprep.mubr.bf16.mxu0 %v9026_v6  ;;  %4568 = vmatprep.mubr.bf16.mxu1 %v9026_v6 }
 0x32f   : > { %v3145_v43 = vpop.f32.mrf.mxu0  ;;  %v3302_v38 = vpop.f32.mrf.mxu1 }
 0x330   : > { %v3185_v63 = vmax.f32 %v3183_v12, %v3145_v43  ;;  %v3342_v32 = vmax.f32 %v3340_v61, %v3302_v38  ;;  %v10048_v61 = vpop.trf.xlu1 }
 0x331   : > { %v3147_v35 = vpop.f32.mrf.mxu0  ;;  %v3304_v46 = vpop.f32.mrf.mxu1 }
 0x332   : > { %v3165_v57 = vmax.f32 %v3163_v8, %v3147_v35  ;;  %v3322_v54 = vmax.f32 %v3320_v9, %v3304_v46 }
 0x333   : > { %v3149_v56 = vpop.f32.mrf.mxu0  ;;  %v3306_v37 = vpop.f32.mrf.mxu1 }
 0x334   : > { %v3166_v0 = vmax.f32 %v3164_v3, %v3165_v57  ;;  %v3323_v62 = vmax.f32 %v3321_v11, %v3322_v54  ;;  %v3186_v59 = vmax.f32 %v3184_v33, %v3149_v56  ;;  %v3343_v13 = vmax.f32 %v3341_v49, %v3306_v37 }
 0x335   : > { %v10026_v16 = vpop.f32.mrf.mxu0  ;;  %v10028_v21 = vpop.f32.mrf.mxu1  ;;  %8375 = vmatmul.mubr.msk.bf16.vlgmr.msra.gmra.mxu0 %vm957_vm2, %v10024_v25  ;;  %8383 = vmatmul.mubr.msk.bf16.vlgmr.msra.gmra.mxu1 %vm957_vm2, %v10024_v25 }
 0x336   : > { %v3167_v52 = vrot.slane %v3166_v0, 4  ;;  %v3324_v4 = vrot.slane %v3323_v62, 4  ;;  %v3187_v41 = vmax.f32 %v3185_v63, %v3186_v59  ;;  %v3344_v51 = vmax.f32 %v3342_v32, %v3343_v13  ;;  %4708 = vmatpush1.bf16.msra.mxu0 %v9261_v24  ;;  %4865 = vmatpush1.bf16.msra.mxu1 %v9263_v26 }
 0x337   : > { %v10036_v2 = vpop.f32.mrf.mxu0  ;;  %v10038_v47 = vpop.f32.mrf.mxu1  ;;  %4421 = vmatprep.mubr.bf16.mxu0 %v9026_v6  ;;  %4578 = vmatprep.mubr.bf16.mxu1 %v9026_v6 }
 0x338   : > { %v3168_v44 = vmax.f32 %v3166_v0, %v3167_v52  ;;  %v3325_v45 = vmax.f32 %v3323_v62, %v3324_v4  ;;  %v3188_v19 = vrot.slane %v3187_v41, 4  ;;  %v3345_v58 = vrot.slane %v3344_v51, 4  ;;  %5063 = vmatprep.subr.bf16.mxu0 %v9265_v27  ;;  %5220 = vmatprep.subr.bf16.mxu1 %v9267_v28  ;;  %v10072_v52 = vpop.trf.xlu1 }
 0x339   : > { %v10044_v40 = vpop.f32.mrf.mxu0  ;;  %v10046_v7 = vpop.f32.mrf.mxu1 }
 0x33a   : > { %v3169_v23 = vrot.slane %v3168_v44, 2  ;;  %v3326_v17 = vrot.slane %v3325_v45, 2  ;;  %v3189_v10 = vmax.f32 %v3187_v41, %v3188_v19  ;;  %v3346_v12 = vmax.f32 %v3344_v51, %v3345_v58 }
 0x33b   : > { %v3393_v18 = vpop.f32.mrf.mxu0  ;;  %v3550_v31 = vpop.f32.mrf.mxu1 }
 0x33c   : > { %v3170_v8 = vmax.f32 %v3168_v44, %v3169_v23  ;;  %v3327_v9 = vmax.f32 %v3325_v45, %v3326_v17  ;;  %v3190_v34 = vrot.slane %v3189_v10, 2  ;;  %v3347_v15 = vrot.slane %v3346_v12, 2 }
 0x33d   : > { %v3397_v33 = vpop.f32.mrf.mxu0  ;;  %v3554_v49 = vpop.f32.mrf.mxu1  ;;  %8376 = vmatmul.mubr.msk.bf16.gmra.mxu0 %vm957_vm2, %v10048_v61  ;;  %8384 = vmatmul.mubr.msk.bf16.gmra.mxu1 %vm957_vm2, %v10048_v61 }
 0x33e   : > { %v3171_v55 = vrot.slane %v3170_v8, 1  ;;  %v3328_v60 = vrot.slane %v3327_v9, 1  ;;  %v3191_v3 = vmax.f32 %v3189_v10, %v3190_v34  ;;  %v3348_v11 = vmax.f32 %v3346_v12, %v3347_v15  ;;  %4431 = vmatprep.mubr.bf16.mxu0 %v9026_v6  ;;  %4588 = vmatprep.mubr.bf16.mxu1 %v9026_v6  ;;  %v10086_v15 = vpop.trf.xlu1 }
 0x33f   : > { %v3466_v43 = vmax.f32 %v10026_v16, %v3397_v33  ;;  %v3623_v38 = vmax.f32 %v10028_v21, %v3554_v49  ;;  %v3399_v63 = vpop.f32.mrf.mxu0  ;;  %v3556_v32 = vpop.f32.mrf.mxu1 }
 0x340   : > { %v10058_v35 = vmax.f32 %v3170_v8, %v3171_v55  ;;  %v10060_v46 = vmax.f32 %v3327_v9, %v3328_v60  ;;  %v3192_v57 = vrot.slane %v3191_v3, 1  ;;  %v3349_v54 = vrot.slane %v3348_v11, 1 }
 0x341   : > { %v3487_v56 = vmax.f32 %v10036_v2, %v3399_v63  ;;  %v3644_v37 = vmax.f32 %v10038_v47, %v3556_v32  ;;  %v3401_v0 = vpop.f32.mrf.mxu0  ;;  %v3558_v62 = vpop.f32.mrf.mxu1 }
 0x342   : > { %v3194_v59 = vmax.f32 %v9871_v42, %v10058_v35  ;;  %v3351_v13 = vmax.f32 %v9876_v39, %v10060_v46  ;;  %v10068_v16 = vmax.f32 %v3191_v3, %v3192_v57  ;;  %v10070_v21 = vmax.f32 %v3348_v11, %v3349_v54 }
 0x343   : > { %v3467_v4 = vmax.f32 %v10044_v40, %v3401_v0  ;;  %v3624_v41 = vmax.f32 %v10046_v7, %v3558_v62  ;;  %v3403_v51 = vpop.f32.mrf.mxu0  ;;  %v3560_v2 = vpop.f32.mrf.mxu1 }
 0x344   : > { %v3195_v47 = vmax.f32 %v9885_v53, %v10068_v16  ;;  %v3352_v44 = vmax.f32 %v9890_v48, %v10070_v21  ;;  %v3488_v45 = vmax.f32 %v3393_v18, %v3403_v51  ;;  %v3645_v19 = vmax.f32 %v3550_v31, %v3560_v2 }
 0x345   : > { %v3407_v58 = vpop.f32.mrf.mxu0  ;;  %v3564_v23 = vpop.f32.mrf.mxu1  ;;  %8377 = vmatmul.mubr.msk.bf16.gmra.mxu0 %vm957_vm2, %v10072_v52  ;;  %8385 = vmatmul.mubr.msk.bf16.gmra.mxu1 %vm957_vm2, %v10072_v52 }
 0x346   : > { %v3468_v40 = vmax.f32 %v3466_v43, %v3407_v58  ;;  %v3625_v7 = vmax.f32 %v3623_v38, %v3564_v23  ;;  %4441 = vmatprep.mubr.bf16.mxu0 %v9026_v6  ;;  %4598 = vmatprep.mubr.bf16.mxu1 %v9026_v6 }
 0x347   : > { %v3409_v17 = vpop.f32.mrf.mxu0  ;;  %v3566_v10 = vpop.f32.mrf.mxu1 }
 0x348   : > { %v3489_v12 = vmax.f32 %v3487_v56, %v3409_v17  ;;  %v3646_v8 = vmax.f32 %v3644_v37, %v3566_v10 }
 0x349   : > { %v3411_v18 = vpop.f32.mrf.mxu0  ;;  %v3568_v31 = vpop.f32.mrf.mxu1 }
 0x34a   : > { %v3469_v9 = vmax.f32 %v3467_v4, %v3411_v18  ;;  %v3626_v34 = vmax.f32 %v3624_v41, %v3568_v31  ;;  %v10094_v4 = vpop.trf.xlu1  ;;  %v8440_v41 = vld [vmem:[%s9253_s22 + $0xe] sm:$0x3]  ;;  %s11326_s22 = sld [smem:[#allocation12_spill]] }
 0x34b   : > { %v3413_v33 = vpop.f32.mrf.mxu0  ;;  %v3570_v49 = vpop.f32.mrf.mxu1  ;;  %5679 = vxpose.xlu1.c.b16.start.end [1/1] (short) %v8440_v41, 128 }
 0x34c   : > { %v3490_v55 = vmax.f32 %v3488_v45, %v3413_v33  ;;  %v3647_v60 = vmax.f32 %v3645_v19, %v3570_v49 }
 0x34d   : > { %v3417_v3 = vpop.f32.mrf.mxu0  ;;  %v3574_v11 = vpop.f32.mrf.mxu1  ;;  %8378 = vmatmul.mubr.msk.bf16.gmra.mxu0 %vm957_vm2, %v10086_v15  ;;  %8386 = vmatmul.mubr.msk.bf16.gmra.mxu1 %vm957_vm2, %v10086_v15 }
 0x34e   : > { %v3470_v43 = vmax.f32 %v3468_v40, %v3417_v3  ;;  %v3627_v38 = vmax.f32 %v3625_v7, %v3574_v11  ;;  %4451 = vmatprep.mubr.bf16.mxu0 %v9026_v6  ;;  %4608 = vmatprep.mubr.bf16.mxu1 %v9026_v6  ;;  %v10104_v33 = vpop.trf.xlu1 }
 0x34f   : > { %v3419_v63 = vpop.f32.mrf.mxu0  ;;  %v3576_v32 = vpop.f32.mrf.mxu1  ;;  %8920 = vset.pattern.permute.xlu1 %v9026_v6 }
 0x350   : > { %v3491_v57 = vmax.f32 %v3489_v12, %v3419_v63  ;;  %v3648_v54 = vmax.f32 %v3646_v8, %v3576_v32 }
 0x351   : > { %v3421_v56 = vpop.f32.mrf.mxu0  ;;  %v3578_v37 = vpop.f32.mrf.mxu1 }
 0x352   : > { %v3471_v0 = vmax.f32 %v3469_v9, %v3421_v56  ;;  %v3628_v62 = vmax.f32 %v3626_v34, %v3578_v37 }
 0x353   : > { %v3423_v51 = vpop.f32.mrf.mxu0  ;;  %v3580_v2 = vpop.f32.mrf.mxu1 }
 0x354   : > { %v3492_v45 = vmax.f32 %v3490_v55, %v3423_v51  ;;  %v3649_v19 = vmax.f32 %v3647_v60, %v3580_v2  ;;  %v10112_v51 = vpop.trf.xlu1 }
 0x355   : > { %v3427_v58 = vpop.f32.mrf.mxu0  ;;  %v3584_v23 = vpop.f32.mrf.mxu1  ;;  %8379 = vmatmul.mubr.msk.bf16.gmra.mxu0 %vm957_vm2, %v10094_v4  ;;  %8387 = vmatmul.mubr.msk.bf16.gmra.mxu1 %vm957_vm2, %v10094_v4 }
 0x356   : > { %v3472_v40 = vmax.f32 %v3470_v43, %v3427_v58  ;;  %v3629_v7 = vmax.f32 %v3627_v38, %v3584_v23  ;;  %4461 = vmatprep.mubr.bf16.mxu0 %v9026_v6  ;;  %4618 = vmatprep.mubr.bf16.mxu1 %v9026_v6 }
 0x357   : > { %v3429_v17 = vpop.f32.mrf.mxu0  ;;  %v3586_v10 = vpop.f32.mrf.mxu1 }
 0x358   : > { %v3493_v12 = vmax.f32 %v3491_v57, %v3429_v17  ;;  %v3650_v8 = vmax.f32 %v3648_v54, %v3586_v10 }
 0x359   : > { %v3431_v18 = vpop.f32.mrf.mxu0  ;;  %v3588_v31 = vpop.f32.mrf.mxu1 }
 0x35a   : > { %v3473_v9 = vmax.f32 %v3471_v0, %v3431_v18  ;;  %v3630_v34 = vmax.f32 %v3628_v62, %v3588_v31 }
 0x35b   : > { %v3433_v49 = vpop.f32.mrf.mxu0  ;;  %v3590_v55 = vpop.f32.mrf.mxu1 }
 0x35c   : > { %v3494_v60 = vmax.f32 %v3492_v45, %v3433_v49  ;;  %v3651_v3 = vmax.f32 %v3649_v19, %v3590_v55  ;;  %v10120_v55 = vpop.trf.xlu1 }
 0x35d   : > { %v3437_v11 = vpop.f32.mrf.mxu0  ;;  %v3594_v43 = vpop.f32.mrf.mxu1  ;;  %8380 = vmatmul.mubr.msk.bf16.gmra.mxu0 %vm957_vm2, %v10104_v33  ;;  %8388 = vmatmul.mubr.msk.bf16.gmra.mxu1 %vm957_vm2, %v10104_v33 }
 0x35e   : > { %v3474_v38 = vmax.f32 %v3472_v40, %v3437_v11  ;;  %v3631_v63 = vmax.f32 %v3629_v7, %v3594_v43  ;;  %4471 = vmatprep.mubr.bf16.mxu0 %v9026_v6  ;;  %4628 = vmatprep.mubr.bf16.mxu1 %v9026_v6 }
 0x35f   : > { %v3439_v32 = vpop.f32.mrf.mxu0  ;;  %v3596_v57 = vpop.f32.mrf.mxu1 }
 0x360   : > { %v3495_v54 = vmax.f32 %v3493_v12, %v3439_v32  ;;  %v3652_v56 = vmax.f32 %v3650_v8, %v3596_v57 }
 0x361   : > { %v3441_v37 = vpop.f32.mrf.mxu0  ;;  %v3598_v0 = vpop.f32.mrf.mxu1 }
 0x362   : > { %v3475_v62 = vmax.f32 %v3473_v9, %v3441_v37  ;;  %v3632_v41 = vmax.f32 %v3630_v34, %v3598_v0 }
 0x363   : > { %v3443_v2 = vpop.f32.mrf.mxu0  ;;  %v3600_v45 = vpop.f32.mrf.mxu1 }
 0x364   : > { %v3496_v19 = vmax.f32 %v3494_v60, %v3443_v2  ;;  %v3653_v58 = vmax.f32 %v3651_v3, %v3600_v45 }
 0x365   : > { %v3447_v23 = vpop.f32.mrf.mxu0  ;;  %v3604_v40 = vpop.f32.mrf.mxu1  ;;  %8381 = vmatmul.mubr.msk.bf16.gmra.mxu0 %vm957_vm2, %v10112_v51  ;;  %8389 = vmatmul.mubr.msk.bf16.gmra.mxu1 %vm957_vm2, %v10112_v51 }
 0x366   : > { %v3476_v7 = vmax.f32 %v3474_v38, %v3447_v23  ;;  %v3633_v17 = vmax.f32 %v3631_v63, %v3604_v40  ;;  %4481 = vmatprep.mubr.bf16.mxu0 %v9026_v6  ;;  %4638 = vmatprep.mubr.bf16.mxu1 %v9026_v6 }
 0x367   : > { %v3449_v10 = vpop.f32.mrf.mxu0  ;;  %v3606_v12 = vpop.f32.mrf.mxu1 }
 0x368   : > { %v3497_v8 = vmax.f32 %v3495_v54, %v3449_v10  ;;  %v3654_v18 = vmax.f32 %v3652_v56, %v3606_v12 }
 0x369   : > { %v3451_v31 = vpop.f32.mrf.mxu0  ;;  %v3608_v9 = vpop.f32.mrf.mxu1 }
 0x36a   : > { %v3477_v34 = vmax.f32 %v3475_v62, %v3451_v31  ;;  %v3634_v49 = vmax.f32 %v3632_v41, %v3608_v9 }
 0x36b   : > { %v3453_v60 = vpop.f32.mrf.mxu0  ;;  %v3610_v3 = vpop.f32.mrf.mxu1 }
 0x36c   : > { %v3498_v11 = vmax.f32 %v3496_v19, %v3453_v60  ;;  %v3655_v43 = vmax.f32 %v3653_v58, %v3610_v3 }
 0x36d   : > { %v3457_v38 = vpop.f32.mrf.mxu0  ;;  %v3614_v63 = vpop.f32.mrf.mxu1  ;;  %8382 = vmatmul.mubr.msk.bf16.gmra.mxu0 %vm957_vm2, %v10120_v55  ;;  %8390 = vmatmul.mubr.msk.bf16.gmra.mxu1 %vm957_vm2, %v10120_v55 }
 0x36e   : > { %v3478_v32 = vmax.f32 %v3476_v7, %v3457_v38  ;;  %v3635_v57 = vmax.f32 %v3633_v17, %v3614_v63  ;;  %4725 = vmatprep.mubr.bf16.mxu0 %v9026_v6  ;;  %4882 = vmatprep.mubr.bf16.mxu1 %v9026_v6 }
 0x36f   : > { %v3459_v54 = vpop.f32.mrf.mxu0  ;;  %v3616_v56 = vpop.f32.mrf.mxu1 }
 0x370   : > { %v3499_v37 = vmax.f32 %v3497_v8, %v3459_v54  ;;  %v3656_v0 = vmax.f32 %v3654_v18, %v3616_v56 }
 0x371   : > { %v3461_v62 = vpop.f32.mrf.mxu0  ;;  %v3618_v41 = vpop.f32.mrf.mxu1 }
 0x372   : > { %v3479_v2 = vmax.f32 %v3477_v34, %v3461_v62  ;;  %v3636_v45 = vmax.f32 %v3634_v49, %v3618_v41 }
 0x373   : > { %v3463_v19 = vpop.f32.mrf.mxu0  ;;  %v3620_v58 = vpop.f32.mrf.mxu1 }
 0x374   : > { %v3480_v23 = vmax.f32 %v3478_v32, %v3479_v2  ;;  %v3637_v40 = vmax.f32 %v3635_v57, %v3636_v45  ;;  %v3500_v10 = vmax.f32 %v3498_v11, %v3463_v19  ;;  %v3657_v12 = vmax.f32 %v3655_v43, %v3620_v58 }
 0x375   : > { %v10128_v7 = vpop.f32.mrf.mxu0  ;;  %v10130_v17 = vpop.f32.mrf.mxu1  ;;  %8391 = vmatmul.mubr.msk.bf16.vlgmr.msra.gmra.mxu0 %vm957_vm2, %v10024_v25  ;;  %8399 = vmatmul.mubr.msk.bf16.vlgmr.msra.gmra.mxu1 %vm957_vm2, %v10024_v25 }
 0x376   : > { %v3481_v8 = vrot.slane %v3480_v23, 4  ;;  %v3638_v18 = vrot.slane %v3637_v40, 4  ;;  %v3501_v31 = vmax.f32 %v3499_v37, %v3500_v10  ;;  %v3658_v9 = vmax.f32 %v3656_v0, %v3657_v12  ;;  %5064 = vmatpush1.bf16.msra.mxu0 %v9257_v20  ;;  %5221 = vmatpush1.bf16.msra.mxu1 %v9259_v22 }
 0x377   : > { %v10138_v34 = vpop.f32.mrf.mxu0  ;;  %v10140_v49 = vpop.f32.mrf.mxu1  ;;  %4735 = vmatprep.mubr.bf16.mxu0 %v9026_v6  ;;  %4892 = vmatprep.mubr.bf16.mxu1 %v9026_v6 }
 0x378   : > { %v3482_v60 = vmax.f32 %v3480_v23, %v3481_v8  ;;  %v3639_v3 = vmax.f32 %v3637_v40, %v3638_v18  ;;  %v3502_v11 = vrot.slane %v3501_v31, 4  ;;  %v3659_v25 = vrot.slane %v3658_v9, 4  ;;  %5377 = vmatprep.subr.bf16.mxu0 %v9269_v29  ;;  %5534 = vmatprep.subr.bf16.mxu1 %v9271_v30 }
 0x379   : > { %v3747_v43 = vpop.f32.mrf.mxu0  ;;  %v3904_v38 = vpop.f32.mrf.mxu1 }
 0x37a   : > { %v3483_v63 = vrot.slane %v3482_v60, 2  ;;  %v3640_v32 = vrot.slane %v3639_v3, 2  ;;  %v3503_v57 = vmax.f32 %v3501_v31, %v3502_v11  ;;  %v3660_v54 = vmax.f32 %v3658_v9, %v3659_v25 }
 0x37b   : > { %v3749_v56 = vpop.f32.mrf.mxu0  ;;  %v3906_v37 = vpop.f32.mrf.mxu1 }
 0x37c   : > { %v3484_v0 = vmax.f32 %v3482_v60, %v3483_v63  ;;  %v3641_v62 = vmax.f32 %v3639_v3, %v3640_v32  ;;  %v3504_v41 = vrot.slane %v3503_v57, 2  ;;  %v3661_v2 = vrot.slane %v3660_v54, 2 }
 0x37d   : > { %v3753_v45 = vpop.f32.mrf.mxu0  ;;  %v3910_v19 = vpop.f32.mrf.mxu1  ;;  %8392 = vmatmul.mubr.msk.bf16.gmra.mxu0 %vm957_vm2, %v10048_v61  ;;  %8400 = vmatmul.mubr.msk.bf16.gmra.mxu1 %vm957_vm2, %v10048_v61 }
 0x37e   : > { %v3485_v58 = vrot.slane %v3484_v0, 1  ;;  %v3642_v23 = vrot.slane %v3641_v62, 1  ;;  %v3505_v40 = vmax.f32 %v3503_v57, %v3504_v41  ;;  %v3662_v10 = vmax.f32 %v3660_v54, %v3661_v2  ;;  %4745 = vmatprep.mubr.bf16.mxu0 %v9026_v6  ;;  %4902 = vmatprep.mubr.bf16.mxu1 %v9026_v6 }
 0x37f   : > { %v3822_v12 = vmax.f32 %v10128_v7, %v3753_v45  ;;  %v3979_v8 = vmax.f32 %v10130_v17, %v3910_v19  ;;  %v3755_v18 = vpop.f32.mrf.mxu0  ;;  %v3912_v31 = vpop.f32.mrf.mxu1 }
 0x380   : > { %v10154_v9 = vmax.f32 %v3484_v0, %v3485_v58  ;;  %v10156_v60 = vmax.f32 %v3641_v62, %v3642_v23  ;;  %v3506_v3 = vrot.slane %v3505_v40, 1  ;;  %v3663_v61 = vrot.slane %v3662_v10, 1 }
 0x381   : > { %v3843_v11 = vmax.f32 %v10138_v34, %v3755_v18  ;;  %v4000_v25 = vmax.f32 %v10140_v49, %v3912_v31  ;;  %v3757_v63 = vpop.f32.mrf.mxu0  ;;  %v3914_v32 = vpop.f32.mrf.mxu1 }
 0x382   : > { %v3508_v57 = vmax.f32 %v9971_v1, %v10154_v9  ;;  %v3665_v7 = vmax.f32 %v9976_v36, %v10156_v60  ;;  %v10164_v17 = vmax.f32 %v3505_v40, %v3506_v3  ;;  %v10166_v54 = vmax.f32 %v3662_v10, %v3663_v61 }
 0x383   : > { %v3823_v0 = vmax.f32 %v3747_v43, %v3757_v63  ;;  %v3980_v62 = vmax.f32 %v3904_v38, %v3914_v32  ;;  %v3759_v41 = vpop.f32.mrf.mxu0  ;;  %v3916_v2 = vpop.f32.mrf.mxu1 }
 0x384   : > { %v3509_v34 = vmax.f32 %v9981_v50, %v10164_v17  ;;  %v3844_v45 = vmax.f32 %v3749_v56, %v3759_v41  ;;  %v4001_v19 = vmax.f32 %v3906_v37, %v3916_v2  ;;  %v11303_v1 = vmax.f32 %v9986_v14, %v10166_v54 }
 0x385   : > { %v3763_v58 = vpop.f32.mrf.mxu0  ;;  %v3920_v23 = vpop.f32.mrf.mxu1  ;;  %8393 = vmatmul.mubr.msk.bf16.gmra.mxu0 %vm957_vm2, %v10072_v52  ;;  %8401 = vmatmul.mubr.msk.bf16.gmra.mxu1 %vm957_vm2, %v10072_v52 }
 0x386   : > { %v3824_v43 = vmax.f32 %v3822_v12, %v3763_v58  ;;  %v3981_v38 = vmax.f32 %v3979_v8, %v3920_v23  ;;  %4755 = vmatprep.mubr.bf16.mxu0 %v9026_v6  ;;  %4912 = vmatprep.mubr.bf16.mxu1 %v9026_v6 }
 0x387   : > { %v3765_v40 = vpop.f32.mrf.mxu0  ;;  %v3922_v10 = vpop.f32.mrf.mxu1 }
 0x388   : > { %v3845_v18 = vmax.f32 %v3843_v11, %v3765_v40  ;;  %v4002_v31 = vmax.f32 %v4000_v25, %v3922_v10 }
 0x389   : > { %v3767_v56 = vpop.f32.mrf.mxu0  ;;  %v3924_v37 = vpop.f32.mrf.mxu1 }
 0x38a   : > { %v3825_v3 = vmax.f32 %v3823_v0, %v3767_v56  ;;  %v3982_v61 = vmax.f32 %v3980_v62, %v3924_v37 }
 0x38b   : > { %v3769_v63 = vpop.f32.mrf.mxu0  ;;  %v3926_v32 = vpop.f32.mrf.mxu1 }
 0x38c   : > { %v3846_v41 = vmax.f32 %v3844_v45, %v3769_v63  ;;  %v4003_v2 = vmax.f32 %v4001_v19, %v3926_v32 }
 0x38d   : > { %v3773_v49 = vpop.f32.mrf.mxu0  ;;  %v3930_v52 = vpop.f32.mrf.mxu1  ;;  %8394 = vmatmul.mubr.msk.bf16.gmra.mxu0 %vm957_vm2, %v10086_v15  ;;  %8402 = vmatmul.mubr.msk.bf16.gmra.mxu1 %vm957_vm2, %v10086_v15 }
 0x38e   : > { %v3826_v12 = vmax.f32 %v3824_v43, %v3773_v49  ;;  %v3983_v8 = vmax.f32 %v3981_v38, %v3930_v52  ;;  %4765 = vmatprep.mubr.bf16.mxu0 %v9026_v6  ;;  %4922 = vmatprep.mubr.bf16.mxu1 %v9026_v6 }
 0x38f   : > { %v3775_v11 = vpop.f32.mrf.mxu0  ;;  %v3932_v25 = vpop.f32.mrf.mxu1 }
 0x390   : > { %v3847_v0 = vmax.f32 %v3845_v18, %v3775_v11  ;;  %v4004_v62 = vmax.f32 %v4002_v31, %v3932_v25 }
 0x391   : > { %v3777_v45 = vpop.f32.mrf.mxu0  ;;  %v3934_v19 = vpop.f32.mrf.mxu1 }
 0x392   : > { %v3827_v58 = vmax.f32 %v3825_v3, %v3777_v45  ;;  %v3984_v23 = vmax.f32 %v3982_v61, %v3934_v19 }
 0x393   : > { %v3779_v40 = vpop.f32.mrf.mxu0  ;;  %v3936_v10 = vpop.f32.mrf.mxu1 }
 0x394   : > { %v3848_v56 = vmax.f32 %v3846_v41, %v3779_v40  ;;  %v4005_v37 = vmax.f32 %v4003_v2, %v3936_v10 }
 0x395   : > { %v3783_v63 = vpop.f32.mrf.mxu0  ;;  %v3940_v15 = vpop.f32.mrf.mxu1  ;;  %8395 = vmatmul.mubr.msk.bf16.gmra.mxu0 %vm957_vm2, %v10094_v4  ;;  %8403 = vmatmul.mubr.msk.bf16.gmra.mxu1 %vm957_vm2, %v10094_v4 }
 0x396   : > { %v3828_v49 = vmax.f32 %v3826_v12, %v3783_v63  ;;  %v3985_v43 = vmax.f32 %v3983_v8, %v3940_v15  ;;  %4775 = vmatprep.mubr.bf16.mxu0 %v9026_v6  ;;  %4932 = vmatprep.mubr.bf16.mxu1 %v9026_v6 }
 0x397   : > { %v3785_v38 = vpop.f32.mrf.mxu0  ;;  %v3942_v18 = vpop.f32.mrf.mxu1 }
 0x398   : > { %v3849_v31 = vmax.f32 %v3847_v0, %v3785_v38  ;;  %v4006_v3 = vmax.f32 %v4004_v62, %v3942_v18 }
 0x399   : > { %v3787_v61 = vpop.f32.mrf.mxu0  ;;  %v3944_v32 = vpop.f32.mrf.mxu1 }
 0x39a   : > { %v3829_v41 = vmax.f32 %v3827_v58, %v3787_v61  ;;  %v3986_v2 = vmax.f32 %v3984_v23, %v3944_v32 }
 0x39b   : > { %v3789_v52 = vpop.f32.mrf.mxu0  ;;  %v3946_v11 = vpop.f32.mrf.mxu1 }
 0x39c   : > { %v3850_v25 = vmax.f32 %v3848_v56, %v3789_v52  ;;  %v4007_v45 = vmax.f32 %v4005_v37, %v3946_v11 }
 0x39d   : > { %v3793_v19 = vpop.f32.mrf.mxu0  ;;  %v3950_v4 = vpop.f32.mrf.mxu1  ;;  %8396 = vmatmul.mubr.msk.bf16.gmra.mxu0 %vm957_vm2, %v10104_v33  ;;  %8404 = vmatmul.mubr.msk.bf16.gmra.mxu1 %vm957_vm2, %v10104_v33 }
 0x39e   : > { %v3830_v12 = vmax.f32 %v3828_v49, %v3793_v19  ;;  %v3987_v8 = vmax.f32 %v3985_v43, %v3950_v4  ;;  %4785 = vmatprep.mubr.bf16.mxu0 %v9026_v6  ;;  %4942 = vmatprep.mubr.bf16.mxu1 %v9026_v6 }
 0x39f   : > { %v3795_v0 = vpop.f32.mrf.mxu0  ;;  %v3952_v62 = vpop.f32.mrf.mxu1 }
 0x3a0   : > { %v3851_v58 = vmax.f32 %v3849_v31, %v3795_v0  ;;  %v4008_v23 = vmax.f32 %v4006_v3, %v3952_v62 }
 0x3a1   : > { %v3797_v40 = vpop.f32.mrf.mxu0  ;;  %v3954_v10 = vpop.f32.mrf.mxu1 }
 0x3a2   : > { %v3831_v56 = vmax.f32 %v3829_v41, %v3797_v40  ;;  %v3988_v37 = vmax.f32 %v3986_v2, %v3954_v10 }
 0x3a3   : > { %v3799_v63 = vpop.f32.mrf.mxu0  ;;  %v3956_v15 = vpop.f32.mrf.mxu1 }
 0x3a4   : > { %v3852_v38 = vmax.f32 %v3850_v25, %v3799_v63  ;;  %v4009_v18 = vmax.f32 %v4007_v45, %v3956_v15 }
 0x3a5   : > { %v3803_v61 = vpop.f32.mrf.mxu0  ;;  %v3960_v33 = vpop.f32.mrf.mxu1  ;;  %8397 = vmatmul.mubr.msk.bf16.gmra.mxu0 %vm957_vm2, %v10112_v51  ;;  %8405 = vmatmul.mubr.msk.bf16.gmra.mxu1 %vm957_vm2, %v10112_v51 }
 0x3a6   : > { %v3832_v49 = vmax.f32 %v3830_v12, %v3803_v61  ;;  %v3989_v43 = vmax.f32 %v3987_v8, %v3960_v33  ;;  %4795 = vmatprep.mubr.bf16.mxu0 %v9026_v6  ;;  %4952 = vmatprep.mubr.bf16.mxu1 %v9026_v6 }
 0x3a7   : > { %v3805_v31 = vpop.f32.mrf.mxu0  ;;  %v3962_v3 = vpop.f32.mrf.mxu1 }
 0x3a8   : > { %v3853_v32 = vmax.f32 %v3851_v58, %v3805_v31  ;;  %v4010_v41 = vmax.f32 %v4008_v23, %v3962_v3 }
 0x3a9   : > { %v3807_v2 = vpop.f32.mrf.mxu0  ;;  %v3964_v52 = vpop.f32.mrf.mxu1 }
 0x3aa   : > { %v3833_v11 = vmax.f32 %v3831_v56, %v3807_v2  ;;  %v3990_v25 = vmax.f32 %v3988_v37, %v3964_v52 }
 0x3ab   : > { %v3809_v45 = vpop.f32.mrf.mxu0  ;;  %v3966_v19 = vpop.f32.mrf.mxu1 }
 0x3ac   : > { %v3854_v4 = vmax.f32 %v3852_v38, %v3809_v45  ;;  %v4011_v0 = vmax.f32 %v4009_v18, %v3966_v19  ;;  %v10208_v38 = vpop.trf.xlu0 }
 0x3ad   : > { %v3813_v62 = vpop.f32.mrf.mxu0  ;;  %v3970_v51 = vpop.f32.mrf.mxu1  ;;  %8398 = vmatmul.mubr.msk.bf16.gmra.mxu0 %vm957_vm2, %v10120_v55  ;;  %8406 = vmatmul.mubr.msk.bf16.gmra.mxu1 %vm957_vm2, %v10120_v55 }
 0x3ae   : > { %v3834_v12 = vmax.f32 %v3832_v49, %v3813_v62  ;;  %v3991_v8 = vmax.f32 %v3989_v43, %v3970_v51  ;;  %5081 = vmatprep.mubr.bf16.mxu0 %v9026_v6  ;;  %5238 = vmatprep.mubr.bf16.mxu1 %v9026_v6 }
 0x3af   : > { %v3815_v58 = vpop.f32.mrf.mxu0  ;;  %v3972_v23 = vpop.f32.mrf.mxu1 }
 0x3b0   : > { %v3855_v40 = vmax.f32 %v3853_v32, %v3815_v58  ;;  %v4012_v10 = vmax.f32 %v4010_v41, %v3972_v23 }
 0x3b1   : > { %v3817_v56 = vpop.f32.mrf.mxu0  ;;  %v3974_v37 = vpop.f32.mrf.mxu1 }
 0x3b2   : > { %v3835_v63 = vmax.f32 %v3833_v11, %v3817_v56  ;;  %v3992_v15 = vmax.f32 %v3990_v25, %v3974_v37 }
 0x3b3   : > { %v3819_v18 = vpop.f32.mrf.mxu0  ;;  %v3976_v61 = vpop.f32.mrf.mxu1 }
 0x3b4   : > { %v3836_v33 = vmax.f32 %v3834_v12, %v3835_v63  ;;  %v3993_v55 = vmax.f32 %v3991_v8, %v3992_v15  ;;  %v3856_v49 = vmax.f32 %v3854_v4, %v3819_v18  ;;  %v4013_v43 = vmax.f32 %v4011_v0, %v3976_v61 }
 0x3b5   : > { %v10210_v31 = vpop.f32.mrf.mxu0  ;;  %v10212_v3 = vpop.f32.mrf.mxu1  ;;  %8408 = vmatmul.mubr.msk.bf16.vlgmr.msra.gmra.mxu0 %vm957_vm2, %v10208_v38  ;;  %8416 = vmatmul.mubr.msk.bf16.vlgmr.msra.gmra.mxu1 %vm957_vm2, %v10208_v38 }
 0x3b6   : > { %v3837_v32 = vrot.slane %v3836_v33, 4  ;;  %v3994_v41 = vrot.slane %v3993_v55, 4  ;;  %v3857_v2 = vmax.f32 %v3855_v40, %v3856_v49  ;;  %v4014_v52 = vmax.f32 %v4012_v10, %v4013_v43  ;;  %5378 = vmatpush1.bf16.msra.mxu0 %v9261_v24  ;;  %5535 = vmatpush1.bf16.msra.mxu1 %v9263_v26  ;;  %v10232_v40 = vpop.trf.xlu0 }
 0x3b7   : > { %v10220_v11 = vpop.f32.mrf.mxu0  ;;  %v10222_v25 = vpop.f32.mrf.mxu1  ;;  %5091 = vmatprep.mubr.bf16.mxu0 %v9026_v6  ;;  %5248 = vmatprep.mubr.bf16.mxu1 %v9026_v6 }
 0x3b8   : > { %v3838_v45 = vmax.f32 %v3836_v33, %v3837_v32  ;;  %v3995_v19 = vmax.f32 %v3993_v55, %v3994_v41  ;;  %v3858_v4 = vrot.slane %v3857_v2, 4  ;;  %v4015_v0 = vrot.slane %v4014_v52, 4  ;;  %5733 = vmatprep.subr.bf16.mxu0 %v9265_v27  ;;  %5890 = vmatprep.subr.bf16.mxu1 %v9267_v28 }
 0x3b9   : > { %v10228_v62 = vpop.f32.mrf.mxu0  ;;  %v10230_v51 = vpop.f32.mrf.mxu1 }
 0x3ba   : > { %v3839_v12 = vrot.slane %v3838_v45, 2  ;;  %v3996_v8 = vrot.slane %v3995_v19, 2  ;;  %v3859_v58 = vmax.f32 %v3857_v2, %v3858_v4  ;;  %v4016_v23 = vmax.f32 %v4014_v52, %v4015_v0 }
 0x3bb   : > { %v4063_v10 = vpop.f32.mrf.mxu0  ;;  %v4220_v56 = vpop.f32.mrf.mxu1 }
 0x3bc   : > { %v3840_v37 = vmax.f32 %v3838_v45, %v3839_v12  ;;  %v3997_v63 = vmax.f32 %v3995_v19, %v3996_v8  ;;  %v3860_v15 = vrot.slane %v3859_v58, 2  ;;  %v4017_v18 = vrot.slane %v4016_v23, 2 }
 0x3bd   : > { %v4067_v61 = vpop.f32.mrf.mxu0  ;;  %v4224_v27 = vpop.f32.mrf.mxu1  ;;  %8409 = vmatmul.mubr.msk.bf16.gmra.mxu0 %vm957_vm2, %v10232_v40  ;;  %8417 = vmatmul.mubr.msk.bf16.gmra.mxu1 %vm957_vm2, %v10232_v40 }
 0x3be   : > { %v3841_v28 = vrot.slane %v3840_v37, 1  ;;  %v3998_v33 = vrot.slane %v3997_v63, 1  ;;  %v3861_v55 = vmax.f32 %v3859_v58, %v3860_v15  ;;  %v4018_v49 = vmax.f32 %v4016_v23, %v4017_v18  ;;  %5101 = vmatprep.mubr.bf16.mxu0 %v9026_v6  ;;  %5258 = vmatprep.mubr.bf16.mxu1 %v9026_v6 }
 0x3bf   : > { %v4136_v43 = vmax.f32 %v10210_v31, %v4067_v61  ;;  %v4293_v32 = vmax.f32 %v10212_v3, %v4224_v27  ;;  %v4069_v41 = vpop.f32.mrf.mxu0  ;;  %v4226_v2 = vpop.f32.mrf.mxu1 }
 0x3c0   : > { %v3842_v52 = vmax.f32 %v3840_v37, %v3841_v28  ;;  %v3999_v45 = vmax.f32 %v3997_v63, %v3998_v33  ;;  %v3862_v19 = vrot.slane %v3861_v55, 1  ;;  %v4019_v4 = vrot.slane %v4018_v49, 1  ;;  %v10254_v63 = vpop.trf.xlu0 }
 0x3c1   : > { %v4157_v0 = vmax.f32 %v10220_v11, %v4069_v41  ;;  %v4314_v12 = vmax.f32 %v10222_v25, %v4226_v2  ;;  %v4071_v8 = vpop.f32.mrf.mxu0  ;;  %v4228_v58 = vpop.f32.mrf.mxu1 }
 0x3c2   : > { %v10247_v23 = vmax.f32 %v3194_v59, %v3842_v52  ;;  %v10252_v31 = vmax.f32 %v3351_v13, %v3999_v45  ;;  %v3863_v3 = vmax.f32 %v3861_v55, %v3862_v19  ;;  %v4020_v37 = vmax.f32 %v4018_v49, %v4019_v4 }
 0x3c3   : > { %v4137_v11 = vmax.f32 %v10228_v62, %v4071_v8  ;;  %v4294_v25 = vmax.f32 %v10230_v51, %v4228_v58  ;;  %v4073_v15 = vpop.f32.mrf.mxu0  ;;  %v4230_v18 = vpop.f32.mrf.mxu1 }
 0x3c4   : > { %v10261_v42 = vmax.f32 %v3195_v47, %v3863_v3  ;;  %v10266_v39 = vmax.f32 %v3352_v44, %v4020_v37  ;;  %v4158_v35 = vmax.f32 %v4063_v10, %v4073_v15  ;;  %v4315_v46 = vmax.f32 %v4220_v56, %v4230_v18  ;;  %v10274_v61 = vpop.trf.xlu0 }
 0x3c5   : > { %v4077_v59 = vpop.f32.mrf.mxu0  ;;  %v4234_v13 = vpop.f32.mrf.mxu1  ;;  %8410 = vmatmul.mubr.msk.bf16.gmra.mxu0 %vm957_vm2, %v10254_v63  ;;  %8418 = vmatmul.mubr.msk.bf16.gmra.mxu1 %vm957_vm2, %v10254_v63 }
 0x3c6   : > { %v4138_v62 = vmax.f32 %v4136_v43, %v4077_v59  ;;  %v4295_v51 = vmax.f32 %v4293_v32, %v4234_v13  ;;  %5111 = vmatprep.mubr.bf16.mxu0 %v9026_v6  ;;  %5268 = vmatprep.mubr.bf16.mxu1 %v9026_v6 }
 0x3c7   : > { %v4079_v53 = vpop.f32.mrf.mxu0  ;;  %v4236_v48 = vpop.f32.mrf.mxu1 }
 0x3c8   : > { %v4159_v16 = vmax.f32 %v4157_v0, %v4079_v53  ;;  %v4316_v21 = vmax.f32 %v4314_v12, %v4236_v48  ;;  %v10282_v58 = vpop.trf.xlu0 }
 0x3c9   : > { %v4081_v47 = vpop.f32.mrf.mxu0  ;;  %v4238_v44 = vpop.f32.mrf.mxu1 }
 0x3ca   : > { %v4139_v10 = vmax.f32 %v4137_v11, %v4081_v47  ;;  %v4296_v56 = vmax.f32 %v4294_v25, %v4238_v44 }
 0x3cb   : > { %v4083_v27 = vpop.f32.mrf.mxu0  ;;  %v4240_v28 = vpop.f32.mrf.mxu1 }
 0x3cc   : > { %v4160_v33 = vmax.f32 %v4158_v35, %v4083_v27  ;;  %v4317_v55 = vmax.f32 %v4315_v46, %v4240_v28  ;;  %v10290_v47 = vpop.trf.xlu0 }
 0x3cd   : > { %v4087_v49 = vpop.f32.mrf.mxu0  ;;  %v4244_v43 = vpop.f32.mrf.mxu1  ;;  %8411 = vmatmul.mubr.msk.bf16.gmra.mxu0 %vm957_vm2, %v10274_v61  ;;  %8419 = vmatmul.mubr.msk.bf16.gmra.mxu1 %vm957_vm2, %v10274_v61 }
 0x3ce   : > { %v4140_v32 = vmax.f32 %v4138_v62, %v4087_v49  ;;  %v4297_v41 = vmax.f32 %v4295_v51, %v4244_v43  ;;  %5121 = vmatprep.mubr.bf16.mxu0 %v9026_v6  ;;  %5278 = vmatprep.mubr.bf16.mxu1 %v9026_v6 }
 0x3cf   : > { %v4089_v2 = vpop.f32.mrf.mxu0  ;;  %v4246_v52 = vpop.f32.mrf.mxu1 }
 0x3d0   : > { %v4161_v45 = vmax.f32 %v4159_v16, %v4089_v2  ;;  %v4318_v19 = vmax.f32 %v4316_v21, %v4246_v52 }
 0x3d1   : > { %v4091_v4 = vpop.f32.mrf.mxu0  ;;  %v4248_v0 = vpop.f32.mrf.mxu1 }
 0x3d2   : > { %v4141_v12 = vmax.f32 %v4139_v10, %v4091_v4  ;;  %v4298_v8 = vmax.f32 %v4296_v56, %v4248_v0  ;;  %v10298_v0 = vpop.trf.xlu0 }
 0x3d3   : > { %v4093_v3 = vpop.f32.mrf.mxu0  ;;  %v4250_v37 = vpop.f32.mrf.mxu1 }
 0x3d4   : > { %v4162_v11 = vmax.f32 %v4160_v33, %v4093_v3  ;;  %v4319_v25 = vmax.f32 %v4317_v55, %v4250_v37 }
 0x3d5   : > { %v4097_v15 = vpop.f32.mrf.mxu0  ;;  %v4254_v18 = vpop.f32.mrf.mxu1  ;;  %8412 = vmatmul.mubr.msk.bf16.gmra.mxu0 %vm957_vm2, %v10282_v58  ;;  %8420 = vmatmul.mubr.msk.bf16.gmra.mxu1 %vm957_vm2, %v10282_v58 }
 0x3d6   : > { %v4142_v35 = vmax.f32 %v4140_v32, %v4097_v15  ;;  %v4299_v46 = vmax.f32 %v4297_v41, %v4254_v18  ;;  %5131 = vmatprep.mubr.bf16.mxu0 %v9026_v6  ;;  %5288 = vmatprep.mubr.bf16.mxu1 %v9026_v6 }
 0x3d7   : > { %v4099_v59 = vpop.f32.mrf.mxu0  ;;  %v4256_v13 = vpop.f32.mrf.mxu1 }
 0x3d8   : > { %v4163_v62 = vmax.f32 %v4161_v45, %v4099_v59  ;;  %v4320_v51 = vmax.f32 %v4318_v19, %v4256_v13 }
 0x3d9   : > { %v4101_v53 = vpop.f32.mrf.mxu0  ;;  %v4258_v48 = vpop.f32.mrf.mxu1 }
 0x3da   : > { %v4143_v16 = vmax.f32 %v4141_v12, %v4101_v53  ;;  %v4300_v21 = vmax.f32 %v4298_v8, %v4258_v48 }
 0x3db   : > { %v4103_v44 = vpop.f32.mrf.mxu0  ;;  %v4260_v10 = vpop.f32.mrf.mxu1 }
 0x3dc   : > { %v4164_v56 = vmax.f32 %v4162_v11, %v4103_v44  ;;  %v4321_v27 = vmax.f32 %v4319_v25, %v4260_v10 }
 0x3dd   : > { %v4107_v28 = vpop.f32.mrf.mxu0  ;;  %v4264_v33 = vpop.f32.mrf.mxu1  ;;  %8413 = vmatmul.mubr.msk.bf16.gmra.mxu0 %vm957_vm2, %v10290_v47  ;;  %8421 = vmatmul.mubr.msk.bf16.gmra.mxu1 %vm957_vm2, %v10290_v47 }
 0x3de   : > { %v4144_v55 = vmax.f32 %v4142_v35, %v4107_v28  ;;  %v4301_v49 = vmax.f32 %v4299_v46, %v4264_v33  ;;  %5141 = vmatprep.mubr.bf16.mxu0 %v9026_v6  ;;  %5298 = vmatprep.mubr.bf16.mxu1 %v9026_v6 }
 0x3df   : > { %v4109_v43 = vpop.f32.mrf.mxu0  ;;  %v4266_v32 = vpop.f32.mrf.mxu1 }
 0x3e0   : > { %v4165_v41 = vmax.f32 %v4163_v62, %v4109_v43  ;;  %v4322_v2 = vmax.f32 %v4320_v51, %v4266_v32 }
 0x3e1   : > { %v4111_v52 = vpop.f32.mrf.mxu0  ;;  %v4268_v45 = vpop.f32.mrf.mxu1 }
 0x3e2   : > { %v4145_v19 = vmax.f32 %v4143_v16, %v4111_v52  ;;  %v4302_v4 = vmax.f32 %v4300_v21, %v4268_v45  ;;  %v10306_v16 = vpop.trf.xlu0 }
 0x3e3   : > { %v4113_v12 = vpop.f32.mrf.mxu0  ;;  %v4270_v8 = vpop.f32.mrf.mxu1 }
 0x3e4   : > { %v4166_v3 = vmax.f32 %v4164_v56, %v4113_v12  ;;  %v4323_v37 = vmax.f32 %v4321_v27, %v4270_v8 }
 0x3e5   : > { %v4117_v11 = vpop.f32.mrf.mxu0  ;;  %v4274_v25 = vpop.f32.mrf.mxu1  ;;  %8414 = vmatmul.mubr.msk.bf16.gmra.mxu0 %vm957_vm2, %v10298_v0  ;;  %8422 = vmatmul.mubr.msk.bf16.gmra.mxu1 %vm957_vm2, %v10298_v0 }
 0x3e6   : > { %v4146_v15 = vmax.f32 %v4144_v55, %v4117_v11  ;;  %v4303_v18 = vmax.f32 %v4301_v49, %v4274_v25  ;;  %5151 = vmatprep.mubr.bf16.mxu0 %v9026_v6  ;;  %5308 = vmatprep.mubr.bf16.mxu1 %v9026_v6 }
 0x3e7   : > { %v4119_v35 = vpop.f32.mrf.mxu0  ;;  %v4276_v46 = vpop.f32.mrf.mxu1 }
 0x3e8   : > { %v4167_v59 = vmax.f32 %v4165_v41, %v4119_v35  ;;  %v4324_v13 = vmax.f32 %v4322_v2, %v4276_v46 }
 0x3e9   : > { %v4121_v62 = vpop.f32.mrf.mxu0  ;;  %v4278_v51 = vpop.f32.mrf.mxu1 }
 0x3ea   : > { %v4147_v53 = vmax.f32 %v4145_v19, %v4121_v62  ;;  %v4304_v48 = vmax.f32 %v4302_v4, %v4278_v51 }
 0x3eb   : > { %v4123_v21 = vpop.f32.mrf.mxu0  ;;  %v4280_v44 = vpop.f32.mrf.mxu1 }
 0x3ec   : > { %v4168_v10 = vmax.f32 %v4166_v3, %v4123_v21  ;;  %v4325_v56 = vmax.f32 %v4323_v37, %v4280_v44 }
 0x3ed   : > { %v4127_v27 = vpop.f32.mrf.mxu0  ;;  %v4284_v28 = vpop.f32.mrf.mxu1  ;;  %8415 = vmatmul.mubr.msk.bf16.gmra.mxu0 %vm957_vm2, %v10306_v16  ;;  %8423 = vmatmul.mubr.msk.bf16.gmra.mxu1 %vm957_vm2, %v10306_v16 }
 0x3ee   : > { %v4148_v33 = vmax.f32 %v4146_v15, %v4127_v27  ;;  %v4305_v55 = vmax.f32 %v4303_v18, %v4284_v28  ;;  %5395 = vmatprep.mubr.bf16.mxu0 %v9026_v6  ;;  %5552 = vmatprep.mubr.bf16.mxu1 %v9026_v6 }
 0x3ef   : > { %v4129_v49 = vpop.f32.mrf.mxu0  ;;  %v4286_v43 = vpop.f32.mrf.mxu1 }
 0x3f0   : > { %v4169_v32 = vmax.f32 %v4167_v59, %v4129_v49  ;;  %v4326_v41 = vmax.f32 %v4324_v13, %v4286_v43 }
 0x3f1   : > { %v4131_v2 = vpop.f32.mrf.mxu0  ;;  %v4288_v52 = vpop.f32.mrf.mxu1 }
 0x3f2   : > { %v4149_v45 = vmax.f32 %v4147_v53, %v4131_v2  ;;  %v4306_v19 = vmax.f32 %v4304_v48, %v4288_v52 }
 0x3f3   : > { %v4133_v4 = vpop.f32.mrf.mxu0  ;;  %v4290_v12 = vpop.f32.mrf.mxu1 }
 0x3f4   : > { %v4150_v8 = vmax.f32 %v4148_v33, %v4149_v45  ;;  %v4307_v3 = vmax.f32 %v4305_v55, %v4306_v19  ;;  %v4170_v37 = vmax.f32 %v4168_v10, %v4133_v4  ;;  %v4327_v11 = vmax.f32 %v4325_v56, %v4290_v12 }
 0x3f5   : > { %v10314_v25 = vpop.f32.mrf.mxu0  ;;  %v10316_v15 = vpop.f32.mrf.mxu1  ;;  %8424 = vmatmul.mubr.msk.bf16.vlgmr.msra.gmra.mxu0 %vm957_vm2, %v10208_v38  ;;  %8432 = vmatmul.mubr.msk.bf16.vlgmr.msra.gmra.mxu1 %vm957_vm2, %v10208_v38 }
 0x3f6   : > { %v4151_v18 = vrot.slane %v4150_v8, 4  ;;  %v4308_v35 = vrot.slane %v4307_v3, 4  ;;  %v4171_v46 = vmax.f32 %v4169_v32, %v4170_v37  ;;  %v4328_v59 = vmax.f32 %v4326_v41, %v4327_v11  ;;  %5734 = vmatpush1.bf16.msra.mxu0 %v9257_v20  ;;  %5891 = vmatpush1.bf16.msra.mxu1 %v9259_v22 }
 0x3f7   : > { %v10324_v13 = vpop.f32.mrf.mxu0  ;;  %v10326_v62 = vpop.f32.mrf.mxu1  ;;  %5405 = vmatprep.mubr.bf16.mxu0 %v9026_v6  ;;  %5562 = vmatprep.mubr.bf16.mxu1 %v9026_v6 }
 0x3f8   : > { %v4152_v51 = vmax.f32 %v4150_v8, %v4151_v18  ;;  %v4309_v53 = vmax.f32 %v4307_v3, %v4308_v35  ;;  %v4172_v48 = vrot.slane %v4171_v46, 4  ;;  %v4329_v38 = vrot.slane %v4328_v59, 4  ;;  %6047 = vmatprep.subr.bf16.mxu0 %v9269_v29  ;;  %6204 = vmatprep.subr.bf16.mxu1 %v9271_v30 }
 0x3f9   : > { %v4417_v21 = vpop.f32.mrf.mxu0  ;;  %v4574_v20 = vpop.f32.mrf.mxu1 }
 0x3fa   : > { %v4153_v44 = vrot.slane %v4152_v51, 2  ;;  %v4310_v22 = vrot.slane %v4309_v53, 2  ;;  %v4173_v10 = vmax.f32 %v4171_v46, %v4172_v48  ;;  %v4330_v56 = vmax.f32 %v4328_v59, %v4329_v38 }
 0x3fb   : > { %v4419_v27 = vpop.f32.mrf.mxu0  ;;  %v4576_v28 = vpop.f32.mrf.mxu1 }
 0x3fc   : > { %v4154_v33 = vmax.f32 %v4152_v51, %v4153_v44  ;;  %v4311_v55 = vmax.f32 %v4309_v53, %v4310_v22  ;;  %v4174_v49 = vrot.slane %v4173_v10, 2  ;;  %v4331_v43 = vrot.slane %v4330_v56, 2 }
 0x3fd   : > { %v4423_v32 = vpop.f32.mrf.mxu0  ;;  %v4580_v41 = vpop.f32.mrf.mxu1  ;;  %8425 = vmatmul.mubr.msk.bf16.gmra.mxu0 %vm957_vm2, %v10232_v40  ;;  %8433 = vmatmul.mubr.msk.bf16.gmra.mxu1 %vm957_vm2, %v10232_v40 }
 0x3fe   : > { %v4155_v29 = vrot.slane %v4154_v33, 1  ;;  %v4312_v30 = vrot.slane %v4311_v55, 1  ;;  %v4175_v2 = vmax.f32 %v4173_v10, %v4174_v49  ;;  %v4332_v52 = vmax.f32 %v4330_v56, %v4331_v43  ;;  %5415 = vmatprep.mubr.bf16.mxu0 %v9026_v6  ;;  %5572 = vmatprep.mubr.bf16.mxu1 %v9026_v6 }
 0x3ff   : > { %v4492_v45 = vmax.f32 %v10314_v25, %v4423_v32  ;;  %v4649_v19 = vmax.f32 %v10316_v15, %v4580_v41  ;;  %v4425_v4 = vpop.f32.mrf.mxu0  ;;  %v4582_v12 = vpop.f32.mrf.mxu1 }
 0x400   : > { %v4156_v8 = vmax.f32 %v4154_v33, %v4155_v29  ;;  %v4313_v3 = vmax.f32 %v4311_v55, %v4312_v30  ;;  %v4176_v37 = vrot.slane %v4175_v2, 1  ;;  %v4333_v11 = vrot.slane %v4332_v52, 1 }
 0x401   : > { %v4513_v40 = vmax.f32 %v10324_v13, %v4425_v4  ;;  %v4670_v18 = vmax.f32 %v10326_v62, %v4582_v12  ;;  %v4427_v35 = vpop.f32.mrf.mxu0  ;;  %v4584_v46 = vpop.f32.mrf.mxu1 }
 0x402   : > { %v10345_v59 = vmax.f32 %v3508_v57, %v4156_v8  ;;  %v10350_v25 = vmax.f32 %v3665_v7, %v4313_v3  ;;  %v4177_v15 = vmax.f32 %v4175_v2, %v4176_v37  ;;  %v4334_v51 = vmax.f32 %v4332_v52, %v4333_v11 }
 0x403   : > { %v4493_v53 = vmax.f32 %v4417_v21, %v4427_v35  ;;  %v4650_v48 = vmax.f32 %v4574_v20, %v4584_v46  ;;  %v4429_v38 = vpop.f32.mrf.mxu0  ;;  %v4586_v13 = vpop.f32.mrf.mxu1 }
 0x404   : > { %v10355_v62 = vmax.f32 %v3509_v34, %v4177_v15  ;;  %v10360_v9 = vmax.f32 %v11303_v1, %v4334_v51  ;;  %v4514_v57 = vmax.f32 %v4419_v27, %v4429_v38  ;;  %v4671_v36 = vmax.f32 %v4576_v28, %v4586_v13 }
 0x405   : > { %v4433_v60 = vpop.f32.mrf.mxu0  ;;  %v4590_v7 = vpop.f32.mrf.mxu1  ;;  %8426 = vmatmul.mubr.msk.bf16.gmra.mxu0 %vm957_vm2, %v10254_v63  ;;  %8434 = vmatmul.mubr.msk.bf16.gmra.mxu1 %vm957_vm2, %v10254_v63 }
 0x406   : > { %v4494_v21 = vmax.f32 %v4492_v45, %v4433_v60  ;;  %v4651_v20 = vmax.f32 %v4649_v19, %v4590_v7  ;;  %5425 = vmatprep.mubr.bf16.mxu0 %v9026_v6  ;;  %5582 = vmatprep.mubr.bf16.mxu1 %v9026_v6 }
 0x407   : > { %v4435_v50 = vpop.f32.mrf.mxu0  ;;  %v4592_v14 = vpop.f32.mrf.mxu1 }
 0x408   : > { %v4515_v17 = vmax.f32 %v4513_v40, %v4435_v50  ;;  %v4672_v54 = vmax.f32 %v4670_v18, %v4592_v14 }
 0x409   : > { %v4437_v34 = vpop.f32.mrf.mxu0  ;;  %v4594_v44 = vpop.f32.mrf.mxu1 }
 0x40a   : > { %v4495_v22 = vmax.f32 %v4493_v53, %v4437_v34  ;;  %v4652_v10 = vmax.f32 %v4650_v48, %v4594_v44 }
 0x40b   : > { %v4439_v56 = vpop.f32.mrf.mxu0  ;;  %v4596_v27 = vpop.f32.mrf.mxu1 }
 0x40c   : > { %v4516_v28 = vmax.f32 %v4514_v57, %v4439_v56  ;;  %v4673_v33 = vmax.f32 %v4671_v36, %v4596_v27 }
 0x40d   : > { %v4443_v55 = vpop.f32.mrf.mxu0  ;;  %v4600_v63 = vpop.f32.mrf.mxu1  ;;  %8427 = vmatmul.mubr.msk.bf16.gmra.mxu0 %vm957_vm2, %v10274_v61  ;;  %8435 = vmatmul.mubr.msk.bf16.gmra.mxu1 %vm957_vm2, %v10274_v61 }
 0x40e   : > { %v4496_v49 = vmax.f32 %v4494_v21, %v4443_v55  ;;  %v4653_v43 = vmax.f32 %v4651_v20, %v4600_v63  ;;  %5435 = vmatprep.mubr.bf16.mxu0 %v9026_v6  ;;  %5592 = vmatprep.mubr.bf16.mxu1 %v9026_v6 }
 0x40f   : > { %v4445_v32 = vpop.f32.mrf.mxu0  ;;  %v4602_v41 = vpop.f32.mrf.mxu1 }
 0x410   : > { %v4517_v29 = vmax.f32 %v4515_v17, %v4445_v32  ;;  %v4674_v30 = vmax.f32 %v4672_v54, %v4602_v41 }
 0x411   : > { %v4447_v2 = vpop.f32.mrf.mxu0  ;;  %v4604_v52 = vpop.f32.mrf.mxu1 }
 0x412   : > { %v4497_v45 = vmax.f32 %v4495_v22, %v4447_v2  ;;  %v4654_v19 = vmax.f32 %v4652_v10, %v4604_v52 }
 0x413   : > { %v4449_v4 = vpop.f32.mrf.mxu0  ;;  %v4606_v12 = vpop.f32.mrf.mxu1 }
 0x414   : > { %v4518_v8 = vmax.f32 %v4516_v28, %v4449_v4  ;;  %v4675_v3 = vmax.f32 %v4673_v33, %v4606_v12 }
 0x415   : > { %v4453_v37 = vpop.f32.mrf.mxu0  ;;  %v4610_v61 = vpop.f32.mrf.mxu1  ;;  %8428 = vmatmul.mubr.msk.bf16.gmra.mxu0 %vm957_vm2, %v10282_v58  ;;  %8436 = vmatmul.mubr.msk.bf16.gmra.mxu1 %vm957_vm2, %v10282_v58 }
 0x416   : > { %v4498_v11 = vmax.f32 %v4496_v49, %v4453_v37  ;;  %v4655_v40 = vmax.f32 %v4653_v43, %v4610_v61  ;;  %5445 = vmatprep.mubr.bf16.mxu0 %v9026_v6  ;;  %5602 = vmatprep.mubr.bf16.mxu1 %v9026_v6 }
 0x417   : > { %v4455_v18 = vpop.f32.mrf.mxu0  ;;  %v4612_v35 = vpop.f32.mrf.mxu1 }
 0x418   : > { %v4519_v46 = vmax.f32 %v4517_v29, %v4455_v18  ;;  %v4676_v15 = vmax.f32 %v4674_v30, %v4612_v35 }
 0x419   : > { %v4457_v51 = vpop.f32.mrf.mxu0  ;;  %v4614_v53 = vpop.f32.mrf.mxu1 }
 0x41a   : > { %v4499_v48 = vmax.f32 %v4497_v45, %v4457_v51  ;;  %v4656_v38 = vmax.f32 %v4654_v19, %v4614_v53  ;;  %v10398_v53 = vpop.trf.xlu1 }
 0x41b   : > { %v4459_v13 = vpop.f32.mrf.mxu0  ;;  %v4616_v1 = vpop.f32.mrf.mxu1 }
 0x41c   : > { %v4520_v57 = vmax.f32 %v4518_v8, %v4459_v13  ;;  %v4677_v36 = vmax.f32 %v4675_v3, %v4616_v1 }
 0x41d   : > { %v4463_v60 = vpop.f32.mrf.mxu0  ;;  %v4620_v58 = vpop.f32.mrf.mxu1  ;;  %8429 = vmatmul.mubr.msk.bf16.gmra.mxu0 %vm957_vm2, %v10290_v47  ;;  %8437 = vmatmul.mubr.msk.bf16.gmra.mxu1 %vm957_vm2, %v10290_v47 }
 0x41e   : > { %v4500_v7 = vmax.f32 %v4498_v11, %v4463_v60  ;;  %v4657_v21 = vmax.f32 %v4655_v40, %v4620_v58  ;;  %5455 = vmatprep.mubr.bf16.mxu0 %v9026_v6  ;;  %5612 = vmatprep.mubr.bf16.mxu1 %v9026_v6 }
 0x41f   : > { %v4465_v20 = vpop.f32.mrf.mxu0  ;;  %v4622_v50 = vpop.f32.mrf.mxu1 }
 0x420   : > { %v4521_v14 = vmax.f32 %v4519_v46, %v4465_v20  ;;  %v4678_v17 = vmax.f32 %v4676_v15, %v4622_v50 }
 0x421   : > { %v4467_v54 = vpop.f32.mrf.mxu0  ;;  %v4624_v34 = vpop.f32.mrf.mxu1 }
 0x422   : > { %v4501_v44 = vmax.f32 %v4499_v48, %v4467_v54  ;;  %v4658_v22 = vmax.f32 %v4656_v38, %v4624_v34 }
 0x423   : > { %v4469_v10 = vpop.f32.mrf.mxu0  ;;  %v4626_v56 = vpop.f32.mrf.mxu1 }
 0x424   : > { %v4522_v27 = vmax.f32 %v4520_v57, %v4469_v10  ;;  %v4679_v28 = vmax.f32 %v4677_v36, %v4626_v56 }
 0x425   : > { %v4473_v33 = vpop.f32.mrf.mxu0  ;;  %v4630_v47 = vpop.f32.mrf.mxu1  ;;  %8430 = vmatmul.mubr.msk.bf16.gmra.mxu0 %vm957_vm2, %v10298_v0  ;;  %8438 = vmatmul.mubr.msk.bf16.gmra.mxu1 %vm957_vm2, %v10298_v0 }
 0x426   : > { %v4502_v55 = vmax.f32 %v4500_v7, %v4473_v33  ;;  %v4659_v63 = vmax.f32 %v4657_v21, %v4630_v47  ;;  %5465 = vmatprep.mubr.bf16.mxu0 %v9026_v6  ;;  %5622 = vmatprep.mubr.bf16.mxu1 %v9026_v6 }
 0x427   : > { %v4475_v49 = vpop.f32.mrf.mxu0  ;;  %v4632_v43 = vpop.f32.mrf.mxu1 }
 0x428   : > { %v4523_v32 = vmax.f32 %v4521_v14, %v4475_v49  ;;  %v4680_v41 = vmax.f32 %v4678_v17, %v4632_v43 }
 0x429   : > { %v4477_v29 = vpop.f32.mrf.mxu0  ;;  %v4634_v30 = vpop.f32.mrf.mxu1 }
 0x42a   : > { %v4503_v2 = vmax.f32 %v4501_v44, %v4477_v29  ;;  %v4660_v52 = vmax.f32 %v4658_v22, %v4634_v30 }
 0x42b   : > { %v4479_v45 = vpop.f32.mrf.mxu0  ;;  %v4636_v19 = vpop.f32.mrf.mxu1 }
 0x42c   : > { %v4524_v4 = vmax.f32 %v4522_v27, %v4479_v45  ;;  %v4681_v12 = vmax.f32 %v4679_v28, %v4636_v19  ;;  %v10420_v28 = vpop.trf.xlu1 }
 0x42d   : > { %v4483_v8 = vpop.f32.mrf.mxu0  ;;  %v4640_v0 = vpop.f32.mrf.mxu1  ;;  %8431 = vmatmul.mubr.msk.bf16.gmra.mxu0 %vm957_vm2, %v10306_v16  ;;  %8439 = vmatmul.mubr.msk.bf16.gmra.mxu1 %vm957_vm2, %v10306_v16 }
 0x42e   : > { %v4504_v3 = vmax.f32 %v4502_v55, %v4483_v8  ;;  %v4661_v37 = vmax.f32 %v4659_v63, %v4640_v0  ;;  %5751 = vmatprep.mubr.bf16.mxu0 %v9026_v6  ;;  %5908 = vmatprep.mubr.bf16.mxu1 %v9026_v6 }
 0x42f   : > { %v4485_v61 = vpop.f32.mrf.mxu0  ;;  %v4642_v11 = vpop.f32.mrf.mxu1 }
 0x430   : > { %v4525_v40 = vmax.f32 %v4523_v32, %v4485_v61  ;;  %v4682_v18 = vmax.f32 %v4680_v41, %v4642_v11 }
 0x431   : > { %v4487_v35 = vpop.f32.mrf.mxu0  ;;  %v4644_v46 = vpop.f32.mrf.mxu1 }
 0x432   : > { %v4505_v15 = vmax.f32 %v4503_v2, %v4487_v35  ;;  %v4662_v51 = vmax.f32 %v4660_v52, %v4644_v46 }
 0x433   : > { %v4489_v48 = vpop.f32.mrf.mxu0  ;;  %v4646_v38 = vpop.f32.mrf.mxu1 }
 0x434   : > { %v4506_v13 = vmax.f32 %v4504_v3, %v4505_v15  ;;  %v4663_v16 = vmax.f32 %v4661_v37, %v4662_v51  ;;  %v4526_v1 = vmax.f32 %v4524_v4, %v4489_v48  ;;  %v4683_v57 = vmax.f32 %v4681_v12, %v4646_v38  ;;  %v10444_v48 = vpop.trf.xlu1 }
 0x435   : > { %v10400_v36 = vpop.f32.mrf.mxu0  ;;  %v10402_v60 = vpop.f32.mrf.mxu1  ;;  %8441 = vmatmul.mubr.msk.bf16.vlgmr.msra.gmra.mxu0 %vm957_vm2, %v10398_v53  ;;  %8449 = vmatmul.mubr.msk.bf16.vlgmr.msra.gmra.mxu1 %vm957_vm2, %v10398_v53 }
 0x436   : > { %v4507_v58 = vrot.slane %v4506_v13, 4  ;;  %v4664_v7 = vrot.slane %v4663_v16, 4  ;;  %v4527_v21 = vmax.f32 %v4525_v40, %v4526_v1  ;;  %v4684_v20 = vmax.f32 %v4682_v18, %v4683_v57  ;;  %6048 = vmatpush1.bf16.msra.mxu0 %v9261_v24  ;;  %6205 = vmatpush1.bf16.msra.mxu1 %v9263_v26 }
 0x437   : > { %v10410_v50 = vpop.f32.mrf.mxu0  ;;  %v10412_v14 = vpop.f32.mrf.mxu1  ;;  %5761 = vmatprep.mubr.bf16.mxu0 %v9026_v6  ;;  %5918 = vmatprep.mubr.bf16.mxu1 %v9026_v6 }
 0x438   : > { %v4508_v17 = vmax.f32 %v4506_v13, %v4507_v58  ;;  %v4665_v54 = vmax.f32 %v4663_v16, %v4664_v7  ;;  %v4528_v34 = vrot.slane %v4527_v21, 4  ;;  %v4685_v44 = vrot.slane %v4684_v20, 4 }
 0x439   : > { %v10416_v22 = vpop.f32.mrf.mxu0  ;;  %v10418_v10 = vpop.f32.mrf.mxu1 }
 0x43a   : > { %v4509_v56 = vrot.slane %v4508_v17, 2  ;;  %v4666_v24 = vrot.slane %v4665_v54, 2  ;;  %v4529_v27 = vmax.f32 %v4527_v21, %v4528_v34  ;;  %v4686_v26 = vmax.f32 %v4684_v20, %v4685_v44 }
 0x43b   : > { %v4733_v33 = vpop.f32.mrf.mxu0  ;;  %v4890_v47 = vpop.f32.mrf.mxu1 }
 0x43c   : > { %v4510_v55 = vmax.f32 %v4508_v17, %v4509_v56  ;;  %v4667_v63 = vmax.f32 %v4665_v54, %v4666_v24  ;;  %v4530_v49 = vrot.slane %v4529_v27, 2  ;;  %v4687_v43 = vrot.slane %v4686_v26, 2  ;;  %v10458_v24 = vpop.trf.xlu1 }
 0x43d   : > { %v4737_v32 = vpop.f32.mrf.mxu0  ;;  %v4894_v41 = vpop.f32.mrf.mxu1  ;;  %8442 = vmatmul.mubr.msk.bf16.gmra.mxu0 %vm957_vm2, %v10420_v28  ;;  %8450 = vmatmul.mubr.msk.bf16.gmra.mxu1 %vm957_vm2, %v10420_v28 }
 0x43e   : > { %v4511_v29 = vrot.slane %v4510_v55, 1  ;;  %v4668_v30 = vrot.slane %v4667_v63, 1  ;;  %v4531_v2 = vmax.f32 %v4529_v27, %v4530_v49  ;;  %v4688_v52 = vmax.f32 %v4686_v26, %v4687_v43  ;;  %5771 = vmatprep.mubr.bf16.mxu0 %v9026_v6  ;;  %5928 = vmatprep.mubr.bf16.mxu1 %v9026_v6 }
 0x43f   : > { %v4806_v45 = vmax.f32 %v10400_v36, %v4737_v32  ;;  %v4963_v19 = vmax.f32 %v10402_v60, %v4894_v41  ;;  %v4739_v4 = vpop.f32.mrf.mxu0  ;;  %v4896_v12 = vpop.f32.mrf.mxu1 }
 0x440   : > { %v10430_v8 = vmax.f32 %v4510_v55, %v4511_v29  ;;  %v10432_v0 = vmax.f32 %v4667_v63, %v4668_v30  ;;  %v4532_v3 = vrot.slane %v4531_v2, 1  ;;  %v4689_v37 = vrot.slane %v4688_v52, 1 }
 0x441   : > { %v4827_v61 = vmax.f32 %v10410_v50, %v4739_v4  ;;  %v4984_v11 = vmax.f32 %v10412_v14, %v4896_v12  ;;  %v4741_v40 = vpop.f32.mrf.mxu0  ;;  %v4898_v18 = vpop.f32.mrf.mxu1 }
 0x442   : > { %v4534_v35 = vmax.f32 %v10247_v23, %v10430_v8  ;;  %v4691_v46 = vmax.f32 %v10252_v31, %v10432_v0  ;;  %v10440_v15 = vmax.f32 %v4531_v2, %v4532_v3  ;;  %v10442_v51 = vmax.f32 %v4688_v52, %v4689_v37  ;;  %v10466_v4 = vpop.trf.xlu1  ;;  %v6383_v31 = vld [vmem:[%s11295_s6 + $0x98] sm:$0xff] }
 0x443   : > { %v4807_v38 = vmax.f32 %v10416_v22, %v4741_v40  ;;  %v4964_v13 = vmax.f32 %v10418_v10, %v4898_v18  ;;  %v4743_v16 = vpop.f32.mrf.mxu0  ;;  %v4900_v1 = vpop.f32.mrf.mxu1  ;;  %v6502_v8 = vld [vmem:[%s11295_s6 + $0x198] sm:$0xff] }
 0x444   : > { %v4828_v57 = vmax.f32 %v4733_v33, %v4743_v16  ;;  %v4985_v36 = vmax.f32 %v4890_v47, %v4900_v1  ;;  %v4535_v60 = vmax.f32 %v10261_v42, %v10440_v15  ;;  %v4692_v58 = vmax.f32 %v10266_v39, %v10442_v51  ;;  %v6366_v15 = vld [vmem:[%s11295_s6 + $0x10] sm:$0xff]  ;;  %v6381_v39 = vld [vmem:[%s11295_s6 + $0x88] sm:$0xff] }
 0x445   : > { %v4747_v7 = vpop.f32.mrf.mxu0  ;;  %v4904_v21 = vpop.f32.mrf.mxu1  ;;  %8443 = vmatmul.mubr.msk.bf16.gmra.mxu0 %vm957_vm2, %v10444_v48  ;;  %8451 = vmatmul.mubr.msk.bf16.gmra.mxu1 %vm957_vm2, %v10444_v48  ;;  %v6500_v51 = vld [vmem:[%s11295_s6 + $0x188] sm:$0xff] }
 0x446   : > { %v4808_v20 = vmax.f32 %v4806_v45, %v4747_v7  ;;  %v4965_v50 = vmax.f32 %v4963_v19, %v4904_v21  ;;  %5781 = vmatprep.mubr.bf16.mxu0 %v9026_v6  ;;  %5938 = vmatprep.mubr.bf16.mxu1 %v9026_v6 }
 0x447   : > { %v4749_v14 = vpop.f32.mrf.mxu0  ;;  %v4906_v17 = vpop.f32.mrf.mxu1 }
 0x448   : > { %v4829_v54 = vmax.f32 %v4827_v61, %v4749_v14  ;;  %v4986_v34 = vmax.f32 %v4984_v11, %v4906_v17 }
 0x449   : > { %v4751_v44 = vpop.f32.mrf.mxu0  ;;  %v4908_v22 = vpop.f32.mrf.mxu1 }
 0x44a   : > { %v4809_v10 = vmax.f32 %v4807_v38, %v4751_v44  ;;  %v4966_v56 = vmax.f32 %v4964_v13, %v4908_v22 }
 0x44b   : > { %v4753_v27 = vpop.f32.mrf.mxu0  ;;  %v4910_v26 = vpop.f32.mrf.mxu1 }
 0x44c   : > { %v4830_v33 = vmax.f32 %v4828_v57, %v4753_v27  ;;  %v4987_v47 = vmax.f32 %v4985_v36, %v4910_v26 }
 0x44d   : > { %v4757_v55 = vpop.f32.mrf.mxu0  ;;  %v4914_v63 = vpop.f32.mrf.mxu1  ;;  %8444 = vmatmul.mubr.msk.bf16.gmra.mxu0 %vm957_vm2, %v10458_v24  ;;  %8452 = vmatmul.mubr.msk.bf16.gmra.mxu1 %vm957_vm2, %v10458_v24 }
 0x44e   : > { %v4810_v49 = vmax.f32 %v4808_v20, %v4757_v55  ;;  %v4967_v43 = vmax.f32 %v4965_v50, %v4914_v63  ;;  %5791 = vmatprep.mubr.bf16.mxu0 %v9026_v6  ;;  %5948 = vmatprep.mubr.bf16.mxu1 %v9026_v6  ;;  %v10474_v50 = vpop.trf.xlu1 }
 0x44f   : > { %v4759_v32 = vpop.f32.mrf.mxu0  ;;  %v4916_v41 = vpop.f32.mrf.mxu1 }
 0x450   : > { %v4831_v29 = vmax.f32 %v4829_v54, %v4759_v32  ;;  %v4988_v30 = vmax.f32 %v4986_v34, %v4916_v41 }
 0x451   : > { %v4761_v2 = vpop.f32.mrf.mxu0  ;;  %v4918_v52 = vpop.f32.mrf.mxu1 }
 0x452   : > { %v4811_v45 = vmax.f32 %v4809_v10, %v4761_v2  ;;  %v4968_v19 = vmax.f32 %v4966_v56, %v4918_v52  ;;  %v10482_v32 = vpop.trf.xlu1 }
 0x453   : > { %v4763_v12 = vpop.f32.mrf.mxu0  ;;  %v4920_v3 = vpop.f32.mrf.mxu1 }
 0x454   : > { %v4832_v37 = vmax.f32 %v4830_v33, %v4763_v12  ;;  %v4989_v61 = vmax.f32 %v4987_v47, %v4920_v3 }
 0x455   : > { %v4767_v11 = vpop.f32.mrf.mxu0  ;;  %v4924_v40 = vpop.f32.mrf.mxu1  ;;  %8445 = vmatmul.mubr.msk.bf16.gmra.mxu0 %vm957_vm2, %v10466_v4  ;;  %8453 = vmatmul.mubr.msk.bf16.gmra.mxu1 %vm957_vm2, %v10466_v4 }
 0x456   : > { %v4812_v18 = vmax.f32 %v4810_v49, %v4767_v11  ;;  %v4969_v38 = vmax.f32 %v4967_v43, %v4924_v40  ;;  %5801 = vmatprep.mubr.bf16.mxu0 %v9026_v6  ;;  %5958 = vmatprep.mubr.bf16.mxu1 %v9026_v6 }
 0x457   : > { %v4769_v13 = vpop.f32.mrf.mxu0  ;;  %v4926_v16 = vpop.f32.mrf.mxu1 }
 0x458   : > { %v4833_v1 = vmax.f32 %v4831_v29, %v4769_v13  ;;  %v4990_v57 = vmax.f32 %v4988_v30, %v4926_v16  ;;  %v10490_v16 = vpop.trf.xlu1 }
 0x459   : > { %v4771_v36 = vpop.f32.mrf.mxu0  ;;  %v4928_v7 = vpop.f32.mrf.mxu1 }
 0x45a   : > { %v4813_v21 = vmax.f32 %v4811_v45, %v4771_v36  ;;  %v4970_v20 = vmax.f32 %v4968_v19, %v4928_v7 }
 0x45b   : > { %v4773_v14 = vpop.f32.mrf.mxu0  ;;  %v4930_v17 = vpop.f32.mrf.mxu1 }
 0x45c   : > { %v4834_v54 = vmax.f32 %v4832_v37, %v4773_v14  ;;  %v4991_v34 = vmax.f32 %v4989_v61, %v4930_v17 }
 0x45d   : > { %v4777_v44 = vpop.f32.mrf.mxu0  ;;  %v4934_v22 = vpop.f32.mrf.mxu1  ;;  %8446 = vmatmul.mubr.msk.bf16.gmra.mxu0 %vm957_vm2, %v10474_v50  ;;  %8454 = vmatmul.mubr.msk.bf16.gmra.mxu1 %vm957_vm2, %v10474_v50 }
 0x45e   : > { %v4814_v10 = vmax.f32 %v4812_v18, %v4777_v44  ;;  %v4971_v56 = vmax.f32 %v4969_v38, %v4934_v22  ;;  %5811 = vmatprep.mubr.bf16.mxu0 %v9026_v6  ;;  %5968 = vmatprep.mubr.bf16.mxu1 %v9026_v6 }
 0x45f   : > { %v4779_v27 = vpop.f32.mrf.mxu0  ;;  %v4936_v26 = vpop.f32.mrf.mxu1 }
 0x460   : > { %v4835_v33 = vmax.f32 %v4833_v1, %v4779_v27  ;;  %v4992_v47 = vmax.f32 %v4990_v57, %v4936_v26 }
 0x461   : > { %v4781_v55 = vpop.f32.mrf.mxu0  ;;  %v4938_v63 = vpop.f32.mrf.mxu1 }
 0x462   : > { %v4815_v49 = vmax.f32 %v4813_v21, %v4781_v55  ;;  %v4972_v43 = vmax.f32 %v4970_v20, %v4938_v63 }
 0x463   : > { %v4783_v41 = vpop.f32.mrf.mxu0  ;;  %v4940_v29 = vpop.f32.mrf.mxu1 }
 0x464   : > { %v4836_v30 = vmax.f32 %v4834_v54, %v4783_v41  ;;  %v4993_v2 = vmax.f32 %v4991_v34, %v4940_v29 }
 0x465   : > { %v4787_v52 = vpop.f32.mrf.mxu0  ;;  %v4944_v45 = vpop.f32.mrf.mxu1  ;;  %8447 = vmatmul.mubr.msk.bf16.gmra.mxu0 %vm957_vm2, %v10482_v32  ;;  %8455 = vmatmul.mubr.msk.bf16.gmra.mxu1 %vm957_vm2, %v10482_v32 }
 0x466   : > { %v4816_v19 = vmax.f32 %v4814_v10, %v4787_v52  ;;  %v4973_v12 = vmax.f32 %v4971_v56, %v4944_v45  ;;  %5821 = vmatprep.mubr.bf16.mxu0 %v9026_v6  ;;  %5978 = vmatprep.mubr.bf16.mxu1 %v9026_v6 }
 0x467   : > { %v4789_v3 = vpop.f32.mrf.mxu0  ;;  %v4946_v37 = vpop.f32.mrf.mxu1 }
 0x468   : > { %v4837_v61 = vmax.f32 %v4835_v33, %v4789_v3  ;;  %v4994_v11 = vmax.f32 %v4992_v47, %v4946_v37 }
 0x469   : > { %v4791_v40 = vpop.f32.mrf.mxu0  ;;  %v4948_v18 = vpop.f32.mrf.mxu1 }
 0x46a   : > { %v4817_v38 = vmax.f32 %v4815_v49, %v4791_v40  ;;  %v4974_v13 = vmax.f32 %v4972_v43, %v4948_v18 }
 0x46b   : > { %v4793_v1 = vpop.f32.mrf.mxu0  ;;  %v4950_v57 = vpop.f32.mrf.mxu1 }
 0x46c   : > { %v4838_v36 = vmax.f32 %v4836_v30, %v4793_v1  ;;  %v4995_v7 = vmax.f32 %v4993_v2, %v4950_v57 }
 0x46d   : > { %v4797_v21 = vpop.f32.mrf.mxu0  ;;  %v4954_v20 = vpop.f32.mrf.mxu1  ;;  %8448 = vmatmul.mubr.msk.bf16.gmra.mxu0 %vm957_vm2, %v10490_v16  ;;  %8456 = vmatmul.mubr.msk.bf16.gmra.mxu1 %vm957_vm2, %v10490_v16 }
 0x46e   : > { %v4818_v14 = vmax.f32 %v4816_v19, %v4797_v21  ;;  %v4975_v17 = vmax.f32 %v4973_v12, %v4954_v20  ;;  %6065 = vmatprep.mubr.bf16.mxu0 %v9026_v6  ;;  %6222 = vmatprep.mubr.bf16.mxu1 %v9026_v6 }
 0x46f   : > { %v4799_v54 = vpop.f32.mrf.mxu0  ;;  %v4956_v34 = vpop.f32.mrf.mxu1 }
 0x470   : > { %v4839_v44 = vmax.f32 %v4837_v61, %v4799_v54  ;;  %v4996_v22 = vmax.f32 %v4994_v11, %v4956_v34 }
 0x471   : > { %v4801_v10 = vpop.f32.mrf.mxu0  ;;  %v4958_v56 = vpop.f32.mrf.mxu1 }
 0x472   : > { %v4819_v27 = vmax.f32 %v4817_v38, %v4801_v10  ;;  %v4976_v26 = vmax.f32 %v4974_v13, %v4958_v56 }
 0x473   : > { %v4803_v33 = vpop.f32.mrf.mxu0  ;;  %v4960_v47 = vpop.f32.mrf.mxu1 }
 0x474   : > { %v4820_v55 = vmax.f32 %v4818_v14, %v4819_v27  ;;  %v4977_v63 = vmax.f32 %v4975_v17, %v4976_v26  ;;  %v4840_v49 = vmax.f32 %v4838_v36, %v4803_v33  ;;  %v4997_v43 = vmax.f32 %v4995_v7, %v4960_v47 }
 0x475   : > { %v10498_v41 = vpop.f32.mrf.mxu0  ;;  %v10500_v29 = vpop.f32.mrf.mxu1  ;;  %8457 = vmatmul.mubr.msk.bf16.vlgmr.msra.gmra.mxu0 %vm957_vm2, %v10398_v53  ;;  %8465 = vmatmul.mubr.msk.bf16.vlgmr.msra.gmra.mxu1 %vm957_vm2, %v10398_v53 }
 0x476   : > { %v4821_v30 = vrot.slane %v4820_v55, 4  ;;  %v4978_v2 = vrot.slane %v4977_v63, 4  ;;  %v4841_v52 = vmax.f32 %v4839_v44, %v4840_v49  ;;  %v4998_v45 = vmax.f32 %v4996_v22, %v4997_v43  ;;  %6075 = vmatprep.mubr.bf16.mxu0 %v9026_v6  ;;  %6232 = vmatprep.mubr.bf16.mxu1 %v9026_v6 }
 0x477   : > { %v10508_v19 = vpop.f32.mrf.mxu0  ;;  %v10510_v12 = vpop.f32.mrf.mxu1 }
 0x478   : > { %v4822_v3 = vmax.f32 %v4820_v55, %v4821_v30  ;;  %v4979_v37 = vmax.f32 %v4977_v63, %v4978_v2  ;;  %v4842_v61 = vrot.slane %v4841_v52, 4  ;;  %v4999_v11 = vrot.slane %v4998_v45, 4 }
 0x479   : > { %v5087_v40 = vpop.f32.mrf.mxu0  ;;  %v5244_v18 = vpop.f32.mrf.mxu1 }
 0x47a   : > { %v4823_v38 = vrot.slane %v4822_v3, 2  ;;  %v4980_v53 = vrot.slane %v4979_v37, 2  ;;  %v4843_v13 = vmax.f32 %v4841_v52, %v4842_v61  ;;  %v5000_v1 = vmax.f32 %v4998_v45, %v4999_v11 }
 0x47b   : > { %v5089_v57 = vpop.f32.mrf.mxu0  ;;  %v5246_v36 = vpop.f32.mrf.mxu1 }
 0x47c   : > { %v4824_v7 = vmax.f32 %v4822_v3, %v4823_v38  ;;  %v4981_v21 = vmax.f32 %v4979_v37, %v4980_v53  ;;  %v4844_v20 = vrot.slane %v4843_v13, 2  ;;  %v5001_v14 = vrot.slane %v5000_v1, 2 }
 0x47d   : > { %v5093_v17 = vpop.f32.mrf.mxu0  ;;  %v5250_v54 = vpop.f32.mrf.mxu1  ;;  %8458 = vmatmul.mubr.msk.bf16.gmra.mxu0 %vm957_vm2, %v10420_v28  ;;  %8466 = vmatmul.mubr.msk.bf16.gmra.mxu1 %vm957_vm2, %v10420_v28 }
 0x47e   : > { %v4825_v34 = vrot.slane %v4824_v7, 1  ;;  %v4982_v44 = vrot.slane %v4981_v21, 1  ;;  %v4845_v22 = vmax.f32 %v4843_v13, %v4844_v20  ;;  %v5002_v10 = vmax.f32 %v5000_v1, %v5001_v14  ;;  %6085 = vmatprep.mubr.bf16.mxu0 %v9026_v6  ;;  %6242 = vmatprep.mubr.bf16.mxu1 %v9026_v6 }
 0x47f   : > { %v5162_v56 = vmax.f32 %v10498_v41, %v5093_v17  ;;  %v5319_v27 = vmax.f32 %v10500_v29, %v5250_v54  ;;  %v5095_v26 = vpop.f32.mrf.mxu0  ;;  %v5252_v33 = vpop.f32.mrf.mxu1 }
 0x480   : > { %v10520_v47 = vmax.f32 %v4824_v7, %v4825_v34  ;;  %v10522_v55 = vmax.f32 %v4981_v21, %v4982_v44  ;;  %v4846_v63 = vrot.slane %v4845_v22, 1  ;;  %v5003_v28 = vrot.slane %v5002_v10, 1 }
 0x481   : > { %v5183_v49 = vmax.f32 %v10508_v19, %v5095_v26  ;;  %v5340_v43 = vmax.f32 %v10510_v12, %v5252_v33  ;;  %v5097_v30 = vpop.f32.mrf.mxu0  ;;  %v5254_v2 = vpop.f32.mrf.mxu1 }
 0x482   : > { %v4848_v52 = vmax.f32 %v10345_v59, %v10520_v47  ;;  %v5005_v41 = vmax.f32 %v10350_v25, %v10522_v55  ;;  %v10530_v29 = vmax.f32 %v4845_v22, %v4846_v63  ;;  %v10532_v45 = vmax.f32 %v5002_v10, %v5003_v28 }
 0x483   : > { %v5163_v3 = vmax.f32 %v5087_v40, %v5097_v30  ;;  %v5320_v37 = vmax.f32 %v5244_v18, %v5254_v2  ;;  %v5099_v61 = vpop.f32.mrf.mxu0  ;;  %v5256_v11 = vpop.f32.mrf.mxu1 }
 0x484   : > { %v5184_v38 = vmax.f32 %v5089_v57, %v5099_v61  ;;  %v5341_v19 = vmax.f32 %v5246_v36, %v5256_v11  ;;  %v4849_v12 = vmax.f32 %v10355_v62, %v10530_v29  ;;  %v5006_v53 = vmax.f32 %v10360_v9, %v10532_v45 }
 0x485   : > { %v5103_v13 = vpop.f32.mrf.mxu0  ;;  %v5260_v1 = vpop.f32.mrf.mxu1  ;;  %8459 = vmatmul.mubr.msk.bf16.gmra.mxu0 %vm957_vm2, %v10444_v48  ;;  %8467 = vmatmul.mubr.msk.bf16.gmra.mxu1 %vm957_vm2, %v10444_v48 }
 0x486   : > { %v5164_v40 = vmax.f32 %v5162_v56, %v5103_v13  ;;  %v5321_v18 = vmax.f32 %v5319_v27, %v5260_v1  ;;  %6095 = vmatprep.mubr.bf16.mxu0 %v9026_v6  ;;  %6252 = vmatprep.mubr.bf16.mxu1 %v9026_v6 }
 0x487   : > { %v5105_v57 = vpop.f32.mrf.mxu0  ;;  %v5262_v36 = vpop.f32.mrf.mxu1 }
 0x488   : > { %v10544_v7 = vmax.f32 %v5183_v49, %v5105_v57  ;;  %v10546_v21 = vmax.f32 %v5340_v43, %v5262_v36 }
 0x489   : > { %v5107_v20 = vpop.f32.mrf.mxu0  ;;  %v5264_v14 = vpop.f32.mrf.mxu1 }
 0x48a   : > { %v5165_v17 = vmax.f32 %v5163_v3, %v5107_v20  ;;  %v5322_v54 = vmax.f32 %v5320_v37, %v5264_v14 }
 0x48b   : > { %v5109_v34 = vpop.f32.mrf.mxu0  ;;  %v5266_v44 = vpop.f32.mrf.mxu1 }
 0x48c   : > { %v10548_v22 = vmax.f32 %v5184_v38, %v5109_v34  ;;  %v10550_v48 = vmax.f32 %v5341_v19, %v5266_v44 }
 0x48d   : > { %v5113_v10 = vpop.f32.mrf.mxu0  ;;  %v5270_v56 = vpop.f32.mrf.mxu1  ;;  %8460 = vmatmul.mubr.msk.bf16.gmra.mxu0 %vm957_vm2, %v10458_v24  ;;  %8468 = vmatmul.mubr.msk.bf16.gmra.mxu1 %vm957_vm2, %v10458_v24 }
 0x48e   : > { %v5166_v27 = vmax.f32 %v5164_v40, %v5113_v10  ;;  %v5323_v26 = vmax.f32 %v5321_v18, %v5270_v56  ;;  %6105 = vmatprep.mubr.bf16.mxu0 %v9026_v6  ;;  %6262 = vmatprep.mubr.bf16.mxu1 %v9026_v6 }
 0x48f   : > { %v10558_v33 = vpop.f32.mrf.mxu0  ;;  %v10560_v63 = vpop.f32.mrf.mxu1 }
 0x490   : > { %v5187_v28 = vmax.f32 %v10544_v7, %v10558_v33  ;;  %v5344_v49 = vmax.f32 %v10546_v21, %v10560_v63  ;;  %v6378_v63 = vld [vmem:[%s11295_s6 + $0x70] sm:$0xff] }
 0x491   : > { %v5117_v43 = vpop.f32.mrf.mxu0  ;;  %v5274_v30 = vpop.f32.mrf.mxu1 }
 0x492   : > { %v5167_v2 = vmax.f32 %v5165_v17, %v5117_v43  ;;  %v5324_v24 = vmax.f32 %v5322_v54, %v5274_v30 }
 0x493   : > { %v5119_v3 = vpop.f32.mrf.mxu0  ;;  %v10566_v37 = vpop.f32.mrf.mxu1 }
 0x494   : > { %v5188_v61 = vmax.f32 %v10548_v22, %v5119_v3  ;;  %v5345_v11 = vmax.f32 %v10550_v48, %v10566_v37  ;;  %v6393_v48 = vld [vmem:[%s11295_s6 + $0xe8] sm:$0xff] }
 0x495   : > { %v5123_v38 = vpop.f32.mrf.mxu0  ;;  %v5280_v19 = vpop.f32.mrf.mxu1  ;;  %8461 = vmatmul.mubr.msk.bf16.gmra.mxu0 %vm957_vm2, %v10466_v4  ;;  %8469 = vmatmul.mubr.msk.bf16.gmra.mxu1 %vm957_vm2, %v10466_v4  ;;  %v6512_v37 = vld [vmem:[%s11295_s6 + $0x1e8] sm:$0xff] }
 0x496   : > { %v5168_v13 = vmax.f32 %v5166_v27, %v5123_v38  ;;  %v5325_v1 = vmax.f32 %v5323_v26, %v5280_v19  ;;  %6115 = vmatprep.mubr.bf16.mxu0 %v9026_v6  ;;  %6272 = vmatprep.mubr.bf16.mxu1 %v9026_v6 }
 0x497   : > { %v5125_v40 = vpop.f32.mrf.mxu0  ;;  %v5282_v18 = vpop.f32.mrf.mxu1 }
 0x499   : > { %v5127_v57 = vpop.f32.mrf.mxu0  ;;  %v5284_v36 = vpop.f32.mrf.mxu1 }
 0x49a   : > { %v5169_v20 = vmax.f32 %v5167_v2, %v5127_v57  ;;  %v5326_v14 = vmax.f32 %v5324_v24, %v5284_v36 }
 0x49b   : > { %v5129_v17 = vpop.f32.mrf.mxu0  ;;  %v5286_v54 = vpop.f32.mrf.mxu1 }
 0x49c   : > { %v5347_v7 = vmax.f32 %v5345_v11, %v5286_v54  ;;  %v6496_v54 = vld [vmem:[%s11295_s6 + $0x168] sm:$0xff] }
 0x49d   : > { %v5133_v34 = vpop.f32.mrf.mxu0  ;;  %v5290_v44 = vpop.f32.mrf.mxu1  ;;  %8462 = vmatmul.mubr.msk.bf16.gmra.mxu0 %vm957_vm2, %v10474_v50  ;;  %8470 = vmatmul.mubr.msk.bf16.gmra.mxu1 %vm957_vm2, %v10474_v50 }
 0x49e   : > { %v5170_v4 = vmax.f32 %v5168_v13, %v5133_v34  ;;  %v5327_v22 = vmax.f32 %v5325_v1, %v5290_v44  ;;  %6125 = vmatprep.mubr.bf16.mxu0 %v9026_v6  ;;  %6282 = vmatprep.mubr.bf16.mxu1 %v9026_v6  ;;  %v6395_v44 = vld [vmem:[%s11295_s6 + $0xf8] sm:$0xff] }
 0x49f   : > { %v5135_v10 = vpop.f32.mrf.mxu0  ;;  %v5292_v56 = vpop.f32.mrf.mxu1  ;;  %8500 = vmatprep.subr.mxu0 %v6395_v44  ;;  %v6511_v44 = vld [vmem:[%s11295_s6 + $0x1e0] sm:$0xff] }
 0x4a1   : > { %v5137_v27 = vpop.f32.mrf.mxu0  ;;  %v5294_v26 = vpop.f32.mrf.mxu1 }
 0x4a2   : > { %v5171_v43 = vmax.f32 %v5169_v20, %v5137_v27  ;;  %v5328_v30 = vmax.f32 %v5326_v14, %v5294_v26  ;;  %v6498_v27 = vld [vmem:[%s11295_s6 + $0x178] sm:$0xff]  ;;  %v5346_v26 = vmax.f32 %v5344_v49, %v5282_v18 }
 0x4a3   : > { %v5139_v2 = vpop.f32.mrf.mxu0  ;;  %v10583_v24 = vpop.f32.mrf.mxu1 }
 0x4a4   : > { %v5349_v11 = vmax.f32 %v5347_v7, %v10583_v24 }
 0x4a5   : > { %v5143_v3 = vpop.f32.mrf.mxu0  ;;  %v5300_v38 = vpop.f32.mrf.mxu1  ;;  %8463 = vmatmul.mubr.msk.bf16.gmra.mxu0 %vm957_vm2, %v10482_v32  ;;  %8471 = vmatmul.mubr.msk.bf16.gmra.mxu1 %vm957_vm2, %v10482_v32 }
 0x4a6   : > { %v10589_v50 = vmax.f32 %v5170_v4, %v5143_v3  ;;  %v10591_v19 = vmax.f32 %v5327_v22, %v5300_v38  ;;  %6135 = vmatprep.mubr.bf16.mxu0 %v9026_v6  ;;  %6292 = vmatprep.mubr.bf16.mxu1 %v9026_v6  ;;  %v6514_v4 = vld [vmem:[%s11295_s6 + $0x1f8] sm:$0xff]  ;;  %v5189_v6 = vmax.f32 %v5187_v28, %v5125_v40  ;;  %v6394_v38 = vld [vmem:[%s11295_s6 + $0xf0] sm:$0xff] }
 0x4a7   : > { %v5145_v13 = vpop.f32.mrf.mxu0  ;;  %v5302_v1 = vpop.f32.mrf.mxu1  ;;  %8535 = vmatprep.subr.mxu1 %v6514_v4  ;;  %v6379_v22 = vld [vmem:[%s11295_s6 + $0x78] sm:$0xff]  ;;  %v6497_v28 = vld [vmem:[%s11295_s6 + $0x170] sm:$0xff] }
 0x4a8   : > { %8501 = vmatpush3.msra.mxu0 %v6379_v22  ;;  %8536 = vmatpush3.msra.mxu1 %v6498_v27  ;;  %v5191_v49 = vmax.f32 %v5189_v6, %v5135_v10  ;;  %v6376_v27 = vld [vmem:[%s11295_s6 + $0x60] sm:$0xff] }
 0x4a9   : > { %v5147_v57 = vpop.f32.mrf.mxu0  ;;  %v5304_v36 = vpop.f32.mrf.mxu1  ;;  %8502 = vmatprep.subr.mxu0 %v6394_v38  ;;  %v6375_v38 = vld [vmem:[%s11295_s6 + $0x58] sm:$0xff] }
 0x4aa   : > { %v10595_v20 = vmax.f32 %v5171_v43, %v5147_v57  ;;  %v10597_v14 = vmax.f32 %v5328_v30, %v5304_v36  ;;  %v5190_v43 = vmax.f32 %v5188_v61, %v5129_v17  ;;  %v6513_v57 = vld [vmem:[%s11295_s6 + $0x1f0] sm:$0xff]  ;;  %8503 = vmatpush3.msra.mxu0 %v6378_v63  ;;  %v6377_v17 = vld [vmem:[%s11295_s6 + $0x68] sm:$0xff]  ;;  %v6392_v36 = vld [vmem:[%s11295_s6 + $0xe0] sm:$0xff] }
 0x4ab   : > { %v5149_v32 = vpop.f32.mrf.mxu0  ;;  %v5306_v34 = vpop.f32.mrf.mxu1  ;;  %8537 = vmatprep.subr.mxu1 %v6513_v57  ;;  %8504 = vmatprep.subr.mxu0 %v6393_v48  ;;  %v6494_v57 = vld [vmem:[%s11295_s6 + $0x158] sm:$0xff] }
 0x4ac   : > { %v5192_v61 = vmax.f32 %v5190_v43, %v5139_v2  ;;  %8538 = vmatpush3.msra.mxu1 %v6497_v28  ;;  %v5351_v4 = vmax.f32 %v5349_v11, %v5306_v34  ;;  %8505 = vmatpush3.msra.mxu0 %v6377_v17  ;;  %v6391_v43 = vld [vmem:[%s11295_s6 + $0xd8] sm:$0xff]  ;;  %v6390_v28 = vld [vmem:[%s11295_s6 + $0xd0] sm:$0xff]  ;;  %v6389_v11 = vld [vmem:[%s11295_s6 + $0xc8] sm:$0xff] }
 0x4ad   : > { %v5153_v30 = vpop.f32.mrf.mxu0  ;;  %v5310_v3 = vpop.f32.mrf.mxu1  ;;  %8464 = vmatmul.mubr.msk.bf16.gmra.mxu0 %vm957_vm2, %v10490_v16  ;;  %8472 = vmatmul.mubr.msk.bf16.gmra.mxu1 %vm957_vm2, %v10490_v16  ;;  %v5348_v16 = vmax.f32 %v5346_v26, %v5292_v56  ;;  %v6510_v34 = vld [vmem:[%s11295_s6 + $0x1d8] sm:$0xff]  ;;  %v6508_v17 = vld [vmem:[%s11295_s6 + $0x1c8] sm:$0xff] }
 0x4ae   : > { %v5174_v21 = vmax.f32 %v10589_v50, %v5153_v30  ;;  %v5331_v33 = vmax.f32 %v10591_v19, %v5310_v3  ;;  %v5193_v50 = vmax.f32 %v5191_v49, %v5145_v13  ;;  %v5194_v56 = vmax.f32 %v5192_v61, %v5149_v32  ;;  %8539 = vmatprep.subr.mxu1 %v6512_v37  ;;  %v6495_v13 = vld [vmem:[%s11295_s6 + $0x160] sm:$0xff]  ;;  %v6509_v49 = vld [vmem:[%s11295_s6 + $0x1d0] sm:$0xff] }
 0x4af   : > { %v5155_v40 = vpop.f32.mrf.mxu0  ;;  %v5312_v18 = vpop.f32.mrf.mxu1  ;;  %v5350_v10 = vmax.f32 %v5348_v16, %v5302_v1  ;;  %8540 = vmatpush3.msra.mxu1 %v6496_v54  ;;  %8506 = vmatprep.subr.mxu0 %v6392_v36 }
 0x4b0   : > { %v5195_v1 = vmax.f32 %v5193_v50, %v5155_v40  ;;  %8541 = vmatprep.subr.mxu1 %v6511_v44  ;;  %8507 = vmatpush3.msra.mxu0 %v6376_v27  ;;  %v6374_v40 = vld [vmem:[%s11295_s6 + $0x50] sm:$0xff] }
 0x4b1   : > { %v5157_v2 = vpop.f32.mrf.mxu0  ;;  %v5314_v19 = vpop.f32.mrf.mxu1  ;;  %v5352_v32 = vmax.f32 %v5350_v10, %v5312_v18  ;;  %8542 = vmatpush3.msra.mxu1 %v6495_v13  ;;  %8508 = vmatprep.subr.mxu0 %v6391_v43  ;;  %v6493_v18 = vld [vmem:[%s11295_s6 + $0x150] sm:$0xff] }
 0x4b2   : > { %v5175_v24 = vmax.f32 %v10595_v20, %v5157_v2  ;;  %v5332_v22 = vmax.f32 %v10597_v14, %v5314_v19  ;;  %8543 = vmatprep.subr.mxu1 %v6510_v34  ;;  %8509 = vmatpush3.msra.mxu0 %v6375_v38  ;;  %v6373_v2 = vld [vmem:[%s11295_s6 + $0x48] sm:$0xff]  ;;  %v6387_v34 = vld [vmem:[%s11295_s6 + $0xb8] sm:$0xff] }
 0x4b3   : > { %v5159_v6 = vpop.f32.mrf.mxu0  ;;  %v5316_v26 = vpop.f32.mrf.mxu1  ;;  %8544 = vmatpush3.msra.mxu1 %v6494_v57  ;;  %8510 = vmatprep.subr.mxu0 %v6390_v28  ;;  %v6492_v19 = vld [vmem:[%s11295_s6 + $0x148] sm:$0xff]  ;;  %v6371_v57 = vld [vmem:[%s11295_s6 + $0x38] sm:$0xff] }
 0x4b4   : > { %v5176_v30 = vmax.f32 %v5174_v21, %v5175_v24  ;;  %v5333_v20 = vmax.f32 %v5331_v33, %v5332_v22  ;;  %v5196_v3 = vmax.f32 %v5194_v56, %v5159_v6  ;;  %v5353_v14 = vmax.f32 %v5351_v4, %v5316_v26  ;;  %8545 = vmatprep.subr.mxu1 %v6509_v49  ;;  %v6388_v4 = vld [vmem:[%s11295_s6 + $0xc0] sm:$0xff]  ;;  %v6490_v28 = vld [vmem:[%s11295_s6 + $0x138] sm:$0xff] }
 0x4b5   : > { %v10637_v7 = vpop.f32.mrf.mxu0  ;;  %v10639_v63 = vpop.f32.mrf.mxu1  ;;  %8511 = vmatpush3.msra.mxu0 %v6374_v40  ;;  %8546 = vmatpush3.msra.mxu1 %v6493_v18  ;;  %v6507_v24 = vld [vmem:[%s11295_s6 + $0x1c0] sm:$0xff] }
 0x4b6   : > { %v5177_v16 = vrot.slane %v5176_v30, 4  ;;  %v5334_v21 = vrot.slane %v5333_v20, 4  ;;  %v5197_v33 = vmax.f32 %v5195_v1, %v5196_v3  ;;  %v5354_v61 = vmax.f32 %v5352_v32, %v5353_v14  ;;  %8512 = vmatprep.subr.mxu0 %v6389_v11  ;;  %8547 = vmatprep.subr.mxu1 %v6508_v17  ;;  %v6372_v32 = vld [vmem:[%s11295_s6 + $0x40] sm:$0xff]  ;;  %v6370_v17 = vld [vmem:[%s11295_s6 + $0x30] sm:$0xff] }
 0x4b7   : > { %v10645_v48 = vpop.f32.mrf.mxu0  ;;  %v10647_v37 = vpop.f32.mrf.mxu1  ;;  %8513 = vmatpush3.msra.mxu0 %v6373_v2  ;;  %v6491_v6 = vld [vmem:[%s11295_s6 + $0x140] sm:$0xff]  ;;  %8548 = vmatpush3.msra.mxu1 %v6492_v19  ;;  %v6385_v19 = vld [vmem:[%s11295_s6 + $0xa8] sm:$0xff] }
 0x4b8   : > { %v5178_v54 = vmax.f32 %v5176_v30, %v5177_v16  ;;  %v5335_v50 = vmax.f32 %v5333_v20, %v5334_v21  ;;  %v5198_v10 = vrot.slane %v5197_v33, 4  ;;  %v5355_v56 = vrot.slane %v5354_v61, 4  ;;  %8514 = vmatprep.subr.mxu0 %v6388_v4  ;;  %v6506_v30 = vld [vmem:[%s11295_s6 + $0x1b8] sm:$0xff]  ;;  %8549 = vmatprep.subr.mxu1 %v6507_v24  ;;  %v6386_v21 = vld [vmem:[%s11295_s6 + $0xb0] sm:$0xff]  ;;  %v6504_v4 = vld [vmem:[%s11295_s6 + $0x1a8] sm:$0xff] }
 0x4b9   : > { %v10653_v36 = vpop.f32.mrf.mxu0  ;;  %v10655_v44 = vpop.f32.mrf.mxu1  ;;  %8515 = vmatpush3.msra.mxu0 %v6372_v32  ;;  %8550 = vmatpush3.msra.mxu1 %v6491_v6 }
 0x4ba   : > { %v5179_v22 = vrot.slane %v5178_v54, 2  ;;  %v5336_v27 = vrot.slane %v5335_v50, 2  ;;  %v5199_v13 = vmax.f32 %v5197_v33, %v5198_v10  ;;  %v5356_v1 = vmax.f32 %v5354_v61, %v5355_v56  ;;  %8516 = vmatprep.subr.mxu0 %v6387_v34  ;;  %v6505_v33 = vld [vmem:[%s11295_s6 + $0x1b0] sm:$0xff]  ;;  %8551 = vmatprep.subr.mxu1 %v6506_v30  ;;  %v6384_v34 = vld [vmem:[%s11295_s6 + $0xa0] sm:$0xff] }
 0x4bb   : > { %v10661_v26 = vpop.f32.mrf.mxu0  ;;  %v10663_v43 = vpop.f32.mrf.mxu1  ;;  %8517 = vmatpush3.msra.mxu0 %v6371_v57  ;;  %8552 = vmatpush3.msra.mxu1 %v6490_v28  ;;  %v6503_v30 = vld [vmem:[%s11295_s6 + $0x1a0] sm:$0xff] }
 0x4bc   : > { %v5180_v20 = vmax.f32 %v5178_v54, %v5179_v22  ;;  %v5337_v3 = vmax.f32 %v5335_v50, %v5336_v27  ;;  %v5200_v14 = vrot.slane %v5199_v13, 2  ;;  %v5357_v38 = vrot.slane %v5356_v1, 2  ;;  %v6489_v54 = vld [vmem:[%s11295_s6 + $0x130] sm:$0xff]  ;;  %8518 = vmatprep.subr.mxu0 %v6386_v21  ;;  %8553 = vmatprep.subr.mxu1 %v6505_v33  ;;  %v6487_v57 = vld [vmem:[%s11295_s6 + $0x120] sm:$0xff] }
 0x4bd   : > { %v10669_v49 = vpop.f32.mrf.mxu0  ;;  %v10671_v16 = vpop.f32.mrf.mxu1  ;;  %8519 = vmatpush3.msra.mxu0 %v6370_v17  ;;  %8554 = vmatpush3.msra.mxu1 %v6489_v54 }
 0x4be   : > { %v5181_v61 = vrot.slane %v5180_v20, 1  ;;  %v5338_v40 = vrot.slane %v5337_v3, 1  ;;  %v5201_v18 = vmax.f32 %v5199_v13, %v5200_v14  ;;  %v5358_v11 = vmax.f32 %v5356_v1, %v5357_v38  ;;  %8520 = vmatprep.subr.mxu0 %v6385_v19  ;;  %8555 = vmatprep.subr.mxu1 %v6504_v4  ;;  %v6368_v38 = vld [vmem:[%s11295_s6 + $0x20] sm:$0xff] }
 0x4bf   : > { %v5476_v50 = vmax.f32 %v10637_v7, %v10669_v49  ;;  %v5633_v10 = vmax.f32 %v10639_v63, %v10671_v16  ;;  %v10681_v56 = vpop.f32.mrf.mxu0  ;;  %v10683_v2 = vpop.f32.mrf.mxu1  ;;  %v6369_v7 = vld [vmem:[%s11295_s6 + $0x28] sm:$0xff]  ;;  %v6499_v19 = vld [vmem:[%s11295_s6 + $0x180] sm:$0xff] }
 0x4c0   : > { %v5182_v24 = vmax.f32 %v5180_v20, %v5181_v61  ;;  %v5339_v22 = vmax.f32 %v5337_v3, %v5338_v40  ;;  %v5202_v27 = vrot.slane %v5201_v18, 1  ;;  %v5359_v13 = vrot.slane %v5358_v11, 1  ;;  %v6488_v63 = vld [vmem:[%s11295_s6 + $0x128] sm:$0xff]  ;;  %8521 = vmatpush3.msra.mxu0 %v6369_v7  ;;  %v6501_v61 = vld [vmem:[%s11295_s6 + $0x190] sm:$0xff] }
 0x4c1   : > { %v5497_v1 = vmax.f32 %v10645_v48, %v10681_v56  ;;  %v5411_v32 = vpop.f32.mrf.mxu0  ;;  %v5568_v6 = vpop.f32.mrf.mxu1  ;;  %8556 = vmatpush3.msra.mxu1 %v6488_v63  ;;  %8522 = vmatprep.subr.mxu0 %v6384_v34  ;;  %v5654_v40 = vmax.f32 %v10647_v37, %v10683_v2  ;;  %v6365_v37 = vld [vmem:[%s11295_s6 + $0x8] sm:$0xff]  ;;  %v6380_v2 = vld [vmem:[%s11295_s6 + $0x80] sm:$0xff] }
 0x4c2   : > { %v10696_v20 = vmax.f32 %v4534_v35, %v5182_v24  ;;  %v10701_v3 = vmax.f32 %v4691_v46, %v5339_v22  ;;  %v5203_v14 = vmax.f32 %v5201_v18, %v5202_v27  ;;  %v5360_v48 = vmax.f32 %v5358_v11, %v5359_v13  ;;  %8557 = vmatprep.subr.mxu1 %v6503_v30  ;;  %v6367_v46 = vld [vmem:[%s11295_s6 + $0x18] sm:$0xff]  ;;  %v6364_v22 = vld [vmem:[%s11295_s6] sm:$0xff] }
 0x4c3   : > { %v5477_v28 = vmax.f32 %v10653_v36, %v5411_v32  ;;  %v5634_v49 = vmax.f32 %v10655_v44, %v5568_v6  ;;  %v5413_v16 = vpop.f32.mrf.mxu0  ;;  %v5570_v23 = vpop.f32.mrf.mxu1  ;;  %v6486_v36 = vld [vmem:[%s11295_s6 + $0x118] sm:$0xff]  ;;  %8523 = vmatpush3.msra.mxu0 %v6368_v38  ;;  %8558 = vmatpush3.msra.mxu1 %v6487_v57  ;;  %v6483_v27 = vld [vmem:[%s11295_s6 + $0x100] sm:$0xff] }
 0x4c4   : > { %11304 = vst [vmem:[#allocation26_spill] sm:$0xff] %v10696_v20  ;;  %11305 = vst [vmem:[#allocation27_spill] sm:$0xff] %v10701_v3  ;;  %v5498_v0 = vmax.f32 %v10661_v26, %v5413_v16  ;;  %v5655_v35 = vmax.f32 %v10663_v43, %v5570_v23  ;;  %v10716_v44 = vmax.f32 %v4535_v60, %v5203_v14  ;;  %v6382_v26 = vld [vmem:[%s11295_s6 + $0x90] sm:$0xff]  ;;  %8524 = vmatprep.subr.mxu0 %v6383_v31 }
 0x4c5   : > { %v5417_v21 = vpop.f32.mrf.mxu0  ;;  %v5574_v33 = vpop.f32.mrf.mxu1  ;;  %v10723_v43 = vmax.f32 %v4692_v58, %v5360_v48  ;;  %8559 = vmatprep.subr.mxu1 %v6502_v8  ;;  %v6485_v60 = vld [vmem:[%s11295_s6 + $0x110] sm:$0xff]  ;;  %8525 = vmatpush3.msra.mxu0 %v6367_v46 }
 0x4c6   : > { %11306 = vst [vmem:[#allocation28_spill] sm:$0xff] %v10716_v44  ;;  %v5478_v18 = vmax.f32 %v5476_v50, %v5417_v21  ;;  %v5635_v42 = vmax.f32 %v5633_v10, %v5574_v33  ;;  %8560 = vmatpush3.msra.mxu1 %v6486_v36  ;;  %8526 = vmatprep.subr.mxu0 %v6382_v26  ;;  %v6484_v50 = vld [vmem:[%s11295_s6 + $0x108] sm:$0xff] }
 0x4c7   : > { %11307 = vst [vmem:[#allocation29_spill] sm:$0xff] %v10723_v43  ;;  %v5419_v11 = vpop.f32.mrf.mxu0  ;;  %v5576_v17 = vpop.f32.mrf.mxu1  ;;  %8561 = vmatprep.subr.mxu1 %v6501_v61  ;;  %8527 = vmatpush3.msra.mxu0 %v6366_v15 }
 0x4c8   : > { %v5499_v58 = vmax.f32 %v5497_v1, %v5419_v11  ;;  %v5656_v54 = vmax.f32 %v5654_v40, %v5576_v17  ;;  %8562 = vmatpush3.msra.mxu1 %v6485_v60  ;;  %8528 = vmatprep.subr.mxu0 %v6381_v39 }
 0x4c9   : > { %v5421_v10 = vpop.f32.mrf.mxu0  ;;  %v5578_v56 = vpop.f32.mrf.mxu1  ;;  %8563 = vmatprep.subr.mxu1 %v6500_v51  ;;  %8529 = vmatpush3.msra.mxu0 %v6365_v37 }
 0x4ca   : > { %v5479_v4 = vmax.f32 %v5477_v28, %v5421_v10  ;;  %v5636_v24 = vmax.f32 %v5634_v49, %v5578_v56  ;;  %8564 = vmatpush3.msra.mxu1 %v6484_v50  ;;  %8530 = vmatprep.subr.mxu0 %v6380_v2 }
 0x4cb   : > { %v5423_v13 = vpop.f32.mrf.mxu0  ;;  %v5580_v7 = vpop.f32.mrf.mxu1  ;;  %8565 = vmatprep.subr.mxu1 %v6499_v19  ;;  %8531 = vmatpush3.msra.mxu0 %v6364_v22 }
 0x4cc   : > { %v5500_v63 = vmax.f32 %v5498_v0, %v5423_v13  ;;  %v5657_v1 = vmax.f32 %v5655_v35, %v5580_v7  ;;  %8566 = vmatpush3.msra.mxu1 %v6483_v27 }
 0x4cd   : > { %v5427_v32 = vpop.f32.mrf.mxu0  ;;  %v5584_v6 = vpop.f32.mrf.mxu1 }
 0x4ce   : > { %v5480_v34 = vmax.f32 %v5478_v18, %v5427_v32  ;;  %v5637_v30 = vmax.f32 %v5635_v42, %v5584_v6 }
 0x4cf   : > { %v5429_v14 = vpop.f32.mrf.mxu0  ;;  %v5586_v48 = vpop.f32.mrf.mxu1 }
 0x4d0   : > { %v5501_v38 = vmax.f32 %v5499_v58, %v5429_v14  ;;  %v5658_v57 = vmax.f32 %v5656_v54, %v5586_v48 }
 0x4d1   : > { %v5431_v28 = vpop.f32.mrf.mxu0  ;;  %v5588_v49 = vpop.f32.mrf.mxu1 }
 0x4d2   : > { %v5481_v16 = vmax.f32 %v5479_v4, %v5431_v28  ;;  %v5638_v23 = vmax.f32 %v5636_v24, %v5588_v49 }
 0x4d3   : > { %v5433_v31 = vpop.f32.mrf.mxu0  ;;  %v5590_v8 = vpop.f32.mrf.mxu1 }
 0x4d4   : > { %v5502_v0 = vmax.f32 %v5500_v63, %v5433_v31  ;;  %v5659_v35 = vmax.f32 %v5657_v1, %v5590_v8 }
 0x4d5   : > { %v5437_v46 = vpop.f32.mrf.mxu0  ;;  %v5594_v36 = vpop.f32.mrf.mxu1 }
 0x4d6   : > { %v5482_v21 = vmax.f32 %v5480_v34, %v5437_v46  ;;  %v5639_v33 = vmax.f32 %v5637_v30, %v5594_v36  ;;  %v6752_v46 = vld [vmem:[%s11295_s6 + $0x3f8] sm:$0xff] }
 0x4d7   : > { %v5439_v26 = vpop.f32.mrf.mxu0  ;;  %v5596_v61 = vpop.f32.mrf.mxu1  ;;  %8605 = vmatprep.subr.mxu1 %v6752_v46 }
 0x4d8   : > { %v5503_v40 = vmax.f32 %v5501_v38, %v5439_v26  ;;  %v5660_v18 = vmax.f32 %v5658_v57, %v5596_v61 }
 0x4d9   : > { %v5441_v42 = vpop.f32.mrf.mxu0  ;;  %v5598_v15 = vpop.f32.mrf.mxu1 }
 0x4da   : > { %v5483_v60 = vmax.f32 %v5481_v16, %v5441_v42  ;;  %v5640_v11 = vmax.f32 %v5638_v23, %v5598_v15 }
 0x4db   : > { %v5443_v17 = vpop.f32.mrf.mxu0  ;;  %v5600_v39 = vpop.f32.mrf.mxu1 }
 0x4dc   : > { %v5504_v51 = vmax.f32 %v5502_v0, %v5443_v17  ;;  %v5661_v58 = vmax.f32 %v5659_v35, %v5600_v39  ;;  %v6633_v35 = vld [vmem:[%s11295_s6 + $0x2f8] sm:$0xff] }
 0x4dd   : > { %v5447_v54 = vpop.f32.mrf.mxu0  ;;  %v5604_v37 = vpop.f32.mrf.mxu1  ;;  %8570 = vmatprep.subr.mxu0 %v6633_v35 }
 0x4de   : > { %v5484_v50 = vmax.f32 %v5482_v21, %v5447_v54  ;;  %v5641_v10 = vmax.f32 %v5639_v33, %v5604_v37  ;;  %v6905_v37 = vld [vmem:[%s10741_s23] sm:$0x1] }
 0x4df   : > { %v5449_v56 = vpop.f32.mrf.mxu0  ;;  %v5606_v2 = vpop.f32.mrf.mxu1  ;;  %6909 = vperm.xlu0 %8919, %v6905_v37  }
 0x4e0   : > { %v5505_v19 = vmax.f32 %v5503_v40, %v5449_v56  ;;  %v5662_v4 = vmax.f32 %v5660_v18, %v5606_v2 }
 0x4e1   : > { %v5451_v24 = vpop.f32.mrf.mxu0  ;;  %v5608_v22 = vpop.f32.mrf.mxu1 }
 0x4e2   : > { %v5485_v27 = vmax.f32 %v5483_v60, %v5451_v24  ;;  %v5642_v13 = vmax.f32 %v5640_v11, %v5608_v22 }
 0x4e3   : > { %v5453_v7 = vpop.f32.mrf.mxu0  ;;  %v5610_v63 = vpop.f32.mrf.mxu1 }
 0x4e4   : > { %v5506_v1 = vmax.f32 %v5504_v51, %v5453_v7  ;;  %v5663_v32 = vmax.f32 %v5661_v58, %v5610_v63 }
 0x4e5   : > { %v5457_v6 = vpop.f32.mrf.mxu0  ;;  %v5614_v34 = vpop.f32.mrf.mxu1 }
 0x4e6   : > { %v5486_v30 = vmax.f32 %v5484_v50, %v5457_v6  ;;  %v5643_v14 = vmax.f32 %v5641_v10, %v5614_v34 }
 0x4e7   : > { %v5459_v48 = vpop.f32.mrf.mxu0  ;;  %v5616_v38 = vpop.f32.mrf.mxu1 }
 0x4e8   : > { %v5507_v57 = vmax.f32 %v5505_v19, %v5459_v48  ;;  %v5664_v28 = vmax.f32 %v5662_v4, %v5616_v38 }
 0x4e9   : > { %v5461_v49 = vpop.f32.mrf.mxu0  ;;  %v5618_v16 = vpop.f32.mrf.mxu1 }
 0x4ea   : > { %v5487_v23 = vmax.f32 %v5485_v27, %v5461_v49  ;;  %v5644_v31 = vmax.f32 %v5642_v13, %v5618_v16 }
 0x4eb   : > { %v5463_v8 = vpop.f32.mrf.mxu0  ;;  %v5620_v0 = vpop.f32.mrf.mxu1 }
 0x4ec   : > { %v5508_v36 = vmax.f32 %v5506_v1, %v5463_v8  ;;  %v5665_v21 = vmax.f32 %v5663_v32, %v5620_v0 }
 0x4ed   : > { %v5467_v33 = vpop.f32.mrf.mxu0  ;;  %v5624_v26 = vpop.f32.mrf.mxu1 }
 0x4ee   : > { %v5488_v61 = vmax.f32 %v5486_v30, %v5467_v33  ;;  %v5645_v40 = vmax.f32 %v5643_v14, %v5624_v26 }
 0x4ef   : > { %v5469_v18 = vpop.f32.mrf.mxu0  ;;  %v5626_v42 = vpop.f32.mrf.mxu1 }
 0x4f0   : > { %v5509_v15 = vmax.f32 %v5507_v57, %v5469_v18  ;;  %v5666_v60 = vmax.f32 %v5664_v28, %v5626_v42 }
 0x4f1   : > { %v5471_v11 = vpop.f32.mrf.mxu0  ;;  %v5628_v17 = vpop.f32.mrf.mxu1 }
 0x4f2   : > { %v5489_v39 = vmax.f32 %v5487_v23, %v5471_v11  ;;  %v5646_v51 = vmax.f32 %v5644_v31, %v5628_v17 }
 0x4f3   : > { %v5473_v58 = vpop.f32.mrf.mxu0  ;;  %v5630_v54 = vpop.f32.mrf.mxu1 }
 0x4f4   : > { %v5490_v50 = vmax.f32 %v5488_v61, %v5489_v39  ;;  %v5647_v10 = vmax.f32 %v5645_v40, %v5646_v51  ;;  %v5510_v56 = vmax.f32 %v5508_v36, %v5473_v58  ;;  %v5667_v2 = vmax.f32 %v5665_v21, %v5630_v54 }
 0x4f5   : > { %v10744_v19 = vpop.f32.mrf.mxu0  ;;  %v10746_v4 = vpop.f32.mrf.mxu1 }
 0x4f6   : > { %v5491_v24 = vrot.slane %v5490_v50, 4  ;;  %v5648_v22 = vrot.slane %v5647_v10, 4  ;;  %v5511_v27 = vmax.f32 %v5509_v15, %v5510_v56  ;;  %v5668_v13 = vmax.f32 %v5666_v60, %v5667_v2 }
 0x4f7   : > { %v10748_v7 = vpop.f32.mrf.mxu0  ;;  %v10750_v63 = vpop.f32.mrf.mxu1 }
 0x4f8   : > { %v5492_v1 = vmax.f32 %v5490_v50, %v5491_v24  ;;  %v5649_v32 = vmax.f32 %v5647_v10, %v5648_v22  ;;  %v5512_v6 = vrot.slane %v5511_v27, 4  ;;  %v5669_v34 = vrot.slane %v5668_v13, 4 }
 0x4f9   : > { %v10752_v30 = vpop.f32.mrf.mxu0  ;;  %v10754_v14 = vpop.f32.mrf.mxu1 }
 0x4fa   : > { %v5493_v48 = vrot.slane %v5492_v1, 2  ;;  %v5650_v38 = vrot.slane %v5649_v32, 2  ;;  %v5513_v57 = vmax.f32 %v5511_v27, %v5512_v6  ;;  %v5670_v28 = vmax.f32 %v5668_v13, %v5669_v34 }
 0x4fb   : > { %v10756_v49 = vpop.f32.mrf.mxu0  ;;  %v10758_v16 = vpop.f32.mrf.mxu1 }
 0x4fc   : > { %v5494_v23 = vmax.f32 %v5492_v1, %v5493_v48  ;;  %v5651_v31 = vmax.f32 %v5649_v32, %v5650_v38  ;;  %v5514_v8 = vrot.slane %v5513_v57, 2  ;;  %v5671_v0 = vrot.slane %v5670_v28, 2 }
 0x4fd   : > { %v10760_v35 = vpop.f32.mrf.mxu0  ;;  %v10762_v46 = vpop.f32.mrf.mxu1 }
 0x4fe   : > { %v5495_v36 = vrot.slane %v5494_v23, 1  ;;  %v5652_v21 = vrot.slane %v5651_v31, 1  ;;  %v5515_v33 = vmax.f32 %v5513_v57, %v5514_v8  ;;  %v5672_v26 = vmax.f32 %v5670_v28, %v5671_v0 }
 0x4ff   : > { %v10764_v61 = vpop.f32.mrf.mxu0  ;;  %v10766_v40 = vpop.f32.mrf.mxu1 }
 0x500   : > { %v5496_v18 = vmax.f32 %v5494_v23, %v5495_v36  ;;  %v5653_v42 = vmax.f32 %v5651_v31, %v5652_v21  ;;  %v5516_v15 = vrot.slane %v5515_v33, 1  ;;  %v5673_v60 = vrot.slane %v5672_v26, 1 }
 0x501   : > { %v5767_v11 = vpop.f32.mrf.mxu0  ;;  %v5924_v17 = vpop.f32.mrf.mxu1 }
 0x502   : > { %v10771_v39 = vmax.f32 %v4848_v52, %v5496_v18  ;;  %v10776_v51 = vmax.f32 %v5005_v41, %v5653_v42  ;;  %v5517_v58 = vmax.f32 %v5515_v33, %v5516_v15  ;;  %v5674_v54 = vmax.f32 %v5672_v26, %v5673_v60 }
 0x503   : > { %v5769_v37 = vpop.f32.mrf.mxu0  ;;  %v5926_v50 = vpop.f32.mrf.mxu1  ;;  %v5832_v42 = vmax.f32 %v10744_v19, %v10760_v35  ;;  %v5989_v15 = vmax.f32 %v10746_v4, %v10762_v46  ;;  %v5833_v60 = vmax.f32 %v10752_v30, %v5767_v11 }
 0x504   : > { %11309 = vst [vmem:[#allocation30_spill] sm:$0xff] %v10771_v39  ;;  %11310 = vst [vmem:[#allocation31_spill] sm:$0xff] %v10776_v51  ;;  %v10781_v10 = vmax.f32 %v4849_v12, %v5517_v58  ;;  %v10786_v59 = vmax.f32 %v5006_v53, %v5674_v54  ;;  %v5990_v58 = vmax.f32 %v10754_v14, %v5924_v17 }
 0x505   : > { %v5773_v47 = vpop.f32.mrf.mxu0  ;;  %v5930_v52 = vpop.f32.mrf.mxu1  ;;  %v5853_v54 = vmax.f32 %v10748_v7, %v10764_v61  ;;  %v6011_v51 = vmax.f32 %v10758_v16, %v5926_v50 }
 0x506   : > { %11311 = vst [vmem:[#allocation32_spill] sm:$0xff] %v10781_v10  ;;  %11312 = vst [vmem:[#allocation33_spill] sm:$0xff] %v10786_v59  ;;  %v6010_v59 = vmax.f32 %v10750_v63, %v10766_v40  ;;  %v5854_v10 = vmax.f32 %v10756_v49, %v5769_v37  ;;  %v5834_v19 = vmax.f32 %v5832_v42, %v5773_v47 }
 0x507   : > { %v5775_v56 = vpop.f32.mrf.mxu0  ;;  %v5932_v25 = vpop.f32.mrf.mxu1  ;;  %v5991_v35 = vmax.f32 %v5989_v15, %v5930_v52 }
 0x508   : > { %v5855_v46 = vmax.f32 %v5853_v54, %v5775_v56  ;;  %v6012_v30 = vmax.f32 %v6010_v59, %v5932_v25 }
 0x509   : > { %v5777_v55 = vpop.f32.mrf.mxu0  ;;  %v5934_v41 = vpop.f32.mrf.mxu1 }
 0x50a   : > { %v5835_v44 = vmax.f32 %v5833_v60, %v5777_v55  ;;  %v5992_v4 = vmax.f32 %v5990_v58, %v5934_v41 }
 0x50b   : > { %v5779_v2 = vpop.f32.mrf.mxu0  ;;  %v5936_v24 = vpop.f32.mrf.mxu1 }
 0x50c   : > { %v5856_v11 = vmax.f32 %v5854_v10, %v5779_v2  ;;  %v6013_v14 = vmax.f32 %v6011_v51, %v5936_v24 }
 0x50d   : > { %v5783_v22 = vpop.f32.mrf.mxu0  ;;  %v5940_v27 = vpop.f32.mrf.mxu1 }
 0x50e   : > { %v5836_v7 = vmax.f32 %v5834_v19, %v5783_v22  ;;  %v5993_v61 = vmax.f32 %v5991_v35, %v5940_v27 }
 0x50f   : > { %v5785_v13 = vpop.f32.mrf.mxu0  ;;  %v5942_v1 = vpop.f32.mrf.mxu1 }
 0x510   : > { %v5857_v40 = vmax.f32 %v5855_v46, %v5785_v13  ;;  %v6014_v49 = vmax.f32 %v6012_v30, %v5942_v1 }
 0x511   : > { %v5787_v62 = vpop.f32.mrf.mxu0  ;;  %v5944_v29 = vpop.f32.mrf.mxu1 }
 0x512   : > { %v5837_v20 = vmax.f32 %v5835_v44, %v5787_v62  ;;  %v5994_v63 = vmax.f32 %v5992_v4, %v5944_v29 }
 0x513   : > { %v5789_v12 = vpop.f32.mrf.mxu0  ;;  %v5946_v32 = vpop.f32.mrf.mxu1 }
 0x514   : > { %v5858_v37 = vmax.f32 %v5856_v11, %v5789_v12  ;;  %v6015_v16 = vmax.f32 %v6013_v14, %v5946_v32 }
 0x515   : > { %v5793_v6 = vpop.f32.mrf.mxu0  ;;  %v5950_v9 = vpop.f32.mrf.mxu1 }
 0x516   : > { %v5838_v47 = vmax.f32 %v5836_v7, %v5793_v6  ;;  %v5995_v52 = vmax.f32 %v5993_v61, %v5950_v9 }
 0x517   : > { %v5795_v45 = vpop.f32.mrf.mxu0  ;;  %v5952_v53 = vpop.f32.mrf.mxu1 }
 0x518   : > { %v5859_v56 = vmax.f32 %v5857_v40, %v5795_v45  ;;  %v6016_v59 = vmax.f32 %v6014_v49, %v5952_v53 }
 0x519   : > { %v5797_v34 = vpop.f32.mrf.mxu0  ;;  %v5954_v48 = vpop.f32.mrf.mxu1 }
 0x51a   : > { %v5839_v55 = vmax.f32 %v5837_v20, %v5797_v34  ;;  %v5996_v41 = vmax.f32 %v5994_v63, %v5954_v48 }
 0x51b   : > { %v5799_v38 = vpop.f32.mrf.mxu0  ;;  %v5956_v57 = vpop.f32.mrf.mxu1 }
 0x51c   : > { %v5860_v10 = vmax.f32 %v5858_v37, %v5799_v38  ;;  %v6017_v51 = vmax.f32 %v6015_v16, %v5956_v57 }
 0x51d   : > { %v5803_v28 = vpop.f32.mrf.mxu0  ;;  %v5960_v23 = vpop.f32.mrf.mxu1 }
 0x51e   : > { %v5840_v24 = vmax.f32 %v5838_v47, %v5803_v28  ;;  %v5997_v22 = vmax.f32 %v5995_v52, %v5960_v23 }
 0x51f   : > { %v10788_v31 = vpop.f32.mrf.mxu0  ;;  %v10790_v8 = vpop.f32.mrf.mxu1 }
 0x520   : > { %v5861_v13 = vmax.f32 %v5859_v56, %v10788_v31  ;;  %v6018_v1 = vmax.f32 %v6016_v59, %v10790_v8  ;;  %v11313_v56 = vld [vmem:[#allocation25_spill] sm:$0xff] }
 0x521   : > { %v5807_v0 = vpop.f32.mrf.mxu0  ;;  %v5964_v36 = vpop.f32.mrf.mxu1  ;;  %v10827_v59 = vsub.s32 0, %v11313_v56 }
 0x522   : > { %v5841_v44 = vmax.f32 %v5839_v55, %v5807_v0  ;;  %v5998_v27 = vmax.f32 %v5996_v41, %v5964_v36 }
 0x523   : > { %v5809_v21 = vpop.f32.mrf.mxu0  ;;  %v5966_v33 = vpop.f32.mrf.mxu1 }
 0x524   : > { %v5862_v62 = vmax.f32 %v5860_v10, %v5809_v21  ;;  %v6019_v29 = vmax.f32 %v6017_v51, %v5966_v33 }
 0x525   : > { %v5813_v26 = vpop.f32.mrf.mxu0  ;;  %v5970_v18 = vpop.f32.mrf.mxu1 }
 0x526   : > { %v5842_v20 = vmax.f32 %v5840_v24, %v5813_v26  ;;  %v5999_v6 = vmax.f32 %v5997_v22, %v5970_v18 }
 0x527   : > { %v5815_v39 = vpop.f32.mrf.mxu0  ;;  %v5972_v43 = vpop.f32.mrf.mxu1 }
 0x528   : > { %v5863_v53 = vmax.f32 %v5861_v13, %v5815_v39  ;;  %v6020_v34 = vmax.f32 %v6018_v1, %v5972_v43  ;;  %v6467_v13 = vld [vmem:[%s9065_s21 + $0x2] sm:$0x3] }
 0x529   : > { %v5817_v17 = vpop.f32.mrf.mxu0  ;;  %v5974_v3 = vpop.f32.mrf.mxu1 }
 0x52a   : > { %v5843_v9 = vmax.f32 %v5841_v44, %v5817_v17  ;;  %v6000_v45 = vmax.f32 %v5998_v27, %v5974_v3  ;;  %v6348_v44 = vld [vmem:[%s9065_s21] sm:$0x3]  ;;  %v10835_v27 = vsub.s32 1, %v11313_v56  ;;  %v6735_v56 = vld [vmem:[%s11295_s6 + $0x370] sm:$0xff] }
 0x52b   : > { %v5819_v50 = vpop.f32.mrf.mxu0  ;;  %v5976_v5 = vpop.f32.mrf.mxu1 }
 0x52c   : > { %v5864_v48 = vmax.f32 %v5862_v62, %v5819_v50  ;;  %v6021_v38 = vmax.f32 %v6019_v29, %v5976_v5 }
 0x52d   : > { %v5823_v25 = vpop.f32.mrf.mxu0  ;;  %v5980_v2 = vpop.f32.mrf.mxu1 }
 0x52e   : > { %v5844_v23 = vmax.f32 %v5842_v20, %v5823_v25  ;;  %v6001_v0 = vmax.f32 %v5999_v6, %v5980_v2  ;;  %v11314_v6 = vld [vmem:[#allocation26_spill] sm:$0xff] }
 0x52f   : > { %v5825_v12 = vpop.f32.mrf.mxu0  ;;  %v5982_v32 = vpop.f32.mrf.mxu1 }
 0x530   : > { %v5865_v42 = vmax.f32 %v5863_v53, %v5825_v12  ;;  %v6022_v8 = vmax.f32 %v6020_v34, %v5982_v32  ;;  %v6353_v34 = vrot.slane %v6348_v44, %v10827_v59 }
 0x531   : > { %v5827_v57 = vpop.f32.mrf.mxu0  ;;  %v5984_v28 = vpop.f32.mrf.mxu1 }
 0x532   : > { %v5845_v36 = vmax.f32 %v5843_v9, %v5827_v57  ;;  %v6002_v31 = vmax.f32 %v6000_v45, %v5984_v28  ;;  %v11315_v45 = vld [vmem:[#allocation27_spill] sm:$0xff] }
 0x533   : > { %v5829_v21 = vpop.f32.mrf.mxu0  ;;  %v5986_v33 = vpop.f32.mrf.mxu1 }
 0x534   : > { %v5846_v15 = vmax.f32 %v5844_v23, %v5845_v36  ;;  %v6003_v60 = vmax.f32 %v6001_v0, %v6002_v31  ;;  %v5866_v26 = vmax.f32 %v5864_v48, %v5829_v21  ;;  %v6023_v18 = vmax.f32 %v6021_v38, %v5986_v33  ;;  %v11317_v33 = vld [vmem:[#allocation29_spill] sm:$0xff] }
 0x535   : > { %v10806_v58 = vpop.f32.mrf.mxu0  ;;  %v10808_v3 = vpop.f32.mrf.mxu1  ;;  %v6472_v48 = vrot.slane %v6467_v13, %v10827_v59  ;;  %v6357_v23 = vrot.slane %v6348_v44, %v10835_v27  ;;  %v6476_v36 = vrot.slane %v6467_v13, %v10835_v27  ;;  %v6615_v44 = vld [vmem:[%s11295_s6 + $0x268] sm:$0xff] }
 0x536   : > { %v5847_v43 = vrot.slane %v5846_v15, 4  ;;  %v6004_v5 = vrot.slane %v6003_v60, 4  ;;  %v5867_v39 = vmax.f32 %v5865_v42, %v5866_v26  ;;  %v6024_v54 = vmax.f32 %v6022_v8, %v6023_v18  ;;  %v11316_v8 = vld [vmem:[#allocation28_spill] sm:$0xff]  ;;  %v6734_v13 = vld [vmem:[%s11295_s6 + $0x368] sm:$0xff] }
 0x537   : > { %v10810_v19 = vpop.f32.mrf.mxu0  ;;  %v10812_v35 = vpop.f32.mrf.mxu1 }
 0x538   : > { %v5848_v4 = vmax.f32 %v5846_v15, %v5847_v43  ;;  %v6005_v46 = vmax.f32 %v6003_v60, %v6004_v5  ;;  %v5868_v30 = vrot.slane %v5867_v39, 4  ;;  %v6025_v11 = vrot.slane %v6024_v54, 4 }
 0x539   : > { %v10814_v14 = vpop.f32.mrf.mxu0  ;;  %v10816_v17 = vpop.f32.mrf.mxu1 }
 0x53a   : > { %v5849_v7 = vrot.slane %v5848_v4, 2  ;;  %v6006_v61 = vrot.slane %v6005_v46, 2  ;;  %v5869_v63 = vmax.f32 %v5867_v39, %v5868_v30  ;;  %v6026_v40 = vmax.f32 %v6024_v54, %v6025_v11 }
 0x53b   : > { %v10818_v49 = vpop.f32.mrf.mxu0  ;;  %v10820_v37 = vpop.f32.mrf.mxu1 }
 0x53c   : > { %v5850_v16 = vmax.f32 %v5848_v4, %v5849_v7  ;;  %v6007_v50 = vmax.f32 %v6005_v46, %v6006_v61  ;;  %v5870_v47 = vrot.slane %v5869_v63, 2  ;;  %v6027_v52 = vrot.slane %v6026_v40, 2  ;;  %v6617_v61 = vld [vmem:[%s11295_s6 + $0x278] sm:$0xff] }
 0x53d   : > { %v10822_v55 = vpop.f32.mrf.mxu0  ;;  %v10824_v41 = vpop.f32.mrf.mxu1 }
 0x53e   : > { %v5851_v10 = vrot.slane %v5850_v16, 1  ;;  %v6008_v51 = vrot.slane %v6007_v50, 1  ;;  %v5871_v25 = vmax.f32 %v5869_v63, %v5870_v47  ;;  %v6028_v2 = vmax.f32 %v6026_v40, %v6027_v52  ;;  %v6736_v63 = vld [vmem:[%s11295_s6 + $0x378] sm:$0xff]  ;;  %v6751_v47 = vld [vmem:[%s11295_s6 + $0x3f0] sm:$0xff] }
 0x53f   : > { %v10829_v24 = vpop.f32.mrf.mxu0  ;;  %v10831_v22 = vpop.f32.mrf.mxu1  ;;  %v6616_v52 = vld [vmem:[%s11295_s6 + $0x270] sm:$0xff] }
 0x540   : > { %v5852_v1 = vmax.f32 %v5850_v16, %v5851_v10  ;;  %v6009_v62 = vmax.f32 %v6007_v50, %v6008_v51  ;;  %v5872_v29 = vrot.slane %v5871_v25, 1  ;;  %v6029_v12 = vrot.slane %v6028_v2, 1  ;;  %v6632_v50 = vld [vmem:[%s11295_s6 + $0x2f0] sm:$0xff] }
 0x541   : > { %v10838_v32 = vpop.f32.mrf.mxu0  ;;  %v10840_v20 = vpop.f32.mrf.mxu1 }
 0x542   : > { %v5874_v9 = vmax.f32 %v11314_v6, %v5852_v1  ;;  %v6031_v53 = vmax.f32 %v11315_v45, %v6009_v62  ;;  %v5873_v28 = vmax.f32 %v5871_v25, %v5872_v29  ;;  %v6030_v0 = vmax.f32 %v6028_v2, %v6029_v12  ;;  %v6631_v25 = vld [vmem:[%s11295_s6 + $0x2e8] sm:$0xff]  ;;  %v6630_v29 = vld [vmem:[%s11295_s6 + $0x2e0] sm:$0xff] }
 0x543   : > { %v10846_v38 = vpop.f32.mrf.mxu0  ;;  %v10848_v57 = vpop.f32.mrf.mxu1  ;;  %v6750_v2 = vld [vmem:[%s11295_s6 + $0x3e8] sm:$0xff]  ;;  %v6749_v12 = vld [vmem:[%s11295_s6 + $0x3e0] sm:$0xff] }
 0x544   : > { %v5875_v21 = vmax.f32 %v11316_v8, %v5873_v28  ;;  %v6032_v15 = vmax.f32 %v11317_v33, %v6030_v0  ;;  %v6360_v60 = vadd.f32 %v6353_v34, %v5874_v9  ;;  %v6479_v26 = vadd.f32 %v6472_v48, %v6031_v53  ;;  %v6614_v6 = vld [vmem:[%s11295_s6 + $0x260] sm:$0xff]  ;;  %v6629_v34 = vld [vmem:[%s11295_s6 + $0x2d8] sm:$0xff]  ;;  %v6628_v8 = vld [vmem:[%s11295_s6 + $0x2d0] sm:$0xff] }
 0x545   : > { %v10852_v31 = vpop.f32.mrf.mxu0  ;;  %v10854_v42 = vpop.f32.mrf.mxu1  ;;  %v6733_v9 = vld [vmem:[%s11295_s6 + $0x360] sm:$0xff]  ;;  %v6748_v48 = vld [vmem:[%s11295_s6 + $0x3d8] sm:$0xff]  ;;  %v6612_v33 = vld [vmem:[%s11295_s6 + $0x250] sm:$0xff] }
 0x546   : > { %v6361_v5 = vadd.f32 %v6357_v23, %v5875_v21  ;;  %v6480_v39 = vadd.f32 %v6476_v36, %v6032_v15  ;;  %v6362_v11 = vmax.f32 %v6360_v60, 0.0  ;;  %v6481_v7 = vmax.f32 %v6479_v26, 0.0  ;;  %v6613_v28 = vld [vmem:[%s11295_s6 + $0x258] sm:$0xff]  ;;  %v6747_v21 = vld [vmem:[%s11295_s6 + $0x3d0] sm:$0xff] }
 0x547   : > { %v10858_v18 = vpop.f32.mrf.mxu0  ;;  %v10860_v43 = vpop.f32.mrf.mxu1  ;;  %v6732_v23 = vld [vmem:[%s11295_s6 + $0x358] sm:$0xff]  ;;  %v6731_v15 = vld [vmem:[%s11295_s6 + $0x350] sm:$0xff] }
 0x548   : > { %v6363_v46 = vmax.f32 %v6361_v5, 0.0  ;;  %v6482_v30 = vmax.f32 %v6480_v39, 0.0  ;;  %v6627_v5 = vld [vmem:[%s11295_s6 + $0x2c8] sm:$0xff] }
 0x549   : > { %v10862_v54 = vpop.f32.mrf.mxu0  ;;  %v10864_v4 = vpop.f32.mrf.mxu1  ;;  %v6746_v39 = vld [vmem:[%s11295_s6 + $0x3c8] sm:$0xff] }
 0x54a   : > { %6460 = vmatprep.mubr.f32.mxu0 %v6363_v46  ;;  %6579 = vmatprep.mubr.f32.mxu1 %v6482_v30  ;;  %v6611_v46 = vld [vmem:[%s11295_s6 + $0x248] sm:$0xff] }
 0x54b   : > { %v10868_v40 = vpop.f32.mrf.mxu0  ;;  %v10870_v16 = vpop.f32.mrf.mxu1  ;;  %6461 = vmatmul.mubr.f32.vlgmr.msra.gmra.mxu0 %v6362_v11  ;;  %6580 = vmatmul.mubr.f32.vlgmr.msra.gmra.mxu1 %v6481_v7  ;;  %v6730_v30 = vld [vmem:[%s11295_s6 + $0x348] sm:$0xff] }
 0x54c   : > { %8571 = vmatpush3.msra.mxu0 %v6617_v61  ;;  %8606 = vmatpush3.msra.mxu1 %v6736_v63  ;;  %v6626_v61 = vld [vmem:[%s11295_s6 + $0x2c0] sm:$0xff] }
 0x54d   : > { %v10876_v10 = vpop.f32.mrf.mxu0  ;;  %v10878_v51 = vpop.f32.mrf.mxu1  ;;  %8572 = vmatprep.subr.mxu0 %v6632_v50  ;;  %8607 = vmatprep.subr.mxu1 %v6751_v47  ;;  %v6745_v63 = vld [vmem:[%s11295_s6 + $0x3c0] sm:$0xff] }
 0x54e   : > { %8573 = vmatpush3.msra.mxu0 %v6616_v52  ;;  %8608 = vmatpush3.msra.mxu1 %v6735_v56  ;;  %v6610_v50 = vld [vmem:[%s11295_s6 + $0x240] sm:$0xff] }
 0x54f   : > { %v10884_v1 = vpop.f32.mrf.mxu0  ;;  %v10886_v62 = vpop.f32.mrf.mxu1  ;;  %8574 = vmatprep.subr.mxu0 %v6631_v25  ;;  %8609 = vmatprep.subr.mxu1 %v6750_v2  ;;  %v6729_v47 = vld [vmem:[%s11295_s6 + $0x340] sm:$0xff]  ;;  %v6625_v25 = vld [vmem:[%s11295_s6 + $0x2b8] sm:$0xff] }
 0x550   : > { %8575 = vmatpush3.msra.mxu0 %v6615_v44  ;;  %8610 = vmatpush3.msra.mxu1 %v6734_v13  ;;  %v6744_v2 = vld [vmem:[%s11295_s6 + $0x3b8] sm:$0xff] }
 0x551   : > { %v10892_v45 = vpop.f32.mrf.mxu0  ;;  %v10894_v53 = vpop.f32.mrf.mxu1  ;;  %8576 = vmatprep.subr.mxu0 %v6630_v29  ;;  %8611 = vmatprep.subr.mxu1 %v6749_v12  ;;  %v6609_v44 = vld [vmem:[%s11295_s6 + $0x238] sm:$0xff] }
 0x552   : > { %8577 = vmatpush3.msra.mxu0 %v6614_v6  ;;  %8612 = vmatpush3.msra.mxu1 %v6733_v9  ;;  %v6728_v13 = vld [vmem:[%s11295_s6 + $0x338] sm:$0xff]  ;;  %v6624_v6 = vld [vmem:[%s11295_s6 + $0x2b0] sm:$0xff] }
 0x553   : > { %v10900_v0 = vpop.f32.mrf.mxu0  ;;  %v10902_v36 = vpop.f32.mrf.mxu1  ;;  %8578 = vmatprep.subr.mxu0 %v6629_v34  ;;  %8613 = vmatprep.subr.mxu1 %v6748_v48  ;;  %v6743_v9 = vld [vmem:[%s11295_s6 + $0x3b0] sm:$0xff] }
 0x554   : > { %8579 = vmatpush3.msra.mxu0 %v6613_v28  ;;  %8614 = vmatpush3.msra.mxu1 %v6732_v23  ;;  %v6608_v34 = vld [vmem:[%s11295_s6 + $0x230] sm:$0xff] }
 0x555   : > { %v10908_v60 = vpop.f32.mrf.mxu0  ;;  %v10910_v26 = vpop.f32.mrf.mxu1  ;;  %8580 = vmatprep.subr.mxu0 %v6628_v8  ;;  %8615 = vmatprep.subr.mxu1 %v6747_v21  ;;  %v6727_v48 = vld [vmem:[%s11295_s6 + $0x330] sm:$0xff]  ;;  %v6623_v8 = vld [vmem:[%s11295_s6 + $0x2a8] sm:$0xff] }
 0x556   : > { %8581 = vmatpush3.msra.mxu0 %v6612_v33  ;;  %8616 = vmatpush3.msra.mxu1 %v6731_v15  ;;  %v6742_v21 = vld [vmem:[%s11295_s6 + $0x3a8] sm:$0xff] }
 0x557   : > { %v10916_v11 = vpop.f32.mrf.mxu0  ;;  %v10918_v7 = vpop.f32.mrf.mxu1  ;;  %8582 = vmatprep.subr.mxu0 %v6627_v5  ;;  %8617 = vmatprep.subr.mxu1 %v6746_v39  ;;  %v6607_v33 = vld [vmem:[%s11295_s6 + $0x228] sm:$0xff] }
 0x558   : > { %8583 = vmatpush3.msra.mxu0 %v6611_v46  ;;  %8618 = vmatpush3.msra.mxu1 %v6730_v30  ;;  %v6726_v15 = vld [vmem:[%s11295_s6 + $0x328] sm:$0xff]  ;;  %v6622_v46 = vld [vmem:[%s11295_s6 + $0x2a0] sm:$0xff] }
 0x559   : > { %v10924_v52 = vpop.f32.mrf.mxu0  ;;  %v10926_v56 = vpop.f32.mrf.mxu1  ;;  %8584 = vmatprep.subr.mxu0 %v6626_v61  ;;  %8619 = vmatprep.subr.mxu1 %v6745_v63  ;;  %v6741_v30 = vld [vmem:[%s11295_s6 + $0x3a0] sm:$0xff] }
 0x55a   : > { %8585 = vmatpush3.msra.mxu0 %v6610_v50  ;;  %8620 = vmatpush3.msra.mxu1 %v6729_v47  ;;  %v6606_v61 = vld [vmem:[%s11295_s6 + $0x220] sm:$0xff] }
 0x55b   : > { %v10932_v29 = vpop.f32.mrf.mxu0  ;;  %v10934_v12 = vpop.f32.mrf.mxu1  ;;  %8586 = vmatprep.subr.mxu0 %v6625_v25  ;;  %8621 = vmatprep.subr.mxu1 %v6744_v2  ;;  %v6725_v63 = vld [vmem:[%s11295_s6 + $0x320] sm:$0xff]  ;;  %v6621_v25 = vld [vmem:[%s11295_s6 + $0x298] sm:$0xff] }
 0x55c   : > { %8587 = vmatpush3.msra.mxu0 %v6609_v44  ;;  %8622 = vmatpush3.msra.mxu1 %v6728_v13  ;;  %v6740_v2 = vld [vmem:[%s11295_s6 + $0x398] sm:$0xff] }
 0x55d   : > { %v10940_v28 = vpop.f32.mrf.mxu0  ;;  %v10942_v23 = vpop.f32.mrf.mxu1  ;;  %8588 = vmatprep.subr.mxu0 %v6624_v6  ;;  %8623 = vmatprep.subr.mxu1 %v6743_v9  ;;  %v6605_v44 = vld [vmem:[%s11295_s6 + $0x218] sm:$0xff]  ;;  %v6146_v6 = vmax.f32 %v10806_v58, %v10822_v55  ;;  %v6604_v58 = vld [vmem:[%s11295_s6 + $0x210] sm:$0xff] }
 0x55e   : > { %8589 = vmatpush3.msra.mxu0 %v6608_v34  ;;  %8624 = vmatpush3.msra.mxu1 %v6727_v48  ;;  %v6724_v13 = vld [vmem:[%s11295_s6 + $0x318] sm:$0xff]  ;;  %v6620_v48 = vld [vmem:[%s11295_s6 + $0x290] sm:$0xff] }
 0x55f   : > { %v10948_v5 = vpop.f32.mrf.mxu0  ;;  %v10950_v39 = vpop.f32.mrf.mxu1  ;;  %8590 = vmatprep.subr.mxu0 %v6623_v8  ;;  %8625 = vmatprep.subr.mxu1 %v6742_v21  ;;  %v6739_v8 = vld [vmem:[%s11295_s6 + $0x390] sm:$0xff]  ;;  %v6303_v21 = vmax.f32 %v10808_v3, %v10824_v41  ;;  %v6168_v3 = vmax.f32 %v10818_v49, %v10846_v38  ;;  %v6603_v49 = vld [vmem:[%s11295_s6 + $0x208] sm:$0xff] }
 0x560   : > { %8591 = vmatpush3.msra.mxu0 %v6607_v33  ;;  %8626 = vmatpush3.msra.mxu1 %v6726_v15  ;;  %v6167_v33 = vmax.f32 %v10810_v19, %v10829_v24  ;;  %v6324_v15 = vmax.f32 %v10812_v35, %v10831_v22  ;;  %v6723_v55 = vld [vmem:[%s11295_s6 + $0x310] sm:$0xff]  ;;  %v6619_v35 = vld [vmem:[%s11295_s6 + $0x288] sm:$0xff]  ;;  %v6325_v22 = vmax.f32 %v10820_v37, %v10848_v57  ;;  %v6618_v37 = vld [vmem:[%s11295_s6 + $0x280] sm:$0xff] }
 0x561   : > { %v10956_v50 = vpop.f32.mrf.mxu0  ;;  %v10958_v47 = vpop.f32.mrf.mxu1  ;;  %8592 = vmatprep.subr.mxu0 %v6622_v46  ;;  %8627 = vmatprep.subr.mxu1 %v6741_v30  ;;  %v6147_v46 = vmax.f32 %v10814_v14, %v10838_v32  ;;  %v6304_v30 = vmax.f32 %v10816_v17, %v10840_v20  ;;  %v6738_v24 = vld [vmem:[%s11295_s6 + $0x388] sm:$0xff]  ;;  %v6148_v14 = vmax.f32 %v6146_v6, %v10852_v31  ;;  %v6737_v57 = vld [vmem:[%s11295_s6 + $0x380] sm:$0xff] }
 0x562   : > { %8593 = vmatpush3.msra.mxu0 %v6606_v61  ;;  %8628 = vmatpush3.msra.mxu1 %v6725_v63  ;;  %v6305_v17 = vmax.f32 %v6303_v21, %v10854_v42  ;;  %v6722_v32 = vld [vmem:[%s11295_s6 + $0x308] sm:$0xff]  ;;  %v6169_v20 = vmax.f32 %v6167_v33, %v10858_v18  ;;  %v6326_v38 = vmax.f32 %v6324_v15, %v10860_v43  ;;  %v6721_v18 = vld [vmem:[%s11295_s6 + $0x300] sm:$0xff] }
 0x563   : > { %v10966_v9 = vpop.f32.mrf.mxu0  ;;  %v10968_v34 = vpop.f32.mrf.mxu1  ;;  %8594 = vmatprep.subr.mxu0 %v6621_v25  ;;  %8629 = vmatprep.subr.mxu1 %v6740_v2  ;;  %v6149_v61 = vmax.f32 %v6147_v46, %v10862_v54  ;;  %v6306_v31 = vmax.f32 %v6304_v30, %v10864_v4  ;;  %v6170_v42 = vmax.f32 %v6168_v3, %v10868_v40 }
 0x564   : > { %8595 = vmatpush3.msra.mxu0 %v6605_v44  ;;  %8630 = vmatpush3.msra.mxu1 %v6724_v13  ;;  %v6327_v2 = vmax.f32 %v6325_v22, %v10870_v16  ;;  %v6602_v44 = vld [vmem:[%s11295_s6 + $0x200] sm:$0xff]  ;;  %v6150_v43 = vmax.f32 %v6148_v14, %v10876_v10  ;;  %v6307_v54 = vmax.f32 %v6305_v17, %v10878_v51  ;;  %v6910_v22 = vpop.permute.xlu0 %6909 }
 0x565   : > { %v10986_v41 = vpop.f32.mrf.mxu0  ;;  %v10988_v19 = vpop.f32.mrf.mxu1  ;;  %8596 = vmatprep.subr.mxu0 %v6620_v48  ;;  %8631 = vmatprep.subr.mxu1 %v6739_v8  ;;  %v6171_v13 = vmax.f32 %v6169_v20, %v10884_v1  ;;  %v6328_v4 = vmax.f32 %v6326_v38, %v10886_v62  ;;  %v6151_v40 = vmax.f32 %v6149_v61, %v10892_v45 }
 0x566   : > { %8597 = vmatpush3.msra.mxu0 %v6604_v58  ;;  %8632 = vmatpush3.msra.mxu1 %v6723_v55  ;;  %v6308_v16 = vmax.f32 %v6306_v31, %v10894_v53  ;;  %v6172_v8 = vmax.f32 %v6170_v42, %v10900_v0  ;;  %v6329_v10 = vmax.f32 %v6327_v2, %v10902_v36 }
 0x567   : > { %v6129_v63 = vpop.f32.mrf.mxu0  ;;  %v6286_v25 = vpop.f32.mrf.mxu1  ;;  %8598 = vmatprep.subr.mxu0 %v6619_v35  ;;  %8633 = vmatprep.subr.mxu1 %v6738_v24  ;;  %v6152_v51 = vmax.f32 %v6150_v43, %v10908_v60  ;;  %v6309_v33 = vmax.f32 %v6307_v54, %v10910_v26  ;;  %v6173_v62 = vmax.f32 %v6171_v13, %v10916_v11 }
 0x568   : > { %8599 = vmatpush3.msra.mxu0 %v6603_v49  ;;  %8634 = vmatpush3.msra.mxu1 %v6722_v32  ;;  %v6153_v45 = vmax.f32 %v6151_v40, %v10924_v52  ;;  %v6310_v53 = vmax.f32 %v6308_v16, %v10926_v56  ;;  %v6330_v15 = vmax.f32 %v6328_v4, %v10918_v7  ;;  %v6586_v40 = vld [vmem:[%s9065_s21 + $0x4] sm:$0x3] }
 0x569   : > { %v6131_v6 = vpop.f32.mrf.mxu0  ;;  %v6288_v48 = vpop.f32.mrf.mxu1  ;;  %8600 = vmatprep.subr.mxu0 %v6618_v37  ;;  %8635 = vmatprep.subr.mxu1 %v6737_v57  ;;  %v6174_v0 = vmax.f32 %v6172_v8, %v10932_v29  ;;  %v6331_v36 = vmax.f32 %v6329_v10, %v10934_v12  ;;  %v6154_v60 = vmax.f32 %v6152_v51, %v10940_v28 }
 0x56a   : > { %8601 = vmatpush3.msra.mxu0 %v6602_v44  ;;  %8636 = vmatpush3.msra.mxu1 %v6721_v18  ;;  %v6311_v46 = vmax.f32 %v6309_v33, %v10942_v23  ;;  %v6175_v26 = vmax.f32 %v6173_v62, %v10948_v5  ;;  %v6155_v11 = vmax.f32 %v6153_v45, %v10956_v50  ;;  %v6906_v5 = vld [vmem:[%s9070_s25] sm:$0x1] }
 0x56b   : > { %v6133_v21 = vpop.f32.mrf.mxu0  ;;  %v6290_v1 = vpop.f32.mrf.mxu1  ;;  %v6312_v52 = vmax.f32 %v6310_v53, %v10958_v47  ;;  %v6332_v56 = vmax.f32 %v6330_v15, %v10950_v39  ;;  %v6176_v7 = vmax.f32 %v6174_v0, %v10966_v9  ;;  %v6333_v29 = vmax.f32 %v6331_v36, %v10968_v34  ;;  %v6705_v36 = vld [vmem:[%s9065_s21 + $0x6] sm:$0x3] }
 0x56c   : > { %v6156_v12 = vmax.f32 %v6154_v60, %v10986_v41  ;;  %v6313_v3 = vmax.f32 %v6311_v46, %v10988_v19  ;;  %v6177_v35 = vmax.f32 %v6175_v26, %v6129_v63  ;;  %v6157_v23 = vmax.f32 %v6155_v11, %v6131_v6 }
 0x56d   : > { %v6137_v58 = vpop.f32.mrf.mxu0  ;;  %v6294_v55 = vpop.f32.mrf.mxu1  ;;  %v6314_v24 = vmax.f32 %v6312_v52, %v6288_v48  ;;  %v6334_v50 = vmax.f32 %v6332_v56, %v6286_v25  ;;  %v6178_v14 = vmax.f32 %v6176_v7, %v6133_v21  ;;  %v6335_v47 = vmax.f32 %v6333_v29, %v6290_v1 }
 0x56e   : > { %v6915_v9 = vrot.slane %v6910_v22, %v10827_v59  ;;  %v6158_v49 = vmax.f32 %v6156_v12, %v6137_v58  ;;  %v6315_v34 = vmax.f32 %v6313_v3, %v6294_v55  ;;  %v6591_v1 = vrot.slane %v6586_v40, %v10827_v59 }
 0x56f   : > { %v6139_v28 = vpop.f32.mrf.mxu0  ;;  %v6296_v30 = vpop.f32.mrf.mxu1  ;;  %v6595_v60 = vrot.slane %v6586_v40, %v10835_v27  ;;  %v6710_v52 = vrot.slane %v6705_v36, %v10827_v59  ;;  %v9032_v40 = vmov 920167782  }
 0x570   : > { %v6179_v20 = vmax.f32 %v6177_v35, %v6139_v28  ;;  %v6336_v38 = vmax.f32 %v6334_v50, %v6296_v30  ;;  %v6916_v63 = vmul.f32 %v6915_v9, %v6906_v5  ;;  %v6714_v30 = vrot.slane %v6705_v36, %v10835_v27  ;;  %v11318_v35 = vld [vmem:[#allocation30_spill] sm:$0xff] }
 0x571   : > { %v6141_v17 = vpop.f32.mrf.mxu0  ;;  %v6298_v39 = vpop.f32.mrf.mxu1  ;;  %v9029_v27 = vmov 2475754826  }
 0x572   : > { %v6159_v32 = vmax.f32 %v6157_v23, %v6141_v17  ;;  %v6316_v41 = vmax.f32 %v6314_v24, %v6298_v39  ;;  %v11036_v42 = vmul.f32 6.2831855, %v6916_v63  ;;  %v11319_v24 = vld [vmem:[#allocation31_spill] sm:$0xff]  ;;  %v11320_v39 = vld [vmem:[#allocation32_spill] sm:$0xff]  ;;  %v9030_v63 = vmov 2131351028  }
 0x573   : > { %v6143_v61 = vpop.f32.mrf.mxu0  ;;  %v6300_v19 = vpop.f32.mrf.mxu1 }
 0x574   : > { %v6160_v37 = vmax.f32 %v6158_v49, %v6159_v32  ;;  %v6317_v57 = vmax.f32 %v6315_v34, %v6316_v41  ;;  %v6180_v31 = vmax.f32 %v6178_v14, %v6143_v61  ;;  %v6337_v25 = vmax.f32 %v6335_v47, %v6300_v19  ;;  %v11321_v34 = vld [vmem:[#allocation33_spill] sm:$0xff] }
 0x575   : > { %v6921_v54 = vand.u32 2139095040, %v11036_v42  ;;  %v6918_v33 = vand.u32 2147483647, %v11036_v42  ;;  %vm6920_vm11 = vcmp.lt.s32.totalorder %v11036_v42, 0 }
 0x576   : > { %v6161_v2 = vrot.slane %v6160_v37, 4  ;;  %v6318_v44 = vrot.slane %v6317_v57, 4  ;;  %v6181_v18 = vmax.f32 %v6179_v20, %v6180_v31  ;;  %v6338_v43 = vmax.f32 %v6336_v38, %v6337_v25 }
 0x577   : > { %v6922_v16 = vshrl.u32 %v6921_v54, 23  ;;  %v6925_v56 = vand.u32 8388607, %v6918_v33  ;;  %v9028_v38 = vmov 683565275  }
 0x578   : > { %v6162_v13 = vmax.f32 %v6160_v37, %v6161_v2  ;;  %v6319_v6 = vmax.f32 %v6317_v57, %v6318_v44  ;;  %v6182_v48 = vrot.slane %v6181_v18, 4  ;;  %v6339_v4 = vrot.slane %v6338_v43, 4 }
 0x579   : > { %v8474_v62 = vadd.s32 4294967169, %v6922_v16  ;;  %v6926_v14 = vor.u32 8388608, %v6925_v56  ;;  %v9031_v54 = vmov 2102212464   ;;  %vm6919_vm12 = vcmp.le.f32.partialorder %v6918_v33, 0.7853982 }
 0x57a   : > { %v6163_v8 = vrot.slane %v6162_v13, 2  ;;  %v6320_v10 = vrot.slane %v6319_v6, 2  ;;  %v6183_v51 = vmax.f32 %v6181_v18, %v6182_v48  ;;  %v6340_v21 = vmax.f32 %v6338_v43, %v6339_v4 }
 0x57b   : > { %v6928_v58 = vadd.s32 1, %v8474_v62  ;;  %v9033_v62 = vmov 1326507024  }
 0x57c   : > { %v6164_v45 = vmax.f32 %v6162_v13, %v6163_v8  ;;  %v6321_v53 = vmax.f32 %v6319_v6, %v6320_v10  ;;  %v6184_v15 = vrot.slane %v6183_v51, 2  ;;  %v6341_v0 = vrot.slane %v6340_v21, 2 }
 0x57d   : > { %vm6929_vm3 = vcmp.gt.s32.totalorder %v6928_v58, 0 }
 0x57e   : > { %v6165_v55 = vrot.slane %v6164_v45, 1  ;;  %v6322_v46 = vrot.slane %v6321_v53, 1  ;;  %v6185_v26 = vmax.f32 %v6183_v51, %v6184_v15  ;;  %v6342_v11 = vmax.f32 %v6340_v21, %v6341_v0 }
 0x57f   : > { %v6930_v3 = vsel %vm6929_vm3, %v6928_v58, 0 }
 0x580   : > { %v6166_v7 = vmax.f32 %v6164_v45, %v6165_v55  ;;  %v6323_v29 = vmax.f32 %v6321_v53, %v6322_v46  ;;  %v6186_v12 = vrot.slane %v6185_v26, 1  ;;  %v6343_v28 = vrot.slane %v6342_v11, 1 }
 0x581   : > { %v6931_v47 = vshrl.u32 %v6930_v3, 5  ;;  %v6932_v17 = vand.u32 31, %v6930_v3  ;;  %v6966_v53 = vshll.u32 %v6926_v14, 8 }
 0x582   : > { %v6188_v23 = vmax.f32 %v11318_v35, %v6166_v7  ;;  %v6345_v5 = vmax.f32 %v11319_v24, %v6323_v29  ;;  %v6187_v22 = vmax.f32 %v6185_v26, %v6186_v12  ;;  %v6344_v50 = vmax.f32 %v6342_v11, %v6343_v28  ;;  %v7128_v24 = vld [vmem:[%s11296_s3 + $0x8] sm:$0xff] }
 0x583   : > { %v6933_v20 = vsub.s32 32, %v6932_v17  ;;  %v6935_v61 = vshll.u32 %v9028_v38, %v6932_v17  ;;  %v6938_v19 = vshll.u32 %v9029_v27, %v6932_v17  ;;  %v6941_v37 = vshll.u32 %v9030_v63, %v6932_v17 }
 0x584   : > { %v6189_v9 = vmax.f32 %v11320_v39, %v6187_v22  ;;  %v6598_v49 = vadd.f32 %v6591_v1, %v6188_v23  ;;  %v6346_v32 = vmax.f32 %v11321_v34, %v6344_v50  ;;  %v6717_v41 = vadd.f32 %v6710_v52, %v6345_v5  ;;  %v7127_v22 = vld [vmem:[%s11296_s3] sm:$0xff]  ;;  %s11328_s3 = sld [smem:[#allocation23_spill]] }
 0x585   : > { %v6934_v44 = vshrl.u32 %v9028_v38, %v6933_v20  ;;  %v6936_v18 = vshrl.u32 %v9029_v27, %v6933_v20  ;;  %v6939_v43 = vshrl.u32 %v9030_v63, %v6933_v20  ;;  %v6942_v13 = vshrl.u32 %v9031_v54, %v6933_v20 }
 0x586   : > { %v6599_v57 = vadd.f32 %v6595_v60, %v6189_v9  ;;  %v6600_v31 = vmax.f32 %v6598_v49, 0.0  ;;  %v6718_v25 = vadd.f32 %v6714_v30, %v6346_v32  ;;  %v6719_v2 = vmax.f32 %v6717_v41, 0.0 }
 0x587   : > { %v6944_v4 = vshll.u32 %v9031_v54, %v6932_v17  ;;  %v6945_v16 = vshrl.u32 %v9032_v40, %v6933_v20  ;;  %v6937_v8 = vor.u32 %v6936_v18, %v6935_v61  ;;  %v6940_v10 = vor.u32 %v6939_v43, %v6938_v19 }
 0x588   : > { %v6601_v6 = vmax.f32 %v6599_v57, 0.0  ;;  %v6720_v48 = vmax.f32 %v6718_v25, 0.0  ;;  %v6943_v51 = vor.u32 %v6942_v13, %v6941_v37  ;;  %v6947_v21 = vshll.u32 %v9032_v40, %v6932_v17 }
 0x589   : > { %v6946_v1 = vor.u32 %v6945_v16, %v6944_v4  ;;  %v6948_v45 = vshrl.u32 %v9033_v62, %v6933_v20  ;;  %vm6950_vm4 = vcmp.lt.s32.totalorder %v6931_v47, 1  ;;  %vm6951_vm5 = vcmp.lt.s32.totalorder %v6931_v47, 2 }
 0x58a   : > { %6698 = vmatprep.mubr.f32.mxu0 %v6601_v6  ;;  %6817 = vmatprep.mubr.f32.mxu1 %v6720_v48  ;;  %vm6952_vm6 = vcmp.lt.s32.totalorder %v6931_v47, 3  ;;  %vm6953_vm7 = vcmp.lt.s32.totalorder %v6931_v47, 4  ;;  %v6958_v15 = vsel %vm6950_vm4, %v6937_v8, %v6940_v10  ;;  %v6954_v58 = vsel %vm6950_vm4, %v6934_v44, %v6937_v8 }
 0x58b   : > { %6699 = vmatmul.mubr.f32.vlgmr.msra.gmra.mxu0 %v6600_v31  ;;  %6818 = vmatmul.mubr.f32.vlgmr.msra.gmra.mxu1 %v6719_v2  ;;  %v6949_v0 = vor.u32 %v6948_v45, %v6947_v21  ;;  %v6955_v36 = vsel %vm6953_vm7, %v6943_v51, 2102212464  ;;  %v6959_v60 = vsel %vm6953_vm7, %v6946_v1, 920167782  ;;  %v6962_v26 = vsel %vm6950_vm4, %v6940_v10, %v6943_v51 }
 0x58c   : > { %v6956_v55 = vsel %vm6952_vm6, %v6940_v10, %v6955_v36  ;;  %v6960_v46 = vsel %vm6952_vm6, %v6943_v51, %v6959_v60  ;;  %v9034_v5 = vmov 0.0   ;;  %vm7010_vm4 = vweird.f32 %v11036_v42 }
 0x58d   : > { %v6961_v11 = vsel %vm6951_vm5, %v6958_v15, %v6960_v46  ;;  %v6963_v52 = vsel %vm6953_vm7, %v6949_v0, 1326507024  ;;  %v6957_v12 = vsel %vm6951_vm5, %v6954_v58, %v6956_v55  ;;  %8712 = vmatprep.subr.mxu1 %v9034_v5  ;;  %8716 = vmatprep.mubr.msk.f32.mxu1 %vm9035_vm8, %v9034_v5  ;;  %v7023_v0 = vld [vmem:[%s9075_s29 + $0x8] sm:$0xff]  ;;  %v6828_v58 = vld [vmem:[%s9120_s20 + $0x18] sm:$0xff]  ;;  %v7022_v55 = vld [vmem:[%s9075_s29] sm:$0xff]  ;;  %vm7285_vm7 = vcmask 203776  }
 0x58e   : > { %v6964_v56 = vsel %vm6952_vm6, %v6946_v1, %v6963_v52  ;;  %v11053_v7 = vmul.u32.u64.low %v6966_v53, %v6961_v11  ;;  %v11054_v29 = vmul.u32.u64.high %v6966_v53, %v6961_v11, %v11053_v7  ;;  %v6973_v35 = vmul.u32 %v6966_v53, %v6957_v12  ;;  %8713 = vmatpush3.msra.mxu1 %v7128_v24  ;;  %8701 = vmatprep.subr.mxu0 %v9034_v5  ;;  %v6826_v11 = vld [vmem:[%s9120_s20 + $0x8] sm:$0xff]  ;;  %v6825_v52 = vld [vmem:[%s9120_s20] sm:$0xff] }
 0x58f   : > { %v6965_v28 = vsel %vm6951_vm5, %v6962_v26, %v6964_v56  ;;  %8714 = vmatprep.subr.mxu1 %v9034_v5  ;;  %8709 = vmatprep.mubr.msk.f32.mxu0 %vm9035_vm8, %v9034_v5  ;;  %vm7129_vm5 = vcmask 130048   ;;  %v6827_v26 = vld [vmem:[%s9120_s20 + $0x10] sm:$0xff]  ;;  %v6347_v12 = vld [vmem:[%s11322_s12] sm:$0x1]  ;;  %vm6830_vm6 = vcmask 261120   ;;  %s9036_s12 = smov [#allocation2]  }
 0x590   : > { %v11058_v30 = vmul.u32.u64.low %v6966_v53, %v6965_v28  ;;  %v11059_v3 = vmul.u32.u64.high %v6966_v53, %v6965_v28, %v11058_v30  ;;  %v6976_v23 = vadd.s32 1, %v11054_v29  ;;  %8715 = vmatpush3.msra.mxu1 %v7127_v22  ;;  %8702 = vmatpush3.msra.mxu0 %v6828_v58  ;;  %s8938_s13 = sshll.u32 %s9036_s12, 4  ;;  %s8939_s13 = int_to_ptr.vmem [resolvable:$false] %s8938_s13 }
 0x591   : > { %8719 = vmatprep.subr.mxu1 %v9034_v5  ;;  %8703 = vmatprep.subr.mxu0 %v9034_v5 }
 0x592   : > { %vm6975_vm9 = vc.u32 %v11059_v3, %v11053_v7  ;;  %v6974_v20 = vadd.s32 %v11053_v7, %v11059_v3  ;;  %8704 = vmatpush3.msra.mxu0 %v6827_v26 }
 0x593   : > { %v6977_v50 = vsel %vm6975_vm9, %v6976_v23, %v11054_v29  ;;  %8705 = vmatprep.subr.mxu0 %v9034_v5  ;;  %vm8087_vm9 = vcmask 196608  }
 0x594   : > { %v6978_v14 = vadd.s32 %v6977_v50, %v6973_v35  ;;  %8706 = vmatpush3.msra.mxu0 %v6826_v11 }
 0x595   : > { %8707 = vmatprep.subr.mxu0 %v9034_v5 }
 0x596   : > { %v6979_v47 = vadd.s32 536870912, %v6978_v14  ;;  %8708 = vmatpush3.msra.mxu0 %v6825_v52 }
 0x597   : > { %8726 = vmatprep.subr.mxu0 %v9034_v5 }
 0x598   : > { %v6980_v17 = vshrl.u32 %v6979_v47, 30 }
 0x59a   : > { %v6981_v39 = vshll.u32 %v6980_v17, 30  ;;  %v7004_v13 = vsub.s32 4, %v6980_v17 }
 0x59c   : > { %v6982_v9 = vsub.s32 %v6978_v14, %v6981_v39  ;;  %v7005_v48 = vsel %vm6920_vm11, %v7004_v13, %v6980_v17  ;;  %v7598_v13 = vld [vmem:[%s11325_s2 + $0x10] sm:$0xff] }
 0x59d   : > { %v7007_v4 = vsel %vm6919_vm12, 0, %v7005_v48  ;;  %v7365_v48 = vld [vmem:[%s11326_s22 + $0x10] sm:$0xff] }
 0x59e   : > { %v6984_v49 = vsub.s32 0, %v6982_v9  ;;  %v7117_v40 = vand.u32 3, %v7007_v4  ;;  %v7011_v16 = vadd.s32 3, %v7007_v4  ;;  %v7596_v4 = vld [vmem:[%s11325_s2] sm:$0xff] }
 0x5a0   : > { %v8475_v34 = vmin.u32 %v6984_v49, %v6982_v9  ;;  %v7012_v8 = vand.u32 3, %v7011_v16  ;;  %vm7122_vm13 = vcmp.eq.s32.totalorder %v7117_v40, 2  ;;  %vm7119_vm14 = vcmp.eq.s32.totalorder %v7117_v40, 0  ;;  %v7283_v49 = vld [vmem:[%s11294_s14 + $0x18] sm:$0x1]  ;;  %v7363_v16 = vld [vmem:[%s11326_s22] sm:$0xff] }
 0x5a1   : > { %vm7118_vm2 = vcmp.lt.s32.totalorder %v7117_v40, 2  ;;  %v7364_v40 = vld [vmem:[%s11326_s22 + $0x8] sm:$0xff] }
 0x5a2   : > { %v6986_v32 = vclz %v8475_v34  ;;  %vm7014_vm15 = vcmp.eq.s32.totalorder %v7012_v8, 0  ;;  %vm7017_vm1 = vcmp.eq.s32.totalorder %v7012_v8, 2  ;;  %vm7013_vm3 = vcmp.lt.s32.totalorder %v7012_v8, 2  ;;  %v7282_v34 = vld [vmem:[%s11294_s14 + $0x10] sm:$0xff] }
 0x5a4   : > { %v8476_v41 = vadd.s32 4294967294, %v6986_v32  ;;  %v7281_v32 = vld [vmem:[%s11294_s14 + $0x8] sm:$0xff] }
 0x5a6   : > { %vm8477_vm10 = vcmp.lt.s32.totalorder %v8476_v41, 0 }
 0x5a7   : > { %v6989_v38 = vsel %vm8477_vm10, 0, %v8476_v41  ;;  %v7280_v41 = vld [vmem:[%s11294_s14] sm:$0xff]  ;;  %s8940_s14 = scalar_lea.vmem %s8939_s13, 32 }
 0x5a8   : > { %v6990_v61 = vsub.s32 32, %v6989_v38  ;;  %v6991_v27 = vshll.u32 %v6982_v9, %v6989_v38  ;;  %v6994_v19 = vsub.s32 4294967266, %v6989_v38  ;;  %v7449_v38 = vld [vmem:[%s9135_s30 + $0x18] sm:$0xff] }
 0x5aa   : > { %v6992_v63 = vshrl.u32 %v6974_v20, %v6990_v61  ;;  %v6995_v37 = vadd.s32 127, %v6994_v19  ;;  %v7279_v20 = vld [vmem:[%s927_s16] sm:$0x1]  ;;  %v7448_v61 = vld [vmem:[%s9135_s30 + $0x10] sm:$0xff]  ;;  %s11327_s16 = sld [smem:[#allocation16_spill]] }
 0x5ab   : > { %v7446_v19 = vld [vmem:[%s9135_s30] sm:$0xff] }
 0x5ac   : > { %v6993_v57 = vor.u32 %v6992_v63, %v6991_v27  ;;  %v6996_v31 = vshll.u32 %v6995_v37, 23  ;;  %v7447_v27 = vld [vmem:[%s9135_s30 + $0x8] sm:$0xff] }
 0x5ae   : > { %v6997_v25 = vor.u32 4788187, %v6996_v31  ;;  %v7000_v2 = vcvt.s32.f32 %v6993_v57  ;;  %v7276_v31 = vld [vmem:[%s11324_s8] sm:$0x1] }
 0x5b0   : > { %v6998_v44 = vand.u32 2147483647, %v6997_v25  ;;  %v6829_v8 = vld [vmem:[%s11327_s16] sm:$0x1]  ;;  %s11332_s16 = sld [smem:[#allocation13_spill]] }
 0x5b2   : > { %v7001_v18 = vmul.f32 %v7000_v2, %v6998_v44 }
 0x5b4   : > { %v7002_v43 = vxor.u32 2147483648, %v7001_v18 }
 0x5b6   : > { %v7003_v54 = vsel %vm6920_vm11, %v7002_v43, %v7001_v18  ;;  %v7599_v43 = vld [vmem:[%s11325_s2 + $0x18] sm:$0xff] }
 0x5b7   : > { %v7006_v6 = vsel %vm6919_vm12, %v11036_v42, %v7003_v54  ;;  %v7366_v54 = vld [vmem:[%s11326_s22 + $0x18] sm:$0xff] }
 0x5b8   : > { %8923 = vcosq.f32 %v7006_v6 }
 0x5b9   : > { %8925 = vsinq.f32 %v7006_v6  ;;  %v7597_v6 = vld [vmem:[%s11325_s2 + $0x8] sm:$0xff]  ;;  %s11330_s2 = sld [smem:[#allocation24_spill]] }
 0x5bf   : > { %v7907_v26 = vld [vmem:[%s11330_s2 + $0x8] sm:$0xff]  ;;  %v7906_v11 = vld [vmem:[%s11330_s2] sm:$0xff] }
 0x5c5   : > { %v8924_v10 = vpop.eup %8923 }
 0x5c6   : > { %v8926_v51 = vpop.eup %8925  ;;  %v7018_v21 = vxor.u32 2147483648, %v8924_v10 }
 0x5c7   : > { %v7015_v33 = vxor.u32 2147483648, %v8926_v51 }
 0x5c8   : > { %v7124_v1 = vsel %vm7122_vm13, %v7018_v21, %v8926_v51  ;;  %v7019_v62 = vsel %vm7017_vm1, %v7018_v21, %v8926_v51 }
 0x5c9   : > { %v7121_v45 = vsel %vm7119_vm14, %v8924_v10, %v7015_v33  ;;  %v7016_v53 = vsel %vm7014_vm15, %v8924_v10, %v7015_v33 }
 0x5ca   : > { %v7125_v15 = vsel %vm7118_vm2, %v7121_v45, %v7124_v1  ;;  %v7020_v36 = vsel %vm7013_vm3, %v7016_v53, %v7019_v62  ;;  %v7762_v1 = vld [vmem:[%s11328_s3 + $0x18] sm:$0xff]  ;;  %v7761_v62 = vld [vmem:[%s11328_s3 + $0x10] sm:$0xff]  ;;  %v7284_v45 = vld [vmem:[%s11329_s5] sm:$0x1]  ;;  %s11331_s5 = sld [smem:[#allocation17_spill]] }
 0x5cb   : > { %v7126_v60 = vsel %vm7010_vm4, nan, %v7125_v15  ;;  %v7021_v46 = vsel %vm7010_vm4, nan, %v7020_v36  ;;  %v7760_v53 = vld [vmem:[%s11328_s3 + $0x8] sm:$0xff]  ;;  %v7759_v36 = vld [vmem:[%s11328_s3] sm:$0xff]  ;;  %s11334_s3 = sld [smem:[#allocation19_spill]] }
 0x5cc   : > { %8717 = vmatmul.mubr.msk.f32.vlgmr.msra.gmra.mxu1 %vm7129_vm5, %v7126_v60 }
 0x5cd   : > { %8720 = vmatpush3.msra.mxu1 %v7023_v0  ;;  %8723 = vmatprep.mubr.msk.f32.mxu1 %vm9035_vm8, %v9034_v5 }
 0x5ce   : > { %8721 = vmatprep.subr.mxu1 %v9034_v5 }
 0x5cf   : > { %8722 = vmatpush3.msra.mxu1 %v7022_v55  ;;  %v7909_v55 = vld [vmem:[%s11330_s2 + $0x18] sm:$0xff] }
 0x5d0   : > { %8724 = vmatmul.mubr.msk.f32.vlgmr.msra.gmra.mxu1 %vm7129_vm5, %v7021_v46  ;;  %8737 = vmatprep.subr.mxu1 %v9034_v5  ;;  %v7908_v46 = vld [vmem:[%s11330_s2 + $0x10] sm:$0xff]  ;;  %s11333_s2 = sld [smem:[#allocation20_spill]] }
 0x5d1   : > { %8745 = vmatprep.mubr.msk.f32.mxu1 %vm9035_vm8, %v9034_v5  ;;  %8738 = vmatpush3.msra.mxu1 %v7366_v54 }
 0x5d2   : > { %8739 = vmatprep.subr.mxu1 %v9034_v5 }
 0x5d3   : > { %8740 = vmatpush3.msra.mxu1 %v7365_v48 }
 0x5d4   : > { %8741 = vmatprep.subr.mxu1 %v9034_v5 }
 0x5d5   : > { %8742 = vmatpush3.msra.mxu1 %v7364_v40  ;;  %v7986_v40 = vld [vmem:[%s9180_s19 + $0x10] sm:$0xff] }
 0x5d6   : > { %8743 = vmatprep.subr.mxu1 %v9034_v5 }
 0x5d7   : > { %8744 = vmatpush3.msra.mxu1 %v7363_v16 }
 0x5d8   : > { %8759 = vmatprep.subr.mxu1 %v9034_v5 }
 0x60b   : > { %v8532_v42 = vpop.f32.mrf.mxu0  ;;  %v8567_v7 = vpop.f32.mrf.mxu1 }
 0x60d   : > { %v8533_v56 = vpop.f32.mrf.mxu0  ;;  %v8568_v28 = vpop.f32.mrf.mxu1 }
 0x60e   : > { %v8534_v29 = vadd.f32 %v8533_v56, %v8532_v42  ;;  %v8569_v23 = vadd.f32 %v8568_v28, %v8567_v7  ;;  %v7445_v56 = vld [vmem:[%s11331_s5 + $0x18] sm:$0xff]  ;;  %v7444_v7 = vld [vmem:[%s11331_s5 + $0x10] sm:$0xff] }
 0x610   : > { %v6466_v30 = vadd.f32 %v8534_v29, %v6347_v12  ;;  %v7443_v29 = vld [vmem:[%s11331_s5 + $0x8] sm:$0xff]  ;;  %v7442_v12 = vld [vmem:[%s11331_s5] sm:$0xff]  ;;  %s11336_s5 = sld [smem:[#allocation21_spill]] }
 0x612   : > { %v6585_v50 = vadd.f32 %v8569_v23, %v6466_v30 }
 0x64b   : > { %v8602_v3 = vpop.f32.mrf.mxu0  ;;  %v8637_v35 = vpop.f32.mrf.mxu1 }
 0x64d   : > { %v8603_v24 = vpop.f32.mrf.mxu0  ;;  %v8638_v22 = vpop.f32.mrf.mxu1 }
 0x64e   : > { %v8604_v14 = vadd.f32 %v8603_v24, %v8602_v3  ;;  %v8639_v17 = vadd.f32 %v8638_v22, %v8637_v35  ;;  %v7367_v3 = vld [vmem:[%s11332_s16] sm:$0x1]  ;;  %s11335_s16 = sld [smem:[#allocation22_spill]] }
 0x650   : > { %v6704_v47 = vadd.f32 %v8604_v14, %v6585_v50 }
 0x652   : > { %v6823_v39 = vadd.f32 %v8639_v17, %v6704_v47 }
 0x654   : > { %v6824_v9 = vmax.f32 %v6823_v39, 0.0  ;;  %v7680_v39 = vld [vmem:[%s11333_s2 + $0x18] sm:$0xff] }
 0x656   : > { %8710 = vmatmul.mubr.msk.f32.vlgmr.msra.gmra.mxu0 %vm6830_vm6, %v6824_v9  ;;  %v7679_v9 = vld [vmem:[%s11333_s2 + $0x10] sm:$0xff] }
 0x657   : > { %8727 = vmatpush3.msk.msra.mxu0 %vm982_vm0, %v7283_v49  ;;  %8734 = vmatprep.mubr.msk.f32.mxu0 %vm9035_vm8, %v9034_v5  ;;  %v7678_v49 = vld [vmem:[%s11333_s2 + $0x8] sm:$0xff] }
 0x658   : > { %8728 = vmatprep.subr.mxu0 %v9034_v5 }
 0x659   : > { %8729 = vmatpush3.msra.mxu0 %v7282_v34  ;;  %v7677_v34 = vld [vmem:[%s11333_s2] sm:$0xff] }
 0x65a   : > { %8730 = vmatprep.subr.mxu0 %v9034_v5 }
 0x65b   : > { %8731 = vmatpush3.msra.mxu0 %v7281_v32 }
 0x65c   : > { %8732 = vmatprep.subr.mxu0 %v9034_v5 }
 0x65d   : > { %8733 = vmatpush3.msra.mxu0 %v7280_v41 }
 0x65e   : > { %8735 = vmatmul.mubr.msk.f32.vlgmr.msra.gmra.mxu0 %vm7285_vm7, %v7279_v20  ;;  %8748 = vmatprep.subr.mxu0 %v9034_v5  ;;  %v7674_v20 = vld [vmem:[%s11334_s3] sm:$0x1]  ;;  %s915_s3 = sand.u32 1, %s8986_s10  }
 0x65f   : > { %8749 = vmatpush3.msra.mxu0 %v7449_v38  ;;  %8756 = vmatprep.mubr.msk.f32.mxu0 %vm9035_vm8, %v9034_v5  ;;  %s8090_s8 = scalar_lea.sflag [#allocation3], %s915_s3 }
 0x660   : > { %8750 = vmatprep.subr.mxu0 %v9034_v5 }
 0x661   : > { %8751 = vmatpush3.msra.mxu0 %v7448_v61 }
 0x662   : > { %8752 = vmatprep.subr.mxu0 %v9034_v5 }
 0x663   : > { %8753 = vmatpush3.msra.mxu0 %v7447_v27 }
 0x664   : > { %8754 = vmatprep.subr.mxu0 %v9034_v5 }
 0x665   : > { %8755 = vmatpush3.msra.mxu0 %v7446_v19 }
 0x666   : > { %8770 = vmatprep.subr.mxu0 %v9034_v5 }
 0x68c   : > { %v7199_v63 = vpop.f32.mrf.mxu1 }
 0x68e   : > { %v8718_v37 = vpop.f32.mrf.mxu1 }
 0x68f   : > { %v7757_v37 = vld [vmem:[%s11335_s16 + $0x10] sm:$0xff] }
 0x690   : > { %v7272_v57 = vpop.f32.mrf.mxu1 }
 0x691   : > { %v7273_v25 = vadd.f32 %v7272_v57, %v7199_v63  ;;  %v7758_v63 = vld [vmem:[%s11335_s16 + $0x18] sm:$0xff]  ;;  %v7756_v57 = vld [vmem:[%s11335_s16 + $0x8] sm:$0xff] }
 0x692   : > { %v8725_v2 = vpop.f32.mrf.mxu1 }
 0x693   : > { %v7277_v44 = vadd.f32 %v7276_v31, %v7273_v25  ;;  %v7755_v31 = vld [vmem:[%s11335_s16] sm:$0xff] }
 0x694   : > { %v7681_v25 = vld [vmem:[%s11336_s5] sm:$0x1]  ;;  %s916_s5 = scalar_lea.vmem [#allocation2], %s915_s3 }
 0x695   : > { %v7278_v18 = vmax.f32 %v7277_v44, 0.0  ;;  %s8102_s2 = sshll.u32 %s916_s5, 4  ;;  %s8103_s2 = int_to_ptr.vmem [resolvable:$true] %s8102_s2 }
 0x696   : > { %s8934_s9 = scalar_lea.vmem %s8103_s2, 16  ;;  %p8941_p0 = scmp.lt.s32.totalorder %s8103_s2, %s8939_s13 }
 0x697   : > { %8757 = vmatmul.mubr.msk.f32.vlgmr.msra.gmra.mxu0 %vm6830_vm6, %v7278_v18  ;;  %p8935_p11 = scmp.ne.s32.totalorder %s8103_s2, %s8934_s9  ;;  %p8942_p1 = scmp.lt.s32.totalorder %s8940_s14, %s8934_s9 }
 0x698   : > { %8771 = vmatpush3.msra.mxu0 %v7599_v43  ;;  %8778 = vmatprep.mubr.msk.f32.mxu0 %vm9035_vm8, %v9034_v5  ;;  %v8933_v43 = vld [vmem:[%s10741_s23] sm:$0x1]  ;;  %s8496_s23 = sshll.u32 %s9213_s0, 4 }
 0x699   : > { %8772 = vmatprep.subr.mxu0 %v9034_v5  ;;  %v8062_v54 = vmul.f32 6.437752, %v8933_v43  ;;  %s8100_s6 = scalar_lea.hbm %s9190_s4, %s8496_s23  ;;  %p8936_p12 = pnand %p8935_p11, %p9230_p5 }
 0x69a   : > { %8773 = vmatpush3.msra.mxu0 %v7598_v13  ;;  %p8943_p2 = por %p8942_p1, %p8941_p0 }
 0x69b   : > { %8774 = vmatprep.subr.mxu0 %v9034_v5  ;;  %v8063_v13 = vmul.f32 1.442695, %v8062_v54  ;;  %p8937_p13 = pneg %p8936_p12 }
 0x69c   : > { %8775 = vmatpush3.msra.mxu0 %v7597_v6 }
 0x69d   : > { %8776 = vmatprep.subr.mxu0 %v9034_v5  ;;  %8927 = vpow2.f32 %v8063_v13  ;;  %p8944_p3 = pnand %p8943_p2, %p8937_p13 }
 0x69e   : > { %8777 = vmatpush3.msra.mxu0 %v7596_v4  ;;  %v7987_v4 = vld [vmem:[%s9180_s19 + $0x18] sm:$0xff] }
 0x69f   : > { %8792 = vmatprep.subr.mxu0 %v9034_v5 }
 0x6aa   : > { %v8928_v6 = vpop.eup %8927 }
 0x6ab   : > { %v8495_v48 = vadd.f32 -1.0, %v8928_v6 }
 0x6ad   : > { %v8067_v16 = vmul.f32 0.15533373, %v8495_v48 }
 0x6af   : > { %8929 = vrsqrt.f32 %v8067_v16  ;;  %vm8070_vm0 = vcmp.eq.f32.partialorder %v8067_v16, inf }
 0x716   : > { %v6900_v10 = vpop.f32.mrf.mxu0 }
 0x717   : > { %v6901_v51 = vadd.f32 %v6900_v10, %v6829_v8  ;;  %v7985_v8 = vld [vmem:[%s9180_s19 + $0x8] sm:$0xff]  ;;  %v7984_v10 = vld [vmem:[%s9180_s19] sm:$0xff] }
 0x718   : > { %v8711_v21 = vpop.f32.mrf.mxu0 }
 0x719   : > { %v6904_v33 = vmax.f32 %v6901_v51, 0.0  ;;  %v8930_v51 = vpop.eup %8929  ;;  %v8073_v21 = vand.u32 2147483648, %v8067_v16 }
 0x71b   : > { %8779 = vmatmul.mubr.msk.f32.vlgmr.msra.gmra.mxu0 %vm6830_vm6, %v6904_v33 }
 0x71c   : > { %8793 = vmatpush3.msra.mxu0 %v7762_v1  ;;  %8800 = vmatprep.mubr.msk.f32.mxu0 %vm9035_vm8, %v9034_v5 }
 0x71d   : > { %8794 = vmatprep.subr.mxu0 %v9034_v5 }
 0x71e   : > { %v7358_v15 = vpop.f32.mrf.mxu0  ;;  %8795 = vmatpush3.msra.mxu0 %v7761_v62 }
 0x71f   : > { %v7359_v0 = vadd.f32 %v7358_v15, %v7284_v45  ;;  %8796 = vmatprep.subr.mxu0 %v9034_v5 }
 0x720   : > { %v8736_v60 = vpop.f32.mrf.mxu0  ;;  %8797 = vmatpush3.msra.mxu0 %v7760_v53 }
 0x721   : > { %v7362_v58 = vmax.f32 %v7359_v0, 0.0  ;;  %8798 = vmatprep.subr.mxu0 %v9034_v5  ;;  %v7981_v0 = vld [vmem:[%s9175_s24] sm:$0x1] }
 0x722   : > { %8799 = vmatpush3.msra.mxu0 %v7759_v36 }
 0x723   : > { %8746 = vmatmul.mubr.msk.f32.vlgmr.msra.gmra.mxu1 %vm6830_vm6, %v7362_v58  ;;  %8814 = vmatprep.subr.mxu0 %v9034_v5 }
 0x724   : > { %8801 = vmatmul.mubr.msk.f32.vlgmr.msra.gmra.mxu0 %vm6830_vm6, %v7278_v18  ;;  %8767 = vmatprep.mubr.msk.f32.mxu1 %vm9035_vm8, %v9034_v5 }
 0x725   : > { %8815 = vmatpush3.msra.mxu0 %v7909_v55  ;;  %8822 = vmatprep.mubr.msk.f32.mxu0 %vm9035_vm8, %v9034_v5 }
 0x726   : > { %8816 = vmatprep.subr.mxu0 %v9034_v5  ;;  %8760 = vmatpush3.msra.mxu1 %v7445_v56 }
 0x727   : > { %8817 = vmatpush3.msra.mxu0 %v7908_v46  ;;  %8761 = vmatprep.subr.mxu1 %v9034_v5 }
 0x728   : > { %8818 = vmatprep.subr.mxu0 %v9034_v5  ;;  %8762 = vmatpush3.msra.mxu1 %v7444_v7 }
 0x729   : > { %8819 = vmatpush3.msra.mxu0 %v7907_v26  ;;  %8763 = vmatprep.subr.mxu1 %v9034_v5  ;;  %v7988_v26 = vld [vmem:[%s9185_s27] sm:$0x1] }
 0x72a   : > { %8820 = vmatprep.subr.mxu0 %v9034_v5  ;;  %8764 = vmatpush3.msra.mxu1 %v7443_v29 }
 0x72b   : > { %8821 = vmatpush3.msra.mxu0 %v7906_v11  ;;  %8765 = vmatprep.subr.mxu1 %v9034_v5 }
 0x72c   : > { %8823 = vmatmul.mubr.msk.f32.vlgmr.msra.gmra.mxu0 %vm6830_vm6, %v6904_v33  ;;  %8766 = vmatpush3.msra.mxu1 %v7442_v12  ;;  %v8069_v33 = vmul.f32 %v8930_v51, %v8067_v16 }
 0x72d   : > { %8781 = vmatprep.subr.mxu1 %v9034_v5 }
 0x72e   : > { %v8071_v1 = vsel %vm8070_vm0, %v8067_v16, %v8069_v33 }
 0x757   : > { %v7519_v52 = vpop.f32.mrf.mxu0 }
 0x759   : > { %v8758_v42 = vpop.f32.mrf.mxu0 }
 0x7db   : > { %v7669_v28 = vpop.f32.mrf.mxu0 }
 0x7dd   : > { %v8780_v30 = vpop.f32.mrf.mxu0 }
 0x7e3   : > { %v7437_v35 = vpop.f32.mrf.mxu1 }
 0x7e4   : > { %v7438_v23 = vadd.f32 %v7437_v35, %v7367_v3  ;;  %v11183_v24 = vpop.f32.mrf.mxu0 }
 0x7e5   : > { %v8747_v22 = vpop.f32.mrf.mxu1 }
 0x7e6   : > { %v7441_v50 = vmax.f32 %v7438_v23, 0.0  ;;  %v8802_v14 = vpop.f32.mrf.mxu0 }
 0x7e8   : > { %8768 = vmatmul.mubr.msk.f32.vlgmr.msra.gmra.mxu1 %vm6830_vm6, %v7441_v50 }
 0x7e9   : > { %8789 = vmatprep.mubr.msk.f32.mxu1 %vm9035_vm8, %v9034_v5  ;;  %8782 = vmatpush3.msra.mxu1 %v7680_v39 }
 0x7ea   : > { %8783 = vmatprep.subr.mxu1 %v9034_v5 }
 0x7eb   : > { %8784 = vmatpush3.msra.mxu1 %v7679_v9 }
 0x7ec   : > { %v11188_v47 = vpop.f32.mrf.mxu0  ;;  %8785 = vmatprep.subr.mxu1 %v9034_v5 }
 0x7ed   : > { %8786 = vmatpush3.msra.mxu1 %v7678_v49 }
 0x7ee   : > { %v8824_v17 = vpop.f32.mrf.mxu0  ;;  %8787 = vmatprep.subr.mxu1 %v9034_v5 }
 0x7ef   : > { %8788 = vmatpush3.msra.mxu1 %v7677_v34 }
 0x7f0   : > { %8803 = vmatprep.subr.mxu1 %v9034_v5 }
 0x8a8   : > { %v7592_v32 = vpop.f32.mrf.mxu1 }
 0x8a9   : > { %v7593_v41 = vadd.f32 %v7592_v32, %v7519_v52 }
 0x8aa   : > { %v8769_v38 = vpop.f32.mrf.mxu1 }
 0x8ab   : > { %v7673_v61 = vadd.f32 %v7669_v28, %v7593_v41 }
 0x8ad   : > { %v7675_v27 = vadd.f32 %v7674_v20, %v7673_v61 }
 0x8af   : > { %v7676_v19 = vmax.f32 %v7675_v27, 0.0 }
 0x8b1   : > { %8790 = vmatmul.mubr.msk.f32.vlgmr.msra.gmra.mxu1 %vm6830_vm6, %v7676_v19 }
 0x8b2   : > { %8804 = vmatpush3.msra.mxu1 %v7758_v63  ;;  %8811 = vmatprep.mubr.msk.f32.mxu1 %vm9035_vm8, %v9034_v5 }
 0x8b3   : > { %8805 = vmatprep.subr.mxu1 %v9034_v5 }
 0x8b4   : > { %8806 = vmatpush3.msra.mxu1 %v7757_v37 }
 0x8b5   : > { %8807 = vmatprep.subr.mxu1 %v9034_v5 }
 0x8b6   : > { %8808 = vmatpush3.msra.mxu1 %v7756_v57 }
 0x8b7   : > { %8809 = vmatprep.subr.mxu1 %v9034_v5 }
 0x8b8   : > { %8810 = vmatpush3.msra.mxu1 %v7755_v31 }
 0x8b9   : > { %8825 = vmatprep.subr.mxu1 %v9034_v5 }
 0x971   : > { %v7751_v2 = vpop.f32.mrf.mxu1 }
 0x972   : > { %v7752_v44 = vadd.f32 %v7751_v2, %v7681_v25 }
 0x973   : > { %v8791_v18 = vpop.f32.mrf.mxu1 }
 0x974   : > { %8812 = vmatmul.mubr.msk.f32.vlgmr.msra.gmra.mxu1 %vm6830_vm6, %v7752_v44 }
 0x975   : > { %8833 = vmatprep.mubr.msk.f32.mxu1 %vm9035_vm8, %v9034_v5  ;;  %8826 = vmatpush3.msra.mxu1 %v7987_v4  ;;  %vm8072_vm8 = vcmp.eq.f32.partialorder %v8067_v16, 0.0 }
 0x976   : > { %8827 = vmatprep.subr.mxu1 %v9034_v5  ;;  %v8074_v62 = vsel %vm8072_vm8, %v8073_v21, %v8071_v1 }
 0x977   : > { %8828 = vmatpush3.msra.mxu1 %v7986_v40  ;;  %v8075_v45 = vadd.f32 1e-07, %v8074_v62 }
 0x978   : > { %8829 = vmatprep.subr.mxu1 %v9034_v5 }
 0x979   : > { %8830 = vmatpush3.msra.mxu1 %v7985_v8  ;;  %8078 = vperm.xlu1 %8920, %v8075_v45  }
 0x97a   : > { %8831 = vmatprep.subr.mxu1 %v9034_v5 }
 0x97b   : > { %8832 = vmatpush3.msra.mxu1 %v7984_v10 }
 0x9f4   : > { %v8079_v55 = vpop.permute.xlu1 %8078 }
 0x9f5   : > { %v8084_v46 = vrot.slane %v8079_v55, %v10827_v59 }
 0x9f7   : > { %8931 = vrcp.f32 %v8084_v46 }
 0xa04   : > { %v8932_v11 = vpop.eup %8931 }
 0xa34   : > { %v7902_v53 = vpop.f32.mrf.mxu1 }
 0xa35   : > { %v7903_v15 = vadd.f32 %v7902_v53, %v11183_v24 }
 0xa36   : > { %v8813_v36 = vpop.f32.mrf.mxu1 }
 0xa37   : > { %v7980_v5 = vadd.f32 %v11188_v47, %v7903_v15 }
 0xa39   : > { %v7982_v60 = vadd.f32 %v7981_v0, %v7980_v5 }
 0xa3b   : > { %v7983_v58 = vmax.f32 %v7982_v60, 0.0 }
 0xa3d   : > { %8834 = vmatmul.mubr.msk.f32.vlgmr.msra.gmra.mxu1 %vm6830_vm6, %v7983_v58 }
 0xafd   : > { %v8058_v52 = vpop.f32.mrf.mxu1 }
 0xafe   : > { %v8059_v42 = vadd.f32 %v8058_v52, %v7988_v26 }
 0xaff   : > { %v8835_v56 = vpop.f32.mrf.mxu1 }
 0xb00   : > { %v8086_v7 = vmul.f32 %v8932_v11, %v8059_v42 }
 0xb02   : > { %8088 = vst.msk [vmem:[%s916_s5] sm:$0x1] %vm8087_vm9, %v8086_v7 }
 0xb03   : > { %8947 = shalt.err (!%p8944_p3)
}
 0xb04   : > { %s8948_s0 = scalar_lea.hbm %s8100_s6, 16  ;;  %s8952_s3 = scalar_lea.hbm %s9190_s4, 32 }
 0xb05   : > { %p8949_p4 = scmp.ne.s32.totalorder %s8100_s6, %s8948_s0  ;;  %p8953_p9 = scmp.lt.s32.totalorder %s8100_s6, %s9190_s4 }
 0xb06   : > { %p8954_p10 = scmp.lt.s32.totalorder %s8952_s3, %s8948_s0 }
 0xb07   : > { %p8950_p7 = pnand %p8949_p4, %p9230_p5 }
 0xb08   : > { %p8955_p11 = por %p8954_p10, %p8953_p9 }
 0xb09   : > { %p8951_p8 = pneg %p8950_p7 }
 0xb0b   : > { %p8956_p12 = pnand %p8955_p11, %p8951_p8 }
 0xb0d   : > { %8959 = shalt.err (!%p8956_p12)
}
 0xb0e   : > { %8840 = dma.vmem_to_hbm [thread:$0]  (%p9230_p5), %s8103_s2, 16, %s8100_s6, %s8090_s8  }
 0xb0f PF: > { %p8846_p13 = scmp.ge.s32.totalorder %s8994_s15, 2  ;;  %s8114_s9 = sand.u32 1, %s8982_s7  }
 0xb10   : > { %s8115_s13 = scalar_lea.sflag [#allocation3], %s8114_s9 }
 0xb11   : > { %p8843_p0 = pnand %p8846_p13, %p9234_p6 }
 0xb13   : > { %p8844_p1 = pneg %p8843_p0 }
 0xb15   : > { %8977 = dma.done.wait (%p8844_p1), %s8115_s13, 16  }
 0xb16   : > { %8979 = vsyncadd (%p8844_p1), %s8115_s13, 4294967280  ;;  %p69_p2 = scmp.ge.s32.totalorder %s9217_s18, 4   ;;  %s11337_s7 = smov %s8986_s10 }
 0xb17   : > { %s11338_s10 = smov %s8990_s11  ;;  %s11339_s11 = smov %s9228_s26 }
 0xb18   : > { %s11340_s15 = smov %s9217_s18  ;;  %71 = sbr.rel (!%p69_p2) target bundleno = 56 (0x38), region = 213 }
 0xb1d   :  { %8119 = vsyncpa [#allocation3], 1 }
 0xb1e   :  { %8121 = vsyncpa [#allocation3 + $0x1], 1 }

</bundles_post_ra>
